<compile_context>
chip_gen: v7x
topology: tpu7x:2x2x1
jax: 0.10.0
libtpu: 0.0.40
codegen_flags: <defaults>
</compile_context>

<pallas_src>
import jax
import jax.numpy as jnp
import numpy as np
from jax import lax
from jax.experimental import pallas as pl
from jax.experimental.pallas import tpu as pltpu

BN_EPS = 1e-5
LANE = 128


@jax.jit
def residual_block(x_nchw, params):
    """Pallas ResidualBlock forward (stride=1). NCHW in / NCHW out, f32."""
    w1, b1, g1, be1, w2, b2, g2, be2 = params
    del b1, b2  # cancelled exactly by the training-mode BN mean subtraction
    N, C, H, W = x_nchw.shape
    Cout = w1.shape[0]
    assert C == Cout, "stride=1 path uses an identity skip, so in_ch must equal out_ch"

    Cp = ((C + LANE - 1) // LANE) * LANE        # channels padded to a 128-lane multiple
    Wp = W + 2                                  # padded row width (left/right zero pad)
    L = H * Wp                                  # conv-output rows per sample (flattened)
    Pr = (H + 3) * Wp                           # padded-input rows (top 1, bottom 2)
    lead = (-(Wp + 1)) % 16                     # align the z1 scratch store to 16 rows
    Pz = ((lead + L + 2 * Wp + 2 + 7) // 8) * 8  # conv2 staging scratch rows

    # ---- layout prep: NCHW -> flattened padded-width NHWC rows, channel-padded ----
    x = jnp.transpose(x_nchw, (0, 2, 3, 1)).astype(jnp.float32)          # (N,H,W,C)
    x = jnp.pad(x, ((0, 0), (0, 0), (0, 0), (0, Cp - C)))                # channel pad
    xp = jnp.pad(x, ((0, 0), (1, 2), (1, 1), (0, 0)))                    # spatial pad
    xp_flat = xp.reshape(N, Pr, Cp).astype(jnp.bfloat16)

    def prep_w(w):
        # (Cout, Cin, 3, 3) -> (9, Cp_in, Cp_out), zero-padded, bf16 for the MXU
        co, ci = w.shape[0], w.shape[1]
        wk = jnp.transpose(w, (2, 3, 1, 0)).reshape(9, ci, co)
        wk = jnp.pad(wk, ((0, 0), (0, Cp - ci), (0, Cp - co)))
        return wk.astype(jnp.bfloat16)

    w1_k = prep_w(w1)
    w2_k = prep_w(w2)

    cparams = pltpu.CompilerParams(
        dimension_semantics=("parallel",),
        vmem_limit_bytes=48 * 1024 * 1024,
    )

    def col_mask():
        # True on the W real columns of each flattened padded-width row.
        col = lax.broadcasted_iota(jnp.int32, (L, 1), 0) % Wp
        return col < W

    # ---------------- kernel A: conv1 (+ per-sample channel sums for bn1) -------------
    def conv1_kernel(xp_ref, w_ref, y_ref, st_ref):
        acc = jnp.zeros((L, Cp), jnp.float32)
        for dh in range(3):
            for dw in range(3):
                patch = xp_ref[0, pl.ds(dh * Wp + dw, L), :]             # (L, Cp) bf16
                acc = acc + jnp.dot(patch, w_ref[dh * 3 + dw],
                                    preferred_element_type=jnp.float32)
        valid = col_mask()
        accm = jnp.where(valid, acc, 0.0)
        y_ref[0] = acc
        st_ref[0, 0:1, :] = jnp.sum(accm, axis=0, keepdims=True)
        st_ref[0, 1:2, :] = jnp.sum(accm * accm, axis=0, keepdims=True)

    y1, st1 = pl.pallas_call(
        conv1_kernel,
        grid=(N,),
        in_specs=[
            pl.BlockSpec((1, Pr, Cp), lambda n: (n, 0, 0)),
            pl.BlockSpec((9, Cp, Cp), lambda n: (0, 0, 0)),
        ],
        out_specs=(
            pl.BlockSpec((1, L, Cp), lambda n: (n, 0, 0)),
            pl.BlockSpec((1, 2, Cp), lambda n: (n, 0, 0)),
        ),
        out_shape=(
            jax.ShapeDtypeStruct((N, L, Cp), jnp.float32),
            jax.ShapeDtypeStruct((N, 2, Cp), jnp.float32),
        ),
        compiler_params=cparams,
    )(xp_flat, w1_k)

    # ---- per-channel BN finalization (O(C) glue): fold into one scale/shift pair ----
    cnt = jnp.float32(N * H * W)

    def bn_fold(st, gamma, beta):
        s = jnp.sum(st[:, 0, :], axis=0)
        q = jnp.sum(st[:, 1, :], axis=0)
        mean = s / cnt
        var = jnp.maximum(q / cnt - mean * mean, 0.0)   # single-pass biased variance
        gp = jnp.pad(gamma.astype(jnp.float32), (0, Cp - Cout))
        bp = jnp.pad(beta.astype(jnp.float32), (0, Cp - Cout))
        scale = gp * lax.rsqrt(var + BN_EPS)
        shift = bp - mean * scale
        return scale.reshape(1, Cp), shift.reshape(1, Cp)

    sc1, sh1 = bn_fold(st1, g1, be1)

    # ------------- kernel B: bn1 + relu, conv2 (+ per-sample sums for bn2) ------------
    def bn1_conv2_kernel(sc_ref, sh_ref, y1_ref, w_ref, y2_ref, st_ref, zpad_ref):
        valid = col_mask()
        # zero ring supplies conv2's zero padding (junk cols double as left/right pad)
        zpad_ref[...] = jnp.zeros_like(zpad_ref)
        z1 = y1_ref[0] * sc_ref[...] + sh_ref[...]      # fused per-channel scale/shift
        z1 = jnp.maximum(z1, 0.0)
        z1 = jnp.where(valid, z1, 0.0)
        zpad_ref[pl.ds(lead + Wp + 1, L), :] = z1.astype(jnp.bfloat16)
        acc = jnp.zeros((L, Cp), jnp.float32)
        for dh in range(3):
            for dw in range(3):
                patch = zpad_ref[pl.ds(lead + dh * Wp + dw, L), :]       # (L, Cp) bf16
                acc = acc + jnp.dot(patch, w_ref[dh * 3 + dw],
                                    preferred_element_type=jnp.float32)
        accm = jnp.where(valid, acc, 0.0)
        y2_ref[0] = acc
        st_ref[0, 0:1, :] = jnp.sum(accm, axis=0, keepdims=True)
        st_ref[0, 1:2, :] = jnp.sum(accm * accm, axis=0, keepdims=True)

    y2, st2 = pl.pallas_call(
        bn1_conv2_kernel,
        grid=(N,),
        in_specs=[
            pl.BlockSpec((1, Cp), lambda n: (0, 0)),
            pl.BlockSpec((1, Cp), lambda n: (0, 0)),
            pl.BlockSpec((1, L, Cp), lambda n: (n, 0, 0)),
            pl.BlockSpec((9, Cp, Cp), lambda n: (0, 0, 0)),
        ],
        out_specs=(
            pl.BlockSpec((1, L, Cp), lambda n: (n, 0, 0)),
            pl.BlockSpec((1, 2, Cp), lambda n: (n, 0, 0)),
        ),
        out_shape=(
            jax.ShapeDtypeStruct((N, L, Cp), jnp.float32),
            jax.ShapeDtypeStruct((N, 2, Cp), jnp.float32),
        ),
        scratch_shapes=[pltpu.VMEM((Pz, Cp), jnp.bfloat16)],
        compiler_params=cparams,
    )(sc1, sh1, y1, w2_k)

    sc2, sh2 = bn_fold(st2, g2, be2)

    # ------------------- kernel C: bn2 + identity skip + final relu -------------------
    def bn2_skip_kernel(sc_ref, sh_ref, y2_ref, xp_ref, out_ref):
        skip = xp_ref[0, pl.ds(Wp + 1, L), :].astype(jnp.float32)
        z2 = y2_ref[0] * sc_ref[...] + sh_ref[...]
        out_ref[0] = jnp.maximum(skip + z2, 0.0)

    out_flat = pl.pallas_call(
        bn2_skip_kernel,
        grid=(N,),
        in_specs=[
            pl.BlockSpec((1, Cp), lambda n: (0, 0)),
            pl.BlockSpec((1, Cp), lambda n: (0, 0)),
            pl.BlockSpec((1, L, Cp), lambda n: (n, 0, 0)),
            pl.BlockSpec((1, Pr, Cp), lambda n: (n, 0, 0)),
        ],
        out_specs=pl.BlockSpec((1, L, Cp), lambda n: (n, 0, 0)),
        out_shape=jax.ShapeDtypeStruct((N, L, Cp), jnp.float32),
        compiler_params=cparams,
    )(sc2, sh2, y2, xp_flat)

    # flattened padded-width rows -> NCHW; drop channel padding and junk columns
    out = out_flat.reshape(N, H, Wp, Cp)[:, :, :W, :Cout]
    return jnp.transpose(out, (0, 3, 1, 2))


def residual_block_ref(x_nchw, params):
    """Pure-JAX f32 reference mirroring the PyTorch forward (training-mode BN)."""
    w1, b1, g1, be1, w2, b2, g2, be2 = params

    def conv(x, w, b):
        y = lax.conv_general_dilated(x, w, (1, 1), ((1, 1), (1, 1)),
                                     dimension_numbers=('NCHW', 'OIHW', 'NCHW'))
        return y + b[None, :, None, None]

    def bn(x, g, be):
        mean = jnp.mean(x, axis=(0, 2, 3), keepdims=True)
        var = jnp.mean((x - mean) ** 2, axis=(0, 2, 3), keepdims=True)
        return ((x - mean) * lax.rsqrt(var + BN_EPS)
                * g[None, :, None, None] + be[None, :, None, None])

    z = jax.nn.relu(bn(conv(x_nchw, w1, b1), g1, be1))
    z = bn(conv(z, w2, b2), g2, be2)
    return jax.nn.relu(x_nchw + z)


if __name__ == "__main__":
    N, C, H, W = 2, 4, 16, 16        # in_channels = out_channels = 4, stride = 1
    Cout, K = C, 3

    key = jax.random.PRNGKey(0)
    ks = jax.random.split(key, 9)
    fan_in = C * K * K
    scale = 1.0 / np.sqrt(fan_in)
    w1 = jax.random.uniform(ks[0], (Cout, C, K, K), jnp.float32, -scale, scale)
    b1 = jax.random.uniform(ks[1], (Cout,), jnp.float32, -scale, scale)
    w2 = jax.random.uniform(ks[2], (Cout, Cout, K, K), jnp.float32, -scale, scale)
    b2 = jax.random.uniform(ks[3], (Cout,), jnp.float32, -scale, scale)
    g1 = 1.0 + 0.1 * jax.random.normal(ks[4], (Cout,), jnp.float32)
    be1 = 0.1 * jax.random.normal(ks[5], (Cout,), jnp.float32)
    g2 = 1.0 + 0.1 * jax.random.normal(ks[6], (Cout,), jnp.float32)
    be2 = 0.1 * jax.random.normal(ks[7], (Cout,), jnp.float32)
    params = (w1, b1, g1, be1, w2, b2, g2, be2)

    x = jax.random.normal(ks[8], (N, C, H, W), jnp.float32)

    out = jax.block_until_ready(residual_block(x, params))
    ref = jax.block_until_ready(residual_block_ref(x, params))

    # Tolerance sized for bf16 MXU operands (with f32 accumulation) through two 3x3
    # convolutions each followed by a batch-variance normalization; reference is pure f32.
    np.testing.assert_allclose(np.asarray(out), np.asarray(ref), rtol=5e-2, atol=5e-2)
    print("KERNEL_OK")
</pallas_src>

<mosaic_0001>
module attributes {stable_mosaic.version = 11 : i64} {
  func.func @conv1_kernel(%arg0: i32, %arg1: memref<1x342x128xbf16, #tpu.memory_space<vmem>>, %arg2: memref<9x128x128xbf16, #tpu.memory_space<vmem>>, %arg3: memref<1x288x128xf32, #tpu.memory_space<vmem>>, %arg4: memref<1x2x128xf32, #tpu.memory_space<vmem>>) attributes {dimension_semantics = [#tpu.dimension_semantics<parallel>], iteration_bounds = array<i64: 2>, scalar_prefetch = 0 : i64, scratch_operands = 0 : i64, tpu.core_type = #tpu.core_type<tc>, window_params = [{transform_indices = @transform_0, window_bounds = array<i64: 1, 342, 128>}, {pipeline_mode = #tpu.pipeline_mode<synchronous>, transform_indices = @transform_1, window_bounds = array<i64: 9, 128, 128>}, {transform_indices = @transform_2, window_bounds = array<i64: 1, 288, 128>}, {transform_indices = @transform_3, window_bounds = array<i64: 1, 2, 128>}]} {
    %cst = arith.constant 0.000000e+00 : f32
    %0 = vector.broadcast %cst : f32 to vector<288x128xf32>
    %c0 = arith.constant 0 : index
    %c0_0 = arith.constant 0 : index
    %c0_1 = arith.constant 0 : index
    %1 = vector.load %arg1[%c0, %c0_0, %c0_1] : memref<1x342x128xbf16, #tpu.memory_space<vmem>>, vector<1x288x128xbf16>
    %2 = vector.shape_cast %1 : vector<1x288x128xbf16> to vector<288x128xbf16>
    %c0_2 = arith.constant 0 : index
    %c0_3 = arith.constant 0 : index
    %c0_4 = arith.constant 0 : index
    %3 = vector.load %arg2[%c0_2, %c0_3, %c0_4] : memref<9x128x128xbf16, #tpu.memory_space<vmem>>, vector<1x128x128xbf16>
    %4 = vector.shape_cast %3 : vector<1x128x128xbf16> to vector<128x128xbf16>
    %cst_5 = arith.constant dense<0.000000e+00> : vector<288x128xf32>
    %5 = tpu.matmul %2, %4, %cst_5 {dimension_numbers = #tpu.dot_dimension_numbers<[1], [0], [0], [1], [0, 0, 1, 1], [], []>} : vector<288x128xbf16>, vector<128x128xbf16>, vector<288x128xf32> -> vector<288x128xf32>
    %6 = arith.addf %0, %5 : vector<288x128xf32>
    %c0_6 = arith.constant 0 : index
    %c1 = arith.constant 1 : index
    %c0_7 = arith.constant 0 : index
    %7 = vector.load %arg1[%c0_6, %c1, %c0_7] : memref<1x342x128xbf16, #tpu.memory_space<vmem>>, vector<1x288x128xbf16>
    %8 = vector.shape_cast %7 : vector<1x288x128xbf16> to vector<288x128xbf16>
    %c1_8 = arith.constant 1 : index
    %c0_9 = arith.constant 0 : index
    %c0_10 = arith.constant 0 : index
    %9 = vector.load %arg2[%c1_8, %c0_9, %c0_10] : memref<9x128x128xbf16, #tpu.memory_space<vmem>>, vector<1x128x128xbf16>
    %10 = vector.shape_cast %9 : vector<1x128x128xbf16> to vector<128x128xbf16>
    %cst_11 = arith.constant dense<0.000000e+00> : vector<288x128xf32>
    %11 = tpu.matmul %8, %10, %cst_11 {dimension_numbers = #tpu.dot_dimension_numbers<[1], [0], [0], [1], [0, 0, 1, 1], [], []>} : vector<288x128xbf16>, vector<128x128xbf16>, vector<288x128xf32> -> vector<288x128xf32>
    %12 = arith.addf %6, %11 : vector<288x128xf32>
    %c0_12 = arith.constant 0 : index
    %c2 = arith.constant 2 : index
    %c0_13 = arith.constant 0 : index
    %13 = vector.load %arg1[%c0_12, %c2, %c0_13] : memref<1x342x128xbf16, #tpu.memory_space<vmem>>, vector<1x288x128xbf16>
    %14 = vector.shape_cast %13 : vector<1x288x128xbf16> to vector<288x128xbf16>
    %c2_14 = arith.constant 2 : index
    %c0_15 = arith.constant 0 : index
    %c0_16 = arith.constant 0 : index
    %15 = vector.load %arg2[%c2_14, %c0_15, %c0_16] : memref<9x128x128xbf16, #tpu.memory_space<vmem>>, vector<1x128x128xbf16>
    %16 = vector.shape_cast %15 : vector<1x128x128xbf16> to vector<128x128xbf16>
    %cst_17 = arith.constant dense<0.000000e+00> : vector<288x128xf32>
    %17 = tpu.matmul %14, %16, %cst_17 {dimension_numbers = #tpu.dot_dimension_numbers<[1], [0], [0], [1], [0, 0, 1, 1], [], []>} : vector<288x128xbf16>, vector<128x128xbf16>, vector<288x128xf32> -> vector<288x128xf32>
    %18 = arith.addf %12, %17 : vector<288x128xf32>
    %c0_18 = arith.constant 0 : index
    %c18 = arith.constant 18 : index
    %c0_19 = arith.constant 0 : index
    %19 = vector.load %arg1[%c0_18, %c18, %c0_19] : memref<1x342x128xbf16, #tpu.memory_space<vmem>>, vector<1x288x128xbf16>
    %20 = vector.shape_cast %19 : vector<1x288x128xbf16> to vector<288x128xbf16>
    %c3 = arith.constant 3 : index
    %c0_20 = arith.constant 0 : index
    %c0_21 = arith.constant 0 : index
    %21 = vector.load %arg2[%c3, %c0_20, %c0_21] : memref<9x128x128xbf16, #tpu.memory_space<vmem>>, vector<1x128x128xbf16>
    %22 = vector.shape_cast %21 : vector<1x128x128xbf16> to vector<128x128xbf16>
    %cst_22 = arith.constant dense<0.000000e+00> : vector<288x128xf32>
    %23 = tpu.matmul %20, %22, %cst_22 {dimension_numbers = #tpu.dot_dimension_numbers<[1], [0], [0], [1], [0, 0, 1, 1], [], []>} : vector<288x128xbf16>, vector<128x128xbf16>, vector<288x128xf32> -> vector<288x128xf32>
    %24 = arith.addf %18, %23 : vector<288x128xf32>
    %c0_23 = arith.constant 0 : index
    %c19 = arith.constant 19 : index
    %c0_24 = arith.constant 0 : index
    %25 = vector.load %arg1[%c0_23, %c19, %c0_24] : memref<1x342x128xbf16, #tpu.memory_space<vmem>>, vector<1x288x128xbf16>
    %26 = vector.shape_cast %25 : vector<1x288x128xbf16> to vector<288x128xbf16>
    %c4 = arith.constant 4 : index
    %c0_25 = arith.constant 0 : index
    %c0_26 = arith.constant 0 : index
    %27 = vector.load %arg2[%c4, %c0_25, %c0_26] : memref<9x128x128xbf16, #tpu.memory_space<vmem>>, vector<1x128x128xbf16>
    %28 = vector.shape_cast %27 : vector<1x128x128xbf16> to vector<128x128xbf16>
    %cst_27 = arith.constant dense<0.000000e+00> : vector<288x128xf32>
    %29 = tpu.matmul %26, %28, %cst_27 {dimension_numbers = #tpu.dot_dimension_numbers<[1], [0], [0], [1], [0, 0, 1, 1], [], []>} : vector<288x128xbf16>, vector<128x128xbf16>, vector<288x128xf32> -> vector<288x128xf32>
    %30 = arith.addf %24, %29 : vector<288x128xf32>
    %c0_28 = arith.constant 0 : index
    %c20 = arith.constant 20 : index
    %c0_29 = arith.constant 0 : index
    %31 = vector.load %arg1[%c0_28, %c20, %c0_29] : memref<1x342x128xbf16, #tpu.memory_space<vmem>>, vector<1x288x128xbf16>
    %32 = vector.shape_cast %31 : vector<1x288x128xbf16> to vector<288x128xbf16>
    %c5 = arith.constant 5 : index
    %c0_30 = arith.constant 0 : index
    %c0_31 = arith.constant 0 : index
    %33 = vector.load %arg2[%c5, %c0_30, %c0_31] : memref<9x128x128xbf16, #tpu.memory_space<vmem>>, vector<1x128x128xbf16>
    %34 = vector.shape_cast %33 : vector<1x128x128xbf16> to vector<128x128xbf16>
    %cst_32 = arith.constant dense<0.000000e+00> : vector<288x128xf32>
    %35 = tpu.matmul %32, %34, %cst_32 {dimension_numbers = #tpu.dot_dimension_numbers<[1], [0], [0], [1], [0, 0, 1, 1], [], []>} : vector<288x128xbf16>, vector<128x128xbf16>, vector<288x128xf32> -> vector<288x128xf32>
    %36 = arith.addf %30, %35 : vector<288x128xf32>
    %c0_33 = arith.constant 0 : index
    %c36 = arith.constant 36 : index
    %c0_34 = arith.constant 0 : index
    %37 = vector.load %arg1[%c0_33, %c36, %c0_34] : memref<1x342x128xbf16, #tpu.memory_space<vmem>>, vector<1x288x128xbf16>
    %38 = vector.shape_cast %37 : vector<1x288x128xbf16> to vector<288x128xbf16>
    %c6 = arith.constant 6 : index
    %c0_35 = arith.constant 0 : index
    %c0_36 = arith.constant 0 : index
    %39 = vector.load %arg2[%c6, %c0_35, %c0_36] : memref<9x128x128xbf16, #tpu.memory_space<vmem>>, vector<1x128x128xbf16>
    %40 = vector.shape_cast %39 : vector<1x128x128xbf16> to vector<128x128xbf16>
    %cst_37 = arith.constant dense<0.000000e+00> : vector<288x128xf32>
    %41 = tpu.matmul %38, %40, %cst_37 {dimension_numbers = #tpu.dot_dimension_numbers<[1], [0], [0], [1], [0, 0, 1, 1], [], []>} : vector<288x128xbf16>, vector<128x128xbf16>, vector<288x128xf32> -> vector<288x128xf32>
    %42 = arith.addf %36, %41 : vector<288x128xf32>
    %c0_38 = arith.constant 0 : index
    %c37 = arith.constant 37 : index
    %c0_39 = arith.constant 0 : index
    %43 = vector.load %arg1[%c0_38, %c37, %c0_39] : memref<1x342x128xbf16, #tpu.memory_space<vmem>>, vector<1x288x128xbf16>
    %44 = vector.shape_cast %43 : vector<1x288x128xbf16> to vector<288x128xbf16>
    %c7 = arith.constant 7 : index
    %c0_40 = arith.constant 0 : index
    %c0_41 = arith.constant 0 : index
    %45 = vector.load %arg2[%c7, %c0_40, %c0_41] : memref<9x128x128xbf16, #tpu.memory_space<vmem>>, vector<1x128x128xbf16>
    %46 = vector.shape_cast %45 : vector<1x128x128xbf16> to vector<128x128xbf16>
    %cst_42 = arith.constant dense<0.000000e+00> : vector<288x128xf32>
    %47 = tpu.matmul %44, %46, %cst_42 {dimension_numbers = #tpu.dot_dimension_numbers<[1], [0], [0], [1], [0, 0, 1, 1], [], []>} : vector<288x128xbf16>, vector<128x128xbf16>, vector<288x128xf32> -> vector<288x128xf32>
    %48 = arith.addf %42, %47 : vector<288x128xf32>
    %c0_43 = arith.constant 0 : index
    %c38 = arith.constant 38 : index
    %c0_44 = arith.constant 0 : index
    %49 = vector.load %arg1[%c0_43, %c38, %c0_44] : memref<1x342x128xbf16, #tpu.memory_space<vmem>>, vector<1x288x128xbf16>
    %50 = vector.shape_cast %49 : vector<1x288x128xbf16> to vector<288x128xbf16>
    %c8 = arith.constant 8 : index
    %c0_45 = arith.constant 0 : index
    %c0_46 = arith.constant 0 : index
    %51 = vector.load %arg2[%c8, %c0_45, %c0_46] : memref<9x128x128xbf16, #tpu.memory_space<vmem>>, vector<1x128x128xbf16>
    %52 = vector.shape_cast %51 : vector<1x128x128xbf16> to vector<128x128xbf16>
    %cst_47 = arith.constant dense<0.000000e+00> : vector<288x128xf32>
    %53 = tpu.matmul %50, %52, %cst_47 {dimension_numbers = #tpu.dot_dimension_numbers<[1], [0], [0], [1], [0, 0, 1, 1], [], []>} : vector<288x128xbf16>, vector<128x128xbf16>, vector<288x128xf32> -> vector<288x128xf32>
    %54 = arith.addf %48, %53 : vector<288x128xf32>
    %55 = tpu.iota {dimensions = array<i32: 0>} : vector<288x1xi32>
    %c18_i32 = arith.constant 18 : i32
    %c0_i32 = arith.constant 0 : i32
    %56 = arith.cmpi eq, %c18_i32, %c0_i32 : i32
    %c1_i32 = arith.constant 1 : i32
    %57 = arith.select %56, %c1_i32, %c18_i32 : i32
    %58 = vector.broadcast %57 : i32 to vector<288x1xi32>
    %59 = arith.remsi %55, %58 : vector<288x1xi32>
    %c0_i32_48 = arith.constant 0 : i32
    %60 = vector.broadcast %c0_i32_48 : i32 to vector<288x1xi32>
    %61 = arith.cmpi ne, %59, %60 : vector<288x1xi32>
    %c0_i32_49 = arith.constant 0 : i32
    %62 = vector.broadcast %c0_i32_49 : i32 to vector<288x1xi32>
    %63 = arith.cmpi slt, %59, %62 : vector<288x1xi32>
    %c0_i32_50 = arith.constant 0 : i32
    %64 = arith.cmpi slt, %57, %c0_i32_50 : i32
    %65 = vector.broadcast %64 : i1 to vector<288x1xi1>
    %66 = vector.broadcast %65 : vector<288x1xi1> to vector<288x1xi1>
    %67 = arith.xori %63, %66 : vector<288x1xi1>
    %68 = arith.andi %67, %61 : vector<288x1xi1>
    %69 = vector.broadcast %57 : i32 to vector<288x1xi32>
    %70 = arith.addi %59, %69 : vector<288x1xi32>
    %71 = arith.select %68, %70, %59 : vector<288x1xi1>, vector<288x1xi32>
    %c16_i32 = arith.constant 16 : i32
    %72 = vector.broadcast %c16_i32 : i32 to vector<288x1xi32>
    %73 = arith.cmpi slt, %71, %72 : vector<288x1xi32>
    %cst_51 = arith.constant 0.000000e+00 : f32
    %74 = vector.shape_cast %73 : vector<288x1xi1> to vector<288x1xi1>
    %75 = vector.broadcast %74 : vector<288x1xi1> to vector<288x128xi1>
    %76 = vector.broadcast %cst_51 : f32 to vector<288x128xf32>
    %77 = arith.select %75, %54, %76 : vector<288x128xi1>, vector<288x128xf32>
    %c0_52 = arith.constant 0 : index
    %c0_53 = arith.constant 0 : index
    %c0_54 = arith.constant 0 : index
    %78 = vector.load %arg3[%c0_52, %c0_53, %c0_54] : memref<1x288x128xf32, #tpu.memory_space<vmem>>, vector<1x288x128xf32>
    %79 = vector.shape_cast %78 : vector<1x288x128xf32> to vector<288x128xf32>
    %80 = vector.shape_cast %54 : vector<288x128xf32> to vector<1x288x128xf32>
    tpu.vector_store %arg3[%c0_52, %c0_53, %c0_54], %80 {strides = array<i32>} : memref<1x288x128xf32, #tpu.memory_space<vmem>>, vector<1x288x128xf32>,
    %cst_55 = arith.constant dense<0.000000e+00> : vector<128xf32>
    %81 = vector.multi_reduction <add>, %77, %cst_55 [0] : vector<288x128xf32> to vector<128xf32>
    %82 = vector.shape_cast %81 : vector<128xf32> to vector<1x128xf32>
    %c0_56 = arith.constant 0 : index
    %c0_57 = arith.constant 0 : index
    %c0_58 = arith.constant 0 : index
    %83 = vector.load %arg4[%c0_56, %c0_57, %c0_58] : memref<1x2x128xf32, #tpu.memory_space<vmem>>, vector<1x1x128xf32>
    %84 = vector.shape_cast %83 : vector<1x1x128xf32> to vector<1x128xf32>
    %85 = vector.shape_cast %82 : vector<1x128xf32> to vector<1x1x128xf32>
    tpu.vector_store %arg4[%c0_56, %c0_57, %c0_58], %85 {strides = array<i32>} : memref<1x2x128xf32, #tpu.memory_space<vmem>>, vector<1x1x128xf32>,
    %86 = arith.mulf %77, %77 : vector<288x128xf32>
    %cst_59 = arith.constant dense<0.000000e+00> : vector<128xf32>
    %87 = vector.multi_reduction <add>, %86, %cst_59 [0] : vector<288x128xf32> to vector<128xf32>
    %88 = vector.shape_cast %87 : vector<128xf32> to vector<1x128xf32>
    %c0_60 = arith.constant 0 : index
    %c1_61 = arith.constant 1 : index
    %c0_62 = arith.constant 0 : index
    %89 = vector.load %arg4[%c0_60, %c1_61, %c0_62] : memref<1x2x128xf32, #tpu.memory_space<vmem>>, vector<1x1x128xf32>
    %90 = vector.shape_cast %89 : vector<1x1x128xf32> to vector<1x128xf32>
    %91 = vector.shape_cast %88 : vector<1x128xf32> to vector<1x1x128xf32>
    tpu.vector_store %arg4[%c0_60, %c1_61, %c0_62], %91 {strides = array<i32>} : memref<1x2x128xf32, #tpu.memory_space<vmem>>, vector<1x1x128xf32>,
    return
  }
  func.func @transform_0(%arg0: i32) -> (i32, i32, i32) {
    %c0_i32 = arith.constant 0 : i32
    %c0_i32_0 = arith.constant 0 : i32
    %c0_i32_1 = arith.constant 0 : i32
    return %arg0, %c0_i32, %c0_i32_0 : i32, i32, i32
  }
  func.func @transform_1(%arg0: i32) -> (i32, i32, i32) {
    %c0_i32 = arith.constant 0 : i32
    %c0_i32_0 = arith.constant 0 : i32
    %c0_i32_1 = arith.constant 0 : i32
    %c0_i32_2 = arith.constant 0 : i32
    return %c0_i32, %c0_i32_0, %c0_i32_1 : i32, i32, i32
  }
  func.func @transform_2(%arg0: i32) -> (i32, i32, i32) {
    %c0_i32 = arith.constant 0 : i32
    %c0_i32_0 = arith.constant 0 : i32
    %c0_i32_1 = arith.constant 0 : i32
    return %arg0, %c0_i32, %c0_i32_0 : i32, i32, i32
  }
  func.func @transform_3(%arg0: i32) -> (i32, i32, i32) {
    %c0_i32 = arith.constant 0 : i32
    %c0_i32_0 = arith.constant 0 : i32
    %c0_i32_1 = arith.constant 0 : i32
    return %arg0, %c0_i32, %c0_i32_0 : i32, i32, i32
  }
}

module attributes {stable_mosaic.version = 11 : i64} {
  func.func @bn1_conv2_kernel(%arg0: i32, %arg1: memref<1x128xf32, #tpu.memory_space<vmem>>, %arg2: memref<1x128xf32, #tpu.memory_space<vmem>>, %arg3: memref<1x288x128xf32, #tpu.memory_space<vmem>>, %arg4: memref<9x128x128xbf16, #tpu.memory_space<vmem>>, %arg5: memref<1x288x128xf32, #tpu.memory_space<vmem>>, %arg6: memref<1x2x128xf32, #tpu.memory_space<vmem>>, %arg7: memref<344x128xbf16, #tpu.memory_space<vmem>>) attributes {dimension_semantics = [#tpu.dimension_semantics<parallel>], iteration_bounds = array<i64: 2>, scalar_prefetch = 0 : i64, scratch_operands = 1 : i64, tpu.core_type = #tpu.core_type<tc>, window_params = [{pipeline_mode = #tpu.pipeline_mode<synchronous>, transform_indices = @transform_0, window_bounds = array<i64: 1, 128>}, {pipeline_mode = #tpu.pipeline_mode<synchronous>, transform_indices = @transform_1, window_bounds = array<i64: 1, 128>}, {transform_indices = @transform_2, window_bounds = array<i64: 1, 288, 128>}, {pipeline_mode = #tpu.pipeline_mode<synchronous>, transform_indices = @transform_3, window_bounds = array<i64: 9, 128, 128>}, {transform_indices = @transform_4, window_bounds = array<i64: 1, 288, 128>}, {transform_indices = @transform_5, window_bounds = array<i64: 1, 2, 128>}]} {
    %0 = tpu.iota {dimensions = array<i32: 0>} : vector<288x1xi32>
    %c18_i32 = arith.constant 18 : i32
    %c0_i32 = arith.constant 0 : i32
    %1 = arith.cmpi eq, %c18_i32, %c0_i32 : i32
    %c1_i32 = arith.constant 1 : i32
    %2 = arith.select %1, %c1_i32, %c18_i32 : i32
    %3 = vector.broadcast %2 : i32 to vector<288x1xi32>
    %4 = arith.remsi %0, %3 : vector<288x1xi32>
    %c0_i32_0 = arith.constant 0 : i32
    %5 = vector.broadcast %c0_i32_0 : i32 to vector<288x1xi32>
    %6 = arith.cmpi ne, %4, %5 : vector<288x1xi32>
    %c0_i32_1 = arith.constant 0 : i32
    %7 = vector.broadcast %c0_i32_1 : i32 to vector<288x1xi32>
    %8 = arith.cmpi slt, %4, %7 : vector<288x1xi32>
    %c0_i32_2 = arith.constant 0 : i32
    %9 = arith.cmpi slt, %2, %c0_i32_2 : i32
    %10 = vector.broadcast %9 : i1 to vector<288x1xi1>
    %11 = vector.broadcast %10 : vector<288x1xi1> to vector<288x1xi1>
    %12 = arith.xori %8, %11 : vector<288x1xi1>
    %13 = arith.andi %12, %6 : vector<288x1xi1>
    %14 = vector.broadcast %2 : i32 to vector<288x1xi32>
    %15 = arith.addi %4, %14 : vector<288x1xi32>
    %16 = arith.select %13, %15, %4 : vector<288x1xi1>, vector<288x1xi32>
    %c16_i32 = arith.constant 16 : i32
    %17 = vector.broadcast %c16_i32 : i32 to vector<288x1xi32>
    %18 = arith.cmpi slt, %16, %17 : vector<288x1xi32>
    %cst = arith.constant 0.000000e+00 : bf16
    %19 = vector.broadcast %cst : bf16 to vector<344x128xbf16>
    %c0 = arith.constant 0 : index
    %c0_3 = arith.constant 0 : index
    %20 = vector.load %arg7[%c0, %c0_3] : memref<344x128xbf16, #tpu.memory_space<vmem>>, vector<344x128xbf16>
    tpu.vector_store %arg7[%c0, %c0_3], %19 {strides = array<i32>} : memref<344x128xbf16, #tpu.memory_space<vmem>>, vector<344x128xbf16>,
    %c0_4 = arith.constant 0 : index
    %c0_5 = arith.constant 0 : index
    %c0_6 = arith.constant 0 : index
    %21 = vector.load %arg3[%c0_4, %c0_5, %c0_6] : memref<1x288x128xf32, #tpu.memory_space<vmem>>, vector<1x288x128xf32>
    %22 = vector.shape_cast %21 : vector<1x288x128xf32> to vector<288x128xf32>
    %c0_7 = arith.constant 0 : index
    %c0_8 = arith.constant 0 : index
    %23 = vector.load %arg1[%c0_7, %c0_8] : memref<1x128xf32, #tpu.memory_space<vmem>>, vector<1x128xf32>
    %24 = vector.broadcast %23 : vector<1x128xf32> to vector<288x128xf32>
    %25 = arith.mulf %22, %24 : vector<288x128xf32>
    %c0_9 = arith.constant 0 : index
    %c0_10 = arith.constant 0 : index
    %26 = vector.load %arg2[%c0_9, %c0_10] : memref<1x128xf32, #tpu.memory_space<vmem>>, vector<1x128xf32>
    %27 = vector.broadcast %26 : vector<1x128xf32> to vector<288x128xf32>
    %28 = arith.addf %25, %27 : vector<288x128xf32>
    %cst_11 = arith.constant 0.000000e+00 : f32
    %29 = vector.broadcast %cst_11 : f32 to vector<288x128xf32>
    %30 = arith.maximumf %28, %29 : vector<288x128xf32>
    %cst_12 = arith.constant 0.000000e+00 : f32
    %31 = vector.shape_cast %18 : vector<288x1xi1> to vector<288x1xi1>
    %32 = vector.broadcast %31 : vector<288x1xi1> to vector<288x128xi1>
    %33 = vector.broadcast %cst_12 : f32 to vector<288x128xf32>
    %34 = arith.select %32, %30, %33 : vector<288x128xi1>, vector<288x128xf32>
    %35 = arith.truncf %34 : vector<288x128xf32> to vector<288x128xbf16>
    %c32 = arith.constant 32 : index
    %c0_13 = arith.constant 0 : index
    %36 = vector.load %arg7[%c32, %c0_13] : memref<344x128xbf16, #tpu.memory_space<vmem>>, vector<288x128xbf16>
    tpu.vector_store %arg7[%c32, %c0_13], %35 {strides = array<i32>} : memref<344x128xbf16, #tpu.memory_space<vmem>>, vector<288x128xbf16>,
    %cst_14 = arith.constant 0.000000e+00 : f32
    %37 = vector.broadcast %cst_14 : f32 to vector<288x128xf32>
    %c13 = arith.constant 13 : index
    %c0_15 = arith.constant 0 : index
    %38 = vector.load %arg7[%c13, %c0_15] : memref<344x128xbf16, #tpu.memory_space<vmem>>, vector<288x128xbf16>
    %c0_16 = arith.constant 0 : index
    %c0_17 = arith.constant 0 : index
    %c0_18 = arith.constant 0 : index
    %39 = vector.load %arg4[%c0_16, %c0_17, %c0_18] : memref<9x128x128xbf16, #tpu.memory_space<vmem>>, vector<1x128x128xbf16>
    %40 = vector.shape_cast %39 : vector<1x128x128xbf16> to vector<128x128xbf16>
    %cst_19 = arith.constant dense<0.000000e+00> : vector<288x128xf32>
    %41 = tpu.matmul %38, %40, %cst_19 {dimension_numbers = #tpu.dot_dimension_numbers<[1], [0], [0], [1], [0, 0, 1, 1], [], []>} : vector<288x128xbf16>, vector<128x128xbf16>, vector<288x128xf32> -> vector<288x128xf32>
    %42 = arith.addf %37, %41 : vector<288x128xf32>
    %c14 = arith.constant 14 : index
    %c0_20 = arith.constant 0 : index
    %43 = vector.load %arg7[%c14, %c0_20] : memref<344x128xbf16, #tpu.memory_space<vmem>>, vector<288x128xbf16>
    %c1 = arith.constant 1 : index
    %c0_21 = arith.constant 0 : index
    %c0_22 = arith.constant 0 : index
    %44 = vector.load %arg4[%c1, %c0_21, %c0_22] : memref<9x128x128xbf16, #tpu.memory_space<vmem>>, vector<1x128x128xbf16>
    %45 = vector.shape_cast %44 : vector<1x128x128xbf16> to vector<128x128xbf16>
    %cst_23 = arith.constant dense<0.000000e+00> : vector<288x128xf32>
    %46 = tpu.matmul %43, %45, %cst_23 {dimension_numbers = #tpu.dot_dimension_numbers<[1], [0], [0], [1], [0, 0, 1, 1], [], []>} : vector<288x128xbf16>, vector<128x128xbf16>, vector<288x128xf32> -> vector<288x128xf32>
    %47 = arith.addf %42, %46 : vector<288x128xf32>
    %c15 = arith.constant 15 : index
    %c0_24 = arith.constant 0 : index
    %48 = vector.load %arg7[%c15, %c0_24] : memref<344x128xbf16, #tpu.memory_space<vmem>>, vector<288x128xbf16>
    %c2 = arith.constant 2 : index
    %c0_25 = arith.constant 0 : index
    %c0_26 = arith.constant 0 : index
    %49 = vector.load %arg4[%c2, %c0_25, %c0_26] : memref<9x128x128xbf16, #tpu.memory_space<vmem>>, vector<1x128x128xbf16>
    %50 = vector.shape_cast %49 : vector<1x128x128xbf16> to vector<128x128xbf16>
    %cst_27 = arith.constant dense<0.000000e+00> : vector<288x128xf32>
    %51 = tpu.matmul %48, %50, %cst_27 {dimension_numbers = #tpu.dot_dimension_numbers<[1], [0], [0], [1], [0, 0, 1, 1], [], []>} : vector<288x128xbf16>, vector<128x128xbf16>, vector<288x128xf32> -> vector<288x128xf32>
    %52 = arith.addf %47, %51 : vector<288x128xf32>
    %c31 = arith.constant 31 : index
    %c0_28 = arith.constant 0 : index
    %53 = vector.load %arg7[%c31, %c0_28] : memref<344x128xbf16, #tpu.memory_space<vmem>>, vector<288x128xbf16>
    %c3 = arith.constant 3 : index
    %c0_29 = arith.constant 0 : index
    %c0_30 = arith.constant 0 : index
    %54 = vector.load %arg4[%c3, %c0_29, %c0_30] : memref<9x128x128xbf16, #tpu.memory_space<vmem>>, vector<1x128x128xbf16>
    %55 = vector.shape_cast %54 : vector<1x128x128xbf16> to vector<128x128xbf16>
    %cst_31 = arith.constant dense<0.000000e+00> : vector<288x128xf32>
    %56 = tpu.matmul %53, %55, %cst_31 {dimension_numbers = #tpu.dot_dimension_numbers<[1], [0], [0], [1], [0, 0, 1, 1], [], []>} : vector<288x128xbf16>, vector<128x128xbf16>, vector<288x128xf32> -> vector<288x128xf32>
    %57 = arith.addf %52, %56 : vector<288x128xf32>
    %c32_32 = arith.constant 32 : index
    %c0_33 = arith.constant 0 : index
    %58 = vector.load %arg7[%c32_32, %c0_33] : memref<344x128xbf16, #tpu.memory_space<vmem>>, vector<288x128xbf16>
    %c4 = arith.constant 4 : index
    %c0_34 = arith.constant 0 : index
    %c0_35 = arith.constant 0 : index
    %59 = vector.load %arg4[%c4, %c0_34, %c0_35] : memref<9x128x128xbf16, #tpu.memory_space<vmem>>, vector<1x128x128xbf16>
    %60 = vector.shape_cast %59 : vector<1x128x128xbf16> to vector<128x128xbf16>
    %cst_36 = arith.constant dense<0.000000e+00> : vector<288x128xf32>
    %61 = tpu.matmul %58, %60, %cst_36 {dimension_numbers = #tpu.dot_dimension_numbers<[1], [0], [0], [1], [0, 0, 1, 1], [], []>} : vector<288x128xbf16>, vector<128x128xbf16>, vector<288x128xf32> -> vector<288x128xf32>
    %62 = arith.addf %57, %61 : vector<288x128xf32>
    %c33 = arith.constant 33 : index
    %c0_37 = arith.constant 0 : index
    %63 = vector.load %arg7[%c33, %c0_37] : memref<344x128xbf16, #tpu.memory_space<vmem>>, vector<288x128xbf16>
    %c5 = arith.constant 5 : index
    %c0_38 = arith.constant 0 : index
    %c0_39 = arith.constant 0 : index
    %64 = vector.load %arg4[%c5, %c0_38, %c0_39] : memref<9x128x128xbf16, #tpu.memory_space<vmem>>, vector<1x128x128xbf16>
    %65 = vector.shape_cast %64 : vector<1x128x128xbf16> to vector<128x128xbf16>
    %cst_40 = arith.constant dense<0.000000e+00> : vector<288x128xf32>
    %66 = tpu.matmul %63, %65, %cst_40 {dimension_numbers = #tpu.dot_dimension_numbers<[1], [0], [0], [1], [0, 0, 1, 1], [], []>} : vector<288x128xbf16>, vector<128x128xbf16>, vector<288x128xf32> -> vector<288x128xf32>
    %67 = arith.addf %62, %66 : vector<288x128xf32>
    %c49 = arith.constant 49 : index
    %c0_41 = arith.constant 0 : index
    %68 = vector.load %arg7[%c49, %c0_41] : memref<344x128xbf16, #tpu.memory_space<vmem>>, vector<288x128xbf16>
    %c6 = arith.constant 6 : index
    %c0_42 = arith.constant 0 : index
    %c0_43 = arith.constant 0 : index
    %69 = vector.load %arg4[%c6, %c0_42, %c0_43] : memref<9x128x128xbf16, #tpu.memory_space<vmem>>, vector<1x128x128xbf16>
    %70 = vector.shape_cast %69 : vector<1x128x128xbf16> to vector<128x128xbf16>
    %cst_44 = arith.constant dense<0.000000e+00> : vector<288x128xf32>
    %71 = tpu.matmul %68, %70, %cst_44 {dimension_numbers = #tpu.dot_dimension_numbers<[1], [0], [0], [1], [0, 0, 1, 1], [], []>} : vector<288x128xbf16>, vector<128x128xbf16>, vector<288x128xf32> -> vector<288x128xf32>
    %72 = arith.addf %67, %71 : vector<288x128xf32>
    %c50 = arith.constant 50 : index
    %c0_45 = arith.constant 0 : index
    %73 = vector.load %arg7[%c50, %c0_45] : memref<344x128xbf16, #tpu.memory_space<vmem>>, vector<288x128xbf16>
    %c7 = arith.constant 7 : index
    %c0_46 = arith.constant 0 : index
    %c0_47 = arith.constant 0 : index
    %74 = vector.load %arg4[%c7, %c0_46, %c0_47] : memref<9x128x128xbf16, #tpu.memory_space<vmem>>, vector<1x128x128xbf16>
    %75 = vector.shape_cast %74 : vector<1x128x128xbf16> to vector<128x128xbf16>
    %cst_48 = arith.constant dense<0.000000e+00> : vector<288x128xf32>
    %76 = tpu.matmul %73, %75, %cst_48 {dimension_numbers = #tpu.dot_dimension_numbers<[1], [0], [0], [1], [0, 0, 1, 1], [], []>} : vector<288x128xbf16>, vector<128x128xbf16>, vector<288x128xf32> -> vector<288x128xf32>
    %77 = arith.addf %72, %76 : vector<288x128xf32>
    %c51 = arith.constant 51 : index
    %c0_49 = arith.constant 0 : index
    %78 = vector.load %arg7[%c51, %c0_49] : memref<344x128xbf16, #tpu.memory_space<vmem>>, vector<288x128xbf16>
    %c8 = arith.constant 8 : index
    %c0_50 = arith.constant 0 : index
    %c0_51 = arith.constant 0 : index
    %79 = vector.load %arg4[%c8, %c0_50, %c0_51] : memref<9x128x128xbf16, #tpu.memory_space<vmem>>, vector<1x128x128xbf16>
    %80 = vector.shape_cast %79 : vector<1x128x128xbf16> to vector<128x128xbf16>
    %cst_52 = arith.constant dense<0.000000e+00> : vector<288x128xf32>
    %81 = tpu.matmul %78, %80, %cst_52 {dimension_numbers = #tpu.dot_dimension_numbers<[1], [0], [0], [1], [0, 0, 1, 1], [], []>} : vector<288x128xbf16>, vector<128x128xbf16>, vector<288x128xf32> -> vector<288x128xf32>
    %82 = arith.addf %77, %81 : vector<288x128xf32>
    %cst_53 = arith.constant 0.000000e+00 : f32
    %83 = vector.shape_cast %18 : vector<288x1xi1> to vector<288x1xi1>
    %84 = vector.broadcast %83 : vector<288x1xi1> to vector<288x128xi1>
    %85 = vector.broadcast %cst_53 : f32 to vector<288x128xf32>
    %86 = arith.select %84, %82, %85 : vector<288x128xi1>, vector<288x128xf32>
    %c0_54 = arith.constant 0 : index
    %c0_55 = arith.constant 0 : index
    %c0_56 = arith.constant 0 : index
    %87 = vector.load %arg5[%c0_54, %c0_55, %c0_56] : memref<1x288x128xf32, #tpu.memory_space<vmem>>, vector<1x288x128xf32>
    %88 = vector.shape_cast %87 : vector<1x288x128xf32> to vector<288x128xf32>
    %89 = vector.shape_cast %82 : vector<288x128xf32> to vector<1x288x128xf32>
    tpu.vector_store %arg5[%c0_54, %c0_55, %c0_56], %89 {strides = array<i32>} : memref<1x288x128xf32, #tpu.memory_space<vmem>>, vector<1x288x128xf32>,
    %cst_57 = arith.constant dense<0.000000e+00> : vector<128xf32>
    %90 = vector.multi_reduction <add>, %86, %cst_57 [0] : vector<288x128xf32> to vector<128xf32>
    %91 = vector.shape_cast %90 : vector<128xf32> to vector<1x128xf32>
    %c0_58 = arith.constant 0 : index
    %c0_59 = arith.constant 0 : index
    %c0_60 = arith.constant 0 : index
    %92 = vector.load %arg6[%c0_58, %c0_59, %c0_60] : memref<1x2x128xf32, #tpu.memory_space<vmem>>, vector<1x1x128xf32>
    %93 = vector.shape_cast %92 : vector<1x1x128xf32> to vector<1x128xf32>
    %94 = vector.shape_cast %91 : vector<1x128xf32> to vector<1x1x128xf32>
    tpu.vector_store %arg6[%c0_58, %c0_59, %c0_60], %94 {strides = array<i32>} : memref<1x2x128xf32, #tpu.memory_space<vmem>>, vector<1x1x128xf32>,
    %95 = arith.mulf %86, %86 : vector<288x128xf32>
    %cst_61 = arith.constant dense<0.000000e+00> : vector<128xf32>
    %96 = vector.multi_reduction <add>, %95, %cst_61 [0] : vector<288x128xf32> to vector<128xf32>
    %97 = vector.shape_cast %96 : vector<128xf32> to vector<1x128xf32>
    %c0_62 = arith.constant 0 : index
    %c1_63 = arith.constant 1 : index
    %c0_64 = arith.constant 0 : index
    %98 = vector.load %arg6[%c0_62, %c1_63, %c0_64] : memref<1x2x128xf32, #tpu.memory_space<vmem>>, vector<1x1x128xf32>
    %99 = vector.shape_cast %98 : vector<1x1x128xf32> to vector<1x128xf32>
    %100 = vector.shape_cast %97 : vector<1x128xf32> to vector<1x1x128xf32>
    tpu.vector_store %arg6[%c0_62, %c1_63, %c0_64], %100 {strides = array<i32>} : memref<1x2x128xf32, #tpu.memory_space<vmem>>, vector<1x1x128xf32>,
    return
  }
  func.func @transform_0(%arg0: i32) -> (i32, i32) {
    %c0_i32 = arith.constant 0 : i32
    %c0_i32_0 = arith.constant 0 : i32
    %c0_i32_1 = arith.constant 0 : i32
    return %c0_i32, %c0_i32_0 : i32, i32
  }
  func.func @transform_1(%arg0: i32) -> (i32, i32) {
    %c0_i32 = arith.constant 0 : i32
    %c0_i32_0 = arith.constant 0 : i32
    %c0_i32_1 = arith.constant 0 : i32
    return %c0_i32, %c0_i32_0 : i32, i32
  }
  func.func @transform_2(%arg0: i32) -> (i32, i32, i32) {
    %c0_i32 = arith.constant 0 : i32
    %c0_i32_0 = arith.constant 0 : i32
    %c0_i32_1 = arith.constant 0 : i32
    return %arg0, %c0_i32, %c0_i32_0 : i32, i32, i32
  }
  func.func @transform_3(%arg0: i32) -> (i32, i32, i32) {
    %c0_i32 = arith.constant 0 : i32
    %c0_i32_0 = arith.constant 0 : i32
    %c0_i32_1 = arith.constant 0 : i32
    %c0_i32_2 = arith.constant 0 : i32
    return %c0_i32, %c0_i32_0, %c0_i32_1 : i32, i32, i32
  }
  func.func @transform_4(%arg0: i32) -> (i32, i32, i32) {
    %c0_i32 = arith.constant 0 : i32
    %c0_i32_0 = arith.constant 0 : i32
    %c0_i32_1 = arith.constant 0 : i32
    return %arg0, %c0_i32, %c0_i32_0 : i32, i32, i32
  }
  func.func @transform_5(%arg0: i32) -> (i32, i32, i32) {
    %c0_i32 = arith.constant 0 : i32
    %c0_i32_0 = arith.constant 0 : i32
    %c0_i32_1 = arith.constant 0 : i32
    return %arg0, %c0_i32, %c0_i32_0 : i32, i32, i32
  }
}

module attributes {stable_mosaic.version = 11 : i64} {
  func.func @bn2_skip_kernel(%arg0: i32, %arg1: memref<1x128xf32, #tpu.memory_space<vmem>>, %arg2: memref<1x128xf32, #tpu.memory_space<vmem>>, %arg3: memref<1x288x128xf32, #tpu.memory_space<vmem>>, %arg4: memref<1x342x128xbf16, #tpu.memory_space<vmem>>, %arg5: memref<1x288x128xf32, #tpu.memory_space<vmem>>) attributes {dimension_semantics = [#tpu.dimension_semantics<parallel>], iteration_bounds = array<i64: 2>, scalar_prefetch = 0 : i64, scratch_operands = 0 : i64, tpu.core_type = #tpu.core_type<tc>, window_params = [{pipeline_mode = #tpu.pipeline_mode<synchronous>, transform_indices = @transform_0, window_bounds = array<i64: 1, 128>}, {pipeline_mode = #tpu.pipeline_mode<synchronous>, transform_indices = @transform_1, window_bounds = array<i64: 1, 128>}, {transform_indices = @transform_2, window_bounds = array<i64: 1, 288, 128>}, {transform_indices = @transform_3, window_bounds = array<i64: 1, 342, 128>}, {transform_indices = @transform_4, window_bounds = array<i64: 1, 288, 128>}]} {
    %c0 = arith.constant 0 : index
    %c19 = arith.constant 19 : index
    %c0_0 = arith.constant 0 : index
    %0 = vector.load %arg4[%c0, %c19, %c0_0] : memref<1x342x128xbf16, #tpu.memory_space<vmem>>, vector<1x288x128xbf16>
    %1 = vector.shape_cast %0 : vector<1x288x128xbf16> to vector<288x128xbf16>
    %2 = arith.extf %1 : vector<288x128xbf16> to vector<288x128xf32>
    %c0_1 = arith.constant 0 : index
    %c0_2 = arith.constant 0 : index
    %c0_3 = arith.constant 0 : index
    %3 = vector.load %arg3[%c0_1, %c0_2, %c0_3] : memref<1x288x128xf32, #tpu.memory_space<vmem>>, vector<1x288x128xf32>
    %4 = vector.shape_cast %3 : vector<1x288x128xf32> to vector<288x128xf32>
    %c0_4 = arith.constant 0 : index
    %c0_5 = arith.constant 0 : index
    %5 = vector.load %arg1[%c0_4, %c0_5] : memref<1x128xf32, #tpu.memory_space<vmem>>, vector<1x128xf32>
    %6 = vector.broadcast %5 : vector<1x128xf32> to vector<288x128xf32>
    %7 = arith.mulf %4, %6 : vector<288x128xf32>
    %c0_6 = arith.constant 0 : index
    %c0_7 = arith.constant 0 : index
    %8 = vector.load %arg2[%c0_6, %c0_7] : memref<1x128xf32, #tpu.memory_space<vmem>>, vector<1x128xf32>
    %9 = vector.broadcast %8 : vector<1x128xf32> to vector<288x128xf32>
    %10 = arith.addf %7, %9 : vector<288x128xf32>
    %11 = arith.addf %2, %10 : vector<288x128xf32>
    %cst = arith.constant 0.000000e+00 : f32
    %12 = vector.broadcast %cst : f32 to vector<288x128xf32>
    %13 = arith.maximumf %11, %12 : vector<288x128xf32>
    %c0_8 = arith.constant 0 : index
    %c0_9 = arith.constant 0 : index
    %c0_10 = arith.constant 0 : index
    %14 = vector.load %arg5[%c0_8, %c0_9, %c0_10] : memref<1x288x128xf32, #tpu.memory_space<vmem>>, vector<1x288x128xf32>
    %15 = vector.shape_cast %14 : vector<1x288x128xf32> to vector<288x128xf32>
    %16 = vector.shape_cast %13 : vector<288x128xf32> to vector<1x288x128xf32>
    tpu.vector_store %arg5[%c0_8, %c0_9, %c0_10], %16 {strides = array<i32>} : memref<1x288x128xf32, #tpu.memory_space<vmem>>, vector<1x288x128xf32>,
    return
  }
  func.func @transform_0(%arg0: i32) -> (i32, i32) {
    %c0_i32 = arith.constant 0 : i32
    %c0_i32_0 = arith.constant 0 : i32
    %c0_i32_1 = arith.constant 0 : i32
    return %c0_i32, %c0_i32_0 : i32, i32
  }
  func.func @transform_1(%arg0: i32) -> (i32, i32) {
    %c0_i32 = arith.constant 0 : i32
    %c0_i32_0 = arith.constant 0 : i32
    %c0_i32_1 = arith.constant 0 : i32
    return %c0_i32, %c0_i32_0 : i32, i32
  }
  func.func @transform_2(%arg0: i32) -> (i32, i32, i32) {
    %c0_i32 = arith.constant 0 : i32
    %c0_i32_0 = arith.constant 0 : i32
    %c0_i32_1 = arith.constant 0 : i32
    return %arg0, %c0_i32, %c0_i32_0 : i32, i32, i32
  }
  func.func @transform_3(%arg0: i32) -> (i32, i32, i32) {
    %c0_i32 = arith.constant 0 : i32
    %c0_i32_0 = arith.constant 0 : i32
    %c0_i32_1 = arith.constant 0 : i32
    return %arg0, %c0_i32, %c0_i32_0 : i32, i32, i32
  }
  func.func @transform_4(%arg0: i32) -> (i32, i32, i32) {
    %c0_i32 = arith.constant 0 : i32
    %c0_i32_0 = arith.constant 0 : i32
    %c0_i32_1 = arith.constant 0 : i32
    return %arg0, %c0_i32, %c0_i32_0 : i32, i32, i32
  }
}

</mosaic_0001>

<bundles_post_ra>
// kernel: residual_block.5
= control target key start
LH: loop header
LB: loop body
LE: loop exit
PB: predicated region body
PF: predicated region fallthrough
CT: control target
= control target key end

     0   :  { %s877_s15 = smov 0   ;;  %s1133_s0 = inlined_call_operand.vmem [shape: f32[1,128], index: 0, kind: input, shape index: {}]   ;;  %s1134_s1 = inlined_call_operand.vmem [shape: f32[1,128], index: 1, kind: input, shape index: {}]   ;;  %s1135_s2 = inlined_call_operand.vmem [shape: f32[2,288,128], index: 2, kind: input, shape index: {}]   ;;  %s1136_s3 = inlined_call_operand.vmem [shape: bf16[2,342,128], index: 3, kind: input, shape index: {}]   ;;  %s1137_s4 = inlined_call_operand.vmem [shape: f32[2,288,128], index: 4, kind: output, shape index: {}]  }
   0x1 LB: > { %s737_s16 = sadd.s32 4294967295, %s850_s15   ;;  %p741_p0 = scmp.ge.s32.totalorder %s850_s15, 1  ;;  %s850_s15 = sphi %s877_s15, %s14_s15  }
   0x2   : > { %p172_p1 = scmp.lt.s32.totalorder %s850_s15, 3 }
   0x4   : > { %p173_p2 = pnand %p741_p0, %p172_p1 }
   0x5   : > { %p203_p3 = scmp.lt.s32.totalorder (!%p173_p2), %s737_s16, 1  ;;  %v892_v0 = vld [vmem:[%s1133_s0] ss:$0 sm:$0xff] (!%p173_p2)  ;;  %vm450_vm0 = vcmask (!%p173_p2), 1042432  }
   0x6   : > { %176 = sbr.rel (%p173_p2) target bundleno = 87 (0x57), region = 36  ;;  %v904_v1 = vld [vmem:[%s1134_s1] ss:$0 sm:$0xff] (!%p173_p2) }
   0xd   : > { %s1139_s16 = smov (!%p203_p3, %s737_s16), 1 }
   0xe   : > { %s834_s17 = smul.u32 288, %s1139_s16 }
   0xf   : > { %s835_s18 = smul.u32 172, %s1139_s16 }
  0x10   : > { %s899_s23 = scalar_lea.vmem %s1135_s2, %s834_s17  ;;  %s945_s5 = scalar_lea.vmem %s1137_s4, %s834_s17 }
  0x11   : > { %s909_s28 = scalar_lea.vmem %s1136_s3, %s835_s18  ;;  %v292_v2 = vld [vmem:[%s899_s23] sm:$0xff]  ;;  %v293_v3 = vld [vmem:[%s899_s23 + $0x8] sm:$0xff]  ;;  %v294_v4 = vld [vmem:[%s899_s23 + $0x10] sm:$0xff] }
  0x12   : > { %v218_v5 = vld [vmem:[%s909_s28 + $0x8] sm:$0xe]  ;;  %v335_v6 = vmul.f32 %v892_v0, %v292_v2  ;;  %v219_v7 = vld [vmem:[%s909_s28 + $0xc] sm:$0xf]  ;;  %v336_v8 = vmul.f32 %v892_v0, %v293_v3  ;;  %v817_v9 = vld [vmem:[%s909_s28 + $0x10] sm:$0xff]   ;;  %v337_v10 = vmul.f32 %v892_v0, %v294_v4 }
  0x13   : > { %v255_v11 = vunpack.c.l.bf16 %v218_v5  ;;  %v256_v12 = vunpack.c.l.bf16 %v219_v7  ;;  %v751_v13 = vunpack.c.l.bf16 %v817_v9  ;;  %v295_v14 = vld [vmem:[%s899_s23 + $0x18] sm:$0xff]  ;;  %v296_v16 = vld [vmem:[%s899_s23 + $0x20] sm:$0xff]  ;;  %v297_v21 = vld [vmem:[%s899_s23 + $0x28] sm:$0xff]  ;;  %v752_v23 = vunpack.c.h.bf16 %v817_v9 }
  0x14   : > { %v818_v15 = vld [vmem:[%s909_s28 + $0x18] sm:$0xff]   ;;  %v378_v17 = vadd.f32 %v904_v1, %v335_v6  ;;  %v379_v18 = vadd.f32 %v904_v1, %v336_v8  ;;  %v380_v19 = vadd.f32 %v904_v1, %v337_v10  ;;  %v338_v20 = vmul.f32 %v892_v0, %v295_v14  ;;  %v298_v22 = vld [vmem:[%s899_s23 + $0x30] sm:$0xff]  ;;  %v935_v34 = vld [vmem:[%s909_s28 + $0x20] sm:$0xff]  }
  0x15   : > { %v755_v24 = vunpack.c.l.bf16 %v818_v15  ;;  %v339_v25 = vmul.f32 %v892_v0, %v296_v16  ;;  %v340_v26 = vmul.f32 %v892_v0, %v297_v21  ;;  %v756_v32 = vunpack.c.h.bf16 %v818_v15  ;;  %v299_v44 = vld [vmem:[%s899_s23 + $0x38] sm:$0xff]  ;;  %v300_v49 = vld [vmem:[%s899_s23 + $0x40] sm:$0xff]  ;;  %v820_v54 = vld [vmem:[%s909_s28 + $0x28] sm:$0xff]  }
  0x16   : > { %v451_v27 = vrot.slane %v378_v17, 5  ;;  %v452_v28 = vrot.slane %v379_v18, 5  ;;  %v454_v29 = vrot.slane %v380_v19, 5  ;;  %v381_v30 = vadd.f32 %v904_v1, %v338_v20  ;;  %v301_v59 = vld [vmem:[%s899_s23 + $0x48] sm:$0xff]  ;;  %v821_v2 = vld [vmem:[%s909_s28 + $0x30] sm:$0xff]   ;;  %v303_v8 = vld [vmem:[%s899_s23 + $0x58] sm:$0xff] }
  0x17   : > { %v382_v31 = vadd.f32 %v904_v1, %v339_v25  ;;  %v383_v33 = vadd.f32 %v904_v1, %v340_v26  ;;  %v341_v35 = vmul.f32 %v892_v0, %v298_v22  ;;  %v759_v47 = vunpack.c.l.bf16 %v935_v34  ;;  %v302_v3 = vld [vmem:[%s899_s23 + $0x50] sm:$0xff]  ;;  %v822_v22 = vld [vmem:[%s909_s28 + $0x38] sm:$0xff]  }
  0x18   : > { %v559_v36 = vadd.f32 %v451_v27, %v255_v11  ;;  %v453_v37 = vsel %vm450_vm0, %v451_v27, %v452_v28  ;;  %v455_v38 = vsel %vm450_vm0, %v452_v28, %v454_v29  ;;  %v456_v39 = vrot.slane %v381_v30, 5  ;;  %v305_v27 = vld [vmem:[%s899_s23 + $0x68] sm:$0xff] }
  0x19   : > { %v560_v40 = vadd.f32 %v453_v37, %v256_v12  ;;  %v561_v41 = vadd.f32 %v751_v13, %v455_v38  ;;  %v458_v42 = vrot.slane %v382_v31, 5  ;;  %v460_v43 = vrot.slane %v383_v33, 5  ;;  %v304_v13 = vld [vmem:[%s899_s23 + $0x60] sm:$0xff] }
  0x1a   : > { %v596_v45 = vmax.f32 %v559_v36, 0.0  ;;  %v457_v46 = vsel %vm450_vm0, %v454_v29, %v456_v39  ;;  %v384_v48 = vadd.f32 %v904_v1, %v341_v35  ;;  %v342_v58 = vmul.f32 %v892_v0, %v299_v44 }
  0x1b   : > { %v597_v50 = vmax.f32 %v560_v40, 0.0  ;;  %v598_v51 = vmax.f32 %v561_v41, 0.0  ;;  %v562_v52 = vadd.f32 %v752_v23, %v457_v46  ;;  %v459_v53 = vsel %vm450_vm0, %v456_v39, %v458_v42  ;;  %v306_v40 = vld [vmem:[%s899_s23 + $0x70] sm:$0xff] }
  0x1c   : > { %633 = vst [vmem:[%s945_s5 - $0x3] sm:$0xf8] %v596_v45  ;;  %v563_v55 = vadd.f32 %v755_v24, %v459_v53  ;;  %v461_v56 = vsel %vm450_vm0, %v458_v42, %v460_v43  ;;  %v462_v57 = vrot.slane %v384_v48, 5  ;;  %v760_v62 = vunpack.c.h.bf16 %v935_v34  ;;  %v823_v45 = vld [vmem:[%s909_s28 + $0x40] sm:$0xff]  }
  0x1d   : > { %634 = vst [vmem:[%s945_s5 + $0x5] sm:$0xff] %v597_v50  ;;  %635 = vst [vmem:[%s945_s5 + $0xd] sm:$0xff] %v598_v51  ;;  %v599_v60 = vmax.f32 %v562_v52, 0.0  ;;  %v564_v61 = vadd.f32 %v756_v32, %v461_v56  ;;  %v343_v63 = vmul.f32 %v892_v0, %v300_v49  ;;  %v385_v6 = vadd.f32 %v904_v1, %v342_v58  ;;  %v307_v50 = vld [vmem:[%s899_s23 + $0x78] sm:$0xff]  ;;  %v308_v56 = vld [vmem:[%s899_s23 + $0x80] sm:$0xff] }
  0x1e   : > { %v600_v4 = vmax.f32 %v563_v55, 0.0  ;;  %v463_v5 = vsel %vm450_vm0, %v460_v43, %v462_v57  ;;  %v763_v7 = vunpack.c.l.bf16 %v820_v54  ;;  %v344_v12 = vmul.f32 %v892_v0, %v301_v59  ;;  %v824_v55 = vld [vmem:[%s909_s28 + $0x48] sm:$0xff]  }
  0x1f   : > { %636 = vst [vmem:[%s945_s5 + $0x15] sm:$0xff] %v599_v60  ;;  %v601_v9 = vmax.f32 %v564_v61, 0.0  ;;  %v565_v10 = vadd.f32 %v759_v47, %v463_v5  ;;  %v386_v11 = vadd.f32 %v904_v1, %v343_v63  ;;  %v464_v14 = vrot.slane %v385_v6, 5  ;;  %v309_v61 = vld [vmem:[%s899_s23 + $0x88] sm:$0xff]  ;;  %v310_v5 = vld [vmem:[%s899_s23 + $0x90] sm:$0xff] }
  0x20   : > { %637 = vst [vmem:[%s945_s5 + $0x1d] sm:$0xff] %v600_v4  ;;  %v764_v15 = vunpack.c.h.bf16 %v820_v54  ;;  %v767_v16 = vunpack.c.l.bf16 %v821_v2  ;;  %v345_v17 = vmul.f32 %v892_v0, %v302_v3  ;;  %v387_v20 = vadd.f32 %v904_v1, %v344_v12  ;;  %v1004_v4 = vld [vmem:[%s909_s28 + $0x50] sm:$0xff]  }
  0x21   : > { %638 = vst [vmem:[%s945_s5 + $0x25] sm:$0xff] %v601_v9  ;;  %v602_v18 = vmax.f32 %v565_v10, 0.0  ;;  %v466_v19 = vrot.slane %v386_v11, 5  ;;  %v346_v21 = vmul.f32 %v892_v0, %v303_v8  ;;  %v465_v23 = vsel %vm450_vm0, %v462_v57, %v464_v14 }
  0x22   : > { %v388_v24 = vadd.f32 %v904_v1, %v345_v17  ;;  %v768_v25 = vunpack.c.h.bf16 %v821_v2  ;;  %v347_v26 = vmul.f32 %v892_v0, %v304_v13  ;;  %v566_v28 = vadd.f32 %v760_v62, %v465_v23 }
  0x23   : > { %639 = vst [vmem:[%s945_s5 + $0x2d] sm:$0xff] %v602_v18  ;;  %v467_v29 = vsel %vm450_vm0, %v464_v14, %v466_v19  ;;  %v468_v30 = vrot.slane %v387_v20, 5  ;;  %v389_v31 = vadd.f32 %v904_v1, %v346_v21  ;;  %v771_v34 = vunpack.c.l.bf16 %v822_v22  ;;  %v311_v14 = vld [vmem:[%s899_s23 + $0x98] sm:$0xff] }
  0x24   : > { %v567_v32 = vadd.f32 %v763_v7, %v467_v29  ;;  %v470_v33 = vrot.slane %v388_v24, 5  ;;  %v390_v35 = vadd.f32 %v904_v1, %v347_v26  ;;  %v603_v36 = vmax.f32 %v566_v28, 0.0 }
  0x25   : > { %v469_v37 = vsel %vm450_vm0, %v466_v19, %v468_v30  ;;  %v472_v38 = vrot.slane %v389_v31, 5  ;;  %v348_v39 = vmul.f32 %v892_v0, %v305_v27  ;;  %v772_v48 = vunpack.c.h.bf16 %v822_v22  ;;  %v312_v19 = vld [vmem:[%s899_s23 + $0xa0] sm:$0xff]  ;;  %v1027_v31 = vld [vmem:[%s909_s28 + $0x58] sm:$0xff]  }
  0x26   : > { %v604_v41 = vmax.f32 %v567_v32, 0.0  ;;  %v568_v42 = vadd.f32 %v764_v15, %v469_v37  ;;  %v471_v43 = vsel %vm450_vm0, %v468_v30, %v470_v33  ;;  %v474_v44 = vrot.slane %v390_v35, 5  ;;  %640 = vst [vmem:[%s945_s5 + $0x35] sm:$0xff] %v603_v36 }
  0x27   : > { %v569_v46 = vadd.f32 %v767_v16, %v471_v43  ;;  %v473_v47 = vsel %vm450_vm0, %v470_v33, %v472_v38  ;;  %v391_v49 = vadd.f32 %v904_v1, %v348_v39  ;;  %v349_v54 = vmul.f32 %v892_v0, %v306_v40 }
  0x28   : > { %641 = vst [vmem:[%s945_s5 + $0x3d] sm:$0xff] %v604_v41  ;;  %v605_v51 = vmax.f32 %v568_v42, 0.0  ;;  %v570_v52 = vadd.f32 %v768_v25, %v473_v47  ;;  %v475_v53 = vsel %vm450_vm0, %v472_v38, %v474_v44  ;;  %v775_v60 = vunpack.c.l.bf16 %v823_v45  ;;  %v313_v41 = vld [vmem:[%s899_s23 + $0xa8] sm:$0xff]  ;;  %v314_v42 = vld [vmem:[%s899_s23 + $0xb0] sm:$0xff] }
  0x29   : > { %v606_v57 = vmax.f32 %v569_v46, 0.0  ;;  %v571_v58 = vadd.f32 %v771_v34, %v475_v53  ;;  %v476_v59 = vrot.slane %v391_v49, 5  ;;  %v392_v63 = vadd.f32 %v904_v1, %v349_v54  ;;  %v827_v53 = vld [vmem:[%s909_s28 + $0x60] sm:$0xff]  }
  0x2a   : > { %642 = vst [vmem:[%s945_s5 + $0x45] sm:$0xff] %v605_v51  ;;  %v607_v62 = vmax.f32 %v570_v52, 0.0  ;;  %v776_v2 = vunpack.c.h.bf16 %v823_v45  ;;  %v350_v3 = vmul.f32 %v892_v0, %v307_v50  ;;  %v779_v8 = vunpack.c.l.bf16 %v824_v55 }
  0x2b   : > { %643 = vst [vmem:[%s945_s5 + $0x4d] sm:$0xff] %v606_v57  ;;  %v608_v6 = vmax.f32 %v571_v58, 0.0  ;;  %v477_v7 = vsel %vm450_vm0, %v474_v44, %v476_v59  ;;  %v351_v9 = vmul.f32 %v892_v0, %v308_v56  ;;  %v478_v11 = vrot.slane %v392_v63, 5  ;;  %v316_v56 = vld [vmem:[%s899_s23 + $0xc0] sm:$0xff] }
  0x2c   : > { %644 = vst [vmem:[%s945_s5 + $0x55] sm:$0xff] %v607_v62  ;;  %v572_v10 = vadd.f32 %v772_v48, %v477_v7  ;;  %v393_v12 = vadd.f32 %v904_v1, %v350_v3  ;;  %v352_v13 = vmul.f32 %v892_v0, %v309_v61  ;;  %v780_v16 = vunpack.c.h.bf16 %v824_v55  ;;  %v315_v55 = vld [vmem:[%s899_s23 + $0xb8] sm:$0xff]  ;;  %v828_v3 = vld [vmem:[%s909_s28 + $0x68] sm:$0xff]  }
  0x2d   : > { %645 = vst [vmem:[%s945_s5 + $0x5d] sm:$0xff] %v608_v6  ;;  %v394_v15 = vadd.f32 %v904_v1, %v351_v9  ;;  %v783_v17 = vunpack.c.l.bf16 %v1004_v4  ;;  %v353_v18 = vmul.f32 %v892_v0, %v310_v5  ;;  %v479_v21 = vsel %vm450_vm0, %v476_v59, %v478_v11  ;;  %v318_v9 = vld [vmem:[%s899_s23 + $0xd0] sm:$0xff] }
  0x2e   : > { %v609_v20 = vmax.f32 %v572_v10, 0.0  ;;  %v480_v22 = vrot.slane %v393_v12, 5  ;;  %v395_v23 = vadd.f32 %v904_v1, %v352_v13  ;;  %v573_v24 = vadd.f32 %v775_v60, %v479_v21 }
  0x2f   : > { %v482_v25 = vrot.slane %v394_v15, 5  ;;  %v396_v26 = vadd.f32 %v904_v1, %v353_v18  ;;  %v354_v27 = vmul.f32 %v892_v0, %v311_v14  ;;  %v784_v30 = vunpack.c.h.bf16 %v1004_v4  ;;  %v317_v4 = vld [vmem:[%s899_s23 + $0xc8] sm:$0xff]  ;;  %v829_v18 = vld [vmem:[%s909_s28 + $0x70] sm:$0xff]  }
  0x30   : > { %646 = vst [vmem:[%s945_s5 + $0x65] sm:$0xff] %v609_v20  ;;  %v481_v28 = vsel %vm450_vm0, %v478_v11, %v480_v22  ;;  %v484_v29 = vrot.slane %v395_v23, 5  ;;  %v355_v32 = vmul.f32 %v892_v0, %v312_v19  ;;  %v610_v33 = vmax.f32 %v573_v24, 0.0  ;;  %v319_v19 = vld [vmem:[%s899_s23 + $0xd8] sm:$0xff] }
  0x31   : > { %v574_v34 = vadd.f32 %v776_v2, %v481_v28  ;;  %v483_v35 = vsel %vm450_vm0, %v480_v22, %v482_v25  ;;  %v486_v36 = vrot.slane %v396_v26, 5  ;;  %v397_v39 = vadd.f32 %v904_v1, %v354_v27 }
  0x32   : > { %v575_v37 = vadd.f32 %v779_v8, %v483_v35  ;;  %v485_v38 = vsel %vm450_vm0, %v482_v25, %v484_v29  ;;  %v398_v40 = vadd.f32 %v904_v1, %v355_v32  ;;  %647 = vst [vmem:[%s945_s5 + $0x6d] sm:$0xff] %v610_v33  ;;  %v787_v46 = vunpack.c.l.bf16 %v1027_v31  ;;  %v320_v32 = vld [vmem:[%s899_s23 + $0xe0] sm:$0xff]  ;;  %v321_v33 = vld [vmem:[%s899_s23 + $0xe8] sm:$0xff] }
  0x33   : > { %v611_v43 = vmax.f32 %v574_v34, 0.0  ;;  %v576_v44 = vadd.f32 %v780_v16, %v485_v38  ;;  %v487_v45 = vsel %vm450_vm0, %v484_v29, %v486_v36  ;;  %v488_v49 = vrot.slane %v397_v39, 5 }
  0x34   : > { %v612_v47 = vmax.f32 %v575_v37, 0.0  ;;  %v577_v48 = vadd.f32 %v783_v17, %v487_v45  ;;  %v490_v50 = vrot.slane %v398_v40, 5  ;;  %v356_v52 = vmul.f32 %v892_v0, %v313_v41 }
  0x35   : > { %648 = vst [vmem:[%s945_s5 + $0x75] sm:$0xff] %v611_v43  ;;  %v613_v51 = vmax.f32 %v576_v44, 0.0  ;;  %v357_v54 = vmul.f32 %v892_v0, %v314_v42  ;;  %v489_v58 = vsel %vm450_vm0, %v486_v36, %v488_v49  ;;  %v788_v60 = vunpack.c.h.bf16 %v1027_v31  ;;  %v830_v44 = vld [vmem:[%s909_s28 + $0x78] sm:$0xff]  }
  0x36   : > { %649 = vst [vmem:[%s945_s5 + $0x7d] sm:$0xff] %v612_v47  ;;  %v614_v57 = vmax.f32 %v577_v48, 0.0  ;;  %v491_v59 = vsel %vm450_vm0, %v488_v49, %v490_v50  ;;  %v578_v61 = vadd.f32 %v784_v30, %v489_v58  ;;  %v399_v63 = vadd.f32 %v904_v1, %v356_v52  ;;  %v322_v47 = vld [vmem:[%s899_s23 + $0xf0] sm:$0xff] }
  0x37   : > { %650 = vst [vmem:[%s945_s5 + $0x85] sm:$0xff] %v613_v51  ;;  %v579_v62 = vadd.f32 %v787_v46, %v491_v59  ;;  %v400_v2 = vadd.f32 %v904_v1, %v357_v54  ;;  %v791_v5 = vunpack.c.l.bf16 %v827_v53  ;;  %v792_v6 = vunpack.c.h.bf16 %v827_v53 }
  0x38   : > { %651 = vst [vmem:[%s945_s5 + $0x8d] sm:$0xff] %v614_v57  ;;  %v358_v7 = vmul.f32 %v892_v0, %v315_v55  ;;  %v359_v8 = vmul.f32 %v892_v0, %v316_v56  ;;  %v615_v10 = vmax.f32 %v578_v61, 0.0  ;;  %v492_v12 = vrot.slane %v399_v63, 5  ;;  %v323_v56 = vld [vmem:[%s899_s23 + $0xf8] sm:$0xff] }
  0x39   : > { %v616_v11 = vmax.f32 %v579_v62, 0.0  ;;  %v494_v13 = vrot.slane %v400_v2, 5  ;;  %v795_v15 = vunpack.c.l.bf16 %v828_v3  ;;  %v360_v17 = vmul.f32 %v892_v0, %v317_v4  ;;  %v324_v62 = vld [vmem:[%s899_s23 + $0x100] sm:$0xff] }
  0x3a   : > { %v401_v14 = vadd.f32 %v904_v1, %v358_v7  ;;  %v402_v16 = vadd.f32 %v904_v1, %v359_v8  ;;  %652 = vst [vmem:[%s945_s5 + $0x95] sm:$0xff] %v615_v10  ;;  %v493_v20 = vsel %vm450_vm0, %v490_v50, %v492_v12  ;;  %v796_v22 = vunpack.c.h.bf16 %v828_v3 }
  0x3b   : > { %653 = vst [vmem:[%s945_s5 + $0x9d] sm:$0xff] %v616_v11  ;;  %v495_v21 = vsel %vm450_vm0, %v492_v12, %v494_v13  ;;  %v361_v23 = vmul.f32 %v892_v0, %v318_v9  ;;  %v580_v24 = vadd.f32 %v788_v60, %v493_v20  ;;  %v403_v28 = vadd.f32 %v904_v1, %v360_v17  ;;  %v831_v60 = vld [vmem:[%s909_s28 + $0x80] sm:$0xff]   ;;  %v325_v9 = vld [vmem:[%s899_s23 + $0x108] sm:$0xff] }
  0x3c   : > { %v581_v25 = vadd.f32 %v791_v5, %v495_v21  ;;  %v496_v26 = vrot.slane %v401_v14, 5  ;;  %v498_v27 = vrot.slane %v402_v16, 5  ;;  %v799_v29 = vunpack.c.l.bf16 %v829_v18 }
  0x3d   : > { %v404_v30 = vadd.f32 %v904_v1, %v361_v23  ;;  %v362_v31 = vmul.f32 %v892_v0, %v319_v19  ;;  %v617_v34 = vmax.f32 %v580_v24, 0.0  ;;  %v500_v40 = vrot.slane %v403_v28, 5  ;;  %v327_v24 = vld [vmem:[%s899_s23 + $0x118] sm:$0xff]  ;;  %v833_v28 = vld [vmem:[%s909_s28 + $0x90] sm:$0xff]  }
  0x3e   : > { %v618_v35 = vmax.f32 %v581_v25, 0.0  ;;  %v497_v36 = vsel %vm450_vm0, %v494_v13, %v496_v26  ;;  %v499_v37 = vsel %vm450_vm0, %v496_v26, %v498_v27  ;;  %v800_v42 = vunpack.c.h.bf16 %v829_v18  ;;  %v832_v13 = vld [vmem:[%s909_s28 + $0x88] sm:$0xff]  }
  0x3f   : > { %v582_v38 = vadd.f32 %v792_v6, %v497_v36  ;;  %v583_v39 = vadd.f32 %v795_v15, %v499_v37  ;;  %v502_v41 = vrot.slane %v404_v30, 5  ;;  %654 = vst [vmem:[%s945_s5 + $0xa5] sm:$0xff] %v617_v34  ;;  %v405_v43 = vadd.f32 %v904_v1, %v362_v31  ;;  %v326_v15 = vld [vmem:[%s899_s23 + $0x110] sm:$0xff] }
  0x40   : > { %655 = vst [vmem:[%s945_s5 + $0xad] sm:$0xff] %v618_v35  ;;  %v363_v45 = vmul.f32 %v892_v0, %v320_v32  ;;  %v364_v46 = vmul.f32 %v892_v0, %v321_v33  ;;  %v501_v50 = vsel %vm450_vm0, %v498_v27, %v500_v40  ;;  %v803_v57 = vunpack.c.l.bf16 %v830_v44 }
  0x41   : > { %v619_v48 = vmax.f32 %v582_v38, 0.0  ;;  %v620_v49 = vmax.f32 %v583_v39, 0.0  ;;  %v503_v51 = vsel %vm450_vm0, %v500_v40, %v502_v41  ;;  %v584_v52 = vadd.f32 %v796_v22, %v501_v50  ;;  %v254_v38 = vld [vmem:[%s909_s28 + $0x98] sm:$0x3] }
  0x42   : > { %v585_v53 = vadd.f32 %v799_v29, %v503_v51  ;;  %v504_v54 = vrot.slane %v405_v43, 5  ;;  %v406_v55 = vadd.f32 %v904_v1, %v363_v45  ;;  %v804_v58 = vunpack.c.h.bf16 %v830_v44 }
  0x43   : > { %656 = vst [vmem:[%s945_s5 + $0xb5] sm:$0xff] %v619_v48  ;;  %657 = vst [vmem:[%s945_s5 + $0xbd] sm:$0xff] %v620_v49  ;;  %v407_v59 = vadd.f32 %v904_v1, %v364_v46  ;;  %v365_v61 = vmul.f32 %v892_v0, %v322_v47  ;;  %v621_v63 = vmax.f32 %v584_v52, 0.0  ;;  %v366_v8 = vmul.f32 %v892_v0, %v323_v56 }
  0x44   : > { %v622_v2 = vmax.f32 %v585_v53, 0.0  ;;  %v505_v3 = vsel %vm450_vm0, %v502_v41, %v504_v54  ;;  %v506_v4 = vrot.slane %v406_v55, 5  ;;  %v807_v11 = vunpack.c.l.bf16 %v831_v60 }
  0x45   : > { %v586_v5 = vadd.f32 %v800_v42, %v505_v3  ;;  %v508_v6 = vrot.slane %v407_v59, 5  ;;  %v408_v7 = vadd.f32 %v904_v1, %v365_v61  ;;  %658 = vst [vmem:[%s945_s5 + $0xc5] sm:$0xff] %v621_v63  ;;  %v808_v12 = vunpack.c.h.bf16 %v831_v60 }
  0x46   : > { %659 = vst [vmem:[%s945_s5 + $0xcd] sm:$0xff] %v622_v2  ;;  %v507_v10 = vsel %vm450_vm0, %v504_v54, %v506_v4  ;;  %v367_v14 = vmul.f32 %v892_v0, %v324_v62  ;;  %v409_v21 = vadd.f32 %v904_v1, %v366_v8  ;;  %v368_v23 = vmul.f32 %v892_v0, %v325_v9 }
  0x47   : > { %v623_v16 = vmax.f32 %v586_v5, 0.0  ;;  %v587_v17 = vadd.f32 %v803_v57, %v507_v10  ;;  %v509_v18 = vsel %vm450_vm0, %v506_v4, %v508_v6  ;;  %v510_v19 = vrot.slane %v408_v7, 5 }
  0x48   : > { %v588_v20 = vadd.f32 %v804_v58, %v509_v18  ;;  %v410_v22 = vadd.f32 %v904_v1, %v367_v14  ;;  %v811_v27 = vunpack.c.l.bf16 %v832_v13  ;;  %v369_v29 = vmul.f32 %v892_v0, %v326_v15 }
  0x49   : > { %660 = vst [vmem:[%s945_s5 + $0xd5] sm:$0xff] %v623_v16  ;;  %v624_v25 = vmax.f32 %v587_v17, 0.0  ;;  %v511_v26 = vsel %vm450_vm0, %v508_v6, %v510_v19  ;;  %v512_v32 = vrot.slane %v409_v21, 5  ;;  %v812_v34 = vunpack.c.h.bf16 %v832_v13 }
  0x4a   : > { %v625_v30 = vmax.f32 %v588_v20, 0.0  ;;  %v589_v31 = vadd.f32 %v807_v11, %v511_v26  ;;  %v514_v33 = vrot.slane %v410_v22, 5  ;;  %v411_v35 = vadd.f32 %v904_v1, %v368_v23 }
  0x4b   : > { %661 = vst [vmem:[%s945_s5 + $0xdd] sm:$0xff] %v624_v25  ;;  %v412_v36 = vadd.f32 %v904_v1, %v369_v29  ;;  %v370_v37 = vmul.f32 %v892_v0, %v327_v24  ;;  %v513_v40 = vsel %vm450_vm0, %v510_v19, %v512_v32  ;;  %v815_v42 = vunpack.c.l.bf16 %v833_v28 }
  0x4c   : > { %662 = vst [vmem:[%s945_s5 + $0xe5] sm:$0xff] %v625_v30  ;;  %v626_v39 = vmax.f32 %v589_v31, 0.0  ;;  %v515_v41 = vsel %vm450_vm0, %v512_v32, %v514_v33  ;;  %v590_v43 = vadd.f32 %v808_v12, %v513_v40  ;;  %v516_v45 = vrot.slane %v411_v35, 5 }
  0x4d   : > { %v591_v44 = vadd.f32 %v811_v27, %v515_v41  ;;  %v518_v46 = vrot.slane %v412_v36, 5  ;;  %v816_v47 = vunpack.c.h.bf16 %v833_v28  ;;  %v413_v48 = vadd.f32 %v904_v1, %v370_v37 }
  0x4e   : > { %663 = vst [vmem:[%s945_s5 + $0xed] sm:$0xff] %v626_v39  ;;  %v291_v0 = vunpack.c.l.bf16 %v254_v38  ;;  %v627_v49 = vmax.f32 %v590_v43, 0.0  ;;  %v517_v51 = vsel %vm450_vm0, %v514_v33, %v516_v45 }
  0x4f   : > { %v628_v50 = vmax.f32 %v591_v44, 0.0  ;;  %v519_v52 = vsel %vm450_vm0, %v516_v45, %v518_v46  ;;  %v592_v53 = vadd.f32 %v812_v34, %v517_v51  ;;  %v520_v55 = vrot.slane %v413_v48, 5 }
  0x50   : > { %v593_v54 = vadd.f32 %v815_v42, %v519_v52  ;;  %664 = vst [vmem:[%s945_s5 + $0xf5] sm:$0xff] %v627_v49 }
  0x51   : > { %665 = vst [vmem:[%s945_s5 + $0xfd] sm:$0xff] %v628_v50  ;;  %v629_v56 = vmax.f32 %v592_v53, 0.0  ;;  %v521_v1 = vsel %vm450_vm0, %v518_v46, %v520_v55  ;;  %v595_v58 = vadd.f32 %v520_v55, %v291_v0 }
  0x52   : > { %v630_v57 = vmax.f32 %v593_v54, 0.0  ;;  %v594_v59 = vadd.f32 %v816_v47, %v521_v1 }
  0x53   : > { %666 = vst [vmem:[%s945_s5 + $0x105] sm:$0xff] %v629_v56  ;;  %v632_v60 = vmax.f32 %v595_v58, 0.0 }
  0x54   : > { %667 = vst [vmem:[%s945_s5 + $0x10d] sm:$0xff] %v630_v57  ;;  %v631_v61 = vmax.f32 %v594_v59, 0.0 }
  0x55   : > { %669 = vst [vmem:[%s945_s5 + $0x11d] sm:$0x7] %v632_v60 }
  0x56   : > { %668 = vst [vmem:[%s945_s5 + $0x115] sm:$0xff] %v631_v61 }
  0x57 PF: > { %s14_s15 = sadd.s32 1, %s850_s15  }
  0x58   : > { %p11_p4 = scmp.ge.s32.totalorder %s14_s15, 4  }
  0x5a   :  { %13 = sbr.rel (!%p11_p4) target bundleno = 1 (0x1), region = 69 }

// kernel: residual_block.3
= control target key start
LH: loop header
LB: loop body
LE: loop exit
PB: predicated region body
PF: predicated region fallthrough
CT: control target
= control target key end

     0   :  { %s6427_s12 = smov 0   ;;  %s8663_s0 = inlined_call_operand.vmem [shape: bf16[2,342,128], index: 0, kind: input, shape index: {}]   ;;  %s8664_s1 = inlined_call_operand.vmem [shape: bf16[9,128,128], index: 1, kind: input, shape index: {}]   ;;  %s8665_s2 = inlined_call_operand.vmem [shape: f32[2,288,128], index: 2, kind: output, shape index: {0}]   ;;  %s8666_s3 = inlined_call_operand.vmem [shape: f32[2,2,128], index: 3, kind: output, shape index: {1}]  }
   0x1 LB: > { %s4862_s13 = sadd.s32 4294967295, %s6405_s12   ;;  %p4866_p0 = scmp.ge.s32.totalorder %s6405_s12, 1  ;;  %s6405_s12 = sphi %s6427_s12, %s14_s12  }
   0x2   : > { %p140_p1 = scmp.lt.s32.totalorder %s6405_s12, 3 }
   0x4   : > { %p141_p2 = pnand %p4866_p0, %p140_p1 }
   0x6   : > { %144 = sbr.rel (%p141_p2) target bundleno = 618 (0x26a), region = 28 }
   0xd   : > { %v6222_v0 = vld [vmem:[%s8664_s1 + $0x40] sm:$0xff]   ;;  %p168_p3 = scmp.lt.s32.totalorder %s4862_s13, 1  ;;  %v6224_v2 = vld [vmem:[%s8664_s1 + $0x48] sm:$0xff]   ;;  %v6226_v4 = vld [vmem:[%s8664_s1 + $0x50] sm:$0xff]   ;;  %vm346_vm0 = vsmask.f32 7424 }
   0xe   : > { %v6223_v1 = vld [vmem:[%s8664_s1 + $0x100] sm:$0xff]   ;;  %5368 = vmatprep.subr.bf16.mxu1 %v6222_v0  ;;  %v6225_v3 = vld [vmem:[%s8664_s1 + $0x108] sm:$0xff]   ;;  %v6227_v5 = vld [vmem:[%s8664_s1 + $0x110] sm:$0xff]   ;;  %vm1803_vm1 = vsmask.f32 6400  ;;  %vm2274_vm2 = vcmask 1045504  }
   0xf   : > { %5576 = vmatprep.subr.bf16.mxu0 %v6223_v1  ;;  %5369 = vmatpush3.bf16.msra.mxu1 %v6222_v0  ;;  %s8960_s13 = smov (!%p168_p3, %s4862_s13), 1  ;;  %v6228_v6 = vld [vmem:[%s8664_s1 + $0x58] sm:$0xff]   ;;  %v6230_v8 = vld [vmem:[%s8664_s1 + $0x60] sm:$0xff]   ;;  %v6232_v10 = vld [vmem:[%s8664_s1 + $0x68] sm:$0xff]   ;;  %vm1002_vm3 = vcmask 1046528   ;;  %vm3546_vm5 = vcmask 1044480  }
  0x10   : > { %5577 = vmatpush3.bf16.msra.mxu0 %v6223_v1  ;;  %5370 = vmatprep.subr.bf16.mxu1 %v6224_v2  ;;  %v6229_v7 = vld [vmem:[%s8664_s1 + $0x118] sm:$0xff]   ;;  %s6140_s30 = smul.u32 172, %s8960_s13  ;;  %v6231_v9 = vld [vmem:[%s8664_s1 + $0x120] sm:$0xff]   ;;  %v6233_v11 = vld [vmem:[%s8664_s1 + $0x128] sm:$0xff]   ;;  %vm3075_vm4 = vsmask.f32 5376 }
  0x11   : > { %5578 = vmatprep.subr.bf16.mxu0 %v6225_v3  ;;  %v6234_v17 = vld [vmem:[%s8664_s1 + $0x70] sm:$0xff]   ;;  %v6236_v32 = vld [vmem:[%s8664_s1 + $0x78] sm:$0xff]   ;;  %v6243_v48 = vld [vmem:[%s8664_s1] sm:$0xff]   ;;  %s4869_s9 = sshll.u32 %s8960_s13, 1 }
  0x12   : > { %s6471_s10 = scalar_lea.vmem %s8663_s0, %s6140_s30  ;;  %v6235_v20 = vld [vmem:[%s8664_s1 + $0x130] sm:$0xff]   ;;  %v6237_v36 = vld [vmem:[%s8664_s1 + $0x138] sm:$0xff]   ;;  %v6245_v54 = vld [vmem:[%s8664_s1 + $0x140] sm:$0xff]   ;;  %s181_s15 = scalar_lea.vmem %s8666_s3, %s4869_s9 }
  0x13   : > { %5371 = vmatpush3.bf16.msra.mxu1 %v6224_v2  ;;  %v183_v12 = vld [vmem:[%s6471_s10] sm:$0xf]  ;;  %v184_v13 = vld [vmem:[%s6471_s10 + $0x4] sm:$0xf]  ;;  %v6484_v15 = vld [vmem:[%s6471_s10 + $0x8] sm:$0xff]  }
  0x14   : > { %5579 = vmatpush3.bf16.msra.mxu0 %v6225_v3  ;;  %5372 = vmatprep.subr.bf16.mxu1 %v6226_v4  ;;  %v6481_v14 = vcombine.low %v183_v12, %v184_v13  ;;  %v6487_v16 = vld [vmem:[%s6471_s10 + $0x10] sm:$0xff]   ;;  %v1319_v18 = vld [vmem:[%s6471_s10 + $0x8] sm:$0xe]  ;;  %v6494_v19 = vld [vmem:[%s6471_s10 + $0xc] sm:$0xf]  ;;  %v355_v23 = vshll.u32 %v6484_v15, 16 }
  0x15   : > { %5580 = vmatprep.subr.bf16.mxu0 %v6227_v5  ;;  %v6503_v24 = vcombine.low %v1319_v18, %v6494_v19  ;;  %v6506_v25 = vld [vmem:[%s6471_s10 + $0x10] sm:$0xff]   ;;  %v1813_v26 = vshrl.u32 %v6487_v16, 16  ;;  %v1816_v27 = vshll.u32 %v6487_v16, 16  ;;  %v359_v40 = vshrl.u32 %v6484_v15, 16  ;;  %v6521_v41 = vld [vmem:[%s6471_s10 + $0x18] sm:$0xff]   ;;  %v6538_v57 = vld [vmem:[%s6471_s10 + $0x20] sm:$0xff]  }
  0x16   : > { %v348_v21 = vshrl.u32 %v6481_v14, 16  ;;  %v350_v22 = vshll.u32 %v6481_v14, 16  ;;  %v357_v29 = vrot.slane %v355_v23, 1  ;;  %v363_v35 = vshll.u32 %v6506_v25, 16  ;;  %v6535_v55 = vld [vmem:[%s6471_s10 + $0x18] sm:$0xff]   ;;  %v6542_v60 = vld [vmem:[%s6471_s10 + $0x20] sm:$0xff]  }
  0x17   : > { %5373 = vmatpush3.bf16.msra.mxu1 %v6226_v4  ;;  %v1805_v30 = vshrl.u32 %v6503_v24, 16  ;;  %v1808_v31 = vshll.u32 %v6503_v24, 16  ;;  %v1815_v33 = vrot.slane %v1813_v26, 1  ;;  %v1818_v34 = vrot.slane %v1816_v27, 2  ;;  %v6546_v62 = vld [vmem:[%s6471_s10 + $0x28] sm:$0xff]  }
  0x18   : > { %5581 = vmatpush3.bf16.msra.mxu0 %v6227_v5  ;;  %5374 = vmatprep.subr.bf16.mxu1 %v6228_v6  ;;  %v352_v28 = vrot.slane %v350_v22, 1  ;;  %v1822_v45 = vshrl.u32 %v6521_v41, 16  ;;  %v1825_v46 = vshll.u32 %v6521_v41, 16  ;;  %v365_v47 = vrot.slane %v363_v35, 1  ;;  %v6566_v22 = vld [vmem:[%s6471_s10 + $0x28] sm:$0xff]  }
  0x19   : > { %5582 = vmatprep.subr.bf16.mxu0 %v6229_v7  ;;  %v1807_v38 = vrot.slane %v1805_v30, 1  ;;  %v1810_v39 = vrot.slane %v1808_v31, 2  ;;  %v1819_v42 = vor.u32 %v1818_v34, %v1815_v33  ;;  %v367_v49 = vshrl.u32 %v6506_v25, 16  ;;  %v6575_v31 = vld [vmem:[%s6471_s10 + $0x30] sm:$0xff]   ;;  %v6579_v33 = vld [vmem:[%s6471_s10 + $0x38] sm:$0xff]  }
  0x1a   : > { %v353_v37 = vor.u32 %v352_v28, %v348_v21  ;;  %v361_v51 = vor.u32 %v359_v40, %v357_v29  ;;  %v1824_v52 = vrot.slane %v1822_v45, 1  ;;  %v1827_v53 = vrot.slane %v1825_v46, 2  ;;  %v6251_v21 = vld [vmem:[%s8664_s1 + $0x150] sm:$0xff]  }
  0x1b   : > { %5375 = vmatpush3.bf16.msra.mxu1 %v6228_v6  ;;  %v1811_v44 = vor.u32 %v1810_v39, %v1807_v38  ;;  %v369_v58 = vor.u32 %v367_v49, %v365_v47  ;;  %v371_v59 = vshll.u32 %v6535_v55, 16  ;;  %v375_v61 = vshrl.u32 %v6535_v55, 16  ;;  %v6571_v28 = vld [vmem:[%s6471_s10 + $0x30] sm:$0xff]  }
  0x1c   : > { %5583 = vmatpush3.bf16.msra.mxu0 %v6229_v7  ;;  %5376 = vmatprep.subr.bf16.mxu1 %v6230_v8  ;;  %v358_v43 = vsel %vm346_vm0, %v353_v37, %v357_v29  ;;  %v1828_v56 = vor.u32 %v1827_v53, %v1824_v52  ;;  %v366_v63 = vsel %vm346_vm0, %v361_v51, %v365_v47  ;;  %v1831_v1 = vshrl.u32 %v6538_v57, 16  ;;  %v6246_v7 = vld [vmem:[%s8664_s1 + $0x148] sm:$0xff]   ;;  %v6259_v46 = vld [vmem:[%s8664_s1 + $0x10] sm:$0xff]   ;;  %v6258_v53 = vld [vmem:[%s8664_s1 + $0x160] sm:$0xff]  }
  0x1d   : > { %5584 = vmatprep.subr.bf16.mxu0 %v6231_v9  ;;  %5384 = vmatprep.mubr.bf16.mxu1 %v358_v43  ;;  %v1820_v50 = vsel %vm1803_vm1, %v1811_v44, %v1819_v42  ;;  %v1834_v2 = vshll.u32 %v6538_v57, 16  ;;  %v373_v3 = vrot.slane %v371_v59, 1  ;;  %v379_v4 = vshll.u32 %v6542_v60, 16  ;;  %v6253_v43 = vld [vmem:[%s8664_s1 + $0x158] sm:$0xff]  }
  0x1e   : > { %5592 = vmatprep.mubr.bf16.mxu0 %v1820_v50  ;;  %v1829_v0 = vsel %vm1803_vm1, %v1819_v42, %v1828_v56  ;;  %v1840_v5 = vshrl.u32 %v6546_v62, 16  ;;  %v1843_v6 = vshll.u32 %v6546_v62, 16  ;;  %v383_v23 = vshrl.u32 %v6542_v60, 16 }
  0x1f   : > { %5377 = vmatpush3.bf16.msra.mxu1 %v6230_v8  ;;  %v1833_v8 = vrot.slane %v1831_v1, 1  ;;  %v381_v18 = vrot.slane %v379_v4, 1  ;;  %v387_v30 = vshll.u32 %v6566_v22, 16  ;;  %v1852_v37 = vshll.u32 %v6571_v28, 16  ;;  %v6608_v1 = vld [vmem:[%s6471_s10 + $0x40] sm:$0xff]  }
  0x20   : > { %5585 = vmatpush3.bf16.msra.mxu0 %v6231_v9  ;;  %5378 = vmatprep.subr.bf16.mxu1 %v6232_v10  ;;  %v1836_v9 = vrot.slane %v1834_v2, 2  ;;  %v1842_v12 = vrot.slane %v1840_v5, 1  ;;  %v395_v39 = vshll.u32 %v6575_v31, 16  ;;  %v1858_v40 = vshrl.u32 %v6579_v33, 16 }
  0x21   : > { %5586 = vmatprep.subr.bf16.mxu0 %v6233_v11  ;;  %v385_v29 = vor.u32 %v383_v23, %v381_v18  ;;  %v389_v38 = vrot.slane %v387_v30, 1  ;;  %v1861_v42 = vshll.u32 %v6579_v33, 16  ;;  %v1854_v45 = vrot.slane %v1852_v37, 2  ;;  %v6266_v30 = vld [vmem:[%s8664_s1 + $0x18] sm:$0xff]   ;;  %v2253_v37 = vld [vmem:[%s6471_s10 + $0x8] sm:$0xc] }
  0x22   : > { %v1837_v13 = vor.u32 %v1836_v9, %v1833_v8  ;;  %v397_v51 = vrot.slane %v395_v39, 1  ;;  %v2276_v39 = vrot.slane %v6487_v16, 2 }
  0x23   : > { %5379 = vmatpush3.bf16.msra.mxu1 %v6232_v10  ;;  %v6252_v10 = vld [vmem:[%s8664_s1 + $0x8] sm:$0xff]   ;;  %v390_v47 = vsel %vm346_vm0, %v385_v29, %v389_v38  ;;  %v1863_v52 = vrot.slane %v1861_v42, 2  ;;  %v6265_v29 = vld [vmem:[%s8664_s1 + $0x170] sm:$0xff]  }
  0x24   : > { %5587 = vmatpush3.bf16.msra.mxu0 %v6233_v11  ;;  %5380 = vmatprep.subr.bf16.mxu1 %v6234_v17  ;;  %v374_v11 = vsel %vm346_vm0, %v369_v58, %v373_v3  ;;  %v1838_v26 = vsel %vm1803_vm1, %v1828_v56, %v1837_v13  ;;  %v399_v56 = vshrl.u32 %v6575_v31, 16 }
  0x25   : > { %5588 = vmatprep.subr.bf16.mxu0 %v6235_v20 }
  0x27   : > { %5381 = vmatpush3.bf16.msra.mxu1 %v6234_v17  ;;  %v377_v17 = vor.u32 %v375_v61, %v373_v3  ;;  %v6604_v61 = vld [vmem:[%s6471_s10 + $0x40] sm:$0xff]   ;;  %v6260_v3 = vld [vmem:[%s8664_s1 + $0x168] sm:$0xff]  }
  0x28   : > { %5589 = vmatpush3.bf16.msra.mxu0 %v6235_v20  ;;  %5382 = vmatprep.subr.bf16.mxu1 %v6236_v32  ;;  %v1845_v20 = vrot.slane %v1843_v6, 2  ;;  %v1867_v4 = vshrl.u32 %v6604_v61, 16  ;;  %v1870_v5 = vshll.u32 %v6604_v61, 16 }
  0x29   : > { %5590 = vmatprep.subr.bf16.mxu0 %v6237_v36  ;;  %v382_v34 = vsel %vm346_vm0, %v377_v17, %v381_v18 }
  0x2a   : > { %v1846_v27 = vor.u32 %v1845_v20, %v1842_v12  ;;  %v1872_v12 = vrot.slane %v1870_v5, 2  ;;  %v2280_v5 = vrot.slane %v6538_v57, 2 }
  0x2b   : > { %5383 = vmatpush3.bf16.msra.mxu1 %v6236_v32  ;;  %v391_v32 = vshrl.u32 %v6566_v22, 16 }
  0x2c   : > { %5591 = vmatpush3.bf16.msra.mxu0 %v6237_v36  ;;  %5420 = vmatprep.subr.bf16.mxu1 %v6243_v48  ;;  %v1847_v35 = vsel %vm1803_vm1, %v1837_v13, %v1846_v27  ;;  %v1849_v36 = vshrl.u32 %v6571_v28, 16 }
  0x2d   : > { %5628 = vmatprep.subr.bf16.mxu0 %v6245_v54  ;;  %v393_v50 = vor.u32 %v391_v32, %v389_v38  ;;  %v5030_v38 = vcombine.low %v2253_v37, %v6494_v19  ;;  %v6282_v37 = vld [vmem:[%s8664_s1 + $0x190] sm:$0xff]  }
  0x2e   : > { %5385 = vmatmul.mubr.bf16.vlgmr.msra.gmra.mrb[0].mxu1 %v366_v63  ;;  %v1851_v44 = vrot.slane %v1849_v36, 1  ;;  %v401_v63 = vor.u32 %v399_v56, %v397_v51  ;;  %v415_v36 = vshrl.u32 %v6608_v1, 16 }
  0x2f   : > { %5593 = vmatmul.mubr.bf16.vlgmr.msra.gmra.mrb[0].mxu0 %v1829_v0  ;;  %5421 = vmatpush3.bf16.msra.mxu1 %v6243_v48  ;;  %v1860_v48 = vrot.slane %v1858_v40, 1  ;;  %v398_v2 = vsel %vm346_vm0, %v393_v50, %v397_v51  ;;  %v6642_v40 = vld [vmem:[%s6471_s10 + $0x50] sm:$0xff]   ;;  %v2275_v19 = vrot.slane %v5030_v38, 2 }
  0x30   : > { %5629 = vmatpush3.bf16.msra.mxu0 %v6245_v54  ;;  %5388 = vmatprep.mubr.bf16.mxu1 %v374_v11  ;;  %v1855_v49 = vor.u32 %v1854_v45, %v1851_v44  ;;  %v6599_v54 = vld [vmem:[%s6471_s10 + $0x38] sm:$0xff]   ;;  %v1869_v11 = vrot.slane %v1867_v4, 1  ;;  %v431_v51 = vshrl.u32 %v6642_v40, 16 }
  0x31   : > { %5630 = vmatprep.subr.bf16.mxu0 %v6246_v7  ;;  %5422 = vmatprep.subr.bf16.mxu1 %v6252_v10  ;;  %v1864_v59 = vor.u32 %v1863_v52, %v1860_v48  ;;  %v403_v0 = vshll.u32 %v6599_v54, 16  ;;  %v407_v6 = vshrl.u32 %v6599_v54, 16  ;;  %v427_v48 = vshll.u32 %v6642_v40, 16 }
  0x32   : > { %5596 = vmatprep.mubr.bf16.mxu0 %v1838_v26  ;;  %v1856_v58 = vsel %vm1803_vm1, %v1846_v27, %v1855_v49 }
  0x33   : > { %5423 = vmatpush3.bf16.msra.mxu1 %v6252_v10  ;;  %v1865_v8 = vsel %vm1803_vm1, %v1855_v49, %v1864_v59  ;;  %v405_v9 = vrot.slane %v403_v0, 1  ;;  %v411_v10 = vshll.u32 %v6608_v1, 16  ;;  %v6267_v49 = vld [vmem:[%s8664_s1 + $0x178] sm:$0xff]   ;;  %v429_v56 = vrot.slane %v427_v48, 1 }
  0x34   : > { %5631 = vmatpush3.bf16.msra.mxu0 %v6246_v7  ;;  %5424 = vmatprep.subr.bf16.mxu1 %v6259_v46  ;;  %v6618_v7 = vld [vmem:[%s6471_s10 + $0x48] sm:$0xff]   ;;  %v2278_v0 = vrot.slane %v6521_v41, 2  ;;  %v6288_v48 = vld [vmem:[%s8664_s1 + $0x198] sm:$0xff]  }
  0x35   : > { %5632 = vmatprep.subr.bf16.mxu0 %v6251_v21  ;;  %v1876_v13 = vshrl.u32 %v6618_v7, 16  ;;  %v1879_v17 = vshll.u32 %v6618_v7, 16  ;;  %v406_v18 = vsel %vm346_vm0, %v401_v63, %v405_v9  ;;  %v413_v20 = vrot.slane %v411_v10, 1 }
  0x36   : > { %5389 = vmatmul.mubr.bf16.gmra.mrb[4].mxu1 %v382_v34  ;;  %v409_v23 = vor.u32 %v407_v6, %v405_v9  ;;  %v433_v4 = vor.u32 %v431_v51, %v429_v56  ;;  %v6274_v6 = vld [vmem:[%s8664_s1 + $0x180] sm:$0xff]   ;;  %v2279_v57 = vsel %vm2274_vm2, %v2276_v39, %v2278_v0 }
  0x37   : > { %5597 = vmatmul.mubr.bf16.gmra.mrb[4].mxu0 %v1847_v35  ;;  %5392 = vmatprep.mubr.bf16.mxu1 %v390_v47  ;;  %v1878_v26 = vrot.slane %v1876_v13, 1  ;;  %v1881_v27 = vrot.slane %v1879_v17, 2  ;;  %v6635_v35 = vld [vmem:[%s6471_s10 + $0x48] sm:$0xff]   ;;  %v6651_v47 = vld [vmem:[%s6471_s10 + $0x58] sm:$0xff]   ;;  %v6279_v17 = vld [vmem:[%s8664_s1 + $0x30] sm:$0xff]  }
  0x38   : > { %5633 = vmatpush3.bf16.msra.mxu0 %v6251_v21  ;;  %5425 = vmatpush3.bf16.msra.mxu1 %v6259_v46  ;;  %v1873_v21 = vor.u32 %v1872_v12, %v1869_v11  ;;  %v414_v42 = vsel %vm346_vm0, %v409_v23, %v413_v20  ;;  %v419_v44 = vshll.u32 %v6635_v35, 16  ;;  %v423_v45 = vshrl.u32 %v6635_v35, 16  ;;  %v6271_v46 = vld [vmem:[%s8664_s1 + $0x20] sm:$0xff]   ;;  %v6692_v23 = vld [vmem:[%s6471_s10 + $0x70] sm:$0xff]  }
  0x39   : > { %5634 = vmatprep.subr.bf16.mxu0 %v6253_v43  ;;  %5600 = vmatprep.mubr.bf16.mxu0 %v1856_v58  ;;  %v6632_v34 = vor.u32 %v1881_v27, %v1878_v26  ;;  %v435_v52 = vshll.u32 %v6651_v47, 16  ;;  %v6663_v58 = vld [vmem:[%s6471_s10 + $0x60] sm:$0xff]   ;;  %v439_v10 = vshrl.u32 %v6651_v47, 16  ;;  %v2282_v27 = vrot.slane %v6546_v62, 2 }
  0x3a   : > { %v1874_v32 = vsel %vm1803_vm1, %v1864_v59, %v1873_v21  ;;  %5426 = vmatprep.subr.bf16.mxu1 %v6266_v30  ;;  %v421_v50 = vrot.slane %v419_v44, 1  ;;  %v443_v41 = vshll.u32 %v6663_v58, 16  ;;  %v447_v11 = vshrl.u32 %v6663_v58, 16 }
  0x3b   : > { %v1883_v16 = vsel %vm1803_vm1, %v1873_v21, %v6632_v34  ;;  %v459_v38 = vshll.u32 %v6692_v23, 16  ;;  %v463_v44 = vshrl.u32 %v6692_v23, 16 }
  0x3c   : > { %5635 = vmatpush3.bf16.msra.mxu0 %v6253_v43  ;;  %5427 = vmatpush3.bf16.msra.mxu1 %v6266_v30  ;;  %v417_v43 = vor.u32 %v415_v36, %v413_v20  ;;  %v425_v63 = vor.u32 %v423_v45, %v421_v50  ;;  %v6278_v20 = vld [vmem:[%s8664_s1 + $0x188] sm:$0xff]   ;;  %v445_v21 = vrot.slane %v443_v41, 1  ;;  %v2284_v36 = vrot.slane %v6571_v28, 2  ;;  %v6285_v41 = vld [vmem:[%s6471_s10 + $0x50] sm:$0xff]  }
  0x3d   : > { %5636 = vmatprep.subr.bf16.mxu0 %v6258_v53  ;;  %5428 = vmatprep.subr.bf16.mxu1 %v6271_v46 }
  0x3e   : > { %5393 = vmatmul.mubr.bf16.gmra.mrb[8].mxu1 %v398_v2  ;;  %v422_v59 = vsel %vm346_vm0, %v417_v43, %v421_v50  ;;  %v437_v2 = vrot.slane %v435_v52, 1  ;;  %v430_v9 = vsel %vm346_vm0, %v425_v63, %v429_v56  ;;  %v2283_v43 = vsel %vm2274_vm2, %v2280_v5, %v2282_v27 }
  0x3f   : > { %5601 = vmatmul.mubr.bf16.gmra.mrb[8].mxu0 %v1865_v8  ;;  %5396 = vmatprep.mubr.bf16.mxu1 %v406_v18  ;;  %v6675_v8 = vld [vmem:[%s6471_s10 + $0x68] sm:$0xff]   ;;  %v2281_v18 = vsel %vm2274_vm2, %v2278_v0, %v2280_v5  ;;  %v2286_v50 = vrot.slane %v6579_v33, 2  ;;  %v2288_v56 = vrot.slane %v6604_v61, 2  ;;  %v6292_v61 = vld [vmem:[%s8664_s1 + $0x1a0] sm:$0xff]  }
  0x40   : > { %5637 = vmatpush3.bf16.msra.mxu0 %v6258_v53  ;;  %5604 = vmatprep.mubr.bf16.mxu0 %v1874_v32  ;;  %v2277_v53 = vsel %vm2274_vm2, %v2275_v19, %v2276_v39  ;;  %v438_v12 = vsel %vm346_vm0, %v433_v4, %v437_v2  ;;  %v451_v13 = vshll.u32 %v6675_v8, 16  ;;  %v441_v26 = vor.u32 %v439_v10, %v437_v2  ;;  %v6696_v32 = vld [vmem:[%s6471_s10 + $0x78] sm:$0xff]  }
  0x41   : > { %5638 = vmatprep.subr.bf16.mxu0 %v6260_v3  ;;  %5429 = vmatpush3.bf16.msra.mxu1 %v6271_v46  ;;  %v455_v62 = vshrl.u32 %v6675_v8, 16  ;;  %v467_v45 = vshll.u32 %v6696_v32, 16  ;;  %v2285_v46 = vsel %vm2274_vm2, %v2282_v27, %v2284_v36  ;;  %v461_v19 = vrot.slane %v459_v38, 1  ;;  %v6300_v27 = vld [vmem:[%s8664_s1 + $0x1b0] sm:$0xff]  }
  0x42   : > { %v453_v30 = vrot.slane %v451_v13, 1  ;;  %v446_v39 = vsel %vm346_vm0, %v441_v26, %v445_v21  ;;  %v471_v0 = vshrl.u32 %v6696_v32, 16  ;;  %v2287_v2 = vsel %vm2274_vm2, %v2284_v36, %v2286_v50 }
  0x43   : > { %v465_v51 = vor.u32 %v463_v44, %v461_v19  ;;  %v469_v52 = vrot.slane %v467_v45, 1  ;;  %v6291_v45 = vld [vmem:[%s6471_s10 + $0x68] sm:$0xff]  }
  0x44   : > { %5639 = vmatpush3.bf16.msra.mxu0 %v6260_v3  ;;  %v6275_v3 = vld [vmem:[%s8664_s1 + $0x28] sm:$0xff]  }
  0x45   : > { %5640 = vmatprep.subr.bf16.mxu0 %v6265_v29  ;;  %5430 = vmatprep.subr.bf16.mxu1 %v6275_v3 }
  0x46   : > { %5397 = vmatmul.mubr.bf16.gmra.mrb[12].mxu1 %v414_v42  ;;  %v6284_v42 = vld [vmem:[%s8664_s1 + $0x38] sm:$0xff]  }
  0x47   : > { %5605 = vmatmul.mubr.bf16.gmra.mrb[12].mxu0 %v1883_v16  ;;  %5400 = vmatprep.mubr.bf16.mxu1 %v422_v59  ;;  %v6714_v16 = vld [vmem:[%s6471_s10 + $0x80] sm:$0xff]  }
  0x48   : > { %5641 = vmatpush3.bf16.msra.mxu0 %v6265_v29  ;;  %5644 = vmatprep.mubr.bf16.mxu0 %v2277_v53  ;;  %v449_v29 = vor.u32 %v447_v11, %v445_v21  ;;  %v6721_v53 = vld [vmem:[%s6471_s10 + $0x88] sm:$0xff]   ;;  %v6727_v59 = vld [vmem:[%s8664_s1 + $0x80] sm:$0xff]   ;;  %v475_v63 = vshll.u32 %v6714_v16, 16  ;;  %v479_v4 = vshrl.u32 %v6714_v16, 16  ;;  %v473_v11 = vor.u32 %v471_v0, %v469_v52  ;;  %v6299_v0 = vld [vmem:[%s8664_s1 + $0x90] sm:$0xff]  }
  0x49   : > { %5642 = vmatprep.subr.bf16.mxu0 %v6267_v49  ;;  %5431 = vmatpush3.bf16.msra.mxu1 %v6275_v3  ;;  %v470_v3 = vsel %vm346_vm0, %v465_v51, %v469_v52  ;;  %v483_v5 = vshll.u32 %v6721_v53, 16  ;;  %v6294_v51 = vld [vmem:[%s6471_s10 + $0x78] sm:$0xff]  }
  0x4a   : > { %5432 = vmatprep.subr.bf16.mxu1 %v6279_v17  ;;  %v454_v28 = vsel %vm346_vm0, %v449_v29, %v453_v30  ;;  %v477_v10 = vrot.slane %v475_v63, 1 }
  0x4c   : > { %5643 = vmatpush3.bf16.msra.mxu0 %v6267_v49  ;;  %v457_v49 = vor.u32 %v455_v62, %v453_v30  ;;  %v481_v13 = vor.u32 %v479_v4, %v477_v10  ;;  %v478_v21 = vsel %vm346_vm0, %v473_v11, %v477_v10  ;;  %v6304_v62 = vld [vmem:[%s8664_s1 + $0x1b8] sm:$0xff]   ;;  %v6308_v10 = vld [vmem:[%s8664_s1 + $0xa0] sm:$0xff]  }
  0x4d   : > { %5680 = vmatprep.subr.bf16.mxu0 %v6274_v6  ;;  %5433 = vmatpush3.bf16.msra.mxu1 %v6279_v17  ;;  %v485_v17 = vrot.slane %v483_v5, 1  ;;  %v6303_v4 = vld [vmem:[%s8664_s1 + $0x98] sm:$0xff]   ;;  %v2591_v5 = vld [vmem:[%s6471_s10 + $0x10] sm:$0xc] }
  0x4e   : > { %5401 = vmatmul.mubr.bf16.gmra.mrb[16].mxu1 %v430_v9  ;;  %5434 = vmatprep.subr.bf16.mxu1 %v6284_v42  ;;  %v462_v33 = vsel %vm346_vm0, %v457_v49, %v461_v19  ;;  %v6743_v9 = vld [vmem:[%s6471_s10 + $0x90] ss:$0 sps:$4 sm:$0x11]   ;;  %v2298_v49 = vrot.slane %v6291_v45, 2  ;;  %v6323_v45 = vld [vmem:[%s8664_s1 + $0x1d8] sm:$0xff]  }
  0x4f   : > { %5645 = vmatmul.mubr.bf16.vlgmr.msra.gmra.mrb[0].mxu0 %v2279_v57  ;;  %5404 = vmatprep.mubr.bf16.mxu1 %v438_v12  ;;  %v6296_v57 = vld [vmem:[%s8664_s1 + $0x1a8] sm:$0xff]   ;;  %v2290_v12 = vrot.slane %v6618_v7, 2  ;;  %v491_v26 = vshll.u32 %v6743_v9, 16  ;;  %v486_v30 = vsel %vm346_vm0, %v481_v13, %v485_v17  ;;  %v6287_v7 = vld [vmem:[%s6471_s10 + $0x58] sm:$0xff]   ;;  %v6293_v19 = vld [vmem:[%s6471_s10 + $0x70] sm:$0xff]  }
  0x50   : > { %5648 = vmatprep.mubr.bf16.mxu0 %v2281_v18  ;;  %5681 = vmatpush3.bf16.msra.mxu0 %v6274_v6  ;;  %v2289_v6 = vsel %vm2274_vm2, %v2286_v50, %v2288_v56  ;;  %v2292_v18 = vrot.slane %v6285_v41, 2  ;;  %v2300_v50 = vrot.slane %v6293_v19, 2  ;;  %v6302_v11 = vld [vmem:[%s6471_s10 + $0x98] ss:$0 sps:$4 sm:$0x33]   ;;  %v6312_v13 = vld [vmem:[%s8664_s1 + $0xa8] sm:$0xff]  }
  0x51   : > { %5682 = vmatprep.subr.bf16.mxu0 %v6278_v20  ;;  %5435 = vmatpush3.bf16.msra.mxu1 %v6284_v42  ;;  %v2291_v29 = vsel %vm2274_vm2, %v2288_v56, %v2290_v12  ;;  %v2294_v42 = vrot.slane %v6287_v7, 2  ;;  %v6295_v56 = vld [vmem:[%s8664_s1 + $0x88] sm:$0xff]  }
  0x52   : > { %5472 = vmatprep.subr.bf16.mxu1 %v6727_v59  ;;  %v2293_v36 = vsel %vm2274_vm2, %v2290_v12, %v2292_v18  ;;  %v2301_v63 = vsel %vm2274_vm2, %v2298_v49, %v2300_v50 }
  0x53   : > { %v2295_v44 = vsel %vm2274_vm2, %v2292_v18, %v2294_v42 }
  0x54   : > { %5683 = vmatpush3.bf16.msra.mxu0 %v6278_v20  ;;  %v487_v20 = vshrl.u32 %v6721_v53, 16 }
  0x55   : > { %5684 = vmatprep.subr.bf16.mxu0 %v6282_v37 }
  0x56   : > { %5405 = vmatmul.mubr.bf16.gmra.mrb[20].mxu1 %v446_v39  ;;  %v489_v38 = vor.u32 %v487_v20, %v485_v17  ;;  %v493_v39 = vrot.slane %v491_v26, 1  ;;  %v2310_v17 = vrot.slane %v6302_v11, 2 }
  0x57   : > { %5649 = vmatmul.mubr.bf16.gmra.mrb[4].mxu0 %v2283_v43  ;;  %5408 = vmatprep.mubr.bf16.mxu1 %v454_v28 }
  0x58   : > { %5652 = vmatprep.mubr.bf16.mxu0 %v2285_v46  ;;  %5685 = vmatpush3.bf16.msra.mxu0 %v6282_v37  ;;  %v6289_v37 = vld [vmem:[%s6471_s10 + $0x60] sm:$0xff]   ;;  %v494_v28 = vsel %vm346_vm0, %v489_v38, %v493_v39  ;;  %v6845_v38 = vld [vmem:[%s6471_s10 + $0x30] sm:$0xff]   ;;  %v6315_v39 = vld [vmem:[%s8664_s1 + $0x1c8] sm:$0xff]  }
  0x59   : > { %5686 = vmatprep.subr.bf16.mxu0 %v6288_v48  ;;  %v2296_v43 = vrot.slane %v6289_v37, 2 }
  0x5b   : > { %v2297_v46 = vsel %vm2274_vm2, %v2294_v42, %v2296_v43  ;;  %v2299_v52 = vsel %vm2274_vm2, %v2296_v43, %v2298_v49  ;;  %v6319_v43 = vld [vmem:[%s8664_s1 + $0x1d0] sm:$0xff]  }
  0x5c   : > { %5687 = vmatpush3.bf16.msra.mxu0 %v6288_v48  ;;  %v6771_v48 = vld [vmem:[%s8664_s1 + $0x1c0] sm:$0xff]  }
  0x5d   : > { %5688 = vmatprep.subr.bf16.mxu0 %v6292_v61 }
  0x5e   : > { %5409 = vmatmul.mubr.bf16.gmra.mrb[24].mxu1 %v462_v33  ;;  %v6297_v33 = vld [vmem:[%s6471_s10 + $0x80] sm:$0xff]  }
  0x5f   : > { %5653 = vmatmul.mubr.bf16.gmra.mrb[8].mxu0 %v2287_v2  ;;  %5412 = vmatprep.mubr.bf16.mxu1 %v470_v3  ;;  %v6298_v2 = vld [vmem:[%s6471_s10 + $0x88] sm:$0xff]  }
  0x60   : > { %5656 = vmatprep.mubr.bf16.mxu0 %v2289_v6  ;;  %5689 = vmatpush3.bf16.msra.mxu0 %v6292_v61  ;;  %v2304_v61 = vrot.slane %v6297_v33, 2  ;;  %v6799_v6 = vld [vmem:[%s6471_s10 + $0x14] sm:$0xf] }
  0x61   : > { %5690 = vmatprep.subr.bf16.mxu0 %v6296_v57  ;;  %v6336_v33 = vld [vmem:[%s8664_s1 + $0x1f0] sm:$0xff]  }
  0x64   : > { %5691 = vmatpush3.bf16.msra.mxu0 %v6296_v57 }
  0x65   : > { %5692 = vmatprep.subr.bf16.mxu0 %v6300_v27 }
  0x66   : > { %5413 = vmatmul.mubr.bf16.gmra.mrb[28].mxu1 %v478_v21  ;;  %v6316_v21 = vld [vmem:[%s8664_s1 + $0xb0] sm:$0xff]  }
  0x67   : > { %5657 = vmatmul.mubr.bf16.gmra.mrb[12].mxu0 %v2291_v29  ;;  %5416 = vmatprep.mubr.bf16.mxu1 %v486_v30  ;;  %v6320_v29 = vld [vmem:[%s8664_s1 + $0xb8] sm:$0xff]  }
  0x68   : > { %5660 = vmatprep.mubr.bf16.mxu0 %v2293_v36  ;;  %5693 = vmatpush3.bf16.msra.mxu0 %v6300_v27  ;;  %v6825_v27 = vld [vmem:[%s6471_s10 + $0x20] sm:$0xff]  }
  0x69   : > { %5694 = vmatprep.subr.bf16.mxu0 %v6304_v62  ;;  %v2741_v30 = vrot.slane %v6825_v27, 2  ;;  %v6841_v36 = vld [vmem:[%s8664_s1 + $0xc0] sm:$0xff]  }
  0x6c   : > { %5695 = vmatpush3.bf16.msra.mxu0 %v6304_v62  ;;  %v2745_v62 = vrot.slane %v6845_v38, 2 }
  0x6d   : > { %5732 = vmatprep.subr.bf16.mxu0 %v6771_v48 }
  0x6e   : > { %5417 = vmatmul.mubr.bf16.gmra.mrb[32].mxu1 %v494_v28 }
  0x6f   : > { %5661 = vmatmul.mubr.bf16.gmra.mrb[16].mxu0 %v2295_v44  ;;  %5436 = vmatprep.mubr.bf16.mxu1 %v6481_v14  ;;  %v2302_v14 = vrot.slane %v6294_v51, 2  ;;  %v6865_v44 = vld [vmem:[%s6471_s10 + $0x40] sm:$0xff]   ;;  %v6332_v51 = vld [vmem:[%s8664_s1 + $0x1e8] sm:$0xff]  }
  0x70   : > { %5664 = vmatprep.mubr.bf16.mxu0 %v2297_v46  ;;  %v2749_v46 = vrot.slane %v6865_v44, 2 }
  0x71   : > { %v2303_v3 = vsel %vm2274_vm2, %v2300_v50, %v2302_v14  ;;  %v6883_v50 = vld [vmem:[%s6471_s10 + $0x50] sm:$0xff]  }
  0x76   : > { %5437 = vmatmul.mubr.bf16.vlgmr.msra.gmra.mrb[0].mxu1 %v6484_v15  ;;  %v2305_v15 = vsel %vm2274_vm2, %v2302_v14, %v2304_v61 }
  0x77   : > { %5665 = vmatmul.mubr.bf16.gmra.mrb[20].mxu0 %v2299_v52  ;;  %5473 = vmatpush3.bf16.msra.mxu1 %v6727_v59  ;;  %v2306_v59 = vrot.slane %v6298_v2, 2  ;;  %v2753_v52 = vrot.slane %v6883_v50, 2  ;;  %v6907_v2 = vld [vmem:[%s6471_s10 + $0x68] sm:$0xff]  }
  0x78   : > { %5440 = vmatprep.mubr.bf16.mxu1 %v6506_v25  ;;  %5668 = vmatprep.mubr.bf16.mxu0 %v2301_v63  ;;  %v6301_v25 = vld [vmem:[%s6471_s10 + $0x90] sm:$0xff]   ;;  %v981_v63 = vld [vmem:[%s6471_s10] sm:$0xe] }
  0x79   : > { %5474 = vmatprep.subr.bf16.mxu1 %v6295_v56  ;;  %v2308_v41 = vrot.slane %v6301_v25, 2  ;;  %v2307_v57 = vsel %vm2274_vm2, %v2304_v61, %v2306_v59  ;;  %v6357_v25 = vld [vmem:[%s6471_s10 + $0x8] sm:$0xff]  }
  0x7b   : > { %5475 = vmatpush3.bf16.msra.mxu1 %v6295_v56  ;;  %v2309_v12 = vsel %vm2274_vm2, %v2306_v59, %v2308_v41  ;;  %v2311_v26 = vsel %vm2274_vm2, %v2308_v41, %v2310_v17 }
  0x7c   : > { %5476 = vmatprep.subr.bf16.mxu1 %v6299_v0 }
  0x7e   : > { %5441 = vmatmul.mubr.bf16.gmra.mrb[4].mxu1 %v6535_v55  ;;  %v6807_v55 = vcombine.low %v2591_v5, %v6799_v6  ;;  %v2759_v5 = vrot.slane %v6907_v2, 2 }
  0x7f   : > { %5669 = vmatmul.mubr.bf16.gmra.mrb[24].mxu0 %v2303_v3  ;;  %5444 = vmatprep.mubr.bf16.mxu1 %v6542_v60  ;;  %v6810_v60 = vld [vmem:[%s6471_s10 + $0x18] sm:$0xff]  }
  0x80   : > { %5672 = vmatprep.mubr.bf16.mxu0 %v2305_v15  ;;  %5477 = vmatpush3.bf16.msra.mxu1 %v6299_v0  ;;  %v2738_v18 = vrot.slane %v6807_v55, 2  ;;  %v2739_v20 = vrot.slane %v6810_v60, 2  ;;  %v6356_v0 = vld [vmem:[%s6471_s10 + $0x4] sm:$0xf]  ;;  %v6340_v3 = vld [vmem:[%s8664_s1 + $0x1f8] sm:$0xff]  }
  0x81   : > { %5478 = vmatprep.subr.bf16.mxu1 %v6303_v4  ;;  %v4937_v61 = vcombine.low %v981_v63, %v6356_v0  ;;  %v3077_v0 = vshrl.u32 %v6807_v55, 16 }
  0x82   : > { %v2742_v37 = vsel %vm2274_vm2, %v2739_v20, %v2741_v30 }
  0x83   : > { %v1003_v59 = vrot.slane %v4937_v61, 1 }
  0x84   : > { %5479 = vmatpush3.bf16.msra.mxu1 %v6303_v4  ;;  %v1004_v4 = vrot.slane %v6357_v25, 1 }
  0x85   : > { %5480 = vmatprep.subr.bf16.mxu1 %v6308_v10 }
  0x86   : > { %5445 = vmatmul.mubr.bf16.gmra.mrb[8].mxu1 %v6566_v22  ;;  %v2740_v22 = vsel %vm2274_vm2, %v2738_v18, %v2739_v20  ;;  %v1005_v41 = vsel %vm1002_vm3, %v1003_v59, %v1004_v4  ;;  %v6359_v18 = vld [vmem:[%s6471_s10 + $0x18] sm:$0xff]   ;;  %v6341_v59 = vld [vmem:[%s8664_s1 + $0xe0] sm:$0xff]  }
  0x87   : > { %5673 = vmatmul.mubr.bf16.gmra.mrb[28].mxu0 %v2307_v57  ;;  %5448 = vmatprep.mubr.bf16.mxu1 %v6575_v31  ;;  %v6829_v31 = vld [vmem:[%s6471_s10 + $0x28] sm:$0xff]   ;;  %v6929_v57 = vld [vmem:[%s6471_s10 + $0x78] sm:$0xff]   ;;  %v1008_v20 = vrot.slane %v6359_v18, 1  ;;  %v6364_v18 = vld [vmem:[%s6471_s10 + $0x40] sm:$0xff]  }
  0x88   : > { %5676 = vmatprep.mubr.bf16.mxu0 %v2309_v12  ;;  %5481 = vmatpush3.bf16.msra.mxu1 %v6308_v10  ;;  %v2743_v7 = vrot.slane %v6829_v31, 2  ;;  %v6925_v10 = vld [vmem:[%s6471_s10 + $0x70] sm:$0xff]  }
  0x89   : > { %5482 = vmatprep.subr.bf16.mxu1 %v6312_v13  ;;  %v6358_v12 = vld [vmem:[%s6471_s10 + $0x10] sm:$0xff]   ;;  %v2761_v17 = vrot.slane %v6925_v10, 2 }
  0x8a   : > { %v2746_v28 = vsel %vm2274_vm2, %v2743_v7, %v2745_v62 }
  0x8c   : > { %5483 = vmatpush3.bf16.msra.mxu1 %v6312_v13  ;;  %v1006_v13 = vrot.slane %v6358_v12, 1 }
  0x8d   : > { %5484 = vmatprep.subr.bf16.mxu1 %v6316_v21 }
  0x8e   : > { %5449 = vmatmul.mubr.bf16.gmra.mrb[12].mxu1 %v6599_v54  ;;  %v2744_v54 = vsel %vm2274_vm2, %v2741_v30, %v2743_v7  ;;  %v1009_v30 = vsel %vm1002_vm3, %v1006_v13, %v1008_v20 }
  0x8f   : > { %5677 = vmatmul.mubr.bf16.gmra.mrb[32].mxu0 %v2311_v26  ;;  %5452 = vmatprep.mubr.bf16.mxu1 %v6608_v1  ;;  %v6849_v1 = vld [vmem:[%s6471_s10 + $0x38] sm:$0xff]   ;;  %v1007_v26 = vsel %vm1002_vm3, %v1004_v4, %v1006_v13 }
  0x90   : > { %5696 = vmatprep.mubr.bf16.mxu0 %v2740_v22  ;;  %5485 = vmatpush3.bf16.msra.mxu1 %v6316_v21  ;;  %v2747_v42 = vrot.slane %v6849_v1, 2  ;;  %v2763_v21 = vrot.slane %v6929_v57, 2  ;;  %v2762_v22 = vsel %vm2274_vm2, %v2759_v5, %v2761_v17 }
  0x91   : > { %5486 = vmatprep.subr.bf16.mxu1 %v6320_v29 }
  0x92   : > { %v2750_v49 = vsel %vm2274_vm2, %v2747_v42, %v2749_v46  ;;  %v2764_v7 = vsel %vm2274_vm2, %v2761_v17, %v2763_v21  ;;  %v6343_v17 = vld [vmem:[%s8664_s1 + $0xe8] sm:$0xff]  }
  0x94   : > { %5487 = vmatpush3.bf16.msra.mxu1 %v6320_v29  ;;  %v6940_v29 = vld [vmem:[%s6471_s10 + $0x80] sm:$0xff]  }
  0x95   : > { %5524 = vmatprep.subr.bf16.mxu1 %v6841_v36 }
  0x96   : > { %5453 = vmatmul.mubr.bf16.gmra.mrb[16].mxu1 %v6635_v35  ;;  %v6868_v35 = vld [vmem:[%s6471_s10 + $0x48] sm:$0xff]  }
  0x97   : > { %5697 = vmatmul.mubr.bf16.vlgmr.msra.gmra.mrb[0].mxu0 %v2742_v37  ;;  %5456 = vmatprep.mubr.bf16.mxu1 %v6642_v40  ;;  %v2748_v40 = vsel %vm2274_vm2, %v2745_v62, %v2747_v42  ;;  %v2751_v19 = vrot.slane %v6868_v35, 2  ;;  %v6331_v37 = vld [vmem:[%s8664_s1 + $0xc8] sm:$0xff]   ;;  %v2765_v42 = vrot.slane %v6940_v29, 2 }
  0x98   : > { %5700 = vmatprep.mubr.bf16.mxu0 %v2744_v54  ;;  %5733 = vmatpush3.bf16.msra.mxu0 %v6771_v48  ;;  %v6328_v48 = vld [vmem:[%s8664_s1 + $0x1e0] sm:$0xff]   ;;  %v6948_v54 = vld [vmem:[%s6471_s10 + $0x88] sm:$0xff]  }
  0x99   : > { %5734 = vmatprep.subr.bf16.mxu0 %v6315_v39  ;;  %v2754_v14 = vsel %vm2274_vm2, %v2751_v19, %v2753_v52 }
  0x9c   : > { %5735 = vmatpush3.bf16.msra.mxu0 %v6315_v39  ;;  %v6360_v39 = vld [vmem:[%s6471_s10 + $0x20] sm:$0xff]  }
  0x9d   : > { %5736 = vmatprep.subr.bf16.mxu0 %v6319_v43  ;;  %v1010_v62 = vrot.slane %v6360_v39, 1 }
  0x9e   : > { %5457 = vmatmul.mubr.bf16.gmra.mrb[20].mxu1 %v6651_v47  ;;  %v2752_v47 = vsel %vm2274_vm2, %v2749_v46, %v2751_v19 }
  0x9f   : > { %5701 = vmatmul.mubr.bf16.gmra.mrb[4].mxu0 %v2746_v28  ;;  %5460 = vmatprep.mubr.bf16.mxu1 %v6663_v58  ;;  %v6887_v58 = vld [vmem:[%s6471_s10 + $0x58] sm:$0xff]   ;;  %v1011_v46 = vsel %vm1002_vm3, %v1008_v20, %v1010_v62  ;;  %v1018_v20 = vrot.slane %v6364_v18, 1  ;;  %v6369_v18 = vld [vmem:[%s6471_s10 + $0x60] sm:$0xff]  }
  0xa0   : > { %5704 = vmatprep.mubr.bf16.mxu0 %v2748_v40  ;;  %5737 = vmatpush3.bf16.msra.mxu0 %v6319_v43  ;;  %v2755_v56 = vrot.slane %v6887_v58, 2  ;;  %v6361_v43 = vld [vmem:[%s6471_s10 + $0x28] sm:$0xff]   ;;  %v6335_v40 = vld [vmem:[%s8664_s1 + $0xd0] sm:$0xff]  }
  0xa1   : > { %5738 = vmatprep.subr.bf16.mxu0 %v6323_v45  ;;  %v1012_v28 = vrot.slane %v6361_v43, 1  ;;  %v6345_v43 = vld [vmem:[%s8664_s1 + $0xf0] sm:$0xff]  }
  0xa3   : > { %v1013_v19 = vsel %vm1002_vm3, %v1010_v62, %v1012_v28  ;;  %v3103_v62 = vshrl.u32 %v6829_v31, 16 }
  0xa4   : > { %5739 = vmatpush3.bf16.msra.mxu0 %v6323_v45  ;;  %v2767_v45 = vrot.slane %v6948_v54, 2 }
  0xa5   : > { %5740 = vmatprep.subr.bf16.mxu0 %v6328_v48 }
  0xa6   : > { %5461 = vmatmul.mubr.bf16.gmra.mrb[24].mxu1 %v6675_v8  ;;  %v6902_v8 = vld [vmem:[%s6471_s10 + $0x60] sm:$0xff]  }
  0xa7   : > { %5705 = vmatmul.mubr.bf16.gmra.mrb[8].mxu0 %v2750_v49  ;;  %5464 = vmatprep.mubr.bf16.mxu1 %v6692_v23  ;;  %v2756_v23 = vsel %vm2274_vm2, %v2753_v52, %v2755_v56  ;;  %v2757_v15 = vrot.slane %v6902_v8, 2  ;;  %v2768_v49 = vsel %vm2274_vm2, %v2765_v42, %v2767_v45  ;;  %v6362_v52 = vld [vmem:[%s6471_s10 + $0x30] sm:$0xff]  }
  0xa8   : > { %5708 = vmatprep.mubr.bf16.mxu0 %v2752_v47  ;;  %5741 = vmatpush3.bf16.msra.mxu0 %v6328_v48  ;;  %v6962_v48 = vld [vmem:[%s6471_s10 + $0x90] sm:$0xff]   ;;  %v6966_v47 = vld [vmem:[%s6471_s10 + $0x98] sm:$0xff]  }
  0xa9   : > { %5742 = vmatprep.subr.bf16.mxu0 %v6332_v51  ;;  %v2760_v11 = vsel %vm2274_vm2, %v2757_v15, %v2759_v5  ;;  %v2769_v63 = vrot.slane %v6962_v48, 2  ;;  %v2771_v61 = vrot.slane %v6966_v47, 2 }
  0xab   : > { %v2770_v4 = vsel %vm2274_vm2, %v2767_v45, %v2769_v63 }
  0xac   : > { %5743 = vmatpush3.bf16.msra.mxu0 %v6332_v51  ;;  %v6339_v51 = vld [vmem:[%s8664_s1 + $0xd8] sm:$0xff]  }
  0xad   : > { %5744 = vmatprep.subr.bf16.mxu0 %v6336_v33 }
  0xae   : > { %5465 = vmatmul.mubr.bf16.gmra.mrb[28].mxu1 %v6696_v32  ;;  %v6920_v32 = vld [vmem:[%s8664_s1 + $0x200] sm:$0xff]  }
  0xaf   : > { %5709 = vmatmul.mubr.bf16.gmra.mrb[12].mxu0 %v2754_v14  ;;  %5468 = vmatprep.mubr.bf16.mxu1 %v6714_v16  ;;  %v2758_v16 = vsel %vm2274_vm2, %v2755_v56, %v2757_v15  ;;  %v1014_v56 = vrot.slane %v6362_v52, 1  ;;  %v3088_v15 = vshll.u32 %v6810_v60, 16  ;;  %v6347_v52 = vld [vmem:[%s8664_s1 + $0xf8] sm:$0xff]  }
  0xb0   : > { %5712 = vmatprep.mubr.bf16.mxu0 %v2756_v23  ;;  %5745 = vmatpush3.bf16.msra.mxu0 %v6336_v33  ;;  %v6363_v33 = vld [vmem:[%s6471_s10 + $0x38] sm:$0xff]   ;;  %v3080_v23 = vshll.u32 %v6807_v55, 16  ;;  %v2772_v55 = vsel %vm2274_vm2, %v2769_v63, %v2771_v61 }
  0xb1   : > { %5746 = vmatprep.subr.bf16.mxu0 %v6340_v3  ;;  %v1016_v14 = vrot.slane %v6363_v33, 1  ;;  %v1015_v25 = vsel %vm1002_vm3, %v1012_v28, %v1014_v56  ;;  %v3090_v13 = vrot.slane %v3088_v15, 3  ;;  %v3121_v15 = vshrl.u32 %v6849_v1, 16 }
  0xb3   : > { %v1017_v5 = vsel %vm1002_vm3, %v1014_v56, %v1016_v14  ;;  %v1019_v28 = vsel %vm1002_vm3, %v1016_v14, %v1018_v20  ;;  %v6366_v56 = vld [vmem:[%s6471_s10 + $0x50] sm:$0xff]   ;;  %v6367_v14 = vld [vmem:[%s6471_s10 + $0x58] sm:$0xff]  }
  0xb4   : > { %5747 = vmatpush3.bf16.msra.mxu0 %v6340_v3  ;;  %v3085_v3 = vshrl.u32 %v6810_v60, 16  ;;  %v1022_v63 = vrot.slane %v6366_v56, 1  ;;  %v6348_v56 = vld [vmem:[%s8664_s1 + $0x218] sm:$0xff]  }
  0xb5   : > { %5784 = vmatprep.subr.bf16.mxu0 %v6920_v32 }
  0xb6   : > { %5469 = vmatmul.mubr.bf16.gmra.mrb[32].mxu1 %v6721_v53  ;;  %v3087_v12 = vrot.slane %v3085_v3, 2 }
  0xb7   : > { %5713 = vmatmul.mubr.bf16.gmra.mrb[16].mxu0 %v2758_v16  ;;  %5488 = vmatprep.mubr.bf16.mxu1 %v1005_v41  ;;  %v6338_v16 = vld [vmem:[%s6471_s10 + $0xa0] ss:$0 sps:$4 sm:$0x33]   ;;  %v3079_v41 = vrot.slane %v3077_v0, 2  ;;  %v1024_v0 = vrot.slane %v6367_v14, 1 }
  0xb8   : > { %5716 = vmatprep.mubr.bf16.mxu0 %v2760_v11  ;;  %v3082_v11 = vrot.slane %v3080_v23, 3  ;;  %v3091_v39 = vor.u32 %v3090_v13, %v3087_v12  ;;  %v3115_v23 = vshll.u32 %v6845_v38, 16  ;;  %v6344_v13 = vld [vmem:[%s8664_s1 + $0x208] sm:$0xff]  }
  0xbe   : > { %5489 = vmatmul.mubr.bf16.vlgmr.msra.gmra.mrb[0].mxu1 %v1007_v26  ;;  %v6365_v26 = vld [vmem:[%s6471_s10 + $0x48] sm:$0xff]  }
  0xbf   : > { %5717 = vmatmul.mubr.bf16.gmra.mrb[20].mxu0 %v2762_v22  ;;  %5525 = vmatpush3.bf16.msra.mxu1 %v6841_v36  ;;  %v2766_v36 = vsel %vm2274_vm2, %v2763_v21, %v2765_v42  ;;  %v2773_v21 = vrot.slane %v6338_v16, 2  ;;  %v1020_v22 = vrot.slane %v6365_v26, 1  ;;  %v3106_v42 = vshll.u32 %v6829_v31, 16 }
  0xc0   : > { %5492 = vmatprep.mubr.bf16.mxu1 %v1009_v30  ;;  %5720 = vmatprep.mubr.bf16.mxu0 %v2764_v7  ;;  %v3094_v30 = vshrl.u32 %v6825_v27, 16  ;;  %v3097_v7 = vshll.u32 %v6825_v27, 16 }
  0xc1   : > { %5526 = vmatprep.subr.bf16.mxu1 %v6331_v37  ;;  %v1021_v45 = vsel %vm1002_vm3, %v1018_v20, %v1020_v22  ;;  %v1026_v20 = vrot.slane %v6369_v18, 1 }
  0xc3   : > { %5527 = vmatpush3.bf16.msra.mxu1 %v6331_v37  ;;  %v3083_v37 = vor.u32 %v3082_v11, %v3079_v41  ;;  %v3117_v41 = vrot.slane %v3115_v23, 3  ;;  %v3123_v11 = vrot.slane %v3121_v15, 2  ;;  %v3151_v15 = vshll.u32 %v6883_v50, 16 }
  0xc4   : > { %5528 = vmatprep.subr.bf16.mxu1 %v6335_v40 }
  0xc6   : > { %5493 = vmatmul.mubr.bf16.gmra.mrb[4].mxu1 %v1011_v46  ;;  %v3096_v46 = vrot.slane %v3094_v30, 2  ;;  %v3130_v30 = vshrl.u32 %v6865_v44, 16 }
  0xc7   : > { %5721 = vmatmul.mubr.bf16.gmra.mrb[24].mxu0 %v2766_v36  ;;  %5496 = vmatprep.mubr.bf16.mxu1 %v1013_v19  ;;  %v3099_v36 = vrot.slane %v3097_v7, 3  ;;  %v3092_v19 = vsel %vm3075_vm4, %v3083_v37, %v3091_v39  ;;  %v3133_v7 = vshll.u32 %v6865_v44, 16 }
  0xc8   : > { %5724 = vmatprep.mubr.bf16.mxu0 %v2768_v49  ;;  %5529 = vmatpush3.bf16.msra.mxu1 %v6335_v40  ;;  %v2774_v40 = vsel %vm2274_vm2, %v2771_v61, %v2773_v21  ;;  %v3105_v49 = vrot.slane %v3103_v62, 2  ;;  %v3112_v61 = vshrl.u32 %v6845_v38, 16  ;;  %v6370_v21 = vld [vmem:[%s6471_s10 + $0x68] sm:$0xff]   ;;  %v3142_v62 = vshll.u32 %v6868_v35, 16 }
  0xc9   : > { %5530 = vmatprep.subr.bf16.mxu1 %v6339_v51  ;;  %v3100_v33 = vor.u32 %v3099_v36, %v3096_v46  ;;  %v1028_v26 = vrot.slane %v6370_v21, 1  ;;  %v3132_v46 = vrot.slane %v3130_v30, 2  ;;  %v3135_v36 = vrot.slane %v3133_v7, 3  ;;  %v6350_v21 = vld [vmem:[%s8664_s1 + $0x228] sm:$0xff]  }
  0xca   : > { %v3114_v16 = vrot.slane %v3112_v61, 2  ;;  %v6372_v61 = vld [vmem:[%s6471_s10 + $0x78] sm:$0xff]   ;;  %v1036_v7 = vrot.slane %v6721_v53, 1 }
  0xcb   : > { %v1032_v23 = vrot.slane %v6372_v61, 1  ;;  %v6374_v61 = vld [vmem:[%s6471_s10 + $0x10] sm:$0xff]  }
  0xcc   : > { %5531 = vmatpush3.bf16.msra.mxu1 %v6339_v51  ;;  %v3108_v51 = vrot.slane %v3106_v42, 3  ;;  %v6346_v42 = vld [vmem:[%s8664_s1 + $0x210] sm:$0xff]  }
  0xcd   : > { %5532 = vmatprep.subr.bf16.mxu1 %v6341_v59 }
  0xce   : > { %5497 = vmatmul.mubr.bf16.gmra.mrb[8].mxu1 %v1015_v25  ;;  %v3109_v3 = vor.u32 %v3108_v51, %v3105_v49  ;;  %v1023_v25 = vsel %vm1002_vm3, %v1020_v22, %v1022_v63  ;;  %v3118_v22 = vor.u32 %v3117_v41, %v3114_v16 }
  0xcf   : > { %5725 = vmatmul.mubr.bf16.gmra.mrb[28].mxu0 %v2770_v4  ;;  %5500 = vmatprep.mubr.bf16.mxu1 %v1017_v5  ;;  %v3101_v4 = vsel %vm3075_vm4, %v3091_v39, %v3100_v33  ;;  %v1025_v5 = vsel %vm1002_vm3, %v1022_v63, %v1024_v0  ;;  %v3139_v39 = vshrl.u32 %v6868_v35, 16 }
  0xd0   : > { %5728 = vmatprep.mubr.bf16.mxu0 %v2772_v55  ;;  %5533 = vmatpush3.bf16.msra.mxu1 %v6341_v59  ;;  %v3124_v59 = vshll.u32 %v6849_v1, 16  ;;  %v3110_v55 = vsel %vm3075_vm4, %v3100_v33, %v3109_v3  ;;  %v6371_v33 = vld [vmem:[%s6471_s10 + $0x70] sm:$0xff]  }
  0xd1   : > { %5534 = vmatprep.subr.bf16.mxu1 %v6343_v17  ;;  %v3141_v51 = vrot.slane %v3139_v39, 2  ;;  %v1030_v14 = vrot.slane %v6371_v33, 1  ;;  %v3169_v39 = vshll.u32 %v6902_v8, 16  ;;  %v1038_v33 = vrot.slane %v6743_v9, 1 }
  0xd2   : > { %v3126_v12 = vrot.slane %v3124_v59, 3 }
  0xd3   : > { %v1031_v16 = vsel %vm1002_vm3, %v1028_v26, %v1030_v14  ;;  %v1039_v9 = vsel %vm1002_vm3, %v1036_v7, %v1038_v33  ;;  %v3220_v33 = vshrl.u32 %v6962_v48, 16 }
  0xd4   : > { %5535 = vmatpush3.bf16.msra.mxu1 %v6343_v17  ;;  %v7022_v17 = vld [vmem:[%s8664_s1 + $0x100] sm:$0xff]   ;;  %v3127_v37 = vor.u32 %v3126_v12, %v3123_v11  ;;  %v3153_v12 = vrot.slane %v3151_v15, 3  ;;  %v3187_v15 = vshll.u32 %v6925_v10, 16 }
  0xd5   : > { %5536 = vmatprep.subr.bf16.mxu1 %v6345_v43 }
  0xd6   : > { %5501 = vmatmul.mubr.bf16.gmra.mrb[12].mxu1 %v1019_v28  ;;  %v3580_v28 = vrot.slane %v6966_v47, 3  ;;  %v3128_v49 = vsel %vm3075_vm4, %v3118_v22, %v3127_v37 }
  0xd7   : > { %5729 = vmatmul.mubr.bf16.gmra.mrb[32].mxu0 %v2774_v40  ;;  %5504 = vmatprep.mubr.bf16.mxu1 %v1021_v45  ;;  %v1029_v40 = vsel %vm1002_vm3, %v1026_v20, %v1028_v26  ;;  %v3119_v45 = vsel %vm3075_vm4, %v3109_v3, %v3118_v22  ;;  %v3148_v3 = vshrl.u32 %v6883_v50, 16  ;;  %v6373_v26 = vld [vmem:[%s6471_s10 + $0x80] sm:$0xff]  }
  0xd8   : > { %5748 = vmatprep.mubr.bf16.mxu0 %v3092_v19  ;;  %5537 = vmatpush3.bf16.msra.mxu1 %v6345_v43  ;;  %v7036_v43 = vld [vmem:[%s6471_s10 + $0xa0] ss:$0 sps:$4 sm:$0x77]   ;;  %v1034_v22 = vrot.slane %v6373_v26, 1  ;;  %v3205_v26 = vshll.u32 %v6940_v29, 16 }
  0xd9   : > { %5538 = vmatprep.subr.bf16.mxu1 %v6347_v52  ;;  %v3582_v19 = vrot.slane %v7036_v43, 3  ;;  %v3150_v11 = vrot.slane %v3148_v3, 2  ;;  %v3184_v3 = vshrl.u32 %v6925_v10, 16 }
  0xda   : > { %v1037_v53 = vsel %vm1002_vm3, %v1034_v22, %v1036_v7 }
  0xdb   : > { %v7050_v63 = vsel %vm3546_vm5, %v3580_v28, %v3582_v19  ;;  %v3154_v30 = vor.u32 %v3153_v12, %v3150_v11  ;;  %v3171_v19 = vrot.slane %v3169_v39, 3  ;;  %v3214_v39 = vshll.u32 %v6948_v54, 16 }
  0xdc   : > { %5539 = vmatpush3.bf16.msra.mxu1 %v6347_v52  ;;  %v3144_v52 = vrot.slane %v3142_v62, 3 }
  0xdd   : > { %5836 = vmatprep.subr.bf16.mxu1 %v7022_v17 }
  0xde   : > { %5505 = vmatmul.mubr.bf16.gmra.mrb[16].mxu1 %v1023_v25  ;;  %v3145_v59 = vor.u32 %v3144_v52, %v3141_v51  ;;  %v3157_v25 = vshrl.u32 %v6887_v58, 16 }
  0xdf   : > { %5749 = vmatmul.mubr.bf16.vlgmr.msra.gmra.mrb[0].mxu0 %v3101_v4  ;;  %5508 = vmatprep.mubr.bf16.mxu1 %v1025_v5  ;;  %v3160_v4 = vshll.u32 %v6887_v58, 16  ;;  %v6349_v5 = vld [vmem:[%s8664_s1 + $0x220] sm:$0xff]  }
  0xe0   : > { %5752 = vmatprep.mubr.bf16.mxu0 %v3110_v55  ;;  %5785 = vmatpush3.bf16.msra.mxu0 %v6920_v32  ;;  %v1027_v32 = vsel %vm1002_vm3, %v1024_v0, %v1026_v20  ;;  %v3136_v0 = vor.u32 %v3135_v36, %v3132_v46  ;;  %v1033_v55 = vsel %vm1002_vm3, %v1030_v14, %v1032_v23  ;;  %v3159_v18 = vrot.slane %v3157_v25, 2 }
  0xe1   : > { %5786 = vmatprep.subr.bf16.mxu0 %v6344_v13  ;;  %v3162_v20 = vrot.slane %v3160_v4, 3  ;;  %v3155_v46 = vsel %vm3075_vm4, %v3145_v59, %v3154_v30  ;;  %v1466_v14 = vrot.slane %v6503_v24, 1  ;;  %v3193_v25 = vshrl.u32 %v6929_v57, 16 }
  0xe2   : > { %v3137_v41 = vsel %vm3075_vm4, %v3127_v37, %v3136_v0  ;;  %v3166_v37 = vshrl.u32 %v6902_v8, 16  ;;  %v3196_v4 = vshll.u32 %v6929_v57, 16 }
  0xe3   : > { %v3163_v62 = vor.u32 %v3162_v20, %v3159_v18  ;;  %v3195_v11 = vrot.slane %v3193_v25, 2  ;;  %v3222_v25 = vrot.slane %v3220_v33, 2 }
  0xe4   : > { %5787 = vmatpush3.bf16.msra.mxu0 %v6344_v13  ;;  %v3146_v13 = vsel %vm3075_vm4, %v3136_v0, %v3145_v59  ;;  %v3168_v36 = vrot.slane %v3166_v37, 2  ;;  %v3198_v12 = vrot.slane %v3196_v4, 3  ;;  %v3211_v37 = vshrl.u32 %v6948_v54, 16 }
  0xe5   : > { %5788 = vmatprep.subr.bf16.mxu0 %v6346_v42 }
  0xe6   : > { %5509 = vmatmul.mubr.bf16.gmra.mrb[20].mxu1 %v1027_v32  ;;  %v3178_v32 = vshll.u32 %v6907_v2, 16  ;;  %v3172_v0 = vor.u32 %v3171_v19, %v3168_v36  ;;  %v3199_v7 = vor.u32 %v3198_v12, %v3195_v11  ;;  %v3216_v36 = vrot.slane %v3214_v39, 3  ;;  %v6377_v19 = vld [vmem:[%s6471_s10 + $0x28] sm:$0xff]   ;;  %v6382_v12 = vld [vmem:[%s6471_s10 + $0x40] sm:$0xff]  }
  0xe7   : > { %5753 = vmatmul.mubr.bf16.gmra.mrb[4].mxu0 %v3119_v45  ;;  %5512 = vmatprep.mubr.bf16.mxu1 %v1029_v40  ;;  %v6351_v40 = vld [vmem:[%s8664_s1 + $0x230] sm:$0xff]   ;;  %v1035_v45 = vsel %vm1002_vm3, %v1032_v23, %v1034_v22  ;;  %v1467_v23 = vrot.slane %v6374_v61, 1  ;;  %v6376_v22 = vld [vmem:[%s6471_s10 + $0x20] sm:$0xff]  }
  0xe8   : > { %5756 = vmatprep.mubr.bf16.mxu0 %v3128_v49  ;;  %5789 = vmatpush3.bf16.msra.mxu0 %v6346_v42  ;;  %v3175_v42 = vshrl.u32 %v6907_v2, 16  ;;  %v3164_v49 = vsel %vm3075_vm4, %v3154_v30, %v3163_v62  ;;  %v3180_v52 = vrot.slane %v3178_v32, 3  ;;  %v3173_v24 = vsel %vm3075_vm4, %v3163_v62, %v3172_v0 }
  0xe9   : > { %5790 = vmatprep.subr.bf16.mxu0 %v6348_v56  ;;  %v1471_v30 = vrot.slane %v6376_v22, 1  ;;  %v3525_v22 = vld [vmem:[%s6471_s10 + $0x10] sm:$0x8] }
  0xea   : > { %v3177_v51 = vrot.slane %v3175_v42, 2 }
  0xec   : > { %5791 = vmatpush3.bf16.msra.mxu0 %v6348_v56  ;;  %v6353_v56 = vld [vmem:[%s8664_s1 + $0x238] sm:$0xff]   ;;  %v3181_v59 = vor.u32 %v3180_v52, %v3177_v51  ;;  %v6378_v52 = vld [vmem:[%s6471_s10 + $0x30] sm:$0xff]  }
  0xed   : > { %5792 = vmatprep.subr.bf16.mxu0 %v6349_v5 }
  0xee   : > { %5513 = vmatmul.mubr.bf16.gmra.mrb[24].mxu1 %v1031_v16  ;;  %v3186_v16 = vrot.slane %v3184_v3, 2 }
  0xef   : > { %5757 = vmatmul.mubr.bf16.gmra.mrb[8].mxu0 %v3137_v41  ;;  %5516 = vmatprep.mubr.bf16.mxu1 %v1033_v55  ;;  %v3189_v41 = vrot.slane %v3187_v15, 3  ;;  %v3182_v55 = vsel %vm3075_vm4, %v3172_v0, %v3181_v59  ;;  %v6379_v0 = vld [vmem:[%s8664_s1 + $0x108] sm:$0xff]  }
  0xf0   : > { %5760 = vmatprep.mubr.bf16.mxu0 %v3146_v13  ;;  %5793 = vmatpush3.bf16.msra.mxu0 %v6349_v5  ;;  %v1468_v5 = vsel %vm1002_vm3, %v1466_v14, %v1467_v23  ;;  %v6375_v13 = vld [vmem:[%s6471_s10 + $0x18] sm:$0xff]   ;;  %v3223_v14 = vshll.u32 %v6962_v48, 16 }
  0xf1   : > { %5794 = vmatprep.subr.bf16.mxu0 %v6350_v21  ;;  %v1469_v18 = vrot.slane %v6375_v13, 1  ;;  %v3190_v20 = vor.u32 %v3189_v41, %v3186_v16  ;;  %v6381_v41 = vld [vmem:[%s6471_s10 + $0x38] sm:$0xff]   ;;  %v1479_v13 = vrot.slane %v6382_v12, 1 }
  0xf2   : > { %v3225_v4 = vrot.slane %v3223_v14, 3  ;;  %v6388_v14 = vld [vmem:[%s8664_s1 + $0x130] sm:$0xff]  }
  0xf3   : > { %v1470_v62 = vsel %vm1002_vm3, %v1467_v23, %v1469_v18  ;;  %v3191_v42 = vsel %vm3075_vm4, %v3181_v59, %v3190_v20  ;;  %v3229_v23 = vshrl.u32 %v6966_v47, 16 }
  0xf4   : > { %5795 = vmatpush3.bf16.msra.mxu0 %v6350_v21  ;;  %v3202_v21 = vshrl.u32 %v6940_v29, 16  ;;  %v3226_v11 = vor.u32 %v3225_v4, %v3222_v25 }
  0xf5   : > { %5796 = vmatprep.subr.bf16.mxu0 %v6351_v40 }
  0xf6   : > { %5517 = vmatmul.mubr.bf16.gmra.mrb[28].mxu1 %v1035_v45  ;;  %v3204_v32 = vrot.slane %v3202_v21, 2  ;;  %v1472_v45 = vsel %vm1002_vm3, %v1469_v18, %v1471_v30  ;;  %v3238_v18 = vshrl.u32 %v7036_v43, 16 }
  0xf7   : > { %5761 = vmatmul.mubr.bf16.gmra.mrb[12].mxu0 %v3155_v46  ;;  %5520 = vmatprep.mubr.bf16.mxu1 %v1037_v53  ;;  %v3200_v46 = vsel %vm3075_vm4, %v3190_v20, %v3199_v7  ;;  %v3213_v53 = vrot.slane %v3211_v37, 2  ;;  %v3241_v20 = vshll.u32 %v7036_v43, 16 }
  0xf8   : > { %5764 = vmatprep.mubr.bf16.mxu0 %v3164_v49  ;;  %5797 = vmatpush3.bf16.msra.mxu0 %v6351_v40  ;;  %v3207_v40 = vrot.slane %v3205_v26, 3  ;;  %v1473_v49 = vrot.slane %v6377_v19, 1  ;;  %v6383_v26 = vld [vmem:[%s8664_s1 + $0x118] sm:$0xff]   ;;  %v3240_v39 = vrot.slane %v3238_v18, 2 }
  0xf9   : > { %5798 = vmatprep.subr.bf16.mxu0 %v6353_v56  ;;  %v3217_v61 = vor.u32 %v3216_v36, %v3213_v53  ;;  %v7140_v53 = vld [vmem:[%s6471_s10 + $0x50] sm:$0xff]   ;;  %v7186_v18 = vld [vmem:[%s6471_s10 + $0x78] sm:$0xff]  }
  0xfa   : > { %v3208_v51 = vor.u32 %v3207_v40, %v3204_v32  ;;  %v1474_v3 = vsel %vm1002_vm3, %v1471_v30, %v1473_v49  ;;  %v6384_v32 = vld [vmem:[%s8664_s1 + $0x120] sm:$0xff]   ;;  %v6385_v40 = vld [vmem:[%s6471_s10 + $0x48] sm:$0xff]   ;;  %v1483_v36 = vrot.slane %v7140_v53, 1 }
  0xfc   : > { %5799 = vmatpush3.bf16.msra.mxu0 %v6353_v56  ;;  %v1475_v56 = vrot.slane %v6378_v52, 1  ;;  %v3209_v15 = vsel %vm3075_vm4, %v3199_v7, %v3208_v51  ;;  %v3227_v7 = vsel %vm3075_vm4, %v3217_v61, %v3226_v11 }
  0xfe   : > { %5521 = vmatmul.mubr.bf16.gmra.mrb[32].mxu1 %v1039_v9  ;;  %v1476_v59 = vsel %vm1002_vm3, %v1473_v49, %v1475_v56  ;;  %v6380_v9 = vld [vmem:[%s8664_s1 + $0x110] sm:$0xff]   ;;  %v6387_v49 = vld [vmem:[%s8664_s1 + $0x128] sm:$0xff]  }
  0xff   : > { %5765 = vmatmul.mubr.bf16.gmra.mrb[16].mxu0 %v3173_v24  ;;  %5540 = vmatprep.mubr.bf16.mxu1 %v1468_v5  ;;  %v3218_v24 = vsel %vm3075_vm4, %v3208_v51, %v3217_v61  ;;  %v3231_v5 = vrot.slane %v3229_v23, 2  ;;  %v3550_v61 = vrot.slane %v6825_v27, 3  ;;  %v7160_v23 = vld [vmem:[%s6471_s10 + $0x60] sm:$0xff]  }
 0x100   : > { %5768 = vmatprep.mubr.bf16.mxu0 %v3182_v55  ;;  %v1477_v55 = vrot.slane %v6381_v41, 1  ;;  %v3556_v41 = vrot.slane %v6849_v1, 3  ;;  %v3558_v1 = vrot.slane %v6865_v44, 3 }
 0x102   : > { %v1478_v30 = vsel %vm1002_vm3, %v1475_v56, %v1477_v55  ;;  %v1480_v37 = vsel %vm1002_vm3, %v1477_v55, %v1479_v13 }
 0x106   : > { %5541 = vmatmul.mubr.bf16.vlgmr.msra.gmra.mrb[0].mxu1 %v1470_v62  ;;  %v3243_v62 = vrot.slane %v3241_v20, 3  ;;  %v7191_v20 = vld [vmem:[%s6471_s10 + $0x80] sm:$0xff]  }
 0x107   : > { %5769 = vmatmul.mubr.bf16.gmra.mrb[20].mxu0 %v3191_v42  ;;  %5844 = vmatpush3.bf16.msra.mxu1 %v7022_v17  ;;  %v3232_v17 = vshll.u32 %v6966_v47, 16  ;;  %v5123_v42 = vcombine.low %v3525_v22, %v6799_v6  ;;  %v3548_v6 = vrot.slane %v6810_v60, 3  ;;  %v7155_v60 = vld [vmem:[%s6471_s10 + $0x58] sm:$0xff]  }
 0x108   : > { %5544 = vmatprep.mubr.bf16.mxu1 %v1472_v45  ;;  %5772 = vmatprep.mubr.bf16.mxu0 %v3200_v46  ;;  %v1481_v45 = vrot.slane %v6385_v40, 1  ;;  %v3244_v46 = vor.u32 %v3243_v62, %v3240_v39  ;;  %v7200_v39 = vld [vmem:[%s6471_s10 + $0x88] sm:$0xff]   ;;  %v3562_v62 = vrot.slane %v6883_v50, 3  ;;  %v3564_v40 = vrot.slane %v6887_v58, 3 }
 0x109   : > { %5837 = vmatprep.subr.bf16.mxu1 %v6379_v0  ;;  %v3234_v16 = vrot.slane %v3232_v17, 3  ;;  %v3547_v19 = vrot.slane %v5123_v42, 3  ;;  %v1487_v17 = vrot.slane %v7160_v23, 1  ;;  %v3551_v25 = vsel %vm3546_vm5, %v3548_v6, %v3550_v61 }
 0x10a   : > { %v1482_v51 = vsel %vm1002_vm3, %v1479_v13, %v1481_v45  ;;  %v1484_v56 = vsel %vm1002_vm3, %v1481_v45, %v1483_v36  ;;  %v1497_v44 = vrot.slane %v7200_v39, 1  ;;  %v1885_v42 = vshrl.u32 %v7140_v53, 16 }
 0x10b   : > { %5845 = vmatpush3.bf16.msra.mxu1 %v6379_v0  ;;  %v3235_v21 = vor.u32 %v3234_v16, %v3231_v5  ;;  %v3549_v33 = vsel %vm3546_vm5, %v3547_v19, %v3548_v6  ;;  %v1485_v0 = vrot.slane %v7155_v60, 1  ;;  %v7177_v5 = vld [vmem:[%s6471_s10 + $0x70] sm:$0xff]   ;;  %v3565_v50 = vsel %vm3546_vm5, %v3562_v62, %v3564_v40 }
 0x10c   : > { %5838 = vmatprep.subr.bf16.mxu1 %v6380_v9  ;;  %v1491_v16 = vrot.slane %v7177_v5, 1  ;;  %v1887_v6 = vrot.slane %v1885_v42, 1  ;;  %v3566_v58 = vrot.slane %v6902_v8, 3 }
 0x10d   : > { %v3236_v43 = vsel %vm3075_vm4, %v3226_v11, %v3235_v21  ;;  %v3245_v52 = vsel %vm3075_vm4, %v3235_v21, %v3244_v46  ;;  %v1488_v4 = vsel %vm1002_vm3, %v1485_v0, %v1487_v17  ;;  %v1495_v21 = vrot.slane %v7191_v20, 1  ;;  %v6355_v46 = vld [vmem:[%s6471_s10 + $0x98] ss:$0 sps:$4 sm:$0x11]  }
 0x10e   : > { %5545 = vmatmul.mubr.bf16.gmra.mrb[4].mxu1 %v1474_v3  ;;  %v3552_v3 = vrot.slane %v6829_v31, 3 }
 0x10f   : > { %5773 = vmatmul.mubr.bf16.gmra.mrb[24].mxu0 %v3209_v15  ;;  %5548 = vmatprep.mubr.bf16.mxu1 %v1476_v59  ;;  %v6391_v15 = vld [vmem:[%s8664_s1 + $0x138] sm:$0xff]   ;;  %v1486_v59 = vsel %vm1002_vm3, %v1483_v36, %v1485_v0  ;;  %v1498_v45 = vsel %vm1002_vm3, %v1495_v21, %v1497_v44  ;;  %v3568_v0 = vrot.slane %v6907_v2, 3 }
 0x110   : > { %5776 = vmatprep.mubr.bf16.mxu0 %v3218_v24  ;;  %5846 = vmatpush3.bf16.msra.mxu1 %v6380_v9  ;;  %v3553_v27 = vsel %vm3546_vm5, %v3550_v61, %v3552_v3  ;;  %v7172_v9 = vld [vmem:[%s6471_s10 + $0x68] sm:$0xff]   ;;  %v3554_v24 = vrot.slane %v6845_v38, 3  ;;  %v1493_v38 = vrot.slane %v7186_v18, 1 }
 0x111   : > { %5839 = vmatprep.subr.bf16.mxu1 %v6383_v26  ;;  %v1489_v31 = vrot.slane %v7172_v9, 1  ;;  %v3569_v8 = vsel %vm3546_vm5, %v3566_v58, %v3568_v0  ;;  %v1915_v2 = vshll.u32 %v7172_v9, 16 }
 0x112   : > { %v3555_v11 = vsel %vm3546_vm5, %v3552_v3, %v3554_v24  ;;  %v3557_v13 = vsel %vm3546_vm5, %v3554_v24, %v3556_v41  ;;  %v1494_v22 = vsel %vm1002_vm3, %v1491_v16, %v1493_v38  ;;  %v1921_v24 = vshrl.u32 %v7177_v5, 16 }
 0x113   : > { %v1490_v55 = vsel %vm1002_vm3, %v1487_v17, %v1489_v31  ;;  %v1492_v12 = vsel %vm1002_vm3, %v1489_v31, %v1491_v16  ;;  %v3572_v16 = vrot.slane %v6929_v57, 3  ;;  %v1933_v57 = vshll.u32 %v7186_v18, 16 }
 0x114   : > { %5847 = vmatpush3.bf16.msra.mxu1 %v6383_v26  ;;  %v3560_v26 = vrot.slane %v6868_v35, 3  ;;  %v7205_v35 = vld [vmem:[%s6471_s10 + $0x90] sm:$0xff]  }
 0x115   : > { %5840 = vmatprep.subr.bf16.mxu1 %v6384_v32 }
 0x116   : > { %5549 = vmatmul.mubr.bf16.gmra.mrb[8].mxu1 %v1478_v30  ;;  %v3559_v30 = vsel %vm3546_vm5, %v3556_v41, %v3558_v1  ;;  %v3563_v36 = vsel %vm3546_vm5, %v3560_v26, %v3562_v62  ;;  %v1935_v62 = vrot.slane %v1933_v57, 2 }
 0x117   : > { %5777 = vmatmul.mubr.bf16.gmra.mrb[28].mxu0 %v3227_v7  ;;  %5552 = vmatprep.mubr.bf16.mxu1 %v1480_v37  ;;  %v1496_v7 = vsel %vm1002_vm3, %v1493_v38, %v1495_v21  ;;  %v3561_v37 = vsel %vm3546_vm5, %v3558_v1, %v3560_v26  ;;  %v1923_v38 = vrot.slane %v1921_v24, 1  ;;  %v3574_v21 = vrot.slane %v6940_v29, 3 }
 0x118   : > { %5780 = vmatprep.mubr.bf16.mxu0 %v3236_v43  ;;  %5848 = vmatpush3.bf16.msra.mxu1 %v6384_v32  ;;  %v1499_v43 = vrot.slane %v7205_v35, 1  ;;  %v1888_v32 = vshll.u32 %v7140_v53, 16  ;;  %v1897_v53 = vshll.u32 %v7155_v60, 16 }
 0x119   : > { %5841 = vmatprep.subr.bf16.mxu1 %v6387_v49 }
 0x11a   : > { %v1500_v19 = vsel %vm1002_vm3, %v1497_v44, %v1499_v43  ;;  %v1899_v3 = vrot.slane %v1897_v53, 2 }
 0x11c   : > { %5849 = vmatpush3.bf16.msra.mxu1 %v6387_v49  ;;  %v1890_v49 = vrot.slane %v1888_v32, 2 }
 0x11d   : > { %5842 = vmatprep.subr.bf16.mxu1 %v6388_v14 }
 0x11e   : > { %5553 = vmatmul.mubr.bf16.gmra.mrb[12].mxu1 %v1482_v51  ;;  %v1501_v51 = vrot.slane %v6355_v46, 1 }
 0x11f   : > { %5781 = vmatmul.mubr.bf16.gmra.mrb[32].mxu0 %v3245_v52  ;;  %5556 = vmatprep.mubr.bf16.mxu1 %v1484_v56  ;;  %v1894_v52 = vshrl.u32 %v7155_v60, 16  ;;  %v1891_v56 = vor.u32 %v1890_v49, %v1887_v6 }
 0x120   : > { %5800 = vmatprep.mubr.bf16.mxu0 %v3549_v33  ;;  %5850 = vmatpush3.bf16.msra.mxu1 %v6388_v14  ;;  %v1903_v33 = vshrl.u32 %v7160_v23, 16  ;;  %v1906_v14 = vshll.u32 %v7160_v23, 16  ;;  %v1502_v61 = vsel %vm1002_vm3, %v1499_v43, %v1501_v51  ;;  %v1912_v23 = vshrl.u32 %v7172_v9, 16 }
 0x121   : > { %5843 = vmatprep.subr.bf16.mxu1 %v6391_v15  ;;  %v1896_v17 = vrot.slane %v1894_v52, 1  ;;  %v3575_v43 = vsel %vm3546_vm5, %v3572_v16, %v3574_v21 }
 0x122   : > { %v1905_v60 = vrot.slane %v1903_v33, 1 }
 0x124   : > { %5851 = vmatpush3.bf16.msra.mxu1 %v6391_v15  ;;  %v3567_v15 = vsel %vm3546_vm5, %v3564_v40, %v3566_v58 }
 0x126   : > { %5557 = vmatmul.mubr.bf16.gmra.mrb[16].mxu1 %v1486_v59  ;;  %v1892_v59 = vsel %vm1803_vm1, %v6632_v34, %v1891_v56  ;;  %v1924_v34 = vshll.u32 %v7177_v5, 16  ;;  %v1930_v5 = vshrl.u32 %v7186_v18, 16 }
 0x127   : > { %5801 = vmatmul.mubr.bf16.vlgmr.msra.gmra.mrb[0].mxu0 %v3551_v25  ;;  %5560 = vmatprep.mubr.bf16.mxu1 %v1488_v4  ;;  %v1908_v25 = vrot.slane %v1906_v14, 2  ;;  %v1900_v4 = vor.u32 %v1899_v3, %v1896_v17 }
 0x128   : > { %5804 = vmatprep.mubr.bf16.mxu0 %v3553_v27  ;;  %v3570_v27 = vrot.slane %v6925_v10, 3  ;;  %v1926_v9 = vrot.slane %v1924_v34, 2  ;;  %v1932_v44 = vrot.slane %v1930_v5, 1 }
 0x129   : > { %v1909_v31 = vor.u32 %v1908_v25, %v1905_v60  ;;  %v1901_v41 = vsel %vm1803_vm1, %v1891_v56, %v1900_v4  ;;  %v6398_v56 = vld [vmem:[%s6471_s10 + $0x98] ss:$0 sps:$4 sm:$0x33]   ;;  %s6141_s10 = smul.u32 288, %s8960_s13 }
 0x12a   : > { %v3573_v1 = vsel %vm3546_vm5, %v3570_v27, %v3572_v16  ;;  %v1927_v26 = vor.u32 %v1926_v9, %v1923_v38  ;;  %v1936_v29 = vor.u32 %v1935_v62, %v1932_v44  ;;  %v1969_v33 = vshll.u32 %v6398_v56, 16 }
 0x12b   : > { %s7874_s8 = scalar_lea.vmem %s8665_s2, %s6141_s10 }
 0x12c   : > { %v1937_v6 = vsel %vm1803_vm1, %v1927_v26, %v1936_v29  ;;  %v1971_v17 = vrot.slane %v1969_v33, 2 }
 0x12e   : > { %5561 = vmatmul.mubr.bf16.gmra.mrb[20].mxu1 %v1490_v55  ;;  %v1914_v55 = vrot.slane %v1912_v23, 1 }
 0x12f   : > { %5805 = vmatmul.mubr.bf16.gmra.mrb[4].mxu0 %v3555_v11  ;;  %5564 = vmatprep.mubr.bf16.mxu1 %v1492_v12  ;;  %v1917_v11 = vrot.slane %v1915_v2, 2  ;;  %v3571_v12 = vsel %vm3546_vm5, %v3568_v0, %v3570_v27 }
 0x130   : > { %5808 = vmatprep.mubr.bf16.mxu0 %v3557_v13  ;;  %v1910_v13 = vsel %vm1803_vm1, %v1900_v4, %v1909_v31 }
 0x131   : > { %v1918_v10 = vor.u32 %v1917_v11, %v1914_v55 }
 0x133   : > { %v1928_v42 = vsel %vm1803_vm1, %v1918_v10, %v1927_v26 }
 0x136   : > { %5565 = vmatmul.mubr.bf16.gmra.mrb[24].mxu1 %v1494_v22  ;;  %v1939_v22 = vshrl.u32 %v7191_v20, 16 }
 0x137   : > { %5809 = vmatmul.mubr.bf16.gmra.mrb[8].mxu0 %v3559_v30  ;;  %5568 = vmatprep.mubr.bf16.mxu1 %v1496_v7  ;;  %v1942_v30 = vshll.u32 %v7191_v20, 16  ;;  %v3576_v7 = vrot.slane %v6948_v54, 3  ;;  %v1948_v20 = vshrl.u32 %v7200_v39, 16  ;;  %v1951_v54 = vshll.u32 %v7200_v39, 16 }
 0x138   : > { %5812 = vmatprep.mubr.bf16.mxu0 %v3561_v37  ;;  %v1919_v37 = vsel %vm1803_vm1, %v1909_v31, %v1918_v10  ;;  %v1941_v32 = vrot.slane %v1939_v22, 1 }
 0x139   : > { %v1944_v18 = vrot.slane %v1942_v30, 2  ;;  %v3577_v40 = vsel %vm3546_vm5, %v3574_v21, %v3576_v7  ;;  %v1950_v49 = vrot.slane %v1948_v20, 1 }
 0x13b   : > { %v1945_v46 = vor.u32 %v1944_v18, %v1941_v32 }
 0x13d   : > { %v1946_v52 = vsel %vm1803_vm1, %v1936_v29, %v1945_v46 }
 0x13e   : > { %5569 = vmatmul.mubr.bf16.gmra.mrb[28].mxu1 %v1498_v45  ;;  %v3578_v45 = vrot.slane %v6962_v48, 3 }
 0x13f   : > { %5813 = vmatmul.mubr.bf16.gmra.mrb[12].mxu0 %v3563_v36  ;;  %5572 = vmatprep.mubr.bf16.mxu1 %v1500_v19  ;;  %v1957_v36 = vshrl.u32 %v7205_v35, 16  ;;  %v1960_v19 = vshll.u32 %v7205_v35, 16  ;;  %v1966_v35 = vshrl.u32 %v6398_v56, 16 }
 0x140   : > { %5816 = vmatprep.mubr.bf16.mxu0 %v3565_v50  ;;  %v1953_v50 = vrot.slane %v1951_v54, 2  ;;  %v3579_v51 = vsel %vm3546_vm5, %v3576_v7, %v3578_v45  ;;  %v3581_v48 = vsel %vm3546_vm5, %v3578_v45, %v3580_v28 }
 0x141   : > { %v1959_v53 = vrot.slane %v1957_v36, 1  ;;  %v1962_v58 = vrot.slane %v1960_v19, 2 }
 0x142   : > { %v1954_v39 = vor.u32 %v1953_v50, %v1950_v49 }
 0x143   : > { %v1963_v14 = vor.u32 %v1962_v58, %v1959_v53 }
 0x144   : > { %v1955_v0 = vsel %vm1803_vm1, %v1945_v46, %v1954_v39 }
 0x145   : > { %v1964_v3 = vsel %vm1803_vm1, %v1954_v39, %v1963_v14 }
 0x146   : > { %5573 = vmatmul.mubr.bf16.gmra.mrb[32].mxu1 %v1502_v61  ;;  %v1968_v61 = vrot.slane %v1966_v35, 1 }
 0x147   : > { %5817 = vmatmul.mubr.bf16.gmra.mrb[16].mxu0 %v3567_v15  ;;  %5608 = vmatprep.mubr.bf16.mxu1 %v1892_v59  ;;  %v3863_v15 = vlaneseq }
 0x148   : > { %5820 = vmatprep.mubr.bf16.mxu0 %v3569_v8  ;;  %v1972_v47 = vor.u32 %v1971_v17, %v1968_v61 }
 0x149   : > { %v7263_v59 = vshrl.u32 %v3863_v15, 7 }
 0x14a   : > { %v1973_v28 = vsel %vm1803_vm1, %v1963_v14, %v1972_v47 }
 0x14b   : > { %v3866_v60 = vadd.s32 16, %v7263_v59  ;;  %v3867_v4 = vadd.s32 24, %v7263_v59  ;;  %v7271_v23 = vmul.u32.u64.low 3817748708, %v7263_v59  ;;  %v7272_v2 = vmul.u32.u64.high 3817748708, %v7263_v59, %v7271_v23 }
 0x14c   : > { %v3868_v55 = vadd.s32 32, %v7263_v59  ;;  %v7303_v44 = vadd.s32 80, %v7263_v59  ;;  %v7330_v36 = vadd.s32 64, %v7263_v59  ;;  %v7353_v39 = vadd.s32 72, %v7263_v59 }
 0x14d   : > { %v7266_v25 = vmul.u32.u64.low 3817748708, %v3866_v60  ;;  %v7267_v8 = vmul.u32.u64.high 3817748708, %v3866_v60, %v7266_v25  ;;  %v7275_v27 = vmul.u32.u64.low 3817748708, %v3867_v4  ;;  %v7276_v31 = vmul.u32.u64.high 3817748708, %v3867_v4, %v7275_v27 }
 0x14e   : > { %5609 = vmatmul.mubr.bf16.vlgmr.msra.gmra.mrb[16].mxu1 %v1901_v41  ;;  %v3870_v41 = vadd.s32 48, %v7263_v59  ;;  %v3906_v11 = vshrl.u32 %v7272_v2, 4  ;;  %v7290_v10 = vmul.u32.u64.low 3817748708, %v3868_v55  ;;  %v7291_v5 = vmul.u32.u64.high 3817748708, %v3868_v55, %v7290_v10 }
 0x14f   : > { %5821 = vmatmul.mubr.bf16.gmra.mrb[20].mxu0 %v3571_v12  ;;  %5612 = vmatprep.mubr.bf16.mxu1 %v1910_v13  ;;  %v3928_v24 = vshrl.u32 %v7267_v8, 4  ;;  %v3871_v13 = vadd.s32 56, %v7263_v59  ;;  %v3939_v38 = vshrl.u32 %v7276_v31, 4  ;;  %v7360_v33 = vadd.s32 112, %v7263_v59 }
 0x150   : > { %5824 = vmatprep.mubr.bf16.mxu0 %v3573_v1  ;;  %v7287_v9 = vmul.u32.u64.low 3817748708, %v3870_v41  ;;  %v7288_v1 = vmul.u32.u64.high 3817748708, %v3870_v41, %v7287_v9  ;;  %v3907_v57 = vmul.u32 18, %v3906_v11  ;;  %v3950_v20 = vshrl.u32 %v7291_v5, 4 }
 0x151   : > { %v3929_v12 = vmul.u32 18, %v3928_v24  ;;  %v7296_v22 = vmul.u32.u64.low 3817748708, %v3871_v13  ;;  %v7297_v30 = vmul.u32.u64.high 3817748708, %v3871_v13, %v7296_v22  ;;  %v7391_v2 = vadd.s32 120, %v7263_v59 }
 0x152   : > { %v3940_v7 = vmul.u32 18, %v3939_v38  ;;  %v7308_v62 = vsub.s32 %v7263_v59, %v3907_v57  ;;  %v3972_v29 = vshrl.u32 %v7288_v1, 4  ;;  %v7398_v24 = vadd.s32 104, %v7263_v59 }
 0x153   : > { %v7293_v21 = vsub.s32 %v3866_v60, %v3929_v12  ;;  %v7322_v54 = vmul.u32.u64.low 3817748708, %v7303_v44  ;;  %v7323_v45 = vmul.u32.u64.high 3817748708, %v7303_v44, %v7322_v54  ;;  %v3983_v19 = vshrl.u32 %v7297_v30, 4 }
 0x154   : > { %v7313_v32 = vsub.s32 %v3867_v4, %v3940_v7  ;;  %vm4296_vm9 = vcmp.ne.s32.totalorder %v7308_v62, 0  ;;  %vm4332_vm10 = vcmp.lt.s32.totalorder %v7308_v62, 0 }
 0x155   : > { %vm4298_vm6 = vcmp.ne.s32.totalorder %v7293_v21, 0  ;;  %vm4334_vm7 = vcmp.lt.s32.totalorder %v7293_v21, 0  ;;  %v7346_v53 = vmul.u32.u64.low 3817748708, %v7330_v36  ;;  %v7347_v58 = vmul.u32.u64.high 3817748708, %v7330_v36, %v7346_v53  ;;  %vm7404_vm15 = vmand %vm4332_vm10, %vm4296_vm9 }
 0x156   : > { %5613 = vmatmul.mubr.bf16.gmra.mrb[20].mxu1 %v1919_v37  ;;  %v7300_v37 = vadd.s32 40, %v7263_v59  ;;  %vm7325_vm8 = vmand %vm4334_vm7, %vm4298_vm6  ;;  %vm4299_vm11 = vcmp.ne.s32.totalorder %v7313_v32, 0  ;;  %vm4335_vm12 = vcmp.lt.s32.totalorder %v7313_v32, 0  ;;  %v7357_v56 = vadd.s32 18, %v7313_v32 }
 0x157   : > { %5825 = vmatmul.mubr.bf16.gmra.mrb[24].mxu0 %v3575_v43  ;;  %5616 = vmatprep.mubr.bf16.mxu1 %v1928_v42  ;;  %v7311_v42 = vadd.s32 18, %v7293_v21  ;;  %v3984_v35 = vmul.u32 18, %v3983_v19  ;;  %v4016_v47 = vshrl.u32 %v7323_v45, 4  ;;  %vm7422_vm2 = vmand %vm4335_vm12, %vm4299_vm11  ;;  %v8713_v45 = vmov 0 }
 0x158   : > { %5828 = vmatprep.mubr.bf16.mxu0 %v3577_v40  ;;  %v7316_v18 = vmul.u32.u64.low 3817748708, %v7300_v37  ;;  %v7317_v40 = vmul.u32.u64.high 3817748708, %v7300_v37, %v7316_v18  ;;  %v7381_v60 = vmul.u32.u64.low 3817748708, %v7353_v39  ;;  %v7382_v25 = vmul.u32.u64.high 3817748708, %v7353_v39, %v7381_v60 }
 0x159   : > { %v7384_v8 = vsub.s32 %v3871_v13, %v3984_v35  ;;  %v7387_v4 = vmul.u32.u64.low 3817748708, %v7360_v33  ;;  %v7388_v23 = vmul.u32.u64.high 3817748708, %v7360_v33, %v7387_v4  ;;  %v4017_v12 = vmul.u32 18, %v4016_v47 }
 0x15a   : > { %v3961_v14 = vshrl.u32 %v7317_v40, 4  ;;  %v3994_v13 = vshrl.u32 %v7347_v58, 4  ;;  %v7442_v1 = vmul.u32.u64.low 3817748708, %v7391_v2  ;;  %v7443_v10 = vmul.u32.u64.high 3817748708, %v7391_v2, %v7442_v1 }
 0x15b   : > { %8699 = vst [vmem:[#allocation3_spill] sm:$0xff] %v7384_v8  ;;  %vm4303_vm6 = vcmp.ne.s32.totalorder %v7384_v8, 0  ;;  %vm4339_vm7 = vcmp.lt.s32.totalorder %v7384_v8, 0  ;;  %v7463_v30 = vmul.u32.u64.low 3817748708, %v7398_v24  ;;  %v7464_v7 = vmul.u32.u64.high 3817748708, %v7398_v24, %v7463_v30 }
 0x15c   : > { %v8710_v18 = vmov 0  ;;  %vm7494_vm11 = vmand %vm4339_vm7, %vm4303_vm6  ;;  %v7499_v19 = vsub.s32 %v7303_v44, %v4017_v12  ;;  %v4005_v35 = vshrl.u32 %v7382_v25, 4  ;;  %v7516_v47 = vadd.s32 128, %v7263_v59 }
 0x15d   : > { %v8714_v45 = vsel %vm7494_vm11, 4294967295, %v8713_v45  ;;  %v7530_v25 = vadd.s32 152, %v7263_v59 }
 0x15e   : > { %5617 = vmatmul.mubr.bf16.gmra.mrb[24].mxu1 %v1937_v6  ;;  %v7336_v6 = vadd.s32 18, %v7308_v62  ;;  %8715 = vst [vmem:[#allocation7_spill] sm:$0xff] %v8714_v45  ;;  %v4006_v1 = vmul.u32 18, %v4005_v35 }
 0x15f   : > { %5829 = vmatmul.mubr.bf16.gmra.mrb[28].mxu0 %v3579_v51  ;;  %5620 = vmatprep.mubr.bf16.mxu1 %v1946_v52  ;;  %v3973_v51 = vmul.u32 18, %v3972_v29  ;;  %v3951_v52 = vmul.u32 18, %v3950_v20 }
 0x160   : > { %5832 = vmatprep.mubr.bf16.mxu0 %v3581_v48  ;;  %v7350_v48 = vadd.s32 88, %v7263_v59 }
 0x161   : > { %v7371_v17 = vsub.s32 %v3870_v41, %v3973_v51  ;;  %v7414_v41 = vadd.s32 144, %v7263_v59  ;;  %v3995_v51 = vmul.u32 18, %v3994_v13  ;;  %v8719_v13 = vmov 0 }
 0x163   : > { %8698 = vst [vmem:[#allocation2_spill] sm:$0xff] %v7371_v17  ;;  %vm4302_vm0 = vcmp.ne.s32.totalorder %v7371_v17, 0  ;;  %vm4338_vm1 = vcmp.lt.s32.totalorder %v7371_v17, 0  ;;  %v7483_v29 = vmul.u32.u64.low 3817748708, %v7414_v41  ;;  %v7484_v20 = vmul.u32.u64.high 3817748708, %v7414_v41, %v7483_v29 }
 0x164   : > { %vm7455_vm9 = vmand %vm4338_vm1, %vm4302_vm0  ;;  %vm4342_vm0 = vcmp.lt.s32.totalorder %v7499_v19, 0  ;;  %v4071_v29 = vshrl.u32 %v7443_v10, 4  ;;  %v7574_v10 = vadd.s32 160, %v7263_v59 }
 0x165   : > { %v4104_v53 = vshrl.u32 %v7484_v20, 4  ;;  %v7588_v20 = vsub.s32 %v7353_v39, %v4006_v1 }
 0x166   : > { %5621 = vmatmul.mubr.bf16.gmra.mrb[28].mxu1 %v1955_v0  ;;  %v7366_v0 = vadd.s32 96, %v7263_v59  ;;  %v4072_v57 = vmul.u32 18, %v4071_v29  ;;  %v7603_v39 = vmul.u32.u64.low 3817748708, %v7574_v10  ;;  %v7604_v1 = vmul.u32.u64.high 3817748708, %v7574_v10, %v7603_v39 }
 0x167   : > { %5833 = vmatmul.mubr.bf16.gmra.mrb[32].mxu0 %v7050_v63  ;;  %5624 = vmatprep.mubr.bf16.mxu1 %v1964_v3  ;;  %v3865_v63 = vadd.s32 8, %v7263_v59  ;;  %v7373_v3 = vsub.s32 %v3868_v55, %v3951_v52  ;;  %vm8740_vm11 = vcmp.lt.s32.totalorder %v7588_v20, 0 }
 0x168   : > { %v7394_v27 = vmul.u32.u64.low 3817748708, %v7366_v0  ;;  %v7395_v31 = vmul.u32.u64.high 3817748708, %v7366_v0, %v7394_v27 }
 0x169   : > { %v7279_v34 = vmul.u32.u64.low 3817748708, %v3865_v63  ;;  %v7280_v16 = vmul.u32.u64.high 3817748708, %v3865_v63, %v7279_v34  ;;  %vm4300_vm3 = vcmp.ne.s32.totalorder %v7373_v3, 0  ;;  %vm4336_vm4 = vcmp.lt.s32.totalorder %v7373_v3, 0 }
 0x16a   : > { %vm7472_vm10 = vmand %vm4336_vm4, %vm4300_vm3  ;;  %v7477_v40 = vadd.s32 18, %v7373_v3  ;;  %v4038_v44 = vshrl.u32 %v7395_v31, 4  ;;  %v7543_v31 = vadd.s32 136, %v7263_v59 }
 0x16b   : > { %v3917_v26 = vshrl.u32 %v7280_v16, 4  ;;  %v7411_v16 = vadd.s32 18, %v7371_v17  ;;  %v8711_v18 = vsel %vm7472_vm10, 4294967295, %v8710_v18 }
 0x16d   : > { %v3918_v43 = vmul.u32 18, %v3917_v26  ;;  %v8706_v26 = vmov 0 }
 0x16e   : > { %5625 = vmatmul.mubr.bf16.gmra.mrb[32].mxu1 %v1973_v28  ;;  %v7377_v28 = vmul.u32.u64.low 3817748708, %v7350_v48  ;;  %v7378_v15 = vmul.u32.u64.high 3817748708, %v7350_v48, %v7377_v28  ;;  %v8707_v26 = vsel %vm7455_vm9, 4294967295, %v8706_v26 }
 0x16f   : > { %v7338_v49 = vsub.s32 %v3865_v63, %v3918_v43  ;;  %v3962_v63 = vmul.u32 18, %v3961_v14  ;;  %v4060_v14 = vshrl.u32 %v7388_v23, 4  ;;  %v7537_v23 = vadd.s32 18, %v7499_v19 }
 0x170   : > { %v4027_v52 = vshrl.u32 %v7378_v15, 4  ;;  %v4049_v15 = vshrl.u32 %v7464_v7, 4  ;;  %v7563_v58 = vmul.u32.u64.low 3817748708, %v7516_v47  ;;  %v7564_v28 = vmul.u32.u64.high 3817748708, %v7516_v47, %v7563_v58 }
 0x171   : > { %vm4297_vm13 = vcmp.ne.s32.totalorder %v7338_v49, 0  ;;  %vm4333_vm14 = vcmp.lt.s32.totalorder %v7338_v49, 0  ;;  %v7369_v61 = vadd.s32 18, %v7338_v49  ;;  %v7460_v22 = vsub.s32 %v7300_v37, %v3962_v63 }
 0x172   : > { %vm7435_vm5 = vmand %vm4333_vm14, %vm4297_vm13  ;;  %v7480_v37 = vadd.s32 18, %v7384_v8  ;;  %vm4306_vm14 = vcmp.ne.s32.totalorder %v7499_v19, 0  ;;  %v7540_v63 = vsub.s32 %v7330_v36, %v3995_v51  ;;  %v4028_v27 = vmul.u32 18, %v4027_v52 }
 0x173   : > { %8708 = vst [vmem:[#allocation4_spill] sm:$0xff] %v7460_v22  ;;  %vm4301_vm12 = vcmp.ne.s32.totalorder %v7460_v22, 0  ;;  %vm4337_vm13 = vcmp.lt.s32.totalorder %v7460_v22, 0  ;;  %v7527_v60 = vadd.s32 18, %v7460_v22  ;;  %v4061_v30 = vmul.u32 18, %v4060_v14 }
 0x174   : > { %8712 = vst [vmem:[#allocation6_spill] sm:$0xff] %v7480_v37  ;;  %vm7551_vm1 = vmand %vm4337_vm13, %vm4301_vm12  ;;  %v7557_v36 = vadd.s32 176, %v7263_v59  ;;  %v4039_v52 = vmul.u32 18, %v4038_v44  ;;  %v7570_v35 = vmul.u32.u64.low 3817748708, %v7530_v25  ;;  %v7571_v14 = vmul.u32.u64.high 3817748708, %v7530_v25, %v7570_v35 }
 0x175   : > { %8716 = vst [vmem:[#allocation8_spill] sm:$0xff] %v7527_v60  ;;  %v8720_v13 = vsel %vm7551_vm1, 4294967295, %v8719_v13  ;;  %v7581_v44 = vsub.s32 %v7350_v48, %v4028_v27  ;;  %v7584_v58 = vmul.u32.u64.low 3817748708, %v7543_v31  ;;  %v7585_v50 = vmul.u32.u64.high 3817748708, %v7543_v31, %v7584_v58  ;;  %vm7640_vm13 = vmand %vm4342_vm0, %vm4306_vm14 }
 0x176   : > { %8721 = vst [vmem:[#allocation11_spill] sm:$0xff] %v8720_v13  ;;  %vm4304_vm3 = vcmp.ne.s32.totalorder %v7540_v63, 0  ;;  %vm4340_vm4 = vcmp.lt.s32.totalorder %v7540_v63, 0  ;;  %v7597_v7 = vsub.s32 %v7360_v33, %v4061_v30  ;;  %v4050_v48 = vmul.u32 18, %v4049_v15 }
 0x177   : > { %8724 = vst [vmem:[#allocation14_spill] sm:$0xff] %v7581_v44  ;;  %v7600_v27 = vsub.s32 %v7366_v0, %v4039_v52  ;;  %v4105_v58 = vmul.u32 18, %v4104_v53  ;;  %v7614_v33 = vadd.s32 18, %v7581_v44  ;;  %v7621_v0 = vadd.s32 18, %v7588_v20  ;;  %vm7656_vm6 = vmand %vm4340_vm4, %vm4304_vm3 }
 0x178   : > { %v7624_v53 = vsub.s32 %v7391_v2, %v4072_v57  ;;  %v7631_v52 = vsub.s32 %v7398_v24, %v4050_v48  ;;  %v4082_v39 = vshrl.u32 %v7564_v28, 4  ;;  %v7645_v57 = vadd.s32 18, %v7597_v7 }
 0x179   : > { %v7649_v24 = vsub.s32 %v7414_v41, %v4105_v58  ;;  %v4115_v28 = vshrl.u32 %v7571_v14, 4  ;;  %v7666_v41 = vadd.s32 184, %v7263_v59  ;;  %vm8735_vm0 = vcmp.ne.s32.totalorder %v7581_v44, 0 }
 0x17a   : > { %vm8736_vm7 = vcmp.lt.s32.totalorder %v7581_v44, 0  ;;  %v8737_v14 = vmov 0  ;;  %vm8739_vm14 = vcmp.ne.s32.totalorder %v7588_v20, 0  ;;  %vm8743_vm4 = vcmp.ne.s32.totalorder %v7597_v7, 0 }
 0x17b   : > { %8731 = vst [vmem:[#allocation19_spill] sm:$0xff] %v7649_v24  ;;  %8734 = vst [vmem:[#allocation20_spill] sm:$0xff] %v7666_v41  ;;  %vm8744_vm3 = vcmp.lt.s32.totalorder %v7597_v7, 0  ;;  %v4116_v8 = vmul.u32 18, %v4115_v28  ;;  %v4126_v37 = vshrl.u32 %v7604_v1, 4  ;;  %v8755_v1 = vmov 0 }
 0x17c   : > { %vm7672_vm12 = vmand %vm8736_vm7, %vm8735_vm0  ;;  %vm8749_vm0 = vcmp.lt.s32.totalorder %v7600_v27, 0  ;;  %v7720_v22 = vmul.u32.u64.low 3817748708, %v7666_v41  ;;  %v7721_v60 = vmul.u32.u64.high 3817748708, %v7666_v41, %v7720_v22 }
 0x17d   : > { %v8738_v14 = vsel %vm7672_vm12, 4294967295, %v8737_v14  ;;  %vm7686_vm1 = vmand %vm8740_vm11, %vm8739_vm14  ;;  %vm8748_vm14 = vcmp.ne.s32.totalorder %v7600_v27, 0  ;;  %vm8754_vm11 = vcmp.lt.s32.totalorder %v7624_v53, 0  ;;  %v8758_v22 = vsel %vm7404_vm15, %v7336_v6, %v7308_v62 }
 0x17e   : > { %vm7699_vm9 = vmand %vm8744_vm3, %vm8743_vm4  ;;  %vm4350_vm3 = vcmp.lt.s32.totalorder %v7649_v24, 0  ;;  %vm8753_vm4 = vcmp.ne.s32.totalorder %v7624_v53, 0  ;;  %v8763_v62 = vmov 0  ;;  %v7768_v6 = vadd.s32 18, %v7649_v24 }
 0x17f   : > { %vm7714_vm7 = vmand %vm8749_vm0, %vm8748_vm14  ;;  %vm7747_vm0 = vcmp.lt.s32.totalorder %v8758_v22, 16  ;;  %vm8762_vm14 = vcmp.lt.s32.totalorder %v7631_v52, 0  ;;  %vm8800_vm12 = vnez %v8707_v26 }
 0x180   : > { %vm7729_vm10 = vmand %vm8754_vm11, %vm8753_vm4  ;;  %vm8761_vm11 = vcmp.ne.s32.totalorder %v7631_v52, 0  ;;  %8765 = vst [vmem:[#allocation24_spill] sm:$0xff] %v7768_v6  ;;  %vm8768_vm4 = vcmp.ne.s32.totalorder %v7649_v24, 0  ;;  %v8807_v24 = vld [vmem:[#allocation8_spill] sm:$0xff] }
 0x181   : > { %v8756_v1 = vsel %vm7729_vm10, 4294967295, %v8755_v1  ;;  %vm7763_vm15 = vmand %vm8762_vm14, %vm8761_vm11  ;;  %vm8787_vm10 = vnez %v8711_v18  ;;  %v7909_v18 = vadd.s32 216, %v7263_v59  ;;  %v8808_v6 = vld [vmem:[#allocation4_spill] sm:$0xff] }
 0x182   : > { %v8764_v62 = vsel %vm7763_vm15, 4294967295, %v8763_v62  ;;  %vm7787_vm11 = vmand %vm4350_vm3, %vm8768_vm4 }
 0x1d9   : > { %v7416_v55 = vpop.f32.mrb[0].mxu1 }
 0x1da   : > { %v7429_v38 = vpop.f32.mrb[1].mxu1 }
 0x1db   : > { %v7445_v5 = vpop.f32.mrb[2].mxu1 }
 0x1dc   : > { %v7466_v43 = vpop.f32.mrb[3].mxu1 }
 0x1dd   : > { %8709 = vst [vmem:[#allocation5_spill] sm:$0xff] %v7466_v43 }
 0x1e1   : > { %v7532_v4 = vpop.f32.mrb[4].mxu1 }
 0x1e2   : > { %8717 = vst [vmem:[#allocation9_spill] sm:$0xff] %v7532_v4  ;;  %v7545_v12 = vpop.f32.mrb[5].mxu1  ;;  %v7704_v4 = vadd.s32 18, %v7631_v52 }
 0x1e3   : > { %8718 = vst [vmem:[#allocation10_spill] sm:$0xff] %v7545_v12  ;;  %v7559_v51 = vpop.f32.mrb[6].mxu1  ;;  %v4083_v12 = vmul.u32 18, %v4082_v39  ;;  %v8750_v39 = vmov 0 }
 0x1e4   : > { %8722 = vst [vmem:[#allocation12_spill] sm:$0xff] %v7559_v51  ;;  %v7566_v54 = vpop.f32.mrb[7].mxu1  ;;  %v7691_v51 = vadd.s32 18, %v7624_v53  ;;  %v8751_v39 = vsel %vm7714_vm7, 4294967295, %v8750_v39 }
 0x1e5   : > { %8723 = vst [vmem:[#allocation13_spill] sm:$0xff] %v7566_v54  ;;  %v7591_v35 = vmul.u32.u64.low 3817748708, %v7557_v36  ;;  %v7592_v54 = vmul.u32.u64.high 3817748708, %v7557_v36, %v7591_v35  ;;  %v7771_v34 = vsub.s32 %v7516_v47, %v4083_v12  ;;  %v7792_v47 = vsub.s32 %v7530_v25, %v4116_v8 }
 0x1e6   : > { %v7609_v35 = vadd.s32 18, %v7540_v63  ;;  %v4127_v12 = vmul.u32 18, %v4126_v37  ;;  %v8779_v25 = vsel %vm7422_vm2, %v7357_v56, %v7313_v32 }
 0x1e7   : > { %v4148_v58 = vshrl.u32 %v7592_v54, 4  ;;  %v8745_v54 = vmov 0  ;;  %8766 = vst [vmem:[#allocation25_spill] sm:$0xff] %v7771_v34  ;;  %vm4348_vm4 = vcmp.lt.s32.totalorder %v7771_v34, 0  ;;  %v7858_v11 = vadd.s32 18, %v7771_v34 }
 0x1e8   : > { %v8746_v54 = vsel %vm7699_vm9, 4294967295, %v8745_v54  ;;  %v7863_v32 = vsub.s32 %v7574_v10, %v4127_v12  ;;  %v7866_v56 = vadd.s32 18, %v7792_v47 }
 0x1e9   : > { %v7606_v29 = vpop.f32.mrb[8].mxu1  ;;  %8783 = vst [vmem:[#allocation30_spill] sm:$0xff] %v7858_v11 }
 0x1ea   : > { %8725 = vst [vmem:[#allocation15_spill] sm:$0xff] %v7606_v29  ;;  %v7616_v15 = vpop.f32.mrb[9].mxu1  ;;  %v7680_v29 = vadd.s32 168, %v7263_v59  ;;  %v7958_v26 = vadd.s32 18, %v7863_v32 }
 0x1eb   : > { %8726 = vst [vmem:[#allocation16_spill] sm:$0xff] %v7616_v15  ;;  %v7626_v30 = vpop.f32.mrb[10].mxu1 }
 0x1ec   : > { %8727 = vst [vmem:[#allocation17_spill] sm:$0xff] %v7626_v30  ;;  %v7634_v15 = vpop.f32.mrb[11].mxu1  ;;  %v4093_v30 = vshrl.u32 %v7585_v50, 4  ;;  %v7734_v13 = vmul.u32.u64.low 3817748708, %v7680_v29  ;;  %v7735_v17 = vmul.u32.u64.high 3817748708, %v7680_v29, %v7734_v13 }
 0x1ed   : > { %8728 = vst [vmem:[#allocation18_spill] sm:$0xff] %v7634_v15  ;;  %v7662_v15 = vadd.s32 18, %v7600_v27  ;;  %v8775_v13 = vsel %vm7435_vm5, %v7369_v61, %v7338_v49  ;;  %vm4312_vm5 = vcmp.ne.s32.totalorder %v7771_v34, 0  ;;  %v8820_v34 = vld [vmem:[#allocation3_spill] sm:$0xff] }
 0x1ee   : > { %v4094_v43 = vmul.u32 18, %v4093_v30  ;;  %v7738_v30 = vadd.s32 208, %v7263_v59  ;;  %vm7808_vm3 = vcmp.lt.s32.totalorder %v8775_v13, 16  ;;  %vm7876_vm2 = vmand %vm4348_vm4, %vm4312_vm5  ;;  %v8784_v13 = vmov 0 }
 0x1ef   : > { %v8785_v13 = vsel %vm7876_vm2, 4294967295, %v8784_v13  ;;  %vm8791_vm4 = vcmp.ne.s32.totalorder %v7792_v47, 0 }
 0x1f0   : > { %v7825_v49 = vsub.s32 %v7543_v31, %v4094_v43  ;;  %v7836_v9 = vmul.u32.u64.low 3817748708, %v7738_v30  ;;  %v7837_v37 = vmul.u32.u64.high 3817748708, %v7738_v30, %v7836_v9  ;;  %8786 = vst [vmem:[#allocation31_spill] sm:$0xff] %v8785_v13  ;;  %v8789_v31 = vmov 0 }
 0x1f1   : > { %v7708_v45 = vpop.f32.mrb[12].mxu1  ;;  %v8830_v43 = vsel %vm7656_vm6, %v7609_v35, %v7540_v63 }
 0x1f2   : > { %8747 = vst [vmem:[#allocation21_spill] sm:$0xff] %v7708_v45  ;;  %v7723_v28 = vpop.f32.mrb[13].mxu1  ;;  %v4149_v45 = vmul.u32 18, %v4148_v58  ;;  %v8772_v58 = vsel %vm7325_vm8, %v7311_v42, %v7293_v21  ;;  %vm7844_vm8 = vcmp.lt.s32.totalorder %v8779_v25, 16  ;;  %v7881_v10 = vadd.s32 18, %v7825_v49  ;;  %v8805_v21 = vld [vmem:[#allocation11_spill] sm:$0xff] }
 0x1f3   : > { %8752 = vst [vmem:[#allocation22_spill] sm:$0xff] %v7723_v28  ;;  %v7740_v41 = vpop.f32.mrb[14].mxu1  ;;  %vm7799_vm14 = vcmp.lt.s32.totalorder %v8772_v58, 16  ;;  %v8788_v25 = vsel %vm8787_vm10, %v7477_v40, %v7373_v3  ;;  %vm8795_vm10 = vcmp.ne.s32.totalorder %v7825_v49, 0  ;;  %vm8796_vm15 = vcmp.lt.s32.totalorder %v7825_v49, 0 }
 0x1f4   : > { %8757 = vst [vmem:[#allocation23_spill] sm:$0xff] %v7740_v41  ;;  %v7773_v22 = vpop.f32.mrb[15].mxu1  ;;  %v8769_v41 = vmov 0  ;;  %v7833_v8 = vsub.s32 %v7557_v36, %v4149_v45  ;;  %v7855_v45 = vadd.s32 192, %v7263_v59  ;;  %v4159_v36 = vshrl.u32 %v7721_v60, 4  ;;  %vm7916_vm7 = vmand %vm8796_vm15, %vm8795_vm10 }
 0x1f5   : > { %8767 = vst [vmem:[#allocation26_spill] sm:$0xff] %v7773_v22  ;;  %v8770_v41 = vsel %vm7787_vm11, 4294967295, %v8769_v41  ;;  %v4137_v60 = vshrl.u32 %v7735_v17, 4  ;;  %vm7892_vm5 = vcmp.lt.s32.totalorder %v8788_v25, 16  ;;  %vm8792_vm11 = vcmp.lt.s32.totalorder %v7792_v47, 0 }
 0x1f6   : > { %8771 = vst [vmem:[#allocation27_spill] sm:$0xff] %v8770_v41  ;;  %8778 = vst [vmem:[#allocation28_spill] sm:$0xff] %v7833_v8  ;;  %v8790_v31 = vsel %vm7892_vm5, 4294967295, %v8789_v31  ;;  %v7921_v25 = vadd.s32 18, %v7833_v8  ;;  %vm8806_vm10 = vnez %v8805_v21 }
 0x1f7   : > { %8782 = vst [vmem:[#allocation29_spill] sm:$0xff] %v7855_v45  ;;  %vm7900_vm9 = vmand %vm8792_vm11, %vm8791_vm4  ;;  %v8809_v41 = vsel %vm8806_vm10, %v8807_v24, %v8808_v6  ;;  %vm8813_vm4 = vcmp.lt.s32.totalorder %v7833_v8, 0  ;;  %v4160_v24 = vmul.u32 18, %v4159_v36  ;;  %v8816_v6 = vld [vmem:[#allocation5_spill] sm:$0xff] }
 0x1f8   : > { %8799 = vst [vmem:[#allocation32_spill] sm:$0xff] %v7921_v25  ;;  %vm7941_vm11 = vcmp.lt.s32.totalorder %v8809_v41, 16  ;;  %v8829_v25 = vld [vmem:[#allocation9_spill] sm:$0xff] }
 0x1fa   : > { %v5802_v58 = vpop.f32.mrb[0].mxu0 }
 0x1fb   : > { %v5852_v12 = vadd.f32 %v5802_v58, %v7416_v55  ;;  %v3684_v9 = vpop.f32.mrb[1].mxu0  ;;  %v7905_v17 = vmul.u32.u64.low 3817748708, %v7855_v45  ;;  %v7906_v55 = vmul.u32.u64.high 3817748708, %v7855_v45, %v7905_v17 }
 0x1fc   : > { %v5853_v3 = vadd.f32 %v3684_v9, %v7429_v38  ;;  %v5803_v40 = vpop.f32.mrb[2].mxu0  ;;  %v8801_v17 = vld [vmem:[#allocation2_spill] sm:$0xff] }
 0x1fd   : > { %4622 = vst [vmem:[%s7874_s8 + $0x10] sm:$0xff] %v5852_v12  ;;  %v5854_v38 = vadd.f32 %v5803_v40, %v7445_v5  ;;  %v3687_v9 = vpop.f32.mrb[3].mxu0  ;;  %v8802_v61 = vsel %vm8800_vm12, %v7411_v16, %v8801_v17  ;;  %vm8812_vm12 = vcmp.ne.s32.totalorder %v7833_v8, 0  ;;  %v4192_v40 = vshrl.u32 %v7837_v37, 4  ;;  %v8817_v17 = vld [vmem:[#allocation7_spill] sm:$0xff]  ;;  %v8819_v5 = vld [vmem:[#allocation6_spill] sm:$0xff] }
 0x1fe   : > { %vm7932_vm15 = vcmp.lt.s32.totalorder %v8802_v61, 16  ;;  %vm7953_vm5 = vmand %vm8813_vm4, %vm8812_vm12  ;;  %v4584_v41 = vsel %vm7747_vm0, %v5853_v3, 0.0  ;;  %4620 = vst [vmem:[%s7874_s8] sm:$0xff] %v5853_v3  ;;  %v5855_v21 = vadd.f32 %v3687_v9, %v8816_v6  ;;  %v4138_v61 = vmul.u32 18, %v4137_v60  ;;  %v8828_v37 = vld [vmem:[#allocation20_spill] sm:$0xff] }
 0x1ff   : > { %4623 = vst [vmem:[%s7874_s8 + $0x18] sm:$0xff] %v5854_v38  ;;  %vm8818_vm4 = vnez %v8817_v17  ;;  %vm8824_vm0 = vcmp.ne.s32.totalorder %v7863_v32, 0  ;;  %vm8825_vm12 = vcmp.lt.s32.totalorder %v7863_v32, 0  ;;  %v4586_v60 = vsel %vm7799_vm14, %v5852_v12, 0.0  ;;  %v8833_v12 = vld [vmem:[#allocation10_spill] sm:$0xff] }
 0x200   : > { %v8821_v11 = vsel %vm8818_vm4, %v8819_v5, %v8820_v34  ;;  %vm7987_vm2 = vmand %vm8825_vm12, %vm8824_vm0  ;;  %v4585_v3 = vsel %vm7808_vm3, %v5855_v21, 0.0  ;;  %4621 = vst [vmem:[%s7874_s8 + $0x8] sm:$0xff] %v5855_v21  ;;  %v8005_v5 = vadd.s32 200, %v7263_v59  ;;  %v4698_v6 = vmul.f32 %v4584_v41, %v4584_v41 }
 0x201   : > { %vm7971_vm10 = vcmp.lt.s32.totalorder %v8821_v11, 16  ;;  %v7992_v11 = vmul.u32.u64.low 3817748708, %v7909_v18  ;;  %v7993_v36 = vmul.u32.u64.high 3817748708, %v7909_v18, %v7992_v11  ;;  %v4656_v17 = vadd.f32 %v4585_v3, %v4584_v41 }
 0x202   : > { %v4699_v28 = vmul.f32 %v4585_v3, %v4585_v3  ;;  %v8008_v11 = vsub.s32 %v8828_v37, %v4160_v24  ;;  %v4587_v22 = vsel %vm7844_vm8, %v5854_v38, 0.0  ;;  %v5806_v44 = vpop.f32.mrb[4].mxu0  ;;  %v8017_v21 = vsub.s32 %v7680_v29, %v4138_v61 }
 0x203   : > { %v4193_v9 = vmul.u32 18, %v4192_v40  ;;  %v4700_v8 = vmul.f32 %v4586_v60, %v4586_v60  ;;  %v4657_v41 = vadd.f32 %v4656_v17, %v4586_v60  ;;  %v5856_v24 = vadd.f32 %v5806_v44, %v8829_v25  ;;  %v3700_v37 = vpop.f32.mrb[5].mxu0  ;;  %v8834_v17 = vld [vmem:[#allocation12_spill] sm:$0xff] }
 0x204   : > { %v4734_v3 = vadd.f32 %v4699_v28, %v4698_v6  ;;  %vm8025_vm14 = vcmp.lt.s32.totalorder %v8830_v43, 16  ;;  %v5857_v29 = vadd.f32 %v3700_v37, %v8833_v12  ;;  %v5807_v61 = vpop.f32.mrb[6].mxu0  ;;  %v4170_v40 = vshrl.u32 %v7906_v55, 4  ;;  %v8842_v12 = vld [vmem:[#allocation13_spill] sm:$0xff] }
 0x205   : > { %v8032_v28 = vmul.u32.u64.low 3817748708, %v8005_v5  ;;  %v8033_v60 = vmul.u32.u64.high 3817748708, %v8005_v5, %v8032_v28  ;;  %v4701_v25 = vmul.f32 %v4587_v22, %v4587_v22  ;;  %4626 = vst [vmem:[%s7874_s8 + $0x30] sm:$0xff] %v5856_v24  ;;  %v4658_v48 = vadd.f32 %v4657_v41, %v4587_v22  ;;  %v3703_v35 = vpop.f32.mrb[7].mxu0 }
 0x206   : > { %v4735_v6 = vadd.f32 %v4734_v3, %v4700_v8  ;;  %v5858_v63 = vadd.f32 %v5807_v61, %v8834_v17  ;;  %v8835_v44 = vsel %vm7640_vm13, %v7537_v23, %v7499_v19  ;;  %v8838_v8 = vsel %vm7686_vm1, %v7621_v0, %v7588_v20  ;;  %4624 = vst [vmem:[%s7874_s8 + $0x20] sm:$0xff] %v5857_v29  ;;  %v8844_v20 = vld [vmem:[#allocation14_spill] sm:$0xff] }
 0x207   : > { %vm8042_vm6 = vcmp.lt.s32.totalorder %v8835_v44, 16  ;;  %vm8051_vm3 = vcmp.lt.s32.totalorder %v8838_v8, 16  ;;  %vm8841_vm8 = vnez %v8790_v31  ;;  %v5859_v19 = vadd.f32 %v3703_v35, %v8842_v12 }
 0x208   : > { %v4588_v2 = vsel %vm8841_vm8, %v5857_v29, 0.0  ;;  %v8060_v23 = vadd.s32 18, %v8008_v11  ;;  %v8063_v41 = vadd.s32 240, %v7263_v59  ;;  %v4736_v37 = vadd.f32 %v4735_v6, %v4701_v25  ;;  %4627 = vst [vmem:[%s7874_s8 + $0x38] sm:$0xff] %v5858_v63 }
 0x209   : > { %v4659_v50 = vadd.f32 %v4658_v48, %v4588_v2  ;;  %v4702_v3 = vmul.f32 %v4588_v2, %v4588_v2  ;;  %vm8843_vm1 = vnez %v8738_v14  ;;  %v8076_v43 = vadd.s32 224, %v7263_v59  ;;  %4625 = vst [vmem:[%s7874_s8 + $0x28] sm:$0xff] %v5859_v19 }
 0x20a   : > { %v8845_v0 = vsel %vm8843_vm1, %v7614_v33, %v8844_v20  ;;  %v4590_v29 = vsel %vm7932_vm15, %v5856_v24, 0.0  ;;  %v4589_v61 = vsel %vm7941_vm11, %v5859_v19, 0.0  ;;  %v8084_v28 = vadd.s32 18, %v8017_v21  ;;  %v5810_v46 = vpop.f32.mrb[8].mxu0 }
 0x20b   : > { %vm8071_vm13 = vcmp.lt.s32.totalorder %v8845_v0, 16  ;;  %v8087_v14 = vsub.s32 %v7738_v30, %v4193_v9  ;;  %v4737_v33 = vadd.f32 %v4736_v37, %v4702_v3  ;;  %v4660_v25 = vadd.f32 %v4659_v50, %v4589_v61  ;;  %v8848_v30 = vld [vmem:[#allocation15_spill] sm:$0xff]  ;;  %v3716_v12 = vpop.f32.mrb[9].mxu0 }
 0x20c   : > { %v4703_v6 = vmul.f32 %v4589_v61, %v4589_v61  ;;  %v4171_v48 = vmul.u32 18, %v4170_v40  ;;  %v4591_v17 = vsel %vm7971_vm10, %v5858_v63, 0.0  ;;  %v4203_v24 = vshrl.u32 %v7993_v36, 4  ;;  %v8853_v36 = vld [vmem:[#allocation16_spill] sm:$0xff]  ;;  %v5811_v19 = vpop.f32.mrb[10].mxu0 }
 0x20d   : > { %v8093_v45 = vmul.u32.u64.low 3817748708, %v8063_v41  ;;  %v8094_v35 = vmul.u32.u64.high 3817748708, %v8063_v41, %v8093_v45  ;;  %v4704_v44 = vmul.f32 %v4590_v29, %v4590_v29  ;;  %v4661_v8 = vadd.f32 %v4660_v25, %v4590_v29  ;;  %v8854_v29 = vld [vmem:[#allocation17_spill] sm:$0xff] }
 0x20e   : > { %v4738_v2 = vadd.f32 %v4737_v33, %v4703_v6  ;;  %v5860_v9 = vadd.f32 %v5810_v46, %v8848_v30  ;;  %vm8849_vm11 = vnez %v8751_v39  ;;  %v5861_v63 = vadd.f32 %v3716_v12, %v8853_v36 }
 0x20f   : > { %v8850_v13 = vsel %vm8849_vm11, %v7662_v15, %v7600_v27  ;;  %v4181_v50 = vshrl.u32 %v8033_v60, 4  ;;  %v8109_v3 = vmul.u32.u64.low 3817748708, %v8076_v43  ;;  %v8110_v37 = vmul.u32.u64.high 3817748708, %v8076_v43, %v8109_v3  ;;  %v3719_v15 = vpop.f32.mrb[11].mxu0 }
 0x210   : > { %vm8102_vm15 = vcmp.lt.s32.totalorder %v8850_v13, 16  ;;  %v4705_v20 = vmul.f32 %v4591_v17, %v4591_v17  ;;  %v4739_v0 = vadd.f32 %v4738_v2, %v4704_v44  ;;  %4630 = vst [vmem:[%s7874_s8 + $0x50] sm:$0xff] %v5860_v9  ;;  %v4662_v39 = vadd.f32 %v4661_v8, %v4591_v17  ;;  %4628 = vst [vmem:[%s7874_s8 + $0x40] sm:$0xff] %v5861_v63 }
 0x211   : > { %v5862_v27 = vadd.f32 %v5811_v19, %v8854_v29  ;;  %vm8855_vm4 = vnez %v8746_v54  ;;  %vm8859_vm0 = vnez %v8764_v62  ;;  %v4592_v6 = vsel %vm8025_vm14, %v5861_v63, 0.0  ;;  %v8863_v54 = vld [vmem:[#allocation18_spill] sm:$0xff] }
 0x212   : > { %v8856_v61 = vsel %vm8855_vm4, %v7645_v57, %v7597_v7  ;;  %v8860_v60 = vsel %vm8859_vm0, %v7704_v4, %v7631_v52  ;;  %v5863_v7 = vadd.f32 %v3719_v15, %v8863_v54  ;;  %vm4319_vm8 = vcmp.ne.s32.totalorder %v8008_v11, 0  ;;  %v5814_v22 = vpop.f32.mrb[12].mxu0 }
 0x213   : > { %vm8119_vm10 = vcmp.lt.s32.totalorder %v8856_v61, 16  ;;  %vm8128_vm12 = vcmp.lt.s32.totalorder %v8860_v60, 16  ;;  %v4204_v57 = vmul.u32 18, %v4203_v24  ;;  %v8139_v62 = vadd.s32 248, %v7263_v59  ;;  %4631 = vst [vmem:[%s7874_s8 + $0x58] sm:$0xff] %v5862_v27 }
 0x214   : > { %v4663_v4 = vadd.f32 %v4662_v39, %v4592_v6  ;;  %v4706_v52 = vmul.f32 %v4592_v6, %v4592_v6  ;;  %v4740_v17 = vadd.f32 %v4739_v0, %v4705_v20  ;;  %vm8864_vm11 = vnez %v8756_v1  ;;  %4629 = vst [vmem:[%s7874_s8 + $0x48] sm:$0xff] %v5863_v7  ;;  %v3732_v20 = vpop.f32.mrb[13].mxu0  ;;  %v8870_v0 = vld [vmem:[#allocation22_spill] sm:$0xff]  ;;  %v8871_v6 = vld [vmem:[#allocation23_spill] sm:$0xff] }
 0x215   : > { %v8865_v38 = vsel %vm8864_vm11, %v7691_v51, %v7624_v53  ;;  %vm4317_vm4 = vcmp.ne.s32.totalorder %v8017_v21, 0  ;;  %vm4353_vm0 = vcmp.lt.s32.totalorder %v8017_v21, 0  ;;  %v8154_v24 = vadd.s32 232, %v7263_v59  ;;  %v8868_v51 = vld [vmem:[#allocation29_spill] sm:$0xff]  ;;  %v5815_v31 = vpop.f32.mrb[14].mxu0 }
 0x216   : > { %vm8147_vm14 = vcmp.lt.s32.totalorder %v8865_v38, 16  ;;  %v4594_v45 = vsel %vm8042_vm6, %v5860_v9, 0.0  ;;  %v4593_v1 = vsel %vm8051_vm3, %v5863_v7, 0.0  ;;  %vm4322_vm11 = vcmp.ne.s32.totalorder %v8087_v14, 0  ;;  %v3735_v7 = vpop.f32.mrb[15].mxu0 }
 0x217   : > { %v8164_v53 = vsub.s32 %v8868_v51, %v4171_v48  ;;  %v4182_v44 = vmul.u32 18, %v4181_v50  ;;  %v4741_v8 = vadd.f32 %v4740_v17, %v4706_v52  ;;  %v4664_v2 = vadd.f32 %v4663_v4, %v4593_v1  ;;  %v8869_v50 = vld [vmem:[#allocation21_spill] sm:$0xff]  ;;  %v8872_v4 = vld [vmem:[#allocation26_spill] sm:$0xff] }
 0x218   : > { %v4707_v30 = vmul.f32 %v4593_v1, %v4593_v1  ;;  %v8167_v12 = vadd.s32 272, %v7263_v59  ;;  %v4595_v55 = vsel %vm8071_vm13, %v5862_v27, 0.0  ;;  %v8172_v9 = vsub.s32 %v7909_v18, %v4204_v57 }
 0x219   : > { %v8175_v13 = vmul.u32.u64.low 3817748708, %v8139_v62  ;;  %v8176_v36 = vmul.u32.u64.high 3817748708, %v8139_v62, %v8175_v13  ;;  %v4708_v48 = vmul.f32 %v4594_v45, %v4594_v45  ;;  %v4665_v63 = vadd.f32 %v4664_v2, %v4594_v45  ;;  %v8876_v2 = vld [vmem:[#allocation31_spill] sm:$0xff] }
 0x21a   : > { %v4742_v19 = vadd.f32 %v4741_v8, %v4707_v30  ;;  %v5864_v3 = vadd.f32 %v5814_v22, %v8869_v50  ;;  %v5865_v39 = vadd.f32 %v3732_v20, %v8870_v0  ;;  %v8181_v29 = vsub.s32 %v8005_v5, %v4182_v44  ;;  %v5818_v25 = vpop.f32.mrb[16].mxu0  ;;  %v8878_v30 = vld [vmem:[#allocation30_spill] sm:$0xff] }
 0x21b   : > { %v4236_v18 = vshrl.u32 %v8094_v35, 4  ;;  %v4214_v27 = vshrl.u32 %v8110_v37, 4  ;;  %v4709_v15 = vmul.f32 %v4595_v55, %v4595_v55  ;;  %v4666_v60 = vadd.f32 %v4665_v63, %v4595_v55  ;;  %v8879_v55 = vld [vmem:[#allocation25_spill] sm:$0xff]  ;;  %v3748_v20 = vpop.f32.mrb[17].mxu0 }
 0x21c   : > { %v4743_v61 = vadd.f32 %v4742_v19, %v4708_v48  ;;  %4634 = vst [vmem:[%s7874_s8 + $0x70] sm:$0xff] %v5864_v3  ;;  %v5866_v54 = vadd.f32 %v5815_v31, %v8871_v6  ;;  %v4596_v57 = vsel %vm8102_vm15, %v5865_v39, 0.0  ;;  %4632 = vst [vmem:[%s7874_s8 + $0x60] sm:$0xff] %v5865_v39  ;;  %v5867_v5 = vadd.f32 %v3735_v7, %v8872_v4  ;;  %v5819_v39 = vpop.f32.mrb[18].mxu0  ;;  %v8888_v31 = vld [vmem:[#allocation27_spill] sm:$0xff] }
 0x21d   : > { %v8192_v52 = vmul.u32.u64.low 3817748708, %v8154_v24  ;;  %v8193_v17 = vmul.u32.u64.high 3817748708, %v8154_v24, %v8192_v52  ;;  %v4667_v35 = vadd.f32 %v4666_v60, %v4596_v57  ;;  %v4710_v37 = vmul.f32 %v4596_v57, %v4596_v57 }
 0x21e   : > { %v4744_v38 = vadd.f32 %v4743_v61, %v4709_v15  ;;  %4635 = vst [vmem:[%s7874_s8 + $0x78] sm:$0xff] %v5866_v54  ;;  %vm4320_vm6 = vcmp.ne.s32.totalorder %v8164_v53, 0  ;;  %v4598_v45 = vsel %vm8119_vm10, %v5864_v3, 0.0  ;;  %v4597_v40 = vsel %vm8128_vm12, %v5867_v5, 0.0  ;;  %4633 = vst [vmem:[%s7874_s8 + $0x68] sm:$0xff] %v5867_v5  ;;  %v8890_v15 = vld [vmem:[#allocation24_spill] sm:$0xff] }
 0x21f   : > { %vm4356_vm3 = vcmp.lt.s32.totalorder %v8164_v53, 0  ;;  %v4668_v51 = vadd.f32 %v4667_v35, %v4597_v40  ;;  %v4711_v44 = vmul.f32 %v4597_v40, %v4597_v40  ;;  %vm8873_vm15 = vcmp.lt.s32.totalorder %v8008_v11, 0  ;;  %v3751_v5 = vpop.f32.mrb[19].mxu0 }
 0x220   : > { %v4745_v1 = vadd.f32 %v4744_v38, %v4710_v37  ;;  %vm8208_vm1 = vmand %vm8873_vm15, %vm4319_vm8  ;;  %vm4359_vm10 = vcmp.lt.s32.totalorder %v8172_v9, 0  ;;  %v4599_v33 = vsel %vm8147_vm14, %v5866_v54, 0.0  ;;  %vm8877_vm12 = vnez %v8876_v2 }
 0x221   : > { %v8880_v22 = vsel %vm8877_vm12, %v8878_v30, %v8879_v55  ;;  %vm8228_vm8 = vmand %vm4353_vm0, %vm4317_vm4  ;;  %v4237_v46 = vmul.u32 18, %v4236_v18  ;;  %v4215_v63 = vmul.u32 18, %v4214_v27  ;;  %v4712_v19 = vmul.f32 %v4598_v45, %v4598_v45  ;;  %v8891_v18 = vld [vmem:[#allocation19_spill] sm:$0xff] }
 0x222   : > { %vm8220_vm13 = vcmp.lt.s32.totalorder %v8880_v22, 16  ;;  %v4669_v50 = vadd.f32 %v4668_v51, %v4598_v45  ;;  %v4746_v3 = vadd.f32 %v4745_v1, %v4711_v44  ;;  %vm8885_vm15 = vcmp.lt.s32.totalorder %v8087_v14, 0  ;;  %v5822_v55 = vpop.f32.mrb[20].mxu0 }
 0x223   : > { %vm8237_vm12 = vmand %vm8885_vm15, %vm4322_vm11  ;;  %vm4357_vm4 = vcmp.lt.s32.totalorder %v8181_v29, 0  ;;  %vm8889_vm0 = vnez %v8888_v31  ;;  %v8895_v60 = vsel %vm7916_vm7, %v7881_v10, %v7825_v49  ;;  %v8261_v54 = vadd.s32 18, %v8087_v14  ;;  %v8913_v31 = vld [vmem:[#allocation28_spill] sm:$0xff] }
 0x224   : > { %v8892_v27 = vsel %vm8889_vm0, %v8890_v15, %v8891_v18  ;;  %vm8256_vm11 = vcmp.lt.s32.totalorder %v8895_v60, 16  ;;  %vm8267_vm15 = vmand %vm4356_vm3, %vm4320_vm6  ;;  %v8272_v58 = vadd.s32 18, %v8164_v53  ;;  %v8275_v49 = vadd.s32 18, %v8172_v9 }
 0x225   : > { %vm8247_vm14 = vcmp.lt.s32.totalorder %v8892_v27, 16  ;;  %v4247_v10 = vshrl.u32 %v8176_v36, 4  ;;  %v4713_v57 = vmul.f32 %v4599_v33, %v4599_v33  ;;  %v4747_v4 = vadd.f32 %v4746_v3, %v4712_v19  ;;  %v8912_v3 = vld [vmem:[#allocation32_spill] sm:$0xff] }
 0x226   : > { %v4670_v52 = vadd.f32 %v4669_v50, %v4599_v33  ;;  %vm8900_vm7 = vcmp.ne.s32.totalorder %v8172_v9, 0  ;;  %v8287_v37 = vadd.s32 18, %v8181_v29  ;;  %v8903_v36 = vsel %vm7900_vm9, %v7866_v56, %v7792_v47  ;;  %v5610_v33 = vpop.f32.mrb[16].mxu1 }
 0x227   : > { %vm8282_vm6 = vmand %vm4359_vm10, %vm8900_vm7  ;;  %vm8294_vm3 = vcmp.lt.s32.totalorder %v8903_v36, 16  ;;  %v4463_v45 = vsel %vm8208_vm1, %v8060_v23, %v8008_v11  ;;  %vm8906_vm10 = vcmp.ne.s32.totalorder %v8181_v29, 0  ;;  %v8311_v42 = vsub.s32 %v8063_v41, %v4237_v46  ;;  %v2138_v22 = vpop.f32.mrb[17].mxu1 }
 0x228   : > { %vm8306_vm0 = vmand %vm4357_vm4, %vm8906_vm10  ;;  %v8314_v47 = vsub.s32 %v8076_v43, %v4215_v63  ;;  %v8317_v56 = vadd.s32 256, %v7263_v59  ;;  %v4748_v1 = vadd.f32 %v4747_v4, %v4713_v57  ;;  %v4225_v11 = vshrl.u32 %v8193_v17, 4  ;;  %v5611_v46 = vpop.f32.mrb[18].mxu1 }
 0x229   : > { %v8321_v23 = vmul.u32.u64.low 3817748708, %v8167_v12  ;;  %v8322_v51 = vmul.u32.u64.high 3817748708, %v8167_v12, %v8321_v23  ;;  %v4461_v44 = vsel %vm8228_vm8, %v8084_v28, %v8017_v21  ;;  %v4466_v41 = vsel %vm8237_vm12, %v8261_v54, %v8087_v14  ;;  %v2141_v50 = vpop.f32.mrb[19].mxu1 }
 0x22a   : > { %v4248_v43 = vmul.u32 18, %v4247_v10  ;;  %v8333_v8 = vadd.s32 280, %v7263_v59  ;;  %v4464_v17 = vsel %vm8267_vm15, %v8272_v58, %v8164_v53  ;;  %v4467_v21 = vsel %vm8282_vm6, %v8275_v49, %v8172_v9 }
 0x22b   : > { %v4465_v28 = vsel %vm8306_vm0, %v8287_v37, %v8181_v29  ;;  %v8348_v2 = vadd.s32 264, %v7263_v59  ;;  %v5868_v30 = vadd.f32 %v5818_v25, %v5610_v33  ;;  %v8909_v53 = vsel %vm7987_vm2, %v7958_v26, %v7863_v32  ;;  %v3764_v25 = vpop.f32.mrb[21].mxu0 }
 0x22c   : > { %vm8355_vm9 = vcmp.lt.s32.totalorder %v8909_v53, 16  ;;  %vm4326_vm1 = vcmp.ne.s32.totalorder %v8311_v42, 0  ;;  %vm4362_vm8 = vcmp.lt.s32.totalorder %v8311_v42, 0  ;;  %vm4324_vm4 = vcmp.ne.s32.totalorder %v8314_v47, 0  ;;  %v5823_v19 = vpop.f32.mrb[22].mxu0 }
 0x22d   : > { %vm4360_vm15 = vcmp.lt.s32.totalorder %v8314_v47, 0  ;;  %v5869_v59 = vadd.f32 %v3748_v20, %v2138_v22  ;;  %v4226_v34 = vmul.u32 18, %v4225_v11  ;;  %4638 = vst [vmem:[%s7874_s8 + $0x90] sm:$0xff] %v5868_v30  ;;  %v5870_v26 = vadd.f32 %v5819_v39, %v5611_v46  ;;  %v3767_v58 = vpop.f32.mrb[23].mxu0  ;;  %vm8466_vm12 = vmand %vm4362_vm8, %vm4326_vm1 }
 0x22e   : > { %v8364_v63 = vmul.u32.u64.low 3817748708, %v8317_v56  ;;  %v8365_v32 = vmul.u32.u64.high 3817748708, %v8317_v56, %v8364_v63  ;;  %v8914_v15 = vsel %vm7953_vm5, %v8912_v3, %v8913_v31  ;;  %vm8377_vm7 = vcmp.lt.s32.totalorder %v4461_v44, 16  ;;  %vm8397_vm5 = vmand %vm4360_vm15, %vm4324_vm4  ;;  %v5826_v46 = vpop.f32.mrb[24].mxu0 }
 0x22f   : > { %vm8373_vm2 = vcmp.lt.s32.totalorder %v8914_v15, 16  ;;  %v8382_v27 = vadd.s32 18, %v8311_v42  ;;  %v8385_v39 = vadd.s32 18, %v8314_v47  ;;  %v8388_v16 = vsub.s32 %v8139_v62, %v4248_v43  ;;  %4636 = vst [vmem:[%s7874_s8 + $0x80] sm:$0xff] %v5869_v59  ;;  %4639 = vst [vmem:[%s7874_s8 + $0x98] sm:$0xff] %v5870_v26 }
 0x230   : > { %v4600_v60 = vsel %vm8220_vm13, %v5869_v59, 0.0  ;;  %v5871_v7 = vadd.f32 %v3751_v5, %v2141_v50  ;;  %v8402_v57 = vmul.u32.u64.low 3817748708, %v8348_v2  ;;  %v8403_v4 = vmul.u32.u64.high 3817748708, %v8348_v2, %v8402_v57 }
 0x231   : > { %v4671_v62 = vadd.f32 %v4670_v52, %v4600_v60  ;;  %v4714_v36 = vmul.f32 %v4600_v60, %v4600_v60  ;;  %vm8406_vm10 = vcmp.lt.s32.totalorder %v4463_v45, 16  ;;  %v4602_v23 = vsel %vm8247_vm14, %v5868_v30, 0.0  ;;  %v5614_v30 = vpop.f32.mrb[20].mxu1 }
 0x232   : > { %v8411_v5 = vmul.u32.u64.low 3817748708, %v8333_v8  ;;  %v8412_v11 = vmul.u32.u64.high 3817748708, %v8333_v8, %v8411_v5  ;;  %v4601_v44 = vsel %vm8256_vm11, %v5871_v7, 0.0  ;;  %4637 = vst [vmem:[%s7874_s8 + $0x88] sm:$0xff] %v5871_v7  ;;  %v8420_v43 = vsub.s32 %v8154_v24, %v4226_v34  ;;  %v2154_v34 = vpop.f32.mrb[21].mxu1 }
 0x233   : > { %v4280_v52 = vshrl.u32 %v8322_v51, 4  ;;  %v4749_v45 = vadd.f32 %v4748_v1, %v4714_v36  ;;  %v4672_v33 = vadd.f32 %v4671_v62, %v4601_v44  ;;  %v4715_v22 = vmul.f32 %v4601_v44, %v4601_v44  ;;  %v5615_v50 = vpop.f32.mrb[22].mxu1 }
 0x234   : > { %v4468_v53 = vsel %vm8397_vm5, %v8385_v39, %v8314_v47  ;;  %v4603_v61 = vsel %vm8294_vm3, %v5870_v26, 0.0  ;;  %vm4327_vm13 = vcmp.ne.s32.totalorder %v8388_v16, 0  ;;  %vm4363_vm14 = vcmp.lt.s32.totalorder %v8388_v16, 0  ;;  %v3780_v26 = vpop.f32.mrb[25].mxu0 }
 0x235   : > { %v8432_v24 = vadd.s32 18, %v8388_v16  ;;  %v4716_v6 = vmul.f32 %v4602_v23, %v4602_v23  ;;  %v4673_v1 = vadd.f32 %v4672_v33, %v4602_v23  ;;  %v4750_v51 = vadd.f32 %v4749_v45, %v4715_v22  ;;  %v5827_v57 = vpop.f32.mrb[26].mxu0  ;;  %vm8486_vm1 = vmand %vm4363_vm14, %vm4327_vm13 }
 0x236   : > { %v5872_v59 = vadd.f32 %v5822_v55, %v5614_v30  ;;  %vm8434_vm11 = vcmp.lt.s32.totalorder %v4464_v17, 16  ;;  %v5873_v38 = vadd.f32 %v3764_v25, %v2154_v34  ;;  %vm4325_vm3 = vcmp.ne.s32.totalorder %v8420_v43, 0  ;;  %v2157_v17 = vpop.f32.mrb[23].mxu1  ;;  %v3783_v14 = vpop.f32.mrb[27].mxu0 }
 0x237   : > { %v4281_v3 = vmul.u32 18, %v4280_v52  ;;  %v4258_v31 = vshrl.u32 %v8365_v32, 4  ;;  %v4717_v15 = vmul.f32 %v4603_v61, %v4603_v61  ;;  %v4751_v60 = vadd.f32 %v4750_v51, %v4716_v6  ;;  %v5618_v20 = vpop.f32.mrb[24].mxu1  ;;  %v5830_v22 = vpop.f32.mrb[28].mxu0 }
 0x238   : > { %4642 = vst [vmem:[%s7874_s8 + $0xb0] sm:$0xff] %v5872_v59  ;;  %v4674_v7 = vadd.f32 %v4673_v1, %v4603_v61  ;;  %v5874_v55 = vadd.f32 %v5823_v19, %v5615_v50  ;;  %vm8446_vm4 = vcmp.lt.s32.totalorder %v4466_v41, 16  ;;  %vm8455_vm15 = vcmp.lt.s32.totalorder %v4465_v28, 16  ;;  %4640 = vst [vmem:[%s7874_s8 + $0xa0] sm:$0xff] %v5873_v38  ;;  %v2170_v61 = vpop.f32.mrb[25].mxu1 }
 0x239   : > { %v4604_v19 = vsel %vm8355_vm9, %v5873_v38, 0.0  ;;  %v5875_v0 = vadd.f32 %v3767_v58, %v2157_v17  ;;  %vm4361_vm0 = vcmp.lt.s32.totalorder %v8420_v43, 0  ;;  %v4269_v29 = vshrl.u32 %v8403_v4, 4  ;;  %v5619_v30 = vpop.f32.mrb[26].mxu1 }
 0x23a   : > { %v4675_v37 = vadd.f32 %v4674_v7, %v4604_v19  ;;  %v4718_v40 = vmul.f32 %v4604_v19, %v4604_v19  ;;  %v4752_v41 = vadd.f32 %v4751_v60, %v4717_v15  ;;  %4643 = vst [vmem:[%s7874_s8 + $0xb8] sm:$0xff] %v5874_v55  ;;  %vm8478_vm9 = vcmp.lt.s32.totalorder %v4467_v21, 16  ;;  %vm8509_vm6 = vmand %vm4361_vm0, %vm4325_vm3  ;;  %v2173_v51 = vpop.f32.mrb[27].mxu1 }
 0x23b   : > { %v8491_v58 = vadd.s32 18, %v8420_v43  ;;  %v4606_v35 = vsel %vm8373_vm2, %v5872_v59, 0.0  ;;  %v4605_v9 = vsel %vm8377_vm7, %v5875_v0, 0.0  ;;  %4641 = vst [vmem:[%s7874_s8 + $0xa8] sm:$0xff] %v5875_v0  ;;  %v8499_v49 = vsub.s32 %v8167_v12, %v4281_v3  ;;  %v5622_v17 = vpop.f32.mrb[28].mxu1 }
 0x23c   : > { %v4259_v21 = vmul.u32 18, %v4258_v31  ;;  %v4753_v4 = vadd.f32 %v4752_v41, %v4718_v40  ;;  %v4676_v62 = vadd.f32 %v4675_v37, %v4605_v9  ;;  %v4719_v36 = vmul.f32 %v4605_v9, %v4605_v9 }
 0x23d   : > { %v4470_v5 = vsel %vm8466_vm12, %v8382_v27, %v8311_v42  ;;  %v4607_v12 = vsel %vm8406_vm10, %v5874_v55, 0.0  ;;  %v4471_v23 = vsel %vm8486_vm1, %v8432_v24, %v8388_v16  ;;  %v4291_v44 = vshrl.u32 %v8412_v11, 4  ;;  %v3796_v11 = vpop.f32.mrb[29].mxu0 }
 0x23e   : > { %v4270_v42 = vmul.u32 18, %v4269_v29  ;;  %v4720_v27 = vmul.f32 %v4606_v35, %v4606_v35  ;;  %v4677_v52 = vadd.f32 %v4676_v62, %v4606_v35  ;;  %v4754_v45 = vadd.f32 %v4753_v4, %v4719_v36  ;;  %v5831_v1 = vpop.f32.mrb[30].mxu0  ;;  %v2186_v29 = vpop.f32.mrb[29].mxu1 }
 0x23f   : > { %v5876_v33 = vadd.f32 %v5826_v46, %v5618_v20  ;;  %vm8525_vm8 = vcmp.lt.s32.totalorder %v4468_v53, 16  ;;  %v5877_v16 = vadd.f32 %v3780_v26, %v2170_v61  ;;  %v4469_v24 = vsel %vm8509_vm6, %v8491_v58, %v8420_v43  ;;  %v5623_v41 = vpop.f32.mrb[30].mxu1 }
 0x240   : > { %vm4330_vm2 = vcmp.ne.s32.totalorder %v8499_v49, 0  ;;  %v8535_v10 = vsub.s32 %v8317_v56, %v4259_v21  ;;  %v4721_v6 = vmul.f32 %v4607_v12, %v4607_v12  ;;  %v4755_v47 = vadd.f32 %v4754_v45, %v4720_v27  ;;  %v3799_v56 = vpop.f32.mrb[31].mxu0  ;;  %v2189_v36 = vpop.f32.mrb[31].mxu1 }
 0x241   : > { %4646 = vst [vmem:[%s7874_s8 + $0xd0] sm:$0xff] %v5876_v33  ;;  %v4678_v39 = vadd.f32 %v4677_v52, %v4607_v12  ;;  %v5878_v53 = vadd.f32 %v5827_v57, %v5619_v30  ;;  %vm8538_vm7 = vcmp.lt.s32.totalorder %v4470_v5, 16  ;;  %v4608_v43 = vsel %vm8434_vm11, %v5877_v16, 0.0  ;;  %4644 = vst [vmem:[%s7874_s8 + $0xc0] sm:$0xff] %v5877_v16  ;;  %v5834_v54 = vpop.f32.mrb[32].mxu0 }
 0x242   : > { %v5879_v46 = vadd.f32 %v3783_v14, %v2173_v51  ;;  %v4292_v34 = vmul.u32 18, %v4291_v44  ;;  %v8546_v38 = vsub.s32 %v8348_v2, %v4270_v42  ;;  %v4722_v50 = vmul.f32 %v4608_v43, %v4608_v43  ;;  %v3812_v40 = vpop.f32.mrb[33].mxu0 }
 0x243   : > { %v4679_v26 = vadd.f32 %v4678_v39, %v4608_v43  ;;  %v4756_v3 = vadd.f32 %v4755_v47, %v4721_v6  ;;  %4647 = vst [vmem:[%s7874_s8 + $0xd8] sm:$0xff] %v5878_v53  ;;  %vm8549_vm5 = vcmp.lt.s32.totalorder %v4471_v23, 16  ;;  %vm4366_vm10 = vcmp.lt.s32.totalorder %v8499_v49, 0  ;;  %v5835_v62 = vpop.f32.mrb[34].mxu0 }
 0x244   : > { %v4610_v63 = vsel %vm8446_vm4, %v5876_v33, 0.0  ;;  %v4609_v15 = vsel %vm8455_vm15, %v5879_v46, 0.0  ;;  %4645 = vst [vmem:[%s7874_s8 + $0xc8] sm:$0xff] %v5879_v46  ;;  %vm4328_vm13 = vcmp.ne.s32.totalorder %v8535_v10, 0  ;;  %vm4364_vm14 = vcmp.lt.s32.totalorder %v8535_v10, 0  ;;  %vm8588_vm12 = vmand %vm4366_vm10, %vm4330_vm2  ;;  %v3815_v20 = vpop.f32.mrb[35].mxu0 }
 0x245   : > { %v4757_v2 = vadd.f32 %v4756_v3, %v4722_v50  ;;  %v4680_v60 = vadd.f32 %v4679_v26, %v4609_v15  ;;  %v4723_v7 = vmul.f32 %v4609_v15, %v4609_v15  ;;  %v4436_v55 = vadd.s32 18, %v8535_v10  ;;  %vm8578_vm15 = vmand %vm4364_vm14, %vm4328_vm13 }
 0x246   : > { %v4611_v57 = vsel %vm8478_vm9, %v5878_v53, 0.0  ;;  %v8565_v25 = vsub.s32 %v8333_v8, %v4292_v34  ;;  %vm4329_vm11 = vcmp.ne.s32.totalorder %v8546_v38, 0  ;;  %vm4365_vm3 = vcmp.lt.s32.totalorder %v8546_v38, 0 }
 0x247   : > { %v4724_v32 = vmul.f32 %v4610_v63, %v4610_v63  ;;  %v4681_v19 = vadd.f32 %v4680_v60, %v4610_v63  ;;  %v4758_v0 = vadd.f32 %v4757_v2, %v4723_v7  ;;  %v5880_v14 = vadd.f32 %v5830_v22, %v5622_v17  ;;  %vm8601_vm1 = vmand %vm4365_vm3, %vm4329_vm11 }
 0x248   : > { %v5881_v37 = vadd.f32 %v3796_v11, %v2186_v29  ;;  %vm8569_vm4 = vcmp.lt.s32.totalorder %v4469_v24, 16  ;;  %v4438_v8 = vadd.s32 18, %v8499_v49  ;;  %v4437_v58 = vadd.s32 18, %v8546_v38 }
 0x249   : > { %v4725_v35 = vmul.f32 %v4611_v57, %v4611_v57  ;;  %v4759_v9 = vadd.f32 %v4758_v0, %v4724_v32  ;;  %4650 = vst [vmem:[%s7874_s8 + $0xf0] sm:$0xff] %v5880_v14  ;;  %v4682_v21 = vadd.f32 %v4681_v19, %v4611_v57  ;;  %v5882_v4 = vadd.f32 %v5831_v1, %v5623_v41 }
 0x24a   : > { %v4612_v18 = vsel %vm8525_vm8, %v5881_v37, 0.0  ;;  %4648 = vst [vmem:[%s7874_s8 + $0xe0] sm:$0xff] %v5881_v37  ;;  %v5883_v12 = vadd.f32 %v3799_v56, %v2189_v36  ;;  %vm4331_vm0 = vcmp.ne.s32.totalorder %v8565_v25, 0  ;;  %vm4367_vm9 = vcmp.lt.s32.totalorder %v8565_v25, 0 }
 0x24b   : > { %v4683_v44 = vadd.f32 %v4682_v21, %v4612_v18  ;;  %v4726_v42 = vmul.f32 %v4612_v18, %v4612_v18  ;;  %v4760_v27 = vadd.f32 %v4759_v9, %v4725_v35  ;;  %4651 = vst [vmem:[%s7874_s8 + $0xf8] sm:$0xff] %v5882_v4  ;;  %v4472_v52 = vsel %vm8578_vm15, %v4436_v55, %v8535_v10  ;;  %vm8622_vm6 = vmand %vm4367_vm9, %vm4331_vm0  ;;  %v5626_v10 = vpop.f32.mrb[32].mxu1 }
 0x24c   : > { %v4614_v45 = vsel %vm8538_vm7, %v5880_v14, 0.0  ;;  %v4613_v33 = vsel %vm8569_vm4, %v5883_v12, 0.0  ;;  %4649 = vst [vmem:[%s7874_s8 + $0xe8] sm:$0xff] %v5883_v12  ;;  %v4474_v22 = vsel %vm8588_vm12, %v4438_v8, %v8499_v49  ;;  %v4439_v61 = vadd.s32 18, %v8565_v25  ;;  %v2202_v51 = vpop.f32.mrb[33].mxu1 }
 0x24d   : > { %v4761_v13 = vadd.f32 %v4760_v27, %v4726_v42  ;;  %v4684_v16 = vadd.f32 %v4683_v44, %v4613_v33  ;;  %v4727_v11 = vmul.f32 %v4613_v33, %v4613_v33  ;;  %v4473_v24 = vsel %vm8601_vm1, %v4437_v58, %v8546_v38  ;;  %v5627_v46 = vpop.f32.mrb[34].mxu1 }
 0x24e   : > { %v4615_v49 = vsel %vm8549_vm5, %v5882_v4, 0.0  ;;  %vm8631_vm8 = vcmp.lt.s32.totalorder %v4472_v52, 16  ;;  %v4728_v47 = vmul.f32 %v4614_v45, %v4614_v45  ;;  %v5884_v1 = vadd.f32 %v5834_v54, %v5626_v10  ;;  %v2205_v31 = vpop.f32.mrb[35].mxu1 }
 0x24f   : > { %v4685_v39 = vadd.f32 %v4684_v16, %v4614_v45  ;;  %v4762_v53 = vadd.f32 %v4761_v13, %v4727_v11  ;;  %vm8635_vm2 = vcmp.lt.s32.totalorder %v4474_v22, 16  ;;  %v5885_v43 = vadd.f32 %v3812_v40, %v2202_v51 }
 0x250   : > { %v4475_v56 = vsel %vm8622_vm6, %v4439_v61, %v8565_v25  ;;  %vm8642_vm7 = vcmp.lt.s32.totalorder %v4473_v24, 16  ;;  %v4729_v38 = vmul.f32 %v4615_v49, %v4615_v49  ;;  %4654 = vst [vmem:[%s7874_s8 + $0x110] sm:$0xff] %v5884_v1  ;;  %v5886_v3 = vadd.f32 %v5835_v62, %v5627_v46 }
 0x251   : > { %v4763_v26 = vadd.f32 %v4762_v53, %v4728_v47  ;;  %v4686_v50 = vadd.f32 %v4685_v39, %v4615_v49  ;;  %v4616_v63 = vsel %vm8631_vm8, %v5885_v43, 0.0  ;;  %4652 = vst [vmem:[%s7874_s8 + $0x100] sm:$0xff] %v5885_v43  ;;  %v5887_v15 = vadd.f32 %v3815_v20, %v2205_v31 }
 0x252   : > { %v4730_v60 = vmul.f32 %v4616_v63, %v4616_v63  ;;  %vm4511_vm5 = vcmp.lt.s32.totalorder %v4475_v56, 16  ;;  %4655 = vst [vmem:[%s7874_s8 + $0x118] sm:$0xff] %v5886_v3  ;;  %v4618_v55 = vsel %vm8635_vm2, %v5884_v1, 0.0 }
 0x253   : > { %v4687_v2 = vadd.f32 %v4686_v50, %v4616_v63  ;;  %v4764_v7 = vadd.f32 %v4763_v26, %v4729_v38  ;;  %v4617_v57 = vsel %vm8642_vm7, %v5887_v15, 0.0  ;;  %4653 = vst [vmem:[%s7874_s8 + $0x108] sm:$0xff] %v5887_v15  ;;  %v4619_v19 = vsel %vm4511_vm5, %v5886_v3, 0.0 }
 0x254   : > { %v4731_v32 = vmul.f32 %v4617_v57, %v4617_v57  ;;  %v4732_v0 = vmul.f32 %v4618_v55, %v4618_v55  ;;  %v4733_v29 = vmul.f32 %v4619_v19, %v4619_v19 }
 0x255   : > { %v4765_v17 = vadd.f32 %v4764_v7, %v4730_v60  ;;  %v4688_v25 = vadd.f32 %v4687_v2, %v4617_v57 }
 0x257   : > { %v4689_v14 = vadd.f32 %v4688_v25, %v4618_v55  ;;  %v4766_v54 = vadd.f32 %v4765_v17, %v4731_v32 }
 0x259   : > { %v4690_v37 = vadd.f32 %v4689_v14, %v4619_v19  ;;  %v4767_v40 = vadd.f32 %v4766_v54, %v4732_v0 }
 0x25b   : > { %v4691_v41 = vrot.slane %v4690_v37, 4  ;;  %v4768_v28 = vadd.f32 %v4767_v40, %v4733_v29 }
 0x25d   : > { %v4692_v8 = vadd.f32 %v4691_v41, %v4690_v37  ;;  %v4769_v48 = vrot.slane %v4768_v28, 4 }
 0x25f   : > { %v4693_v58 = vrot.slane %v4692_v8, 2  ;;  %v4770_v35 = vadd.f32 %v4769_v48, %v4768_v28 }
 0x261   : > { %v4694_v9 = vadd.f32 %v4693_v58, %v4692_v8  ;;  %v4771_v21 = vrot.slane %v4770_v35, 2 }
 0x263   : > { %v4695_v4 = vrot.slane %v4694_v9, 1  ;;  %v4772_v62 = vadd.f32 %v4771_v21, %v4770_v35 }
 0x265   : > { %v4696_v36 = vadd.f32 %v4695_v4, %v4694_v9  ;;  %v4773_v5 = vrot.slane %v4772_v62, 1 }
 0x267   : > { %4697 = vst [vmem:[%s181_s15] sm:$0x1] %v4696_v36  ;;  %v4774_v18 = vadd.f32 %v4773_v5, %v4772_v62 }
 0x269   : > { %4775 = vst [vmem:[%s181_s15 + $0x1] sm:$0x1] %v4774_v18 }
 0x26a PF: > { %s14_s12 = sadd.s32 1, %s6405_s12  }
 0x26b   : > { %p11_p4 = scmp.ge.s32.totalorder %s14_s12, 4  }
 0x26d   :  { %13 = sbr.rel (!%p11_p4) target bundleno = 1 (0x1), region = 78 }

// kernel: residual_block.4
= control target key start
LH: loop header
LB: loop body
LE: loop exit
PB: predicated region body
PF: predicated region fallthrough
CT: control target
= control target key end

     0   :  { %s7492_s18 = smov 0   ;;  %s9838_s0 = inlined_call_operand.vmem [shape: f32[1,128], index: 0, kind: input, shape index: {}]   ;;  %s9839_s1 = inlined_call_operand.vmem [shape: f32[1,128], index: 1, kind: input, shape index: {}]   ;;  %s9840_s2 = inlined_call_operand.vmem [shape: f32[2,288,128], index: 2, kind: input, shape index: {}]   ;;  %s9841_s3 = inlined_call_operand.vmem [shape: bf16[9,128,128], index: 3, kind: input, shape index: {}]   ;;  %s9842_s4 = inlined_call_operand.vmem [shape: f32[2,288,128], index: 4, kind: output, shape index: {0}]   ;;  %s9843_s5 = inlined_call_operand.vmem [shape: f32[2,2,128], index: 5, kind: output, shape index: {1}]  }
   0x1 LB: > { %s5684_s19 = sadd.s32 4294967295, %s7459_s18   ;;  %p5688_p0 = scmp.ge.s32.totalorder %s7459_s18, 1  ;;  %s7459_s18 = sphi %s7492_s18, %s16_s18  }
   0x2   : > { %p190_p1 = scmp.lt.s32.totalorder %s7459_s18, 3 }
   0x4   : > { %p191_p2 = pnand %p5688_p0, %p190_p1 }
   0x6   : > { %194 = sbr.rel (%p191_p2) target bundleno = 731 (0x2db), region = 36 }
   0xd   : > { %v7262_v0 = vld [vmem:[%s9841_s3 + $0x100] sm:$0xff]   ;;  %p7505_p3 = scmp.lt.s32.totalorder %s5684_s19, 1  ;;  %v7264_v2 = vld [vmem:[%s9841_s3 + $0x108] sm:$0xff]   ;;  %v7461_v3 = vmov 0   ;;  %v237_v5 = vlaneseq  ;;  %v7266_v6 = vld [vmem:[%s9841_s3 + $0x110] sm:$0xff]  }
   0xe   : > { %v7263_v1 = vld [vmem:[%s9841_s3 + $0x40] sm:$0xff]   ;;  %6616 = vmatprep.subr.bf16.mxu0 %v7262_v0  ;;  %889 = vst [vmem:[#allocation2 + $0xc] sm:$0xf] %v7461_v3  ;;  %890 = vst [vmem:[#allocation2 + $0x10] sm:$0xf] %v7461_v3  ;;  %v7265_v4 = vld [vmem:[%s9841_s3 + $0x48] sm:$0xff]  }
   0xf   : > { %891 = vst [vmem:[#allocation2 + $0x14] sm:$0xf] %v7461_v3  ;;  %892 = vst [vmem:[#allocation2 + $0x18] sm:$0xf] %v7461_v3  ;;  %6408 = vmatprep.subr.bf16.mxu1 %v7263_v1  ;;  %6617 = vmatpush3.bf16.msra.mxu0 %v7262_v0  ;;  %v7267_v7 = vld [vmem:[%s9841_s3 + $0x50] sm:$0xff]   ;;  %s10446_s19 = smov (!%p7505_p3, %s5684_s19), 1 }
  0x10   : > { %893 = vst [vmem:[#allocation2 + $0x1c] sm:$0xf] %v7461_v3  ;;  %887 = vst [vmem:[#allocation2 + $0x4] sm:$0xf] %v7461_v3  ;;  %6409 = vmatpush3.bf16.msra.mxu1 %v7263_v1  ;;  %6618 = vmatprep.subr.bf16.mxu0 %v7264_v2  ;;  %v7530_v8 = vshrl.u32 %v237_v5, 7  ;;  %v7268_v9 = vld [vmem:[%s9841_s3 + $0x118] sm:$0xff]  }
  0x11   : > { %888 = vst [vmem:[#allocation2 + $0x8] sm:$0xf] %v7461_v3  ;;  %894 = vst [vmem:[#allocation2 + $0x20] sm:$0xf] %v7461_v3  ;;  %6410 = vmatprep.subr.bf16.mxu1 %v7265_v4  ;;  %v7269_v10 = vld [vmem:[%s9841_s3 + $0x58] sm:$0xff]   ;;  %s7180_s12 = smul.u32 288, %s10446_s19 }
  0x12   : > { %895 = vst [vmem:[#allocation2 + $0x24] sm:$0xf] %v7461_v3  ;;  %896 = vst [vmem:[#allocation2 + $0x28] sm:$0xf] %v7461_v3  ;;  %v7540_v11 = vadd.s32 8, %v7530_v8  ;;  %v7543_v12 = vadd.s32 16, %v7530_v8 }
  0x13   : > { %897 = vst [vmem:[#allocation2 + $0x2c] sm:$0xf] %v7461_v3  ;;  %898 = vst [vmem:[#allocation2 + $0x30] sm:$0xf] %v7461_v3  ;;  %6619 = vmatpush3.bf16.msra.mxu0 %v7264_v2  ;;  %v7270_v13 = vld [vmem:[%s9841_s3 + $0x120] sm:$0xff]   ;;  %v7549_v14 = vadd.s32 24, %v7530_v8  ;;  %s7559_s21 = scalar_lea.vmem %s9840_s2, %s7180_s12  ;;  %s9715_s29 = scalar_lea.vmem %s9842_s4, %s7180_s12 }
  0x14   : > { %899 = vst [vmem:[#allocation2 + $0x34] sm:$0xf] %v7461_v3  ;;  %900 = vst [vmem:[#allocation2 + $0x38] sm:$0xf] %v7461_v3  ;;  %6411 = vmatpush3.bf16.msra.mxu1 %v7265_v4  ;;  %6620 = vmatprep.subr.bf16.mxu0 %v7266_v6  ;;  %v7271_v15 = vld [vmem:[%s9841_s3 + $0x60] sm:$0xff]   ;;  %v7562_v16 = vadd.s32 32, %v7530_v8 }
  0x15   : > { %901 = vst [vmem:[#allocation2 + $0x3c] sm:$0xf] %v7461_v3  ;;  %902 = vst [vmem:[#allocation2 + $0x40] sm:$0xf] %v7461_v3  ;;  %6412 = vmatprep.subr.bf16.mxu1 %v7267_v7  ;;  %v7272_v17 = vld [vmem:[%s9841_s3 + $0x128] sm:$0xff]   ;;  %v7568_v18 = vadd.s32 40, %v7530_v8 }
  0x16   : > { %903 = vst [vmem:[#allocation2 + $0x44] sm:$0xf] %v7461_v3  ;;  %904 = vst [vmem:[#allocation2 + $0x48] sm:$0xf] %v7461_v3  ;;  %v7273_v19 = vld [vmem:[%s9841_s3 + $0x68] sm:$0xff]   ;;  %v7574_v20 = vadd.s32 48, %v7530_v8 }
  0x17   : > { %905 = vst [vmem:[#allocation2 + $0x4c] sm:$0xf] %v7461_v3  ;;  %906 = vst [vmem:[#allocation2 + $0x50] sm:$0xf] %v7461_v3  ;;  %6621 = vmatpush3.bf16.msra.mxu0 %v7266_v6  ;;  %v7577_v21 = vmul.u32.u64.low 3817748708, %v7530_v8  ;;  %v7578_v22 = vmul.u32.u64.high 3817748708, %v7530_v8, %v7577_v21 }
  0x18   : > { %907 = vst [vmem:[#allocation2 + $0x54] sm:$0xf] %v7461_v3  ;;  %908 = vst [vmem:[#allocation2 + $0x58] sm:$0xf] %v7461_v3  ;;  %6413 = vmatpush3.bf16.msra.mxu1 %v7267_v7  ;;  %6622 = vmatprep.subr.bf16.mxu0 %v7268_v9  ;;  %v7581_v23 = vmul.u32.u64.low 3817748708, %v7540_v11  ;;  %v7582_v24 = vmul.u32.u64.high 3817748708, %v7540_v11, %v7581_v23 }
  0x19   : > { %909 = vst [vmem:[#allocation2 + $0x5c] sm:$0xf] %v7461_v3  ;;  %910 = vst [vmem:[#allocation2 + $0x60] sm:$0xf] %v7461_v3  ;;  %6414 = vmatprep.subr.bf16.mxu1 %v7269_v10  ;;  %v929_v25 = vld [vmem:[%s7559_s21] sm:$0xff]  ;;  %v930_v26 = vld [vmem:[%s7559_s21 + $0x8] sm:$0xff] }
  0x1a   : > { %911 = vst [vmem:[#allocation2 + $0x64] sm:$0xf] %v7461_v3  ;;  %912 = vst [vmem:[#allocation2 + $0x68] sm:$0xf] %v7461_v3  ;;  %v7587_v27 = vmul.u32.u64.low 3817748708, %v7543_v12  ;;  %v7588_v28 = vmul.u32.u64.high 3817748708, %v7543_v12, %v7587_v27 }
  0x1b   : > { %913 = vst [vmem:[#allocation2 + $0x6c] sm:$0xf] %v7461_v3  ;;  %914 = vst [vmem:[#allocation2 + $0x70] sm:$0xf] %v7461_v3  ;;  %6623 = vmatpush3.bf16.msra.mxu0 %v7268_v9  ;;  %v7591_v29 = vmul.u32.u64.low 3817748708, %v7549_v14  ;;  %v7592_v30 = vmul.u32.u64.high 3817748708, %v7549_v14, %v7591_v29 }
  0x1c   : > { %915 = vst [vmem:[#allocation2 + $0x74] sm:$0xf] %v7461_v3  ;;  %916 = vst [vmem:[#allocation2 + $0x78] sm:$0xf] %v7461_v3  ;;  %6415 = vmatpush3.bf16.msra.mxu1 %v7269_v10  ;;  %6624 = vmatprep.subr.bf16.mxu0 %v7270_v13  ;;  %v931_v31 = vld [vmem:[%s7559_s21 + $0x10] sm:$0xff]  ;;  %v932_v32 = vld [vmem:[%s7559_s21 + $0x18] sm:$0xff] }
  0x1d   : > { %917 = vst [vmem:[#allocation2 + $0x7c] sm:$0xf] %v7461_v3  ;;  %918 = vst [vmem:[#allocation2 + $0x80] sm:$0xf] %v7461_v3  ;;  %6416 = vmatprep.subr.bf16.mxu1 %v7271_v15  ;;  %v7274_v33 = vld [vmem:[%s9841_s3 + $0x130] sm:$0xff]   ;;  %v7610_v36 = vadd.s32 56, %v7530_v8 }
  0x1e   : > { %919 = vst [vmem:[#allocation2 + $0x84] sm:$0xf] %v7461_v3  ;;  %920 = vst [vmem:[#allocation2 + $0x88] sm:$0xf] %v7461_v3  ;;  %v7602_v34 = vld [vmem:[%s9838_s0] ss:$0 sm:$0xff] }
  0x1f   : > { %921 = vst [vmem:[#allocation2 + $0x8c] sm:$0xf] %v7461_v3  ;;  %922 = vst [vmem:[#allocation2 + $0x90] sm:$0xf] %v7461_v3  ;;  %v7607_v35 = vld [vmem:[%s9839_s1] ss:$0 sm:$0xff]  ;;  %6625 = vmatpush3.bf16.msra.mxu0 %v7270_v13  ;;  %v972_v39 = vmul.f32 %v7602_v34, %v929_v25  ;;  %v973_v40 = vmul.f32 %v7602_v34, %v930_v26  ;;  %v974_v41 = vmul.f32 %v7602_v34, %v931_v31 }
  0x20   : > { %923 = vst [vmem:[#allocation2 + $0x94] sm:$0xf] %v7461_v3  ;;  %924 = vst [vmem:[#allocation2 + $0x98] sm:$0xf] %v7461_v3  ;;  %v7613_v37 = vadd.s32 64, %v7530_v8  ;;  %v7275_v38 = vld [vmem:[%s9841_s3 + $0x70] sm:$0xff]   ;;  %v975_v42 = vmul.f32 %v7602_v34, %v932_v32  ;;  %6417 = vmatpush3.bf16.msra.mxu1 %v7271_v15  ;;  %6626 = vmatprep.subr.bf16.mxu0 %v7272_v17 }
  0x21   : > { %925 = vst [vmem:[#allocation2 + $0x9c] sm:$0xf] %v7461_v3  ;;  %926 = vst [vmem:[#allocation2 + $0xa0] sm:$0xf] %v7461_v3  ;;  %v280_v43 = vshrl.u32 %v7578_v22, 4  ;;  %v291_v44 = vshrl.u32 %v7582_v24, 4  ;;  %6418 = vmatprep.subr.bf16.mxu1 %v7273_v19  ;;  %v7633_v49 = vadd.f32 %v7607_v35, %v972_v39  ;;  %v7636_v50 = vadd.f32 %v7607_v35, %v973_v40 }
  0x22   : > { %927 = vst [vmem:[#allocation2 + $0xa4] sm:$0xf] %v7461_v3  ;;  %928 = vst [vmem:[#allocation2 + $0xa8] sm:$0xf] %v7461_v3  ;;  %v7625_v45 = vadd.s32 72, %v7530_v8  ;;  %v7628_v46 = vadd.s32 80, %v7530_v8  ;;  %v7639_v54 = vadd.f32 %v7607_v35, %v974_v41  ;;  %v7642_v55 = vadd.f32 %v7607_v35, %v975_v42 }
  0x23   : > { %v302_v47 = vshrl.u32 %v7588_v28, 4  ;;  %v313_v48 = vshrl.u32 %v7592_v30, 4  ;;  %v1376_v51 = vld [vmem:[#allocation2 + $0x8] sm:$0xf]  ;;  %v281_v52 = vmul.u32 18, %v280_v43  ;;  %v292_v53 = vmul.u32 18, %v291_v44  ;;  %6627 = vmatpush3.bf16.msra.mxu0 %v7272_v17 }
  0x24   : > { %v1428_v56 = vld [vmem:[#allocation2 + $0x4] sm:$0x8]  ;;  %v1051_v59 = vmax.f32 %v7633_v49, 0.0  ;;  %v1052_v60 = vmax.f32 %v7636_v50, 0.0  ;;  %6419 = vmatpush3.bf16.msra.mxu1 %v7273_v19  ;;  %6628 = vmatprep.subr.bf16.mxu0 %v7274_v33  ;;  %v7276_v61 = vld [vmem:[%s9841_s3 + $0x138] sm:$0xff]   ;;  %v1053_v0 = vmax.f32 %v7639_v54, 0.0 }
  0x25   : > { %v303_v57 = vmul.u32 18, %v302_v47  ;;  %v314_v58 = vmul.u32 18, %v313_v48  ;;  %v282_v62 = vsub.s32 %v7530_v8, %v281_v52  ;;  %v293_v63 = vsub.s32 %v7540_v11, %v292_v53  ;;  %v933_v2 = vld [vmem:[%s7559_s21 + $0x20] sm:$0xff]  ;;  %6420 = vmatprep.subr.bf16.mxu1 %v7275_v38  ;;  %v7277_v3 = vld [vmem:[%s9841_s3 + $0x78] sm:$0xff]   ;;  %v934_v7 = vld [vmem:[%s7559_s21 + $0x28] sm:$0xff]  ;;  %s5691_s12 = sshll.u32 %s10446_s19, 1 }
  0x26   : > { %v1054_v1 = vmax.f32 %v7642_v55, 0.0  ;;  %v7659_v6 = vcombine.low %v1428_v56, %v1376_v51  ;;  %v976_v9 = vmul.f32 %v7602_v34, %v933_v2  ;;  %v7670_v11 = vld [vmem:[%s9841_s3 + $0x140] sm:$0xff]   ;;  %v977_v24 = vmul.f32 %v7602_v34, %v934_v7  ;;  %v936_v42 = vld [vmem:[%s7559_s21 + $0x38] sm:$0xff]  ;;  %v938_v54 = vld [vmem:[%s7559_s21 + $0x48] sm:$0xff] }
  0x27   : > { %v304_v4 = vsub.s32 %v7543_v12, %v303_v57  ;;  %v315_v5 = vsub.s32 %v7549_v14, %v314_v58  ;;  %vm670_vm0 = vcmp.ne.s32.totalorder %v282_v62, 0  ;;  %vm671_vm1 = vcmp.ne.s32.totalorder %v293_v63, 0  ;;  %6629 = vmatpush3.bf16.msra.mxu0 %v7274_v33  ;;  %v7680_v21 = vld [vmem:[%s9841_s3] sm:$0xff]   ;;  %v935_v33 = vld [vmem:[%s7559_s21 + $0x30] sm:$0xff] }
  0x28   : > { %vm706_vm2 = vcmp.lt.s32.totalorder %v282_v62, 0  ;;  %vm707_vm3 = vcmp.lt.s32.totalorder %v293_v63, 0  ;;  %6421 = vmatpush3.bf16.msra.mxu1 %v7275_v38  ;;  %6630 = vmatprep.subr.bf16.mxu0 %v7276_v61  ;;  %v778_v13 = vadd.s32 18, %v282_v62  ;;  %v779_v14 = vadd.s32 18, %v293_v63  ;;  %v937_v43 = vld [vmem:[%s7559_s21 + $0x40] sm:$0xff]  ;;  %v939_v12 = vld [vmem:[%s7559_s21 + $0x50] sm:$0xff] }
  0x29   : > { %vm672_vm4 = vcmp.ne.s32.totalorder %v304_v4, 0  ;;  %vm673_vm5 = vcmp.ne.s32.totalorder %v315_v5, 0  ;;  %vm708_vm6 = vcmp.lt.s32.totalorder %v304_v4, 0  ;;  %vm709_vm7 = vcmp.lt.s32.totalorder %v315_v5, 0  ;;  %vm7663_vm8 = vmand %vm706_vm2, %vm670_vm0  ;;  %6422 = vmatprep.subr.bf16.mxu1 %v7277_v3 }
  0x2a   : > { %vm7672_vm9 = vmand %vm707_vm3, %vm671_vm1  ;;  %v780_v15 = vadd.s32 18, %v304_v4  ;;  %v781_v17 = vadd.s32 18, %v315_v5  ;;  %v1540_v19 = vrot.slane %v7659_v6, 3  ;;  %v814_v25 = vsel %vm7663_vm8, %v778_v13, %v282_v62 }
  0x2b   : > { %vm744_vm10 = vmand %vm708_vm6, %vm672_vm4  ;;  %v7683_v22 = vmul.u32.u64.low 3817748708, %v7562_v16  ;;  %v7684_v23 = vmul.u32.u64.high 3817748708, %v7562_v16, %v7683_v22  ;;  %v815_v26 = vsel %vm7672_vm9, %v779_v14, %v293_v63  ;;  %v7694_v28 = vadd.f32 %v7607_v35, %v976_v9  ;;  %6631 = vmatpush3.bf16.msra.mxu0 %v7276_v61 }
  0x2c   : > { %vm745_vm11 = vmand %vm709_vm7, %vm673_vm5  ;;  %v816_v27 = vsel %vm744_vm10, %v780_v15, %v304_v4  ;;  %vm7696_vm12 = vcmp.lt.s32.totalorder %v814_v25, 16  ;;  %v9980_v30 = vmov 0  ;;  %vm7700_vm13 = vcmp.lt.s32.totalorder %v815_v26, 16  ;;  %6423 = vmatpush3.bf16.msra.mxu1 %v7277_v3  ;;  %6668 = vmatprep.subr.bf16.mxu0 %v7670_v11  ;;  %v2623_v3 = vld [vmem:[#allocation2 + $0xc] sm:$0x8]  ;;  %v940_v26 = vld [vmem:[%s7559_s21 + $0x58] sm:$0xff] }
  0x2d   : > { %v817_v29 = vsel %vm745_vm11, %v781_v17, %v315_v5  ;;  %v9981_v30 = vsel %vm7696_vm12, 4294967295, %v9980_v30  ;;  %v9983_v31 = vmov 0  ;;  %vm7704_vm14 = vcmp.lt.s32.totalorder %v816_v27, 16  ;;  %6460 = vmatprep.subr.bf16.mxu1 %v7680_v21 }
  0x2e   : > { %9982 = vst [vmem:[#allocation3_spill] sm:$0xff] %v9981_v30  ;;  %v9984_v31 = vsel %vm7700_vm13, 4294967295, %v9983_v31  ;;  %v9986_v32 = vmov 0  ;;  %vm7709_vm15 = vcmp.lt.s32.totalorder %v817_v29, 16  ;;  %v9989_v38 = vmov 0 }
  0x2f   : > { %9985 = vst [vmem:[#allocation4_spill] sm:$0xff] %v9984_v31  ;;  %v9987_v32 = vsel %vm7704_vm14, 4294967295, %v9986_v32  ;;  %v9990_v38 = vsel %vm7709_vm15, 4294967295, %v9989_v38  ;;  %v1159_v39 = vsel %vm7696_vm12, %v1051_v59, 0.0  ;;  %v1160_v40 = vsel %vm7700_vm13, %v1052_v60, 0.0 }
  0x30   : > { %9988 = vst [vmem:[#allocation5_spill] sm:$0xff] %v9987_v32  ;;  %9991 = vst [vmem:[#allocation6_spill] sm:$0xff] %v9990_v38  ;;  %v1161_v41 = vsel %vm7704_vm14, %v1053_v0, 0.0  ;;  %v1162_v44 = vsel %vm7709_vm15, %v1054_v1, 0.0  ;;  %v6069_v47 = vpack.c.bf16 %v1160_v40, %v1159_v39  ;;  %v324_v48 = vshrl.u32 %v7684_v23, 4 }
  0x31   : > { %v7727_v49 = vadd.f32 %v7607_v35, %v977_v24  ;;  %v6074_v50 = vpack.c.bf16 %v1162_v44, %v1161_v41  ;;  %v7730_v51 = vmul.u32.u64.low 3817748708, %v7568_v18  ;;  %v7731_v52 = vmul.u32.u64.high 3817748708, %v7568_v18, %v7730_v51  ;;  %v7353_v30 = vld [vmem:[#allocation2 + $0xa0] ss:$0 sps:$4 sm:$0x11]  }
  0x32   : > { %v1055_v53 = vmax.f32 %v7694_v28, 0.0  ;;  %6156 = vst [vmem:[#allocation2 + $0x10] sm:$0xff] %v6069_v47   ;;  %v325_v55 = vmul.u32 18, %v324_v48  ;;  %v7737_v57 = vmul.u32.u64.low 3817748708, %v7574_v20  ;;  %v7738_v58 = vmul.u32.u64.high 3817748708, %v7574_v20, %v7737_v57 }
  0x33   : > { %v1056_v56 = vmax.f32 %v7727_v49, 0.0  ;;  %6157 = vst [vmem:[#allocation2 + $0x18] sm:$0xff] %v6074_v50   ;;  %vm9844_vm0 = vcmask 1044480   ;;  %v7741_v59 = vmul.u32.u64.low 3817748708, %v7610_v36  ;;  %v7742_v60 = vmul.u32.u64.high 3817748708, %v7610_v36, %v7741_v59  ;;  %v7294_v49 = vld [vmem:[%s9841_s3 + $0x158] sm:$0xff]  }
  0x34   : > { %v978_v61 = vmul.f32 %v7602_v34, %v935_v33  ;;  %v979_v62 = vmul.f32 %v7602_v34, %v936_v42  ;;  %v326_v63 = vsub.s32 %v7562_v16, %v325_v55  ;;  %v980_v2 = vmul.f32 %v7602_v34, %v937_v43  ;;  %v7287_v33 = vld [vmem:[%s9841_s3 + $0x148] sm:$0xff]  }
  0x35   : > { %v7748_v0 = vmul.u32.u64.low 3817748708, %v7613_v37  ;;  %v7749_v1 = vmul.u32.u64.high 3817748708, %v7613_v37, %v7748_v0  ;;  %v335_v4 = vshrl.u32 %v7731_v52, 4  ;;  %v981_v9 = vmul.f32 %v7602_v34, %v938_v54 }
  0x36   : > { %v7754_v5 = vadd.f32 %v7607_v35, %v978_v61  ;;  %v7757_v7 = vadd.f32 %v7607_v35, %v979_v62  ;;  %vm674_vm1 = vcmp.ne.s32.totalorder %v326_v63, 0  ;;  %vm710_vm2 = vcmp.lt.s32.totalorder %v326_v63, 0 }
  0x37   : > { %v782_v16 = vadd.s32 18, %v326_v63  ;;  %v346_v10 = vshrl.u32 %v7738_v58, 4  ;;  %v336_v13 = vmul.u32 18, %v335_v4  ;;  %vm7762_vm3 = vmand %vm710_vm2, %vm674_vm1  ;;  %v357_v15 = vshrl.u32 %v7742_v60, 4 }
  0x38   : > { %v1057_v17 = vmax.f32 %v7754_v5, 0.0  ;;  %v1058_v22 = vmax.f32 %v7757_v7, 0.0  ;;  %v368_v25 = vshrl.u32 %v7749_v1, 4  ;;  %v7778_v40 = vadd.f32 %v7607_v35, %v980_v2  ;;  %v7293_v2 = vld [vmem:[%s9841_s3 + $0x8] sm:$0xff]   ;;  %v7297_v5 = vld [vmem:[%s9841_s3 + $0x160] sm:$0xff]  }
  0x39   : > { %v818_v23 = vsel %vm7762_vm3, %v782_v16, %v326_v63  ;;  %v347_v24 = vmul.u32 18, %v346_v10  ;;  %v2624_v27 = vld [vmem:[#allocation2 + $0x10] sm:$0xf]  ;;  %v2625_v29 = vld [vmem:[#allocation2 + $0x14] sm:$0xf]  ;;  %v337_v39 = vsub.s32 %v7568_v18, %v336_v13  ;;  %v9994_v48 = vmov 0 }
  0x3a   : > { %v2626_v41 = vld [vmem:[#allocation2 + $0x18] sm:$0xf]  ;;  %v5823_v42 = vcombine.low %v2623_v3, %v2624_v27  ;;  %v5866_v43 = vcombine.low %v2624_v27, %v2625_v29  ;;  %v7780_v44 = vld [vmem:[#allocation2 + $0x1c] sm:$0xf]  ;;  %v7284_v47 = vld [vmem:[#allocation2 + $0xc] sm:$0xff]   ;;  %vm7782_vm4 = vcmp.lt.s32.totalorder %v818_v23, 16  ;;  %v982_v50 = vmul.f32 %v7602_v34, %v939_v12 }
  0x3b   : > { %v9995_v48 = vsel %vm7782_vm4, 4294967295, %v9994_v48  ;;  %v7787_v51 = vcombine.low %v2625_v29, %v2626_v41  ;;  %v5867_v52 = vcombine.low %v2626_v41, %v7780_v44  ;;  %v7790_v18 = vld [vmem:[#allocation2 + $0x14] sm:$0xff]   ;;  %vm675_vm5 = vcmp.ne.s32.totalorder %v337_v39, 0  ;;  %v7301_v7 = vld [vmem:[%s9841_s3 + $0x168] sm:$0xff]  }
  0x3c   : > { %9996 = vst [vmem:[#allocation7_spill] sm:$0xff] %v9995_v48  ;;  %v7793_v54 = vadd.f32 %v7607_v35, %v981_v9  ;;  %v2771_v55 = vshrl.u32 %v5823_v42, 16  ;;  %6632 = vmatprep.mubr.bf16.mxu0 %v5866_v43  ;;  %v1541_v57 = vrot.slane %v7284_v47, 3  ;;  %vm711_vm6 = vcmp.lt.s32.totalorder %v337_v39, 0  ;;  %v7290_v16 = vld [vmem:[%s9841_s3 + $0x150] sm:$0xff]  }
  0x3d   : > { %v348_v58 = vsub.s32 %v7574_v20, %v347_v24  ;;  %v2774_v59 = vshll.u32 %v5823_v42, 16  ;;  %6633 = vmatmul.mubr.bf16.vlgmr.msra.gmra.mrb[0].mxu0 %v5867_v52  ;;  %v1543_v60 = vrot.slane %v7790_v18, 3  ;;  %vm7797_vm7 = vmand %vm711_vm6, %vm675_vm5  ;;  %v783_v62 = vadd.s32 18, %v337_v39  ;;  %v7300_v13 = vld [vmem:[%s9841_s3 + $0x10] sm:$0xff]   ;;  %v7309_v18 = vld [vmem:[%s9841_s3 + $0x178] sm:$0xff]  }
  0x3e   : > { %v7802_v63 = vmul.f32 %v7602_v34, %v940_v26  ;;  %v2779_v0 = vshrl.u32 %v7787_v51, 16  ;;  %v2782_v1 = vshll.u32 %v7787_v51, 16  ;;  %v1542_v20 = vsel %vm9844_vm0, %v1540_v19, %v1541_v57  ;;  %6669 = vmatpush3.bf16.msra.mxu0 %v7670_v11 }
  0x3f   : > { %v7814_v3 = vadd.f32 %v7607_v35, %v982_v50  ;;  %v7816_v4 = vrot.slane %v2771_v55, 3  ;;  %6424 = vmatprep.mubr.bf16.mxu1 %v1542_v20  ;;  %v1544_v9 = vsel %vm9844_vm0, %v1541_v57, %v1543_v60  ;;  %6670 = vmatprep.subr.bf16.mxu0 %v7287_v33  ;;  %v819_v19 = vsel %vm7797_vm7, %v783_v62, %v337_v39 }
  0x40   : > { %v1163_v11 = vsel %vm7782_vm4, %v1055_v53, 0.0  ;;  %6425 = vmatmul.mubr.bf16.vlgmr.msra.gmra.mrb[0].mxu1 %v1544_v9  ;;  %vm7830_vm8 = vcmp.lt.s32.totalorder %v819_v19, 16  ;;  %v10000_v10 = vmov 0  ;;  %v358_v12 = vmul.u32 18, %v357_v15 }
  0x41   : > { %9999 = vst [vmem:[#allocation8_spill] sm:$0xff] %v7816_v4  ;;  %v10001_v10 = vsel %vm7830_vm8, 4294967295, %v10000_v10  ;;  %vm676_vm9 = vcmp.ne.s32.totalorder %v348_v58, 0  ;;  %vm712_vm10 = vcmp.lt.s32.totalorder %v348_v58, 0  ;;  %v7837_v28 = vrot.slane %v2774_v59, 4  ;;  %6461 = vmatpush3.bf16.msra.mxu1 %v7680_v21 }
  0x42   : > { %10002 = vst [vmem:[#allocation9_spill] sm:$0xff] %v10001_v10  ;;  %v1164_v53 = vsel %vm7830_vm8, %v1056_v56, 0.0  ;;  %vm7844_vm11 = vmand %vm712_vm10, %vm676_vm9  ;;  %v784_v15 = vadd.s32 18, %v348_v58  ;;  %v369_v23 = vmul.u32 18, %v368_v25  ;;  %6671 = vmatpush3.bf16.msra.mxu0 %v7287_v33  ;;  %v359_v26 = vsub.s32 %v7610_v36, %v358_v12  ;;  %6462 = vmatprep.subr.bf16.mxu1 %v7293_v2 }
  0x43   : > { %10003 = vst [vmem:[#allocation10_spill] sm:$0xff] %v7837_v28  ;;  %v6079_v24 = vpack.c.bf16 %v1164_v53, %v1163_v11  ;;  %v7850_v27 = vmul.u32.u64.low 3817748708, %v7625_v45  ;;  %v7851_v29 = vmul.u32.u64.high 3817748708, %v7625_v45, %v7850_v27  ;;  %6672 = vmatprep.subr.bf16.mxu0 %v7290_v16  ;;  %v1059_v25 = vmax.f32 %v7778_v40, 0.0 }
  0x44   : > { %v820_v21 = vsel %vm7844_vm11, %v784_v15, %v348_v58  ;;  %v370_v56 = vsub.s32 %v7613_v37, %v369_v23  ;;  %v7861_v33 = vadd.s32 88, %v7530_v8  ;;  %vm677_vm1 = vcmp.ne.s32.totalorder %v359_v26, 0  ;;  %v941_v58 = vld [vmem:[%s7559_s21 + $0x60] sm:$0xff] }
  0x45   : > { %6158 = vst [vmem:[#allocation2 + $0x20] sm:$0xff] %v6079_v24   ;;  %vm713_vm2 = vcmp.lt.s32.totalorder %v359_v26, 0  ;;  %v785_v36 = vadd.s32 18, %v359_v26  ;;  %vm7863_vm3 = vcmp.lt.s32.totalorder %v820_v21, 16  ;;  %v10006_v39 = vmov 0  ;;  %6463 = vmatpush3.bf16.msra.mxu1 %v7293_v2 }
  0x46   : > { %v10007_v39 = vsel %vm7863_vm3, 4294967295, %v10006_v39  ;;  %vm749_vm5 = vmand %vm713_vm2, %vm677_vm1  ;;  %v1165_v41 = vsel %vm7863_vm3, %v1057_v17, 0.0  ;;  %vm678_vm6 = vcmp.ne.s32.totalorder %v370_v56, 0  ;;  %vm714_vm7 = vcmp.lt.s32.totalorder %v370_v56, 0  ;;  %6673 = vmatpush3.bf16.msra.mxu0 %v7290_v16  ;;  %6464 = vmatprep.subr.bf16.mxu1 %v7300_v13  ;;  %v7308_v17 = vld [vmem:[%s9841_s3 + $0x18] sm:$0xff]  }
  0x47   : > { %10008 = vst [vmem:[#allocation11_spill] sm:$0xff] %v10007_v39  ;;  %v786_v37 = vadd.s32 18, %v370_v56  ;;  %v821_v40 = vsel %vm749_vm5, %v785_v36, %v359_v26  ;;  %v379_v42 = vshrl.u32 %v7851_v29, 4  ;;  %vm750_vm9 = vmand %vm714_vm7, %vm678_vm6  ;;  %v10009_v50 = vmov 0  ;;  %6674 = vmatprep.subr.bf16.mxu0 %v7294_v49  ;;  %v942_v26 = vld [vmem:[%s7559_s21 + $0x68] sm:$0xff] }
  0x48   : > { %v7873_v43 = vmul.u32.u64.low 3817748708, %v7628_v46  ;;  %v7874_v47 = vmul.u32.u64.high 3817748708, %v7628_v46, %v7873_v43  ;;  %vm7882_vm10 = vcmp.lt.s32.totalorder %v821_v40, 16  ;;  %v7891_v59 = vrot.slane %v2779_v0, 3  ;;  %v7321_v40 = vld [vmem:[%s9841_s3 + $0x28] sm:$0xff]  }
  0x49   : > { %v10010_v50 = vsel %vm7882_vm10, 4294967295, %v10009_v50  ;;  %v822_v52 = vsel %vm750_vm9, %v786_v37, %v370_v56  ;;  %v7887_v55 = vmul.u32.u64.low 3817748708, %v7861_v33  ;;  %v7888_v57 = vmul.u32.u64.high 3817748708, %v7861_v33, %v7887_v55  ;;  %6465 = vmatpush3.bf16.msra.mxu1 %v7300_v13  ;;  %v7305_v37 = vld [vmem:[%s9841_s3 + $0x170] sm:$0xff]  }
  0x4a   : > { %10011 = vst [vmem:[#allocation12_spill] sm:$0xff] %v10010_v50  ;;  %10012 = vst [vmem:[#allocation13_spill] sm:$0xff] %v7891_v59  ;;  %v1166_v61 = vsel %vm7882_vm10, %v1058_v22, 0.0  ;;  %v380_v62 = vmul.u32 18, %v379_v42  ;;  %vm7897_vm11 = vcmp.lt.s32.totalorder %v822_v52, 16  ;;  %v10013_v20 = vmov 0  ;;  %6675 = vmatpush3.bf16.msra.mxu0 %v7294_v49  ;;  %6466 = vmatprep.subr.bf16.mxu1 %v7308_v17 }
  0x4b   : > { %v10014_v20 = vsel %vm7897_vm11, 4294967295, %v10013_v20  ;;  %v7903_v2 = vrot.slane %v2782_v1, 4  ;;  %v6084_v9 = vpack.c.bf16 %v1166_v61, %v1165_v41  ;;  %v1060_v19 = vmax.f32 %v7793_v54, 0.0  ;;  %v7315_v54 = vld [vmem:[%s9841_s3 + $0x20] sm:$0xff]   ;;  %6676 = vmatprep.subr.bf16.mxu0 %v7297_v5 }
  0x4c   : > { %10015 = vst [vmem:[#allocation14_spill] sm:$0xff] %v10014_v20  ;;  %v7908_v0 = vadd.f32 %v7607_v35, %v7802_v63  ;;  %v381_v22 = vsub.s32 %v7625_v45, %v380_v62  ;;  %v1167_v51 = vsel %vm7897_vm11, %v1059_v25, 0.0  ;;  %v390_v1 = vshrl.u32 %v7874_v47, 4  ;;  %v2628_v63 = vld [vmem:[#allocation2 + $0x20] sm:$0xf] }
  0x4d   : > { %10016 = vst [vmem:[#allocation15_spill] sm:$0xff] %v7903_v2  ;;  %v1061_v11 = vmax.f32 %v7814_v3, 0.0  ;;  %v2629_v16 = vld [vmem:[#allocation2 + $0x24] sm:$0xf]  ;;  %6159 = vst [vmem:[#allocation2 + $0x28] sm:$0xff] %v6084_v9   ;;  %v984_v12 = vmul.f32 %v7602_v34, %v941_v58  ;;  %v5825_v45 = vcombine.low %v7780_v44, %v2628_v63  ;;  %v7923_v53 = vld [vmem:[#allocation2 + $0x1c] sm:$0xff]   ;;  %6467 = vmatpush3.bf16.msra.mxu1 %v7308_v17 }
  0x4e   : > { %v5868_v13 = vcombine.low %v2628_v63, %v2629_v16  ;;  %vm679_vm1 = vcmp.ne.s32.totalorder %v381_v22, 0  ;;  %vm715_vm2 = vcmp.lt.s32.totalorder %v381_v22, 0  ;;  %v787_v15 = vadd.s32 18, %v381_v22  ;;  %6677 = vmatpush3.bf16.msra.mxu0 %v7297_v5  ;;  %6468 = vmatprep.subr.bf16.mxu1 %v7315_v54 }
  0x4f   : > { %vm7925_vm5 = vmand %vm715_vm2, %vm679_vm1  ;;  %v391_v23 = vmul.u32 18, %v390_v1  ;;  %v401_v24 = vshrl.u32 %v7888_v57, 4  ;;  %v7932_v27 = vadd.f32 %v7607_v35, %v984_v12  ;;  %v1545_v44 = vrot.slane %v7923_v53, 3  ;;  %6678 = vmatprep.subr.bf16.mxu0 %v7301_v7 }
  0x50   : > { %6636 = vmatprep.mubr.bf16.mxu0 %v5868_v13  ;;  %v1062_v29 = vmax.f32 %v7908_v0, 0.0  ;;  %v7937_v21 = vadd.s32 96, %v7530_v8  ;;  %v7940_v49 = vadd.s32 104, %v7530_v8  ;;  %v2788_v56 = vshrl.u32 %v5825_v45, 16 }
  0x51   : > { %v823_v25 = vsel %vm7925_vm5, %v787_v15, %v381_v22  ;;  %v392_v36 = vsub.s32 %v7628_v46, %v391_v23  ;;  %v402_v41 = vmul.u32 18, %v401_v24  ;;  %v2791_v42 = vshll.u32 %v5825_v45, 16  ;;  %6469 = vmatpush3.bf16.msra.mxu1 %v7315_v54  ;;  %v943_v15 = vld [vmem:[%s7559_s21 + $0x70] sm:$0xff]  ;;  %v944_v23 = vld [vmem:[%s7559_s21 + $0x78] sm:$0xff] }
  0x52   : > { %v1546_v43 = vsel %vm9844_vm0, %v1543_v60, %v1545_v44  ;;  %vm7954_vm6 = vcmp.lt.s32.totalorder %v823_v25, 16  ;;  %v10019_v47 = vmov 0  ;;  %v1063_v46 = vmax.f32 %v7932_v27, 0.0  ;;  %v7327_v60 = vld [vmem:[%s9841_s3 + $0x30] sm:$0xff]   ;;  %6679 = vmatpush3.bf16.msra.mxu0 %v7301_v7  ;;  %6470 = vmatprep.subr.bf16.mxu1 %v7321_v40 }
  0x53   : > { %v10020_v47 = vsel %vm7954_vm6, 4294967295, %v10019_v47  ;;  %6428 = vmatprep.mubr.bf16.mxu1 %v1546_v43  ;;  %v1168_v5 = vsel %vm7954_vm6, %v1060_v19, 0.0  ;;  %v403_v17 = vsub.s32 %v7861_v33, %v402_v41  ;;  %vm680_vm7 = vcmp.ne.s32.totalorder %v392_v36, 0  ;;  %6680 = vmatprep.subr.bf16.mxu0 %v7305_v37  ;;  %v946_v43 = vld [vmem:[%s7559_s21 + $0x88] sm:$0xff] }
  0x54   : > { %10021 = vst [vmem:[#allocation16_spill] sm:$0xff] %v10020_v47  ;;  %vm716_vm9 = vcmp.lt.s32.totalorder %v392_v36, 0  ;;  %v2630_v52 = vld [vmem:[#allocation2 + $0x28] sm:$0xf]  ;;  %v2631_v55 = vld [vmem:[#allocation2 + $0x2c] sm:$0xf]  ;;  %v6089_v57 = vpack.c.bf16 %v1168_v5, %v1167_v51  ;;  %v985_v58 = vmul.f32 %v7602_v34, %v942_v26  ;;  %v987_v9 = vmul.f32 %v7602_v34, %v944_v23 }
  0x55   : > { %v7969_v61 = vcombine.low %v2629_v16, %v2630_v52  ;;  %v5869_v33 = vcombine.low %v2630_v52, %v2631_v55  ;;  %v7971_v62 = vld [vmem:[#allocation2 + $0x24] sm:$0xff]   ;;  %vm681_vm1 = vcmp.ne.s32.totalorder %v403_v17, 0  ;;  %vm717_vm2 = vcmp.lt.s32.totalorder %v403_v17, 0  ;;  %vm7974_vm5 = vmand %vm716_vm9, %vm680_vm7  ;;  %6471 = vmatpush3.bf16.msra.mxu1 %v7321_v40 }
  0x56   : > { %6160 = vst [vmem:[#allocation2 + $0x30] sm:$0xff] %v6089_v57   ;;  %vm7978_vm0 = vmand %vm717_vm2, %vm681_vm1  ;;  %v788_v7 = vadd.s32 18, %v392_v36  ;;  %v789_v22 = vadd.s32 18, %v403_v17  ;;  %v7983_v51 = vmul.u32.u64.low 3817748708, %v7937_v21  ;;  %v7984_v1 = vmul.u32.u64.high 3817748708, %v7937_v21, %v7983_v51  ;;  %6681 = vmatpush3.bf16.msra.mxu0 %v7305_v37  ;;  %6472 = vmatprep.subr.bf16.mxu1 %v7327_v60 }
  0x57   : > { %10022 = vst [vmem:[#allocation17_spill] sm:$0xff] %v7969_v61  ;;  %v7986_v54 = vrot.slane %v2788_v56, 3  ;;  %v7988_v63 = vrot.slane %v2791_v42, 4  ;;  %6637 = vmatmul.mubr.bf16.gmra.mrb[4].mxu0 %v5869_v33  ;;  %v1547_v12 = vrot.slane %v7971_v62, 3  ;;  %vm10029_vm7 = vcmask 1044480   ;;  %6682 = vmatprep.subr.bf16.mxu0 %v7309_v18  ;;  %v945_v42 = vld [vmem:[%s7559_s21 + $0x80] sm:$0xff] }
  0x58   : > { %v824_v45 = vsel %vm7974_vm5, %v788_v7, %v392_v36  ;;  %v825_v13 = vsel %vm7978_vm0, %v789_v22, %v403_v17  ;;  %v7997_v53 = vmul.u32.u64.low 3817748708, %v7940_v49  ;;  %v7998_v14 = vmul.u32.u64.high 3817748708, %v7940_v49, %v7997_v53  ;;  %v8017_v36 = vld [vmem:[%s9841_s3 + $0x180] sm:$0xff]   ;;  %vm10037_vm5 = vmmov %vm10029_vm7 }
  0x59   : > { %10027 = vst [vmem:[#allocation18_spill] sm:$0xff] %v7986_v54  ;;  %10028 = vst [vmem:[#allocation19_spill] sm:$0xff] %v7988_v63  ;;  %v1548_v24 = vsel %vm10029_vm7, %v1545_v44, %v1547_v12  ;;  %vm8003_vm9 = vcmp.lt.s32.totalorder %v824_v45, 16  ;;  %v10030_v26 = vmov 0  ;;  %vm8007_vm1 = vcmp.lt.s32.totalorder %v825_v13, 16  ;;  %6473 = vmatpush3.bf16.msra.mxu1 %v7327_v60 }
  0x5a   : > { %v10031_v26 = vsel %vm8003_vm9, 4294967295, %v10030_v26  ;;  %v10033_v56 = vmov 0  ;;  %v8012_v25 = vadd.s32 112, %v7530_v8  ;;  %6429 = vmatmul.mubr.bf16.gmra.mrb[4].mxu1 %v1548_v24  ;;  %v1169_v44 = vsel %vm8003_vm9, %v1061_v11, 0.0  ;;  %6683 = vmatpush3.bf16.msra.mxu0 %v7309_v18 }
  0x5b   : > { %10032 = vst [vmem:[#allocation20_spill] sm:$0xff] %v10031_v26  ;;  %v10034_v56 = vsel %vm8007_vm1, 4294967295, %v10033_v56  ;;  %v1170_v37 = vsel %vm8007_vm1, %v1062_v29, 0.0  ;;  %v412_v40 = vshrl.u32 %v7984_v1, 4  ;;  %v1028_v17 = vadd.f32 %v7607_v35, %v985_v58  ;;  %6720 = vmatprep.subr.bf16.mxu0 %v8017_v36  ;;  %v8738_v26 = vld [vmem:[#allocation2 + $0x20] sm:$0xff]  }
  0x5c   : > { %10035 = vst [vmem:[#allocation21_spill] sm:$0xff] %v10034_v56  ;;  %v6094_v5 = vpack.c.bf16 %v1170_v37, %v1169_v44  ;;  %v8033_v52 = vadd.s32 120, %v7530_v8  ;;  %v8036_v3 = vadd.s32 128, %v7530_v8  ;;  %v423_v0 = vshrl.u32 %v7998_v14, 4  ;;  %v7334_v37 = vld [vmem:[%s9841_s3 + $0x38] sm:$0xff]   ;;  %10166 = vst [vmem:[#allocation48_spill] sm:$0xff] %v8738_v26 }
  0x5d   : > { %v413_v11 = vmul.u32 18, %v412_v40  ;;  %v8040_v57 = vmul.u32.u64.low 3817748708, %v8012_v25  ;;  %v8041_v29 = vmul.u32.u64.high 3817748708, %v8012_v25, %v8040_v57  ;;  %v2632_v33 = vld [vmem:[#allocation2 + $0x30] sm:$0xf]  ;;  %v986_v58 = vmul.f32 %v7602_v34, %v943_v15  ;;  %6474 = vmatprep.subr.bf16.mxu1 %v7334_v37 }
  0x5e   : > { %v2633_v62 = vld [vmem:[#allocation2 + $0x34] sm:$0xf]  ;;  %6161 = vst [vmem:[#allocation2 + $0x38] sm:$0xff] %v6094_v5   ;;  %v988_v19 = vmul.f32 %v7602_v34, %v945_v42  ;;  %v989_v7 = vmul.f32 %v7602_v34, %v946_v43  ;;  %v8048_v60 = vcombine.low %v2631_v55, %v2632_v33  ;;  %v7298_v51 = vld [vmem:[#allocation2 + $0x2c] sm:$0xff]   ;;  %v424_v18 = vmul.u32 18, %v423_v0  ;;  %6475 = vmatpush3.bf16.msra.mxu1 %v7334_v37 }
  0x5f   : > { %v5870_v22 = vcombine.low %v2632_v33, %v2633_v62  ;;  %v414_v1 = vsub.s32 %v7937_v21, %v413_v11  ;;  %v8052_v45 = vmul.u32.u64.low 3817748708, %v8033_v52  ;;  %v8053_v13 = vmul.u32.u64.high 3817748708, %v8033_v52, %v8052_v45  ;;  %v4108_v56 = vld [vmem:[#allocation2 + $0x18] sm:$0xf] }
  0x60   : > { %10036 = vst [vmem:[#allocation22_spill] sm:$0xff] %v8048_v60  ;;  %v8056_v53 = vmul.u32.u64.low 3817748708, %v8036_v3  ;;  %v8057_v14 = vmul.u32.u64.high 3817748708, %v8036_v3, %v8056_v53  ;;  %v1549_v15 = vrot.slane %v7298_v51, 3  ;;  %v425_v23 = vsub.s32 %v7940_v49, %v424_v18 }
  0x61   : > { %6640 = vmatprep.mubr.bf16.mxu0 %v5870_v22  ;;  %v1064_v24 = vmax.f32 %v1028_v17, 0.0  ;;  %v8061_v55 = vadd.s32 136, %v7530_v8  ;;  %vm682_vm0 = vcmp.ne.s32.totalorder %v414_v1, 0  ;;  %vm718_vm2 = vcmp.lt.s32.totalorder %v414_v1, 0 }
  0x62   : > { %v790_v21 = vadd.s32 18, %v414_v1  ;;  %v434_v44 = vshrl.u32 %v8041_v29, 4  ;;  %v1550_v40 = vsel %vm10037_vm5, %v1547_v12, %v1549_v15  ;;  %vm683_vm7 = vcmp.ne.s32.totalorder %v425_v23, 0  ;;  %vm8068_vm6 = vmand %vm718_vm2, %vm682_vm0 }
  0x63   : > { %vm719_vm1 = vcmp.lt.s32.totalorder %v425_v23, 0  ;;  %v791_v49 = vadd.s32 18, %v425_v23  ;;  %6432 = vmatprep.mubr.bf16.mxu1 %v1550_v40  ;;  %v445_v11 = vshrl.u32 %v8053_v13, 4  ;;  %v456_v12 = vshrl.u32 %v8057_v14, 4  ;;  %v7342_v14 = vld [vmem:[%s9841_s3 + $0x80] sm:$0xff]   ;;  %v947_v40 = vld [vmem:[%s7559_s21 + $0x90] sm:$0xff] }
  0x64   : > { %vm8072_vm9 = vmand %vm719_vm1, %vm683_vm7  ;;  %v826_v5 = vsel %vm8068_vm6, %v790_v21, %v414_v1  ;;  %v435_v17 = vmul.u32 18, %v434_v44  ;;  %v1029_v33 = vadd.f32 %v7607_v35, %v986_v58  ;;  %v1030_v22 = vadd.f32 %v7607_v35, %v987_v9  ;;  %6512 = vmatprep.subr.bf16.mxu1 %v7342_v14  ;;  %v8147_v14 = vld [vmem:[#allocation2 + $0x20] sm:$0xff]  }
  0x65   : > { %v2634_v0 = vld [vmem:[#allocation2 + $0x38] sm:$0xf]  ;;  %v8080_v57 = vld [vmem:[#allocation2 + $0x3c] sm:$0xf]  ;;  %v827_v29 = vsel %vm8072_vm9, %v791_v49, %v425_v23  ;;  %vm8091_vm6 = vcmp.lt.s32.totalorder %v826_v5, 16  ;;  %v10043_v45 = vmov 0  ;;  %v8111_v44 = vadd.f32 %v7607_v35, %v988_v19  ;;  %vm10049_vm9 = vmmov %vm10037_vm5 }
  0x66   : > { %v8086_v51 = vcombine.low %v2633_v62, %v2634_v0  ;;  %v5871_v1 = vcombine.low %v2634_v0, %v8080_v57  ;;  %v8089_v18 = vld [vmem:[#allocation2 + $0x34] sm:$0xff]   ;;  %v10044_v45 = vsel %vm8091_vm6, 4294967295, %v10043_v45  ;;  %vm8095_vm1 = vcmp.lt.s32.totalorder %v827_v29, 16 }
  0x67   : > { %10045 = vst [vmem:[#allocation24_spill] sm:$0xff] %v10044_v45  ;;  %v10046_v13 = vmov 0  ;;  %v1171_v58 = vsel %vm8091_vm6, %v1063_v46, 0.0  ;;  %v1172_v62 = vsel %vm8095_vm1, %v1064_v24, 0.0  ;;  %v436_v9 = vsub.s32 %v8012_v25, %v435_v17 }
  0x68   : > { %10042 = vst [vmem:[#allocation23_spill] sm:$0xff] %v8086_v51  ;;  %v10047_v13 = vsel %vm8095_vm1, 4294967295, %v10046_v13  ;;  %v446_v53 = vmul.u32 18, %v445_v11  ;;  %6641 = vmatmul.mubr.bf16.gmra.mrb[8].mxu0 %v5871_v1  ;;  %v1551_v23 = vrot.slane %v8089_v18, 3  ;;  %v6099_v21 = vpack.c.bf16 %v1172_v62, %v1171_v58 }
  0x69   : > { %10048 = vst [vmem:[#allocation25_spill] sm:$0xff] %v10047_v13  ;;  %v8114_v27 = vadd.f32 %v7607_v35, %v989_v7  ;;  %v457_v24 = vmul.u32 18, %v456_v12  ;;  %v8118_v25 = vmul.u32.u64.low 3817748708, %v8061_v55  ;;  %v8119_v37 = vmul.u32.u64.high 3817748708, %v8061_v55, %v8118_v25  ;;  %v948_v7 = vld [vmem:[%s7559_s21 + $0x98] sm:$0xff] }
  0x6a   : > { %v447_v46 = vsub.s32 %v8033_v52, %v446_v53  ;;  %v1552_v42 = vsel %vm10049_vm9, %v1549_v15, %v1551_v23  ;;  %6162 = vst [vmem:[#allocation2 + $0x40] sm:$0xff] %v6099_v21   ;;  %vm684_vm0 = vcmp.ne.s32.totalorder %v436_v9, 0  ;;  %vm720_vm2 = vcmp.lt.s32.totalorder %v436_v9, 0  ;;  %v7310_v15 = vld [vmem:[#allocation2 + $0x10] sm:$0xff]   ;;  %v949_v21 = vld [vmem:[%s7559_s21 + $0xa0] sm:$0xff] }
  0x6b   : > { %v792_v19 = vadd.s32 18, %v436_v9  ;;  %6433 = vmatmul.mubr.bf16.gmra.mrb[8].mxu1 %v1552_v42  ;;  %v458_v35 = vsub.s32 %v8036_v3, %v457_v24  ;;  %vm756_vm1 = vmand %vm720_vm2, %vm684_vm0  ;;  %v1065_v5 = vmax.f32 %v1029_v33, 0.0  ;;  %v1066_v17 = vmax.f32 %v1030_v22, 0.0  ;;  %v7311_v22 = vld [vmem:[#allocation2 + $0x18] sm:$0xff]  }
  0x6c   : > { %vm685_vm5 = vcmp.ne.s32.totalorder %v447_v46, 0  ;;  %vm721_vm7 = vcmp.lt.s32.totalorder %v447_v46, 0  ;;  %v793_v52 = vadd.s32 18, %v447_v46  ;;  %v990_v11 = vmul.f32 %v7602_v34, %v947_v40 }
  0x6d   : > { %vm8127_vm6 = vmand %vm721_vm7, %vm685_vm5  ;;  %v828_v43 = vsel %vm756_vm1, %v792_v19, %v436_v9  ;;  %v467_v12 = vshrl.u32 %v8119_v37, 4  ;;  %vm686_vm9 = vcmp.ne.s32.totalorder %v458_v35, 0  ;;  %vm722_vm11 = vcmp.lt.s32.totalorder %v458_v35, 0 }
  0x6e   : > { %v794_v3 = vadd.s32 18, %v458_v35  ;;  %vm758_vm10 = vmand %vm722_vm11, %vm686_vm9  ;;  %v829_v0 = vsel %vm8127_vm6, %v793_v52, %v447_v46  ;;  %vm8135_vm0 = vcmp.lt.s32.totalorder %v828_v43, 16  ;;  %v10052_v29 = vmov 0  ;;  %v8163_v52 = vld [vmem:[%s9839_s1] ss:$0 sm:$0xff] }
  0x6f   : > { %v10053_v29 = vsel %vm8135_vm0, 4294967295, %v10052_v29  ;;  %v1067_v33 = vmax.f32 %v8111_v44, 0.0  ;;  %v991_v1 = vmul.f32 %v7602_v34, %v948_v7  ;;  %v468_v58 = vmul.u32 18, %v467_v12 }
  0x70   : > { %10054 = vst [vmem:[#allocation26_spill] sm:$0xff] %v10053_v29  ;;  %v830_v62 = vsel %vm758_vm10, %v794_v3, %v458_v35  ;;  %vm8141_vm1 = vcmp.lt.s32.totalorder %v829_v0, 16  ;;  %v10055_v9 = vmov 0  ;;  %v1173_v53 = vsel %vm8135_vm0, %v1065_v5, 0.0 }
  0x71   : > { %v10056_v9 = vsel %vm8141_vm1, 4294967295, %v10055_v9  ;;  %vm8150_vm11 = vcmp.lt.s32.totalorder %v830_v62, 16  ;;  %v10058_v46 = vmov 0  ;;  %v1068_v44 = vmax.f32 %v8114_v27, 0.0  ;;  %v2636_v25 = vld [vmem:[#allocation2 + $0x40] sm:$0xf] }
  0x72   : > { %10057 = vst [vmem:[#allocation27_spill] sm:$0xff] %v10056_v9  ;;  %v10059_v46 = vsel %vm8150_vm11, 4294967295, %v10058_v46  ;;  %v1174_v34 = vsel %vm8141_vm1, %v1066_v17, 0.0  ;;  %v3684_v24 = vshll.u32 %v7310_v15, 16  ;;  %v2637_v37 = vld [vmem:[#allocation2 + $0x44] sm:$0xf]  ;;  %v469_v40 = vsub.s32 %v8061_v55, %v468_v58 }
  0x73   : > { %10060 = vst [vmem:[#allocation28_spill] sm:$0xff] %v10059_v46  ;;  %v6104_v42 = vpack.c.bf16 %v1174_v34, %v1173_v53  ;;  %v8158_v19 = vld [vmem:[#allocation2 + $0x3c] sm:$0xff]   ;;  %v3682_v35 = vshrl.u32 %v7310_v15, 16  ;;  %v8166_v7 = vadd.f32 %v8163_v52, %v990_v11  ;;  %v8169_v27 = vcombine.low %v8080_v57, %v2636_v25 }
  0x74   : > { %v5872_v49 = vcombine.low %v2636_v25, %v2637_v37  ;;  %v3686_v43 = vrot.slane %v3684_v24, 1  ;;  %v3689_v5 = vshll.u32 %v7311_v22, 16  ;;  %vm687_vm10 = vcmp.ne.s32.totalorder %v469_v40, 0  ;;  %v8180_v57 = vld [vmem:[%s9838_s0] ss:$0 sm:$0xff]  ;;  %v7316_v25 = vld [vmem:[#allocation2 + $0x28] sm:$0xff]  }
  0x75   : > { %10061 = vst [vmem:[#allocation29_spill] sm:$0xff] %v8169_v27  ;;  %vm723_vm6 = vcmp.lt.s32.totalorder %v469_v40, 0  ;;  %v795_v55 = vadd.s32 18, %v469_v40  ;;  %6163 = vst [vmem:[#allocation2 + $0x48] sm:$0xff] %v6104_v42   ;;  %v1553_v17 = vrot.slane %v8158_v19, 3  ;;  %v1175_v15 = vsel %vm8150_vm11, %v1067_v33, 0.0 }
  0x76   : > { %6644 = vmatprep.mubr.bf16.mxu0 %v5872_v49  ;;  %vm759_vm2 = vmand %vm723_vm6, %vm687_vm10  ;;  %v3691_v11 = vrot.slane %v3689_v5, 1  ;;  %v8175_v12 = vadd.f32 %v8163_v52, %v991_v1  ;;  %v992_v3 = vmul.f32 %v8180_v57, %v949_v21  ;;  %vm10062_vm5 = vcmask 1044480   ;;  %v950_v33 = vld [vmem:[%s7559_s21 + $0xa8] sm:$0xff]  ;;  %v8200_v5 = vld [vmem:[#allocation2 + $0x30] sm:$0xff]  }
  0x77   : > { %v831_v0 = vsel %vm759_vm2, %v795_v55, %v469_v40  ;;  %v1554_v58 = vsel %vm10062_vm5, %v1551_v23, %v1553_v17  ;;  %v3693_v62 = vshrl.u32 %v7311_v22, 16  ;;  %v3697_v53 = vshll.u32 %v8147_v14, 16  ;;  %vm10067_vm10 = vmmov %vm10062_vm5 }
  0x78   : > { %vm8188_vm7 = vcmp.lt.s32.totalorder %v831_v0, 16  ;;  %v10063_v34 = vmov 0  ;;  %6436 = vmatprep.mubr.bf16.mxu1 %v1554_v58  ;;  %v3687_v1 = vor.u32 %v3686_v43, %v3682_v35  ;;  %v256_v24 = vadd.s32 144, %v7530_v8  ;;  %v951_v58 = vld [vmem:[%s7559_s21 + $0xb0] sm:$0xff] }
  0x79   : > { %v10064_v34 = vsel %vm8188_vm7, 4294967295, %v10063_v34  ;;  %v257_v21 = vadd.s32 152, %v7530_v8  ;;  %v1176_v18 = vsel %vm8188_vm7, %v1068_v44, 0.0  ;;  %vm9855_vm9 = vsmask.f32 7424 }
  0x7a   : > { %10065 = vst [vmem:[#allocation30_spill] sm:$0xff] %v10064_v34  ;;  %v3695_v23 = vor.u32 %v3693_v62, %v3691_v11  ;;  %v3699_v22 = vrot.slane %v3697_v53, 1  ;;  %v6109_v40 = vpack.c.bf16 %v1176_v18, %v1175_v15  ;;  %v3701_v0 = vshrl.u32 %v8147_v14, 16 }
  0x7b   : > { %v8196_v42 = vmul.u32.u64.low 3817748708, %v256_v24  ;;  %v8197_v19 = vmul.u32.u64.high 3817748708, %v256_v24, %v8196_v42  ;;  %v8202_v35 = vmul.u32.u64.low 3817748708, %v257_v21  ;;  %v8203_v43 = vmul.u32.u64.high 3817748708, %v257_v21, %v8202_v35 }
  0x7c   : > { %6164 = vst [vmem:[#allocation2 + $0x50] sm:$0xff] %v6109_v40   ;;  %v2638_v44 = vld [vmem:[#allocation2 + $0x48] sm:$0xf]  ;;  %v2639_v62 = vld [vmem:[#allocation2 + $0x4c] sm:$0xf]  ;;  %v3692_v15 = vsel %vm9855_vm9, %v3687_v1, %v3691_v11  ;;  %v993_v53 = vmul.f32 %v8180_v57, %v950_v33  ;;  %v3700_v16 = vsel %vm9855_vm9, %v3695_v23, %v3699_v22  ;;  %v3705_v35 = vshll.u32 %v7316_v25, 16 }
  0x7d   : > { %v8210_v18 = vcombine.low %v2637_v37, %v2638_v44  ;;  %v5873_v42 = vcombine.low %v2638_v44, %v2639_v62  ;;  %v7307_v41 = vld [vmem:[#allocation2 + $0x44] sm:$0xff]   ;;  %v478_v55 = vshrl.u32 %v8197_v19, 4  ;;  %v3709_v49 = vshrl.u32 %v7316_v25, 16  ;;  %v952_v44 = vld [vmem:[%s7559_s21 + $0xb8] sm:$0xff]  ;;  %v7439_v10 = vld [vmem:[#allocation2 + $0x4c] sm:$0xf] }
  0x7e   : > { %v3713_v14 = vshll.u32 %v8200_v5, 16  ;;  %v8216_v40 = vadd.s32 160, %v7530_v8  ;;  %v1555_v11 = vrot.slane %v7307_v41, 3  ;;  %v489_v1 = vshrl.u32 %v8203_v43, 4  ;;  %v8735_v47 = vld [vmem:[#allocation2 + $0x44] sm:$0xff]  }
  0x7f   : > { %10066 = vst [vmem:[#allocation31_spill] sm:$0xff] %v8210_v18  ;;  %6645 = vmatmul.mubr.bf16.gmra.mrb[12].mxu0 %v5873_v42  ;;  %v3703_v33 = vor.u32 %v3701_v0, %v3699_v22  ;;  %v8220_v37 = vadd.f32 %v8163_v52, %v992_v3  ;;  %v479_v23 = vmul.u32 18, %v478_v55  ;;  %v3707_v62 = vrot.slane %v3705_v35, 1 }
  0x80   : > { %6684 = vmatprep.mubr.bf16.mxu0 %v3692_v15  ;;  %v8224_v19 = vadd.f32 %v8163_v52, %v993_v53  ;;  %v994_v25 = vmul.f32 %v8180_v57, %v951_v58  ;;  %v1556_v34 = vsel %vm10067_vm10, %v1553_v17, %v1555_v11  ;;  %v490_v46 = vmul.u32 18, %v489_v1 }
  0x81   : > { %v8229_v41 = vmul.u32.u64.low 3817748708, %v8216_v40  ;;  %v8230_v42 = vmul.u32.u64.high 3817748708, %v8216_v40, %v8229_v41  ;;  %6437 = vmatmul.mubr.bf16.gmra.mrb[12].mxu1 %v1556_v34  ;;  %v480_v22 = vsub.s32 %v256_v24, %v479_v23  ;;  %v3711_v3 = vor.u32 %v3709_v49, %v3707_v62  ;;  %v7326_v24 = vld [vmem:[%s9841_s3 + $0x188] sm:$0xff]  }
  0x82   : > { %v3715_v43 = vrot.slane %v3713_v14, 1  ;;  %v995_v0 = vmul.f32 %v8180_v57, %v952_v44  ;;  %v491_v15 = vsub.s32 %v257_v21, %v490_v46  ;;  %v3708_v53 = vsel %vm9855_vm9, %v3703_v33, %v3707_v62 }
  0x83   : > { %v8233_v55 = vld [vmem:[#allocation2 + $0x4c] sm:$0xff]   ;;  %v8237_v58 = vadd.s32 168, %v7530_v8  ;;  %vm688_vm6 = vcmp.ne.s32.totalorder %v480_v22, 0  ;;  %vm724_vm2 = vcmp.lt.s32.totalorder %v480_v22, 0  ;;  %v796_v35 = vadd.s32 18, %v480_v22 }
  0x84   : > { %v9859_v49 = vrot.slane %v8233_v55, 3  ;;  %vm689_vm5 = vcmp.ne.s32.totalorder %v491_v15, 0  ;;  %vm725_vm10 = vcmp.lt.s32.totalorder %v491_v15, 0  ;;  %vm760_vm7 = vmand %vm724_vm2, %vm688_vm6  ;;  %v797_v46 = vadd.s32 18, %v491_v15 }
  0x85   : > { %vm761_vm9 = vmand %vm725_vm10, %vm689_vm5  ;;  %v832_v21 = vsel %vm760_vm7, %v796_v35, %v480_v22  ;;  %vm10068_vm11 = vsmask.f32 7424  ;;  %v8247_v1 = vadd.f32 %v8163_v52, %v994_v25  ;;  %v8250_v33 = vadd.f32 %v8163_v52, %v995_v0  ;;  %v7322_v22 = vld [vmem:[#allocation2 + $0x38] sm:$0xff]  }
  0x86   : > { %v3716_v14 = vsel %vm10068_vm11, %v3711_v3, %v3715_v43  ;;  %vm10069_vm1 = vcmask 1044480   ;;  %v833_v23 = vsel %vm761_vm9, %v797_v46, %v491_v15  ;;  %vm8255_vm0 = vcmp.lt.s32.totalorder %v832_v21, 16 }
  0x87   : > { %6685 = vmatmul.mubr.bf16.vlgmr.msra.gmra.mrb[0].mxu0 %v3700_v16  ;;  %v1558_v44 = vsel %vm10069_vm1, %v1555_v11, %v9859_v49  ;;  %v10070_v62 = vmov 0  ;;  %v500_v41 = vshrl.u32 %v8230_v42, 4  ;;  %vm8260_vm11 = vcmp.lt.s32.totalorder %v833_v23, 16  ;;  %v7332_v42 = vld [vmem:[%s9841_s3 + $0x190] sm:$0xff]  }
  0x88   : > { %v10071_v62 = vsel %vm8255_vm0, 4294967295, %v10070_v62  ;;  %6440 = vmatprep.mubr.bf16.mxu1 %v1558_v44  ;;  %v10073_v25 = vmov 0  ;;  %v10076_v3 = vmax.f32 %v8166_v7, 0.0  ;;  %6688 = vmatprep.mubr.bf16.mxu0 %v3708_v53  ;;  %v10077_v15 = vmax.f32 %v8175_v12, 0.0  ;;  %v953_v44 = vld [vmem:[%s7559_s21 + $0xc0] sm:$0xff] }
  0x89   : > { %10072 = vst [vmem:[#allocation32_spill] sm:$0xff] %v10071_v62  ;;  %v10074_v25 = vsel %vm8260_vm11, 4294967295, %v10073_v25  ;;  %v8269_v11 = vmul.u32.u64.low 3817748708, %v8237_v58  ;;  %v8270_v0 = vmul.u32.u64.high 3817748708, %v8237_v58, %v8269_v11  ;;  %v501_v46 = vmul.u32 18, %v500_v41  ;;  %6721 = vmatpush3.bf16.msra.mxu0 %v8017_v36 }
  0x8a   : > { %10075 = vst [vmem:[#allocation33_spill] sm:$0xff] %v10074_v25  ;;  %v1177_v16 = vsel %vm8255_vm0, %v10076_v3, 0.0  ;;  %v1178_v35 = vsel %vm8260_vm11, %v10077_v15, 0.0  ;;  %v260_v7 = vadd.s32 176, %v7530_v8  ;;  %v261_v21 = vadd.s32 184, %v7530_v8  ;;  %v8285_v11 = vld [vmem:[#allocation2 + $0x40] sm:$0xff]   ;;  %6722 = vmatprep.subr.bf16.mxu0 %v7326_v24 }
  0x8b   : > { %v6114_v53 = vpack.c.bf16 %v1178_v35, %v1177_v16  ;;  %v3717_v3 = vshrl.u32 %v8200_v5, 16  ;;  %v502_v12 = vsub.s32 %v8216_v40, %v501_v46  ;;  %v3721_v49 = vshll.u32 %v7322_v22, 16  ;;  %v7338_v5 = vld [vmem:[%s9841_s3 + $0x198] sm:$0xff]  }
  0x8c   : > { %v8288_v41 = vmul.u32.u64.low 3817748708, %v260_v7  ;;  %v8289_v15 = vmul.u32.u64.high 3817748708, %v260_v7, %v8288_v41  ;;  %v511_v34 = vshrl.u32 %v8270_v0, 4  ;;  %v8301_v0 = vadd.s32 192, %v7530_v8 }
  0x8d   : > { %6165 = vst [vmem:[#allocation2 + $0x58] sm:$0xff] %v6114_v53   ;;  %v8292_v36 = vmul.u32.u64.low 3817748708, %v261_v21  ;;  %v8293_v16 = vmul.u32.u64.high 3817748708, %v261_v21, %v8292_v36  ;;  %v3719_v35 = vor.u32 %v3717_v3, %v3715_v43  ;;  %vm690_vm1 = vcmp.ne.s32.totalorder %v502_v12, 0  ;;  %6723 = vmatpush3.bf16.msra.mxu0 %v7326_v24 }
  0x8e   : > { %vm726_vm7 = vcmp.lt.s32.totalorder %v502_v12, 0  ;;  %v798_v23 = vadd.s32 18, %v502_v12  ;;  %v3723_v40 = vrot.slane %v3721_v49, 1  ;;  %v512_v46 = vmul.u32 18, %v511_v34  ;;  %6724 = vmatprep.subr.bf16.mxu0 %v7332_v42 }
  0x8f   : > { %vm762_vm9 = vmand %vm726_vm7, %vm690_vm1  ;;  %v3725_v41 = vshrl.u32 %v7322_v22, 16  ;;  %v3729_v53 = vshll.u32 %v8285_v11, 16  ;;  %6689 = vmatmul.mubr.bf16.gmra.mrb[4].mxu0 %v3716_v14  ;;  %v522_v3 = vshrl.u32 %v8289_v15, 4  ;;  %vm10078_vm6 = vsmask.f32 7424 }
  0x90   : > { %v834_v43 = vsel %vm762_vm9, %v798_v23, %v502_v12  ;;  %v3724_v36 = vsel %vm10078_vm6, %v3719_v35, %v3723_v40  ;;  %v8306_v17 = vadd.s32 200, %v7530_v8  ;;  %v513_v24 = vsub.s32 %v8237_v58, %v512_v46  ;;  %v7343_v58 = vld [vmem:[%s9841_s3 + $0x1a0] sm:$0xff]   ;;  %vm10083_vm7 = vmmov %vm10078_vm6 }
  0x91   : > { %vm8309_vm2 = vcmp.lt.s32.totalorder %v834_v43, 16  ;;  %v10079_v34 = vmov 0  ;;  %v533_v49 = vshrl.u32 %v8293_v16, 4  ;;  %6692 = vmatprep.mubr.bf16.mxu0 %v3724_v36  ;;  %v3727_v22 = vor.u32 %v3725_v41, %v3723_v40  ;;  %6725 = vmatpush3.bf16.msra.mxu0 %v7332_v42  ;;  %v954_v42 = vld [vmem:[%s7559_s21 + $0xc8] sm:$0xff] }
  0x92   : > { %v10080_v34 = vsel %vm8309_vm2, 4294967295, %v10079_v34  ;;  %v10082_v14 = vmax.f32 %v8220_v37, 0.0  ;;  %v523_v12 = vmul.u32 18, %v522_v3  ;;  %v8318_v15 = vrot.slane %v3729_v53, 1  ;;  %6726 = vmatprep.subr.bf16.mxu0 %v7338_v5 }
  0x93   : > { %10081 = vst [vmem:[#allocation34_spill] sm:$0xff] %v10080_v34  ;;  %v996_v35 = vmul.f32 %v8180_v57, %v953_v44  ;;  %vm691_vm5 = vcmp.ne.s32.totalorder %v513_v24, 0  ;;  %vm727_vm10 = vcmp.lt.s32.totalorder %v513_v24, 0  ;;  %v799_v16 = vadd.s32 18, %v513_v24 }
  0x94   : > { %v1179_v23 = vsel %vm8309_vm2, %v10082_v14, 0.0  ;;  %v534_v40 = vmul.u32 18, %v533_v49  ;;  %v8324_v37 = vld [vmem:[#allocation2 + $0x54] sm:$0xff]   ;;  %vm763_vm1 = vmand %vm727_vm10, %vm691_vm5  ;;  %v524_v46 = vsub.s32 %v260_v7, %v523_v12  ;;  %v3732_v41 = vsel %vm10083_vm7, %v3727_v22, %v8318_v15  ;;  %v7347_v12 = vld [vmem:[%s9841_s3 + $0x1a8] sm:$0xff]  }
  0x95   : > { %v8329_v53 = vmul.u32.u64.low 3817748708, %v8301_v0  ;;  %v8330_v44 = vmul.u32.u64.high 3817748708, %v8301_v0, %v8329_v53  ;;  %v835_v43 = vsel %vm763_vm1, %v799_v16, %v513_v24  ;;  %v9863_v49 = vrot.slane %v8324_v37, 3  ;;  %6727 = vmatpush3.bf16.msra.mxu0 %v7338_v5 }
  0x96   : > { %v535_v3 = vsub.s32 %v261_v21, %v534_v40  ;;  %v8334_v36 = vmul.u32.u64.low 3817748708, %v8306_v17  ;;  %v8335_v14 = vmul.u32.u64.high 3817748708, %v8306_v17, %v8334_v36  ;;  %vm8338_vm9 = vcmp.lt.s32.totalorder %v835_v43, 16  ;;  %6728 = vmatprep.subr.bf16.mxu0 %v7343_v58 }
  0x97   : > { %v10084_v34 = vmov 0  ;;  %vm692_vm6 = vcmp.ne.s32.totalorder %v524_v46, 0  ;;  %vm728_vm5 = vcmp.lt.s32.totalorder %v524_v46, 0  ;;  %v10087_v7 = vmax.f32 %v8224_v19, 0.0  ;;  %6693 = vmatmul.mubr.bf16.gmra.mrb[8].mxu0 %v3732_v41 }
  0x98   : > { %v10085_v34 = vsel %vm8338_vm9, 4294967295, %v10084_v34  ;;  %vm693_vm10 = vcmp.ne.s32.totalorder %v535_v3, 0  ;;  %vm729_vm1 = vcmp.lt.s32.totalorder %v535_v3, 0  ;;  %vm8346_vm7 = vmand %vm728_vm5, %vm692_vm6  ;;  %v800_v24 = vadd.s32 18, %v524_v46 }
  0x99   : > { %10086 = vst [vmem:[#allocation35_spill] sm:$0xff] %v10085_v34  ;;  %v1180_v22 = vsel %vm8338_vm9, %v10087_v7, 0.0  ;;  %v10090_v19 = vrot.slane %v8233_v55, 3  ;;  %vm10091_vm2 = vcmask 1044480   ;;  %vm8358_vm9 = vmand %vm729_vm1, %vm693_vm10  ;;  %v801_v53 = vadd.s32 18, %v535_v3  ;;  %6729 = vmatpush3.bf16.msra.mxu0 %v7343_v58 }
  0x9a   : > { %v6119_v16 = vpack.c.bf16 %v1180_v22, %v1179_v23  ;;  %v544_v43 = vshrl.u32 %v8330_v44, 4  ;;  %v836_v36 = vsel %vm8346_vm7, %v800_v24, %v524_v46  ;;  %v555_v7 = vshrl.u32 %v8335_v14, 4  ;;  %v955_v23 = vld [vmem:[%s7559_s21 + $0xd0] sm:$0xff]  ;;  %v956_v46 = vld [vmem:[%s7559_s21 + $0xd8] sm:$0xff]  ;;  %6730 = vmatprep.subr.bf16.mxu0 %v7347_v12 }
  0x9b   : > { %v1560_v5 = vsel %vm10091_vm2, %v10090_v19, %v9863_v49  ;;  %v997_v55 = vmul.f32 %v8180_v57, %v954_v42  ;;  %v1039_v19 = vadd.f32 %v8163_v52, %v996_v35  ;;  %v837_v22 = vsel %vm8358_vm9, %v801_v53, %v535_v3 }
  0x9c   : > { %6441 = vmatmul.mubr.bf16.gmra.mrb[16].mxu1 %v1560_v5  ;;  %6166 = vst [vmem:[#allocation2 + $0x60] sm:$0xff] %v6119_v16   ;;  %vm8371_vm2 = vcmp.lt.s32.totalorder %v836_v36, 16  ;;  %v10094_v41 = vmov 0  ;;  %v545_v44 = vmul.u32 18, %v544_v43  ;;  %v8376_v21 = vadd.s32 208, %v7530_v8  ;;  %v7352_v5 = vld [vmem:[%s9841_s3 + $0x1b0] sm:$0xff]  }
  0x9d   : > { %v10095_v41 = vsel %vm8371_vm2, 4294967295, %v10094_v41  ;;  %vm8379_vm6 = vcmp.lt.s32.totalorder %v837_v22, 16  ;;  %v10097_v42 = vmov 0  ;;  %v10100_v35 = vmax.f32 %v8247_v1, 0.0  ;;  %v957_v43 = vld [vmem:[%s7559_s21 + $0xe0] sm:$0xff]  ;;  %6731 = vmatpush3.bf16.msra.mxu0 %v7347_v12 }
  0x9e   : > { %10096 = vst [vmem:[#allocation36_spill] sm:$0xff] %v10095_v41  ;;  %v10098_v42 = vsel %vm8379_vm6, 4294967295, %v10097_v42  ;;  %v556_v14 = vmul.u32 18, %v555_v7  ;;  %v1040_v24 = vadd.f32 %v8163_v52, %v997_v55  ;;  %v10101_v58 = vmax.f32 %v8250_v33, 0.0  ;;  %6732 = vmatprep.subr.bf16.mxu0 %v7352_v5 }
  0x9f   : > { %10099 = vst [vmem:[#allocation37_spill] sm:$0xff] %v10098_v42  ;;  %v1181_v3 = vsel %vm8371_vm2, %v10100_v35, 0.0  ;;  %v546_v40 = vsub.s32 %v8301_v0, %v545_v44  ;;  %v1075_v53 = vmax.f32 %v1039_v19, 0.0  ;;  %v8397_v1 = vadd.s32 216, %v7530_v8  ;;  %v958_v35 = vld [vmem:[%s7559_s21 + $0xe8] sm:$0xff]  ;;  %v7355_v0 = vld [vmem:[%s9841_s3 + $0x1b8] sm:$0xff]  }
  0xa0   : > { %v1182_v16 = vsel %vm8379_vm6, %v10101_v58, 0.0  ;;  %v557_v7 = vsub.s32 %v8306_v17, %v556_v14  ;;  %v1076_v55 = vmax.f32 %v1040_v24, 0.0  ;;  %v998_v22 = vmul.f32 %v8180_v57, %v955_v23  ;;  %v7328_v58 = vld [vmem:[#allocation2 + $0x48] sm:$0xff]   ;;  %v8410_v23 = vld [vmem:[#allocation2 + $0x50] sm:$0xff]  }
  0xa1   : > { %v6124_v36 = vpack.c.bf16 %v1182_v16, %v1181_v3  ;;  %vm694_vm9 = vcmp.ne.s32.totalorder %v546_v40, 0  ;;  %vm730_vm5 = vcmp.lt.s32.totalorder %v546_v40, 0  ;;  %v802_v33 = vadd.s32 18, %v546_v40  ;;  %6733 = vmatpush3.bf16.msra.mxu0 %v7352_v5 }
  0xa2   : > { %v999_v49 = vmul.f32 %v8180_v57, %v956_v46  ;;  %vm695_vm10 = vcmp.ne.s32.totalorder %v557_v7, 0  ;;  %vm731_vm1 = vcmp.lt.s32.totalorder %v557_v7, 0  ;;  %vm766_vm7 = vmand %vm730_vm5, %vm694_vm9  ;;  %v803_v17 = vadd.s32 18, %v557_v7  ;;  %6734 = vmatprep.subr.bf16.mxu0 %v7355_v0 }
  0xa3   : > { %6167 = vst [vmem:[#allocation2 + $0x68] sm:$0xff] %v6124_v36   ;;  %v8408_v19 = vadd.f32 %v8163_v52, %v998_v22  ;;  %vm767_vm6 = vmand %vm731_vm1, %vm695_vm10  ;;  %v838_v44 = vsel %vm766_vm7, %v802_v33, %v546_v40  ;;  %v8413_v46 = vmul.u32.u64.low 3817748708, %v8376_v21  ;;  %v8414_v12 = vmul.u32.u64.high 3817748708, %v8376_v21, %v8413_v46  ;;  %v8419_v14 = vld [vmem:[#allocation2 + $0x5c] sm:$0xff]  }
  0xa4   : > { %v8417_v3 = vadd.f32 %v8163_v52, %v999_v49  ;;  %v839_v24 = vsel %vm767_vm6, %v803_v17, %v557_v7  ;;  %vm8421_vm9 = vcmp.lt.s32.totalorder %v838_v44, 16  ;;  %v10102_v16 = vmov 0  ;;  %v7362_v40 = vld [vmem:[%s9841_s3 + $0x1c0] sm:$0xff]  }
  0xa5   : > { %v10103_v16 = vsel %vm8421_vm9, 4294967295, %v10102_v16  ;;  %v1000_v36 = vmul.f32 %v8180_v57, %v957_v43  ;;  %v1001_v22 = vmul.f32 %v8180_v57, %v958_v35  ;;  %vm8430_vm5 = vcmp.lt.s32.totalorder %v839_v24, 16  ;;  %6735 = vmatpush3.bf16.msra.mxu0 %v7355_v0 }
  0xa6   : > { %10104 = vst [vmem:[#allocation38_spill] sm:$0xff] %v10103_v16  ;;  %v10105_v33 = vmov 0  ;;  %v1183_v49 = vsel %vm8421_vm9, %v1075_v53, 0.0  ;;  %v8437_v7 = vmul.u32.u64.low 3817748708, %v8397_v1  ;;  %v8438_v17 = vmul.u32.u64.high 3817748708, %v8397_v1, %v8437_v7  ;;  %6772 = vmatprep.subr.bf16.mxu0 %v7362_v40  ;;  %v960_v40 = vld [vmem:[%s7559_s21 + $0xf8] sm:$0xff] }
  0xa7   : > { %v10106_v33 = vsel %vm8430_vm5, 4294967295, %v10105_v33  ;;  %v1561_v43 = vrot.slane %v8419_v14, 3  ;;  %v1184_v35 = vsel %vm8430_vm5, %v1076_v55, 0.0  ;;  %v566_v42 = vshrl.u32 %v8414_v12, 4 }
  0xa8   : > { %10107 = vst [vmem:[#allocation39_spill] sm:$0xff] %v10106_v33  ;;  %v6129_v24 = vpack.c.bf16 %v1184_v35, %v1183_v49  ;;  %v3733_v53 = vshrl.u32 %v8285_v11, 16  ;;  %v3737_v16 = vshll.u32 %v7328_v58, 16  ;;  %v10108_v34 = vrot.slane %v8324_v37, 3 }
  0xa9   : > { %vm10109_vm6 = vcmask 1044480   ;;  %v3741_v7 = vshrl.u32 %v7328_v58, 16  ;;  %v3745_v41 = vshll.u32 %v8410_v23, 16  ;;  %v266_v55 = vadd.s32 224, %v7530_v8 }
  0xaa   : > { %v1562_v5 = vsel %vm10109_vm6, %v10108_v34, %v1561_v43  ;;  %v8452_v44 = vld [vmem:[#allocation2 + $0x64] sm:$0xff]   ;;  %6168 = vst [vmem:[#allocation2 + $0x70] sm:$0xff] %v6129_v24   ;;  %v567_v49 = vmul.u32 18, %v566_v42  ;;  %v3735_v12 = vor.u32 %v3733_v53, %v8318_v15  ;;  %v8456_v11 = vadd.f32 %v8163_v52, %v1000_v36  ;;  %v959_v53 = vld [vmem:[%s7559_s21 + $0xf0] sm:$0xff]  ;;  %vm10111_vm1 = vmmov %vm10109_vm6 }
  0xab   : > { %6444 = vmatprep.mubr.bf16.mxu1 %v1562_v5  ;;  %v8459_v37 = vadd.f32 %v8163_v52, %v1001_v22  ;;  %v577_v34 = vshrl.u32 %v8438_v17, 4  ;;  %v3739_v58 = vrot.slane %v3737_v16, 1  ;;  %v8462_v35 = vrot.slane %v3745_v41, 1 }
  0xac   : > { %v267_v5 = vadd.s32 232, %v7530_v8  ;;  %v1563_v42 = vrot.slane %v8452_v44, 3  ;;  %v568_v15 = vsub.s32 %v8376_v21, %v567_v49  ;;  %vm10110_vm10 = vsmask.f32 7424 }
  0xad   : > { %v8467_v24 = vmul.u32.u64.low 3817748708, %v266_v55  ;;  %v8468_v36 = vmul.u32.u64.high 3817748708, %v266_v55, %v8467_v24  ;;  %v578_v22 = vmul.u32 18, %v577_v34  ;;  %v3740_v0 = vsel %vm10110_vm10, %v3735_v12, %v3739_v58  ;;  %vm10114_vm9 = vmmov %vm10110_vm10 }
  0xae   : > { %v3743_v46 = vor.u32 %v3741_v7, %v3739_v58  ;;  %v1564_v41 = vsel %vm10111_vm1, %v1561_v43, %v1563_v42  ;;  %vm696_vm7 = vcmp.ne.s32.totalorder %v568_v15, 0  ;;  %vm732_vm6 = vcmp.lt.s32.totalorder %v568_v15, 0  ;;  %6696 = vmatprep.mubr.bf16.mxu0 %v3740_v0 }
  0xaf   : > { %v804_v17 = vadd.s32 18, %v568_v15  ;;  %6445 = vmatmul.mubr.bf16.gmra.mrb[20].mxu1 %v1564_v41  ;;  %v579_v21 = vsub.s32 %v8397_v1, %v578_v22  ;;  %vm8476_vm5 = vmand %vm732_vm6, %vm696_vm7  ;;  %v8482_v7 = vmul.u32.u64.low 3817748708, %v267_v5  ;;  %v8483_v34 = vmul.u32.u64.high 3817748708, %v267_v5, %v8482_v7 }
  0xb0   : > { %v3748_v12 = vsel %vm10114_vm9, %v3743_v46, %v8462_v35  ;;  %v588_v58 = vshrl.u32 %v8468_v36, 4  ;;  %v1080_v24 = vmax.f32 %v8459_v37, 0.0  ;;  %v268_v1 = vadd.s32 240, %v7530_v8 }
  0xb1   : > { %v840_v43 = vsel %vm8476_vm5, %v804_v17, %v568_v15  ;;  %6697 = vmatmul.mubr.bf16.gmra.mrb[12].mxu0 %v3748_v12  ;;  %v8490_v22 = vld [vmem:[#allocation2 + $0x6c] sm:$0xff]   ;;  %vm697_vm10 = vcmp.ne.s32.totalorder %v579_v21, 0  ;;  %vm733_vm1 = vcmp.lt.s32.totalorder %v579_v21, 0  ;;  %v805_v0 = vadd.s32 18, %v579_v21 }
  0xb2   : > { %v1002_v46 = vmul.f32 %v8180_v57, %v959_v53  ;;  %vm769_vm9 = vmand %vm733_vm1, %vm697_vm10  ;;  %vm8493_vm7 = vcmp.lt.s32.totalorder %v840_v43, 16  ;;  %v10115_v41 = vmov 0  ;;  %v589_v15 = vmul.u32 18, %v588_v58 }
  0xb3   : > { %v10116_v41 = vsel %vm8493_vm7, 4294967295, %v10115_v41  ;;  %v269_v17 = vadd.s32 248, %v7530_v8  ;;  %v1003_v36 = vmul.f32 %v8180_v57, %v960_v40  ;;  %v9874_v37 = vrot.slane %v8490_v22, 3 }
  0xb4   : > { %10117 = vst [vmem:[#allocation40_spill] sm:$0xff] %v10116_v41  ;;  %v841_v49 = vsel %vm769_vm9, %v805_v0, %v579_v21  ;;  %v10118_v12 = vmax.f32 %v8408_v19, 0.0  ;;  %v599_v53 = vshrl.u32 %v8483_v34, 4  ;;  %v10119_v43 = vmov 0 }
  0xb5   : > { %vm8505_vm5 = vcmp.lt.s32.totalorder %v841_v49, 16  ;;  %v590_v16 = vsub.s32 %v266_v55, %v589_v15  ;;  %v8509_v58 = vmul.u32.u64.low 3817748708, %v268_v1  ;;  %v8510_v33 = vmul.u32.u64.high 3817748708, %v268_v1, %v8509_v58  ;;  %v7333_v15 = vld [vmem:[#allocation2 + $0x58] sm:$0xff]  }
  0xb6   : > { %v1185_v7 = vsel %vm8493_vm7, %v10118_v12, 0.0  ;;  %v10120_v43 = vsel %vm8505_vm5, 4294967295, %v10119_v43  ;;  %vm10122_vm6 = vcmask 1044480   ;;  %v10123_v21 = vmax.f32 %v8417_v3, 0.0 }
  0xb7   : > { %10121 = vst [vmem:[#allocation41_spill] sm:$0xff] %v10120_v43  ;;  %v1566_v40 = vsel %vm10122_vm6, %v1563_v42, %v9874_v37  ;;  %v600_v0 = vmul.u32 18, %v599_v53  ;;  %v8520_v34 = vadd.f32 %v8163_v52, %v1002_v46  ;;  %vm698_vm10 = vcmp.ne.s32.totalorder %v590_v16, 0 }
  0xb8   : > { %v1186_v19 = vsel %vm8505_vm5, %v10123_v21, 0.0  ;;  %6448 = vmatprep.mubr.bf16.mxu1 %v1566_v40  ;;  %vm734_vm1 = vcmp.lt.s32.totalorder %v590_v16, 0  ;;  %v806_v55 = vadd.s32 18, %v590_v16  ;;  %v8526_v3 = vadd.f32 %v8163_v52, %v1003_v36  ;;  %v8531_v40 = vld [vmem:[#allocation2 + $0x60] sm:$0xff]  }
  0xb9   : > { %v6134_v49 = vpack.c.bf16 %v1186_v19, %v1185_v7  ;;  %v601_v12 = vsub.s32 %v267_v5, %v600_v0  ;;  %vm770_vm9 = vmand %vm734_vm1, %vm698_vm10  ;;  %v8522_v58 = vmul.u32.u64.low 3817748708, %v269_v17  ;;  %v8523_v41 = vmul.u32.u64.high 3817748708, %v269_v17, %v8522_v58 }
  0xba   : > { %v842_v42 = vsel %vm770_vm9, %v806_v55, %v590_v16  ;;  %v610_v53 = vshrl.u32 %v8510_v33, 4  ;;  %v1081_v46 = vmax.f32 %v8520_v34, 0.0  ;;  %v3749_v7 = vshrl.u32 %v8410_v23, 16 }
  0xbb   : > { %6169 = vst [vmem:[#allocation2 + $0x78] sm:$0xff] %v6134_v49   ;;  %vm699_vm6 = vcmp.ne.s32.totalorder %v601_v12, 0  ;;  %vm735_vm5 = vcmp.lt.s32.totalorder %v601_v12, 0  ;;  %v807_v5 = vadd.s32 18, %v601_v12  ;;  %vm8533_vm10 = vcmp.lt.s32.totalorder %v842_v42, 16 }
  0xbc   : > { %v10124_v21 = vmov 0  ;;  %vm771_vm1 = vmand %vm735_vm5, %vm699_vm6  ;;  %v10127_v36 = vmax.f32 %v8456_v11, 0.0  ;;  %v611_v33 = vmul.u32 18, %v610_v53  ;;  %v1082_v19 = vmax.f32 %v8526_v3, 0.0 }
  0xbd   : > { %v10125_v21 = vsel %vm8533_vm10, 4294967295, %v10124_v21  ;;  %v3751_v23 = vor.u32 %v3749_v7, %v8462_v35  ;;  %v843_v0 = vsel %vm771_vm1, %v807_v5, %v601_v12  ;;  %v621_v34 = vshrl.u32 %v8523_v41, 4  ;;  %v961_v41 = vld [vmem:[%s7559_s21 + $0x100] sm:$0xff]  ;;  %v962_v5 = vld [vmem:[%s7559_s21 + $0x108] sm:$0xff] }
  0xbe   : > { %10126 = vst [vmem:[#allocation42_spill] sm:$0xff] %v10125_v21  ;;  %v1187_v16 = vsel %vm8533_vm10, %v10127_v36, 0.0  ;;  %v3753_v49 = vshll.u32 %v7333_v15, 16  ;;  %v3757_v55 = vshrl.u32 %v7333_v15, 16  ;;  %vm8544_vm9 = vcmp.lt.s32.totalorder %v843_v0, 16 }
  0xbf   : > { %v10128_v58 = vmov 0  ;;  %v612_v11 = vsub.s32 %v268_v1, %v611_v33  ;;  %v3761_v42 = vshll.u32 %v8531_v40, 16  ;;  %v270_v36 = vadd.s32 256, %v7530_v8 }
  0xc0   : > { %v10129_v58 = vsel %vm8544_vm9, 4294967295, %v10128_v58  ;;  %v1188_v3 = vsel %vm8544_vm9, %v1080_v24, 0.0  ;;  %v622_v53 = vmul.u32 18, %v621_v34  ;;  %v3755_v35 = vrot.slane %v3753_v49, 1 }
  0xc1   : > { %10130 = vst [vmem:[#allocation43_spill] sm:$0xff] %v10129_v58  ;;  %v271_v12 = vadd.s32 264, %v7530_v8  ;;  %v6139_v7 = vpack.c.bf16 %v1188_v3, %v1187_v16  ;;  %vm700_vm5 = vcmp.ne.s32.totalorder %v612_v11, 0  ;;  %vm736_vm6 = vcmp.lt.s32.totalorder %v612_v11, 0 }
  0xc2   : > { %v808_v15 = vadd.s32 18, %v612_v11  ;;  %v8555_v0 = vld [vmem:[#allocation2 + $0x74] sm:$0xff]   ;;  %v623_v1 = vsub.s32 %v269_v17, %v622_v53  ;;  %vm10131_vm1 = vsmask.f32 7424  ;;  %v3759_v37 = vor.u32 %v3757_v55, %v3755_v35  ;;  %vm8558_vm10 = vmand %vm736_vm6, %vm700_vm5 }
  0xc3   : > { %v3756_v33 = vsel %vm10131_vm1, %v3751_v23, %v3755_v35  ;;  %v3763_v21 = vrot.slane %v3761_v42, 1  ;;  %6170 = vst [vmem:[#allocation2 + $0x80] sm:$0xff] %v6139_v7   ;;  %v8562_v34 = vmul.u32.u64.low 3817748708, %v270_v36  ;;  %v8563_v49 = vmul.u32.u64.high 3817748708, %v270_v36, %v8562_v34  ;;  %v7339_v35 = vld [vmem:[#allocation2 + $0x68] sm:$0xff]  }
  0xc4   : > { %6700 = vmatprep.mubr.bf16.mxu0 %v3756_v33  ;;  %v8565_v16 = vmul.u32.u64.low 3817748708, %v271_v12  ;;  %v8566_v3 = vmul.u32.u64.high 3817748708, %v271_v12, %v8565_v16  ;;  %v1567_v58 = vrot.slane %v8555_v0, 3  ;;  %vm701_vm9 = vcmp.ne.s32.totalorder %v623_v1, 0 }
  0xc5   : > { %vm737_vm7 = vcmp.lt.s32.totalorder %v623_v1, 0  ;;  %v809_v17 = vadd.s32 18, %v623_v1  ;;  %v844_v23 = vsel %vm8558_vm10, %v808_v15, %v612_v11  ;;  %vm10134_vm5 = vsmask.f32 7424  ;;  %v1375_v11 = vld [vmem:[#allocation2 + $0x4] sm:$0xc] }
  0xc6   : > { %vm773_vm1 = vmand %vm737_vm7, %vm701_vm9  ;;  %v3764_v55 = vsel %vm10134_vm5, %v3759_v37, %v3763_v21  ;;  %v1004_v42 = vmul.f32 %v8180_v57, %v961_v41  ;;  %v1005_v53 = vmul.f32 %v8180_v57, %v962_v5  ;;  %v10135_v7 = vrot.slane %v8490_v22, 3 }
  0xc7   : > { %vm10136_vm6 = vcmask 1044480   ;;  %v845_v34 = vsel %vm773_vm1, %v809_v17, %v623_v1  ;;  %vm8577_vm2 = vcmp.lt.s32.totalorder %v844_v23, 16  ;;  %v10137_v16 = vmov 0  ;;  %6701 = vmatmul.mubr.bf16.gmra.mrb[16].mxu0 %v3764_v55  ;;  %v8594_v17 = vld [vmem:[#allocation2 + $0x70] sm:$0xff]  }
  0xc8   : > { %v1568_v33 = vsel %vm10136_vm6, %v10135_v7, %v1567_v58  ;;  %v10138_v16 = vsel %vm8577_vm2, 4294967295, %v10137_v16  ;;  %v3765_v24 = vshrl.u32 %v8531_v40, 16  ;;  %vm8582_vm7 = vcmp.lt.s32.totalorder %v845_v34, 16 }
  0xc9   : > { %10139 = vst [vmem:[#allocation44_spill] sm:$0xff] %v10138_v16  ;;  %6449 = vmatmul.mubr.bf16.gmra.mrb[24].mxu1 %v1568_v33  ;;  %v10140_v37 = vmov 0  ;;  %v1189_v57 = vsel %vm8577_vm2, %v1081_v46, 0.0  ;;  %v632_v41 = vshrl.u32 %v8563_v49, 4  ;;  %v643_v15 = vshrl.u32 %v8566_v3, 4 }
  0xca   : > { %v10141_v37 = vsel %vm8582_vm7, 4294967295, %v10140_v37  ;;  %v1190_v5 = vsel %vm8582_vm7, %v1082_v19, 0.0  ;;  %v1047_v1 = vadd.f32 %v8163_v52, %v1004_v42  ;;  %v1048_v40 = vadd.f32 %v8163_v52, %v1005_v53  ;;  %v8596_v34 = vld [vmem:[#allocation2 + $0x7c] sm:$0xff]  }
  0xcb   : > { %10142 = vst [vmem:[#allocation45_spill] sm:$0xff] %v10141_v37  ;;  %v6144_v23 = vpack.c.bf16 %v1190_v5, %v1189_v57  ;;  %v633_v55 = vmul.u32 18, %v632_v41  ;;  %v644_v7 = vmul.u32 18, %v643_v15  ;;  %v3769_v33 = vshll.u32 %v7339_v35, 16  ;;  %v7428_v37 = vld [vmem:[#allocation2 + $0x8] sm:$0xf] }
  0xcc   : > { %v1083_v46 = vmax.f32 %v1047_v1, 0.0  ;;  %v3767_v16 = vor.u32 %v3765_v24, %v3763_v21  ;;  %v5773_v19 = vcombine.low %v1375_v11, %v7428_v37  ;;  %v1569_v42 = vrot.slane %v8596_v34, 3  ;;  %v8609_v1 = vld [vmem:[#allocation2 + $0xc] sm:$0xff]  }
  0xcd   : > { %6171 = vst [vmem:[#allocation2 + $0x88] sm:$0xff] %v6144_v23   ;;  %v634_v49 = vsub.s32 %v270_v36, %v633_v55  ;;  %v645_v3 = vsub.s32 %v271_v12, %v644_v7  ;;  %v3771_v43 = vrot.slane %v3769_v33, 1  ;;  %v1084_v25 = vmax.f32 %v1048_v40, 0.0  ;;  %v7344_v7 = vld [vmem:[#allocation2 + $0x78] sm:$0xff]  }
  0xce   : > { %v3773_v52 = vshrl.u32 %v7339_v35, 16  ;;  %v3777_v53 = vshll.u32 %v8594_v17, 16  ;;  %v1570_v57 = vsel %vm10136_vm6, %v1567_v58, %v1569_v42  ;;  %vm10145_vm2 = vsmask.f32 7424 }
  0xcf   : > { %vm702_vm10 = vcmp.ne.s32.totalorder %v634_v49, 0  ;;  %vm703_vm9 = vcmp.ne.s32.totalorder %v645_v3, 0  ;;  %vm738_vm1 = vcmp.lt.s32.totalorder %v634_v49, 0  ;;  %vm739_vm5 = vcmp.lt.s32.totalorder %v645_v3, 0  ;;  %6452 = vmatprep.mubr.bf16.mxu1 %v1570_v57 }
  0xd0   : > { %vm8601_vm7 = vmand %vm738_vm1, %vm702_vm10  ;;  %v810_v36 = vadd.s32 18, %v634_v49  ;;  %v811_v12 = vadd.s32 18, %v645_v3  ;;  %v3772_v24 = vsel %vm10145_vm2, %v3767_v16, %v3771_v43  ;;  %v3775_v35 = vor.u32 %v3773_v52, %v3771_v43 }
  0xd1   : > { %vm775_vm11 = vmand %vm739_vm5, %vm703_vm9  ;;  %6704 = vmatprep.mubr.bf16.mxu0 %v3772_v24  ;;  %v3779_v37 = vrot.slane %v3777_v53, 1  ;;  %v1825_v41 = vshrl.u32 %v5773_v19, 16  ;;  %v1828_v5 = vshll.u32 %v5773_v19, 16  ;;  %v9889_v40 = vshrl.u32 %v8609_v1, 16  ;;  %v7345_v19 = vld [vmem:[#allocation2 + $0x80] sm:$0xff]  }
  0xd2   : > { %v846_v15 = vsel %vm8601_vm7, %v810_v36, %v634_v49  ;;  %v847_v58 = vsel %vm775_vm11, %v811_v12, %v645_v3  ;;  %v10146_v23 = vmov 0  ;;  %v10149_v16 = vmov 0  ;;  %vm10153_vm11 = vmmov %vm10136_vm6 }
  0xd3   : > { %vm8612_vm10 = vcmp.lt.s32.totalorder %v846_v15, 16  ;;  %vm8616_vm2 = vcmp.lt.s32.totalorder %v847_v58, 16  ;;  %vm10152_vm9 = vsmask.f32 7424  ;;  %v9888_v55 = vshll.u32 %v8609_v1, 16 }
  0xd4   : > { %v10147_v23 = vsel %vm8612_vm10, 4294967295, %v10146_v23  ;;  %v10150_v16 = vsel %vm8616_vm2, 4294967295, %v10149_v16  ;;  %v3780_v43 = vsel %vm10152_vm9, %v3775_v35, %v3779_v37  ;;  %v8622_v33 = vld [vmem:[#allocation2 + $0x84] sm:$0xff]   ;;  %v1191_v49 = vsel %vm8612_vm10, %v1083_v46, 0.0  ;;  %v8636_v46 = vld [vmem:[#allocation2 + $0x14] sm:$0xff]   ;;  %vm10154_vm1 = vmmov %vm10152_vm9 }
  0xd5   : > { %10148 = vst [vmem:[#allocation46_spill] sm:$0xff] %v10147_v23  ;;  %10151 = vst [vmem:[#allocation47_spill] sm:$0xff] %v10150_v16  ;;  %v1192_v3 = vsel %vm8616_vm2, %v1084_v25, 0.0  ;;  %6705 = vmatmul.mubr.bf16.gmra.mrb[20].mxu0 %v3780_v43  ;;  %v1827_v21 = vrot.slane %v1825_v41, 2  ;;  %v1571_v36 = vrot.slane %v8622_v33, 3  ;;  %v1830_v12 = vrot.slane %v1828_v5, 3 }
  0xd6   : > { %v6149_v57 = vpack.c.bf16 %v1192_v3, %v1191_v49  ;;  %v1835_v24 = vrot.slane %v9889_v40, 2  ;;  %v3781_v35 = vshrl.u32 %v8594_v17, 16  ;;  %v1838_v25 = vrot.slane %v9888_v55, 3  ;;  %v7348_v11 = vld [vmem:[#allocation2 + $0x88] sm:$0xff]   ;;  %v963_v49 = vld [vmem:[%s7559_s21 + $0x110] sm:$0xff]  ;;  %vm10156_vm5 = vmmov %vm10154_vm1 }
  0xd7   : > { %v9890_v15 = vshrl.u32 %v8636_v46, 16  ;;  %v3785_v58 = vshll.u32 %v7344_v7, 16  ;;  %v3789_v43 = vshrl.u32 %v7344_v7, 16  ;;  %v1572_v41 = vsel %vm10153_vm11, %v1569_v42, %v1571_v36  ;;  %vm10159_vm6 = vmmov %vm10154_vm1 }
  0xd8   : > { %6172 = vst [vmem:[#allocation2 + $0x90] sm:$0xff] %v6149_v57   ;;  %v3783_v5 = vor.u32 %v3781_v35, %v3779_v37  ;;  %v3793_v3 = vshll.u32 %v7345_v19, 16  ;;  %6453 = vmatmul.mubr.bf16.gmra.mrb[28].mxu1 %v1572_v41  ;;  %vm9908_vm7 = vsmask.f32 5376  ;;  %v1831_v7 = vor.u32 %v1830_v12, %v1827_v21  ;;  %vm10160_vm9 = vmmov %vm10153_vm11 }
  0xd9   : > { %v3787_v52 = vrot.slane %v3785_v58, 1  ;;  %v1839_v42 = vor.u32 %v1838_v25, %v1835_v24  ;;  %v1844_v37 = vrot.slane %v9890_v15, 2  ;;  %v10155_v17 = vshll.u32 %v8636_v46, 16  ;;  %v8651_v58 = vld [vmem:[#allocation2 + $0x1c] sm:$0xff]   ;;  %v8656_v25 = vld [vmem:[#allocation2 + $0x24] sm:$0xff]   ;;  %vm10161_vm11 = vmmov %vm10160_vm9 }
  0xda   : > { %v3795_v40 = vrot.slane %v3793_v3, 1  ;;  %v3797_v12 = vshrl.u32 %v7345_v19, 16  ;;  %v10158_v16 = vshll.u32 %v8651_v58, 16  ;;  %v10162_v29 = vshrl.u32 %v8656_v25, 16 }
  0xdb   : > { %v3788_v35 = vsel %vm10154_vm1, %v3783_v5, %v3787_v52  ;;  %v3791_v53 = vor.u32 %v3789_v43, %v3787_v52  ;;  %v1847_v57 = vrot.slane %v10155_v17, 3  ;;  %v3801_v43 = vshll.u32 %v7348_v11, 16  ;;  %v964_v5 = vld [vmem:[%s7559_s21 + $0x118] sm:$0xff]  ;;  %v7433_v52 = vld [vmem:[%s9838_s0] ss:$0 sm:$0xff]  ;;  %s235_s21 = scalar_lea.vmem %s9843_s5, %s5691_s12 }
  0xdc   : > { %6708 = vmatprep.mubr.bf16.mxu0 %v3788_v35  ;;  %v3799_v17 = vor.u32 %v3797_v12, %v3795_v40  ;;  %v3805_v35 = vshrl.u32 %v7348_v11, 16  ;;  %v1856_v3 = vrot.slane %v10158_v16, 3  ;;  %v272_v45 = vadd.s32 272, %v7530_v8 }
  0xdd   : > { %v3796_v24 = vsel %vm10156_vm5, %v3791_v53, %v3795_v40  ;;  %v3803_v41 = vrot.slane %v3801_v43, 1  ;;  %v10157_v53 = vshrl.u32 %v8651_v58, 16  ;;  %v1840_v40 = vsel %vm9908_vm7, %v1831_v7, %v1839_v42 }
  0xde   : > { %6709 = vmatmul.mubr.bf16.gmra.mrb[24].mxu0 %v3796_v24  ;;  %v1006_v24 = vmul.f32 %v7433_v52, %v963_v49  ;;  %v1007_v43 = vmul.f32 %v7433_v52, %v964_v5  ;;  %v1862_v49 = vrot.slane %v10162_v29, 2  ;;  %v273_v7 = vadd.s32 280, %v7530_v8 }
  0xdf   : > { %v8661_v55 = vld [vmem:[#allocation2 + $0x8c] sm:$0xff]   ;;  %v8663_v15 = vld [vmem:[#allocation2 + $0x94] ss:$0 sps:$4 sm:$0x77]   ;;  %v1853_v21 = vrot.slane %v10157_v53, 2  ;;  %v3804_v12 = vsel %vm10159_vm6, %v3799_v17, %v3803_v41  ;;  %v1848_v53 = vor.u32 %v1847_v57, %v1844_v37  ;;  %v3807_v9 = vor.u32 %v3805_v35, %v3803_v41 }
  0xe0   : > { %v1573_v19 = vrot.slane %v8661_v55, 3  ;;  %v8670_v23 = vld [vmem:[#allocation2 + $0x90] sm:$0xff]   ;;  %v1575_v11 = vrot.slane %v8663_v15, 3  ;;  %6712 = vmatprep.mubr.bf16.mxu0 %v3804_v12  ;;  %v8685_v17 = vld [vmem:[#allocation2 + $0x1c] sm:$0xf]  ;;  %v10163_v57 = vshll.u32 %v8656_v25, 16 }
  0xe1   : > { %v3809_v16 = vshll.u32 %v8670_v23, 16  ;;  %v8694_v29 = vmul.u32.u64.low 3817748708, %v272_v45  ;;  %v8695_v5 = vmul.u32.u64.high 3817748708, %v272_v45, %v8694_v29  ;;  %v1849_v12 = vsel %vm9908_vm7, %v1839_v42, %v1848_v53 }
  0xe2   : > { %v1574_v62 = vsel %vm10160_vm9, %v1571_v36, %v1573_v19  ;;  %v1576_v13 = vsel %vm10161_vm11, %v1573_v19, %v1575_v11  ;;  %v1857_v36 = vor.u32 %v1856_v3, %v1853_v21  ;;  %v1865_v37 = vrot.slane %v10163_v57, 3  ;;  %v8703_v3 = vld [vmem:[#allocation2 + $0x34] sm:$0xff]   ;;  %v7346_v19 = vld [vmem:[%s9841_s3 + $0x88] sm:$0xff]   ;;  %v8727_v21 = vld [vmem:[#allocation2 + $0x3c] sm:$0xff]  }
  0xe3   : > { %6456 = vmatprep.mubr.bf16.mxu1 %v1574_v62  ;;  %v8689_v41 = vrot.slane %v3809_v16, 1  ;;  %v8691_v62 = vld [vmem:[#allocation2 + $0x2c] sm:$0xff]   ;;  %v8697_v35 = vmul.u32.u64.low 3817748708, %v273_v7  ;;  %v8698_v8 = vmul.u32.u64.high 3817748708, %v273_v7, %v8697_v35  ;;  %v7436_v16 = vld [vmem:[%s9839_s1] ss:$0 sm:$0xff]  ;;  %v8721_v42 = vcombine.low %v4108_v56, %v8685_v17 }
  0xe4   : > { %6457 = vmatmul.mubr.bf16.gmra.mrb[32].mxu1 %v1576_v13  ;;  %v9900_v52 = vshrl.u32 %v8691_v62, 16  ;;  %v8712_v57 = vadd.f32 %v7436_v16, %v1006_v24  ;;  %v1858_v29 = vsel %vm9908_vm7, %v1848_v53, %v1857_v36  ;;  %v1866_v35 = vor.u32 %v1865_v37, %v1862_v49 }
  0xe5   : > { %6476 = vmatprep.mubr.bf16.mxu1 %v1840_v40  ;;  %v3812_v13 = vsel %vm10154_vm1, %v3807_v9, %v8689_v41  ;;  %v2640_v9 = vld [vmem:[#allocation2 + $0x50] sm:$0xf]  ;;  %v8718_v11 = vadd.f32 %v7436_v16, %v1007_v43  ;;  %v654_v40 = vshrl.u32 %v8695_v5, 4  ;;  %v665_v24 = vshrl.u32 %v8698_v8, 4 }
  0xe6   : > { %6713 = vmatmul.mubr.bf16.gmra.mrb[28].mxu0 %v3812_v13  ;;  %v1871_v13 = vrot.slane %v9900_v52, 2  ;;  %v10164_v49 = vshll.u32 %v8691_v62, 16  ;;  %v10165_v43 = vshrl.u32 %v8703_v3, 16  ;;  %v10167_v5 = vshll.u32 %v8703_v3, 16 }
  0xe7   : > { %v655_v20 = vmul.u32 18, %v654_v40  ;;  %v666_v50 = vmul.u32 18, %v665_v24  ;;  %v1085_v53 = vmax.f32 %v8712_v57, 0.0  ;;  %v1086_v56 = vmax.f32 %v8718_v11, 0.0 }
  0xe8   : > { %v1874_v37 = vrot.slane %v10164_v49, 3  ;;  %v1880_v16 = vrot.slane %v10165_v43, 2  ;;  %v1883_v8 = vrot.slane %v10167_v5, 3  ;;  %v8743_v49 = vcombine.low %v7439_v10, %v2640_v9  ;;  %v7350_v43 = vld [vmem:[%s9841_s3 + $0x90] sm:$0xff]   ;;  %v7440_v5 = vld [vmem:[%s9841_s3 + $0x80] sm:$0xff]  }
  0xe9   : > { %v656_v40 = vsub.s32 %v272_v45, %v655_v20  ;;  %v667_v57 = vsub.s32 %v273_v7, %v666_v50  ;;  %v10169_v10 = vshrl.u32 %v8727_v21, 16  ;;  %v1867_v24 = vsel %vm9908_vm7, %v1857_v36, %v1866_v35  ;;  %v7354_v7 = vld [vmem:[%s9841_s3 + $0x98] sm:$0xff]  }
  0xea   : > { %10168 = vst [vmem:[#allocation49_spill] sm:$0xff] %v8743_v49  ;;  %v1875_v39 = vor.u32 %v1874_v37, %v1871_v13  ;;  %v10170_v11 = vshll.u32 %v8727_v21, 16  ;;  %v10171_v48 = vshrl.u32 %v8735_v47, 16  ;;  %v4258_v36 = vshll.u32 %v8721_v42, 16  ;;  %v8770_v13 = vld [vmem:[#allocation2 + $0x28] sm:$0xff]  }
  0xeb   : > { %v1889_v9 = vrot.slane %v10169_v10, 2  ;;  %vm704_vm5 = vcmp.ne.s32.totalorder %v656_v40, 0  ;;  %vm705_vm6 = vcmp.ne.s32.totalorder %v667_v57, 0  ;;  %vm740_vm9 = vcmp.lt.s32.totalorder %v656_v40, 0  ;;  %10174 = vst [vmem:[#allocation50_spill] sm:$0xff] %v8770_v13  ;;  %v8776_v10 = vld [vmem:[#allocation2 + $0x54] sm:$0xff]  }
  0xec   : > { %6477 = vmatmul.mubr.bf16.vlgmr.msra.gmra.mrb[0].mxu1 %v1849_v12  ;;  %v1892_v52 = vrot.slane %v10170_v11, 3  ;;  %v1898_v38 = vrot.slane %v10171_v48, 2  ;;  %vm741_vm11 = vcmp.lt.s32.totalorder %v667_v57, 0  ;;  %vm8761_vm1 = vmand %vm740_vm9, %vm704_vm5  ;;  %v812_v20 = vadd.s32 18, %v656_v40  ;;  %v8772_v48 = vld [vmem:[#allocation2 + $0x4c] sm:$0xff]  }
  0xed   : > { %6513 = vmatpush3.bf16.msra.mxu1 %v7440_v5  ;;  %6480 = vmatprep.mubr.bf16.mxu1 %v1858_v29  ;;  %v813_v45 = vadd.s32 18, %v667_v57  ;;  %vm777_vm7 = vmand %vm741_vm11, %vm705_vm6  ;;  %vm10175_vm5 = vsmask.f32 5376  ;;  %v1884_v32 = vor.u32 %v1883_v8, %v1880_v16  ;;  %v10176_v18 = vmov 0 }
  0xee   : > { %6514 = vmatprep.subr.bf16.mxu1 %v7346_v19  ;;  %v1876_v31 = vsel %vm10175_vm5, %v1866_v35, %v1875_v39  ;;  %v10179_v5 = vmov 0  ;;  %v1893_v11 = vor.u32 %v1892_v52, %v1889_v9  ;;  %v10182_v12 = vshll.u32 %v8735_v47, 16  ;;  %v8793_v35 = vld [vmem:[#allocation2 + $0x30] sm:$0xff]   ;;  %vm10191_vm11 = vmmov %vm10175_vm5 }
  0xef   : > { %v849_v29 = vsel %vm777_vm7, %v813_v45, %v667_v57  ;;  %10183 = vst [vmem:[#allocation53_spill] sm:$0xff] %v8793_v35  ;;  %v4260_v52 = vrot.slane %v4258_v36, 1  ;;  %v10184_v9 = vshll.u32 %v8738_v26, 16  ;;  %vm10190_vm7 = vmmov %vm10175_vm5  ;;  %v4682_v57 = vld [vmem:[#allocation2 + $0x18] sm:$0xe]  ;;  %v10193_v36 = vshll.u32 %v8770_v13, 16 }
  0xf0   : > { %vm8787_vm9 = vcmp.lt.s32.totalorder %v849_v29, 16  ;;  %v1901_v37 = vrot.slane %v10182_v12, 3  ;;  %v10202_v51 = vshrl.u32 %v8555_v0, 16  ;;  %v10207_v60 = vshrl.u32 %v8596_v34, 16 }
  0xf1   : > { %6515 = vmatpush3.bf16.msra.mxu1 %v7346_v19  ;;  %v848_v19 = vsel %vm8761_vm1, %v812_v20, %v656_v40  ;;  %v10180_v5 = vsel %vm8787_vm9, 4294967295, %v10179_v5  ;;  %v1194_v8 = vsel %vm8787_vm9, %v1086_v56, 0.0  ;;  %v4265_v12 = vrot.slane %v10184_v9, 1  ;;  %v8818_v9 = vld [vmem:[#allocation2 + $0x38] sm:$0xff]   ;;  %vm10196_vm1 = vmmov %vm10175_vm5 }
  0xf2   : > { %6516 = vmatprep.subr.bf16.mxu1 %v7350_v43  ;;  %vm8783_vm6 = vcmp.lt.s32.totalorder %v848_v19, 16  ;;  %10181 = vst [vmem:[#allocation52_spill] sm:$0xff] %v10180_v5  ;;  %v10187_v56 = vshrl.u32 %v8776_v10, 16  ;;  %v10188_v19 = vshll.u32 %v8776_v10, 16  ;;  %10189 = vst [vmem:[#allocation54_spill] sm:$0xff] %v8818_v9  ;;  %v10192_v5 = vshrl.u32 %v8721_v42, 16 }
  0xf3   : > { %v10177_v18 = vsel %vm8783_vm6, 4294967295, %v10176_v18  ;;  %v1193_v16 = vsel %vm8783_vm6, %v1085_v53, 0.0  ;;  %v10186_v53 = vshll.u32 %v8772_v48, 16  ;;  %v10195_v42 = vshll.u32 %v8793_v35, 16 }
  0xf4   : > { %10178 = vst [vmem:[#allocation51_spill] sm:$0xff] %v10177_v18  ;;  %6481 = vmatmul.mubr.bf16.gmra.mrb[4].mxu1 %v1867_v24  ;;  %v6154_v50 = vpack.c.bf16 %v1194_v8, %v1193_v16  ;;  %v10185_v24 = vshrl.u32 %v8772_v48, 16  ;;  %v1916_v29 = vrot.slane %v10187_v56, 2  ;;  %v1919_v40 = vrot.slane %v10188_v19, 3 }
  0xf5   : > { %6484 = vmatprep.mubr.bf16.mxu1 %v1876_v31  ;;  %6517 = vmatpush3.bf16.msra.mxu1 %v7350_v43  ;;  %v1910_v45 = vrot.slane %v10186_v53, 3  ;;  %v7359_v31 = vld [vmem:[%s9841_s3 + $0xa0] sm:$0xff]   ;;  %v3813_v16 = vshrl.u32 %v8670_v23, 16  ;;  %v3825_v53 = vshll.u32 %v7353_v30, 16  ;;  %v1894_v56 = vsel %vm10191_vm11, %v1884_v32, %v1893_v11  ;;  %vm10200_vm11 = vmmov %vm10196_vm1 }
  0xf6   : > { %6518 = vmatprep.subr.bf16.mxu1 %v7354_v7  ;;  %v1907_v20 = vrot.slane %v10185_v24, 2  ;;  %6173 = vst [vmem:[#allocation2 + $0x98] sm:$0xff] %v6154_v50   ;;  %v1885_v24 = vsel %vm10190_vm7, %v1875_v39, %v1884_v32  ;;  %v1902_v19 = vor.u32 %v1901_v37, %v1898_v38  ;;  %v4261_v43 = vor.u32 %v4260_v52, %v10192_v5  ;;  %v7363_v38 = vld [vmem:[%s9841_s3 + $0xa8] sm:$0xff]  }
  0xf7   : > { %v4273_v50 = vrot.slane %v10193_v36, 1  ;;  %v9922_v23 = vshrl.u32 %v8419_v14, 16  ;;  %v9918_v8 = vshll.u32 %v8419_v14, 16  ;;  %v10194_v18 = vshrl.u32 %v8738_v26, 16 }
  0xf8   : > { %v1911_v39 = vor.u32 %v1910_v45, %v1907_v20  ;;  %v8830_v30 = vor.u32 %v1919_v40, %v1916_v29  ;;  %v9919_v32 = vshrl.u32 %v8770_v13, 16  ;;  %v9920_v37 = vshrl.u32 %v8793_v35, 16 }
  0xf9   : > { %6519 = vmatpush3.bf16.msra.mxu1 %v7354_v7  ;;  %v4269_v49 = vor.u32 %v10194_v18, %v4265_v12  ;;  %v8838_v7 = vrot.slane %v10195_v42, 1  ;;  %v9921_v5 = vshll.u32 %v8818_v9, 16  ;;  %v8843_v18 = vcombine.low %v4682_v57, %v8685_v17  ;;  %v8854_v57 = vld [vmem:[#allocation2 + $0x40] sm:$0xff]  }
  0xfa   : > { %6520 = vmatprep.subr.bf16.mxu1 %v7359_v31  ;;  %v3815_v40 = vor.u32 %v3813_v16, %v8689_v41  ;;  %v3827_v52 = vrot.slane %v3825_v53, 1  ;;  %v9925_v20 = vshrl.u32 %v8452_v44, 16  ;;  %v9928_v45 = vshll.u32 %v8452_v44, 16  ;;  %10198 = vst [vmem:[#allocation55_spill] sm:$0xff] %v8854_v57  ;;  %v7367_v41 = vld [vmem:[%s9841_s3 + $0xb0] sm:$0xff]   ;;  %v8880_v53 = vld [vmem:[#allocation2 + $0x48] sm:$0xff]  }
  0xfb   : > { %v1903_v29 = vsel %vm10196_vm1, %v1893_v11, %v1902_v19  ;;  %vm10197_vm5 = vsmask.f32 7424  ;;  %v1925_v42 = vrot.slane %v9922_v23, 2  ;;  %v1928_v17 = vrot.slane %v9918_v8, 3  ;;  %10201 = vst [vmem:[#allocation56_spill] sm:$0xff] %v8880_v53 }
  0xfc   : > { %6485 = vmatmul.mubr.bf16.gmra.mrb[8].mxu1 %v1885_v24  ;;  %v4266_v36 = vsel %vm10197_vm5, %v4261_v43, %v4265_v12  ;;  %vm10199_vm7 = vmmov %vm10197_vm5  ;;  %v1912_v11 = vsel %vm10200_vm11, %v1902_v19, %v1911_v39  ;;  %v8865_v12 = vsel %vm10196_vm1, %v1911_v39, %v8830_v30  ;;  %v8874_v43 = vor.u32 %v9920_v37, %v8838_v7 }
  0xfd   : > { %6488 = vmatprep.mubr.bf16.mxu1 %v1894_v56  ;;  %6521 = vmatpush3.bf16.msra.mxu1 %v7359_v31  ;;  %v7351_v16 = vld [vmem:[#allocation2 + $0x98] sm:$0xff]   ;;  %v8860_v24 = vsel %vm10199_vm7, %v4269_v49, %v4273_v50  ;;  %v8869_v31 = vor.u32 %v9919_v32, %v4273_v50  ;;  %v8878_v49 = vrot.slane %v9921_v5, 1  ;;  %v1934_v50 = vrot.slane %v9925_v20, 2  ;;  %v8907_v5 = vld [vmem:[#allocation2 + $0x50] sm:$0xff]   ;;  %vm10209_vm7 = vmmov %vm10197_vm5 }
  0xfe   : > { %6522 = vmatprep.subr.bf16.mxu1 %v7363_v38  ;;  %v3817_v39 = vshll.u32 %v7351_v16, 16  ;;  %v3821_v8 = vshrl.u32 %v7351_v16, 16  ;;  %v1937_v32 = vrot.slane %v9928_v45, 3  ;;  %v8888_v37 = vor.u32 %v1928_v17, %v1925_v42  ;;  %10204 = vst [vmem:[#allocation57_spill] sm:$0xff] %v8907_v5  ;;  %vm10214_vm11 = vmmov %vm10196_vm1 }
  0xff   : > { %v1952_v45 = vrot.slane %v10202_v51, 2  ;;  %v10203_v42 = vshll.u32 %v8555_v0, 16  ;;  %v10205_v51 = vshrl.u32 %v8818_v9, 16  ;;  %v10206_v23 = vshll.u32 %v8854_v57, 16 }
 0x100   : > { %v3819_v56 = vrot.slane %v3817_v39, 1  ;;  %v7372_v39 = vld [vmem:[%s9841_s3 + $0xb8] sm:$0xff]   ;;  %v1938_v19 = vor.u32 %v1937_v32, %v1934_v50  ;;  %v1961_v61 = vrot.slane %v10207_v60, 2  ;;  %v9933_v50 = vshll.u32 %v8622_v33, 16  ;;  %v8953_v60 = vld [vmem:[#allocation2 + $0x60] sm:$0xff]  }
 0x101   : > { %6523 = vmatpush3.bf16.msra.mxu1 %v7363_v38  ;;  %v1955_v38 = vrot.slane %v10203_v42, 3  ;;  %v4293_v42 = vor.u32 %v10205_v51, %v8878_v49  ;;  %v4297_v17 = vrot.slane %v10206_v23, 1  ;;  %v10212_v23 = vshll.u32 %v8490_v22, 16  ;;  %10218 = vst [vmem:[#allocation60_spill] sm:$0xff] %v8953_v60 }
 0x102   : > { %6524 = vmatprep.subr.bf16.mxu1 %v7367_v41  ;;  %v3820_v27 = vsel %vm10197_vm5, %v3815_v40, %v3819_v56  ;;  %v3823_v16 = vor.u32 %v3821_v8, %v3819_v56  ;;  %v10208_v8 = vshll.u32 %v8596_v34, 16  ;;  %v10220_v2 = vshrl.u32 %v8880_v53, 16  ;;  %vm10223_vm5 = vmmov %vm10196_vm1 }
 0x103   : > { %6716 = vmatprep.mubr.bf16.mxu0 %v3820_v27  ;;  %v10211_v27 = vshrl.u32 %v8622_v33, 16  ;;  %v1946_v51 = vrot.slane %v10212_v23, 3  ;;  %v8926_v20 = vor.u32 %v1955_v38, %v1952_v45  ;;  %v1973_v45 = vrot.slane %v9933_v50, 3  ;;  %v8955_v50 = vld [vmem:[#allocation2 + $0x68] sm:$0xff]  }
 0x104   : > { %6489 = vmatmul.mubr.bf16.gmra.mrb[12].mxu1 %v1903_v29  ;;  %v1964_v40 = vrot.slane %v10208_v8, 3  ;;  %v3828_v32 = vsel %vm10209_vm7, %v3823_v16, %v3827_v52  ;;  %v10210_v29 = vshrl.u32 %v8490_v22, 16  ;;  %v8932_v52 = vld [vmem:[%s9841_s3 + $0xc0] sm:$0xff]   ;;  %v10216_v38 = vshll.u32 %v8880_v53, 16  ;;  %10219 = vst [vmem:[#allocation61_spill] sm:$0xff] %v8955_v50 }
 0x105   : > { %6492 = vmatprep.mubr.bf16.mxu1 %v1912_v11  ;;  %6525 = vmatpush3.bf16.msra.mxu1 %v7367_v41  ;;  %v1970_v11 = vrot.slane %v10211_v27, 2  ;;  %10213 = vst [vmem:[#allocation58_spill] sm:$0xff] %v8932_v52  ;;  %v1930_v41 = vsel %vm10214_vm11, %v8830_v30, %v8888_v37  ;;  %v1986_v30 = vshrl.u32 %v8663_v15, 16  ;;  %v10217_v27 = vshrl.u32 %v8854_v57, 16  ;;  %vm10224_vm11 = vmmov %vm10209_vm7 }
 0x106   : > { %v1943_v56 = vrot.slane %v10210_v29, 2  ;;  %6717 = vmatmul.mubr.bf16.gmra.mrb[32].mxu0 %v3828_v32  ;;  %v1965_v8 = vor.u32 %v1964_v40, %v1961_v61  ;;  %6526 = vmatprep.subr.bf16.mxu1 %v7372_v39  ;;  %v8938_v32 = vld [vmem:[#allocation2 + $0x58] sm:$0xff]   ;;  %v9935_v61 = vshrl.u32 %v8661_v55, 16  ;;  %v4305_v40 = vrot.slane %v10216_v38, 1 }
 0x107   : > { %6736 = vmatprep.mubr.bf16.mxu0 %v4266_v36  ;;  %10215 = vst [vmem:[#allocation59_spill] sm:$0xff] %v8938_v32  ;;  %v4301_v23 = vor.u32 %v10217_v27, %v4297_v17  ;;  %v1974_v16 = vor.u32 %v1973_v45, %v1970_v11  ;;  %v1989_v38 = vshll.u32 %v8663_v15, 16  ;;  %v10221_v59 = vshll.u32 %v8661_v55, 16 }
 0x108   : > { %v8947_v29 = vsel %vm10196_vm1, %v8926_v20, %v1965_v8  ;;  %v1979_v63 = vrot.slane %v9935_v61, 2  ;;  %v1947_v54 = vor.u32 %v1946_v51, %v1943_v56  ;;  %v4309_v36 = vor.u32 %v10220_v2, %v4305_v40  ;;  %v7366_v56 = vld [vmem:[%s9841_s3 + $0x1c8] sm:$0xff]  }
 0x109   : > { %6527 = vmatpush3.bf16.msra.mxu1 %v7372_v39  ;;  %v1982_v28 = vrot.slane %v10221_v59, 3  ;;  %v1988_v4 = vrot.slane %v1986_v30, 2  ;;  %v10222_v11 = vshll.u32 %v8907_v5, 16  ;;  %v9934_v27 = vshll.u32 %v8938_v32, 16 }
 0x10a   : > { %6564 = vmatprep.subr.bf16.mxu1 %v8932_v52  ;;  %v8970_v39 = vsel %vm10223_vm5, %v1965_v8, %v1974_v16  ;;  %v1991_v15 = vrot.slane %v1989_v38, 3  ;;  %v4282_v2 = vsel %vm10209_vm7, %v8869_v31, %v8838_v7  ;;  %v4290_v59 = vsel %vm10224_vm11, %v8874_v43, %v8878_v49  ;;  %v8983_v8 = vld [vmem:[#allocation2 + $0x70] sm:$0xff]   ;;  %vm10226_vm5 = vmmov %vm10209_vm7 }
 0x10b   : > { %v4313_v45 = vrot.slane %v10222_v11, 1  ;;  %v1983_v51 = vor.u32 %v1982_v28, %v1979_v63  ;;  %10225 = vst [vmem:[#allocation62_spill] sm:$0xff] %v8983_v8  ;;  %v4298_v30 = vsel %vm10226_vm5, %v4293_v42, %v4297_v17  ;;  %v9936_v38 = vshll.u32 %v8953_v60, 16  ;;  %vm10227_vm7 = vmmov %vm10226_vm5  ;;  %v7443_v63 = vld [vmem:[%s9841_s3 + $0x1c0] sm:$0xff]  }
 0x10c   : > { %6493 = vmatmul.mubr.bf16.gmra.mrb[16].mxu1 %v8865_v12  ;;  %v1939_v12 = vsel %vm10196_vm1, %v8888_v37, %v1938_v19  ;;  %v9937_v7 = vshll.u32 %v8955_v50, 16  ;;  %v1992_v31 = vor.u32 %v1991_v15, %v1988_v4  ;;  %v8990_v43 = vsel %vm10227_vm7, %v4301_v23, %v4305_v40  ;;  %vm10228_vm11 = vmmov %vm10196_vm1 }
 0x10d   : > { %6496 = vmatprep.mubr.bf16.mxu1 %v1930_v41  ;;  %v1948_v37 = vsel %vm10228_vm11, %v1938_v19, %v1947_v54  ;;  %v9939_v49 = vshrl.u32 %v8907_v5, 16  ;;  %v8995_v28 = vsel %vm10196_vm1, %v1974_v16, %v1983_v51  ;;  %v9001_v4 = vsel %vm10226_vm5, %v4309_v36, %v4313_v45  ;;  %vm10229_vm7 = vmmov %vm10196_vm1  ;;  %v7370_v41 = vld [vmem:[%s9841_s3 + $0x1d0] sm:$0xff]   ;;  %v9015_v36 = vld [vmem:[#allocation2 + $0x78] sm:$0xff]  }
 0x10e   : > { %6737 = vmatmul.mubr.bf16.vlgmr.msra.gmra.mrb[0].mxu0 %v8860_v24  ;;  %v4321_v24 = vrot.slane %v9934_v27, 1  ;;  %v9006_v17 = vsel %vm10229_vm7, %v1983_v51, %v1992_v31  ;;  %v10230_v19 = vshrl.u32 %v8609_v1, 16  ;;  %v9938_v40 = vshll.u32 %v8983_v8, 16  ;;  %10231 = vst [vmem:[#allocation63_spill] sm:$0xff] %v9015_v36  ;;  %v9062_v16 = vld [vmem:[#allocation2 + $0x80] sm:$0xff]   ;;  %vm10251_vm7 = vmmov %vm10226_vm5 }
 0x10f   : > { %6740 = vmatprep.mubr.bf16.mxu0 %v4282_v2  ;;  %6773 = vmatpush3.bf16.msra.mxu0 %v7443_v63  ;;  %v10232_v23 = vshll.u32 %v8609_v1, 16  ;;  %v10233_v15 = vshrl.u32 %v8636_v46, 16  ;;  %v4329_v51 = vrot.slane %v9936_v38, 1  ;;  %v4337_v63 = vrot.slane %v9937_v7, 1  ;;  %10242 = vst [vmem:[#allocation65_spill] sm:$0xff] %v9062_v16 }
 0x110   : > { %v2267_v42 = vrot.slane %v10230_v19, 3  ;;  %6774 = vmatprep.subr.bf16.mxu0 %v7366_v56  ;;  %v10234_v19 = vshll.u32 %v8636_v46, 16  ;;  %v9941_v61 = vshrl.u32 %v8955_v50, 16  ;;  %vm9943_vm11 = vsmask.f32 4352  ;;  %v7374_v46 = vld [vmem:[%s9841_s3 + $0x1d8] sm:$0xff]  }
 0x111   : > { %v2268_v11 = vrot.slane %v10232_v23, 4  ;;  %v2271_v2 = vrot.slane %v10233_v15, 3  ;;  %v2260_v23 = vshrl.u32 %v7659_v6, 16  ;;  %v2263_v15 = vshll.u32 %v7659_v6, 16 }
 0x112   : > { %v2272_v27 = vrot.slane %v10234_v19, 4  ;;  %v10235_v31 = vshrl.u32 %v8651_v58, 16  ;;  %v10237_v6 = vshrl.u32 %v8656_v25, 16  ;;  %v10239_v19 = vshll.u32 %v8656_v25, 16 }
 0x113   : > { %v9030_v1 = vor.u32 %v2268_v11, %v2267_v42  ;;  %6775 = vmatpush3.bf16.msra.mxu0 %v7366_v56  ;;  %v4345_v42 = vrot.slane %v9938_v40, 1  ;;  %v10236_v56 = vshll.u32 %v8651_v58, 16  ;;  %v10240_v58 = vshrl.u32 %v8938_v32, 16 }
 0x114   : > { %6497 = vmatmul.mubr.bf16.gmra.mrb[20].mxu1 %v1939_v12  ;;  %v2273_v38 = vor.u32 %v2272_v27, %v2271_v2  ;;  %v2275_v7 = vrot.slane %v10235_v31, 3  ;;  %6776 = vmatprep.subr.bf16.mxu0 %v7370_v41  ;;  %v2279_v27 = vrot.slane %v10237_v6, 3  ;;  %v1957_v2 = vsel %vm10196_vm1, %v1947_v54, %v8926_v20  ;;  %vm10252_vm1 = vmmov %vm10226_vm5 }
 0x115   : > { %6500 = vmatprep.mubr.bf16.mxu1 %v1948_v37  ;;  %v2276_v11 = vrot.slane %v10236_v56, 4  ;;  %v4317_v37 = vor.u32 %v9939_v49, %v4313_v45  ;;  %v2280_v40 = vrot.slane %v10239_v19, 4  ;;  %v4325_v56 = vor.u32 %v10240_v58, %v4321_v24  ;;  %vm10253_vm9 = vmmov %vm10252_vm1 }
 0x116   : > { %v9052_v31 = vsel %vm9943_vm11, %v9030_v1, %v2273_v38  ;;  %6741 = vmatmul.mubr.bf16.gmra.mrb[4].mxu0 %v4290_v59  ;;  %v10241_v12 = vshrl.u32 %v8953_v60, 16  ;;  %v4341_v54 = vor.u32 %v9941_v61, %v4337_v63  ;;  %v2262_v45 = vrot.slane %v2260_v23, 3 }
 0x117   : > { %10238 = vst [vmem:[#allocation64_spill] sm:$0xff] %v9052_v31  ;;  %v2277_v20 = vor.u32 %v2276_v11, %v2275_v7  ;;  %6744 = vmatprep.mubr.bf16.mxu0 %v4298_v30  ;;  %6777 = vmatpush3.bf16.msra.mxu0 %v7370_v41  ;;  %v2265_v49 = vrot.slane %v2263_v15, 4  ;;  %v2281_v52 = vor.u32 %v2280_v40, %v2279_v27  ;;  %v10243_v25 = vshrl.u32 %v8691_v62, 16  ;;  %v7378_v30 = vld [vmem:[%s9841_s3 + $0x1e0] sm:$0xff]   ;;  %v9079_v15 = vld [vmem:[#allocation2 + $0x88] sm:$0xff]  }
 0x118   : > { %v4333_v6 = vor.u32 %v10241_v12, %v4329_v51  ;;  %6778 = vmatprep.subr.bf16.mxu0 %v7374_v46  ;;  %v10244_v19 = vshrl.u32 %v8983_v8, 16  ;;  %v10245_v12 = vshll.u32 %v9015_v36, 16  ;;  %v10246_v41 = vshll.u32 %v8691_v62, 16  ;;  %10247 = vst [vmem:[#allocation66_spill] sm:$0xff] %v9079_v15 }
 0x119   : > { %v2283_v59 = vrot.slane %v10243_v25, 3  ;;  %v9074_v7 = vsel %vm9943_vm11, %v2273_v38, %v2277_v20  ;;  %v9082_v11 = vsel %vm9943_vm11, %v2277_v20, %v2281_v52  ;;  %v10249_v27 = vshrl.u32 %v8703_v3, 16  ;;  %vm10254_vm11 = vmmov %vm10252_vm1 }
 0x11a   : > { %v4349_v58 = vor.u32 %v10244_v19, %v4345_v42  ;;  %v4353_v31 = vrot.slane %v10245_v12, 1  ;;  %v2284_v40 = vrot.slane %v10246_v41, 4  ;;  %10248 = vst [vmem:[#allocation67_spill] sm:$0xff] %v9082_v11  ;;  %v10250_v19 = vshll.u32 %v8703_v3, 16 }
 0x11b   : > { %v2287_v25 = vrot.slane %v10249_v27, 3  ;;  %v4322_v61 = vsel %vm10226_vm5, %v4317_v37, %v4321_v24  ;;  %v9090_v38 = vsel %vm10251_vm7, %v4325_v56, %v4329_v51  ;;  %v9093_v62 = vsel %vm10252_vm1, %v4333_v6, %v4337_v63  ;;  %6779 = vmatpush3.bf16.msra.mxu0 %v7374_v46  ;;  %v7382_v51 = vld [vmem:[%s9841_s3 + $0x1e8] sm:$0xff]  }
 0x11c   : > { %v2288_v12 = vrot.slane %v10250_v19, 4  ;;  %v2285_v41 = vor.u32 %v2284_v40, %v2283_v59  ;;  %6501 = vmatmul.mubr.bf16.gmra.mrb[24].mxu1 %v1957_v2  ;;  %v9096_v20 = vsel %vm10253_vm9, %v4341_v54, %v4345_v42  ;;  %v2266_v23 = vor.u32 %v2265_v49, %v2262_v45  ;;  %6780 = vmatprep.subr.bf16.mxu0 %v7378_v30 }
 0x11d   : > { %v9945_v27 = vshll.u32 %v9062_v16, 16  ;;  %6504 = vmatprep.mubr.bf16.mxu1 %v8947_v29  ;;  %v9101_v3 = vsel %vm10254_vm11, %v4349_v58, %v4353_v31  ;;  %v9946_v24 = vshrl.u32 %v9062_v16, 16  ;;  %vm10255_vm5 = vsmask.f32 4352 }
 0x11e   : > { %v2289_v11 = vor.u32 %v2288_v12, %v2287_v25  ;;  %v9108_v63 = vsel %vm10255_vm5, %v2281_v52, %v2285_v41  ;;  %v10256_v49 = vshrl.u32 %v8727_v21, 16  ;;  %v10257_v42 = vshrl.u32 %v9015_v36, 16  ;;  %vm10258_vm9 = vmmov %vm10255_vm5  ;;  %6745 = vmatmul.mubr.bf16.gmra.mrb[8].mxu0 %v8990_v43 }
 0x11f   : > { %v9944_v29 = vshll.u32 %v9079_v15, 16  ;;  %v10259_v56 = vshll.u32 %v8727_v21, 16  ;;  %v10260_v52 = vshrl.u32 %v8735_v47, 16  ;;  %v10261_v45 = vshll.u32 %v8735_v47, 16  ;;  %6748 = vmatprep.mubr.bf16.mxu0 %v9001_v4  ;;  %vm10262_vm7 = vmmov %vm10255_vm5  ;;  %6781 = vmatpush3.bf16.msra.mxu0 %v7378_v30  ;;  %v7387_v47 = vld [vmem:[%s9841_s3 + $0x1f0] sm:$0xff]  }
 0x120   : > { %v2291_v46 = vrot.slane %v10256_v49, 3  ;;  %v9114_v2 = vor.u32 %v10257_v42, %v4353_v31  ;;  %v9118_v37 = vsel %vm10258_vm9, %v2285_v41, %v2289_v11  ;;  %vm4703_vm11 = vcmask 1046528   ;;  %6782 = vmatprep.subr.bf16.mxu0 %v7382_v51  ;;  %vm10265_vm1 = vmmov %vm10255_vm5 }
 0x121   : > { %v2292_v6 = vrot.slane %v10259_v56, 4  ;;  %v2295_v54 = vrot.slane %v10260_v52, 3  ;;  %v2296_v59 = vrot.slane %v10261_v45, 4  ;;  %v4704_v31 = vrot.slane %v8843_v18, 1  ;;  %vm10267_vm5 = vmmov %vm10265_vm1 }
 0x122   : > { %v9131_v58 = vsel %vm10262_vm7, %v2266_v23, %v9030_v1  ;;  %v9135_v21 = vrot.slane %v9945_v27, 1  ;;  %v4705_v40 = vrot.slane %v8738_v26, 1  ;;  %v4707_v4 = vrot.slane %v8770_v13, 1  ;;  %vm10271_vm9 = vmmov %vm10265_vm1  ;;  %v10295_v27 = vld [vmem:[#allocation19_spill] sm:$0xff] }
 0x123   : > { %v2293_v43 = vor.u32 %v2292_v6, %v2291_v46  ;;  %v2297_v25 = vor.u32 %v2296_v59, %v2295_v54  ;;  %v10263_v19 = vshrl.u32 %v8772_v48, 16  ;;  %v10264_v30 = vshll.u32 %v8772_v48, 16  ;;  %6783 = vmatpush3.bf16.msra.mxu0 %v7382_v51  ;;  %vm10274_vm7 = vmmov %vm10265_vm1 }
 0x124   : > { %v9148_v12 = vrot.slane %v9944_v29, 1  ;;  %v9154_v49 = vsel %vm4703_vm11, %v4704_v31, %v4705_v40  ;;  %v10266_v46 = vshrl.u32 %v8776_v10, 16  ;;  %v9162_v6 = vsel %vm4703_vm11, %v4705_v40, %v4707_v4  ;;  %6505 = vmatmul.mubr.bf16.gmra.mrb[28].mxu1 %v8970_v39  ;;  %6784 = vmatprep.subr.bf16.mxu0 %v7387_v47 }
 0x125   : > { %v2299_v1 = vrot.slane %v10263_v19, 3  ;;  %v2300_v23 = vrot.slane %v10264_v30, 4  ;;  %v9151_v41 = vsel %vm10265_vm1, %v2289_v11, %v2293_v43  ;;  %v9159_v56 = vsel %vm10267_vm5, %v2293_v43, %v2297_v25  ;;  %6508 = vmatprep.mubr.bf16.mxu1 %v8995_v28  ;;  %vm10278_vm5 = vmmov %vm10265_vm1 }
 0x126   : > { %v2303_v42 = vrot.slane %v10266_v46, 3  ;;  %v10268_v52 = vshll.u32 %v8776_v10, 16  ;;  %v4709_v11 = vrot.slane %v8793_v35, 1  ;;  %v4711_v45 = vrot.slane %v8818_v9, 1  ;;  %v7390_v10 = vld [vmem:[%s9841_s3 + $0x1f8] sm:$0xff]   ;;  %6749 = vmatmul.mubr.bf16.gmra.mrb[12].mxu0 %v4322_v61 }
 0x127   : > { %v2301_v48 = vor.u32 %v2300_v23, %v2299_v1  ;;  %v10269_v59 = vshrl.u32 %v8419_v14, 16  ;;  %v10270_v43 = vshll.u32 %v8419_v14, 16  ;;  %v10272_v40 = vshrl.u32 %v8452_v44, 16  ;;  %6752 = vmatprep.mubr.bf16.mxu0 %v9090_v38  ;;  %6785 = vmatpush3.bf16.msra.mxu0 %v7387_v47  ;;  %v10312_v9 = vld [vmem:[#allocation29_spill] sm:$0xff] }
 0x128   : > { %v2304_v54 = vrot.slane %v10268_v52, 4  ;;  %v10273_v30 = vshll.u32 %v8452_v44, 16  ;;  %v9185_v14 = vsel %vm4703_vm11, %v4707_v4, %v4709_v11  ;;  %v9188_v28 = vsel %vm4703_vm11, %v4709_v11, %v4711_v45  ;;  %6786 = vmatprep.subr.bf16.mxu0 %v7390_v10 }
 0x129   : > { %v2307_v31 = vrot.slane %v10269_v59, 3  ;;  %v2308_v19 = vrot.slane %v10270_v43, 4  ;;  %v9178_v39 = vsel %vm10271_vm9, %v2297_v25, %v2301_v48  ;;  %v2311_v1 = vrot.slane %v10272_v40, 3  ;;  %vm10284_vm9 = vmmov %vm10265_vm1 }
 0x12a   : > { %v2305_v51 = vor.u32 %v2304_v54, %v2303_v42  ;;  %v2312_v23 = vrot.slane %v10273_v30, 4  ;;  %v4713_v52 = vrot.slane %v8854_v57, 1  ;;  %v4715_v54 = vrot.slane %v8880_v53, 1 }
 0x12b   : > { %v2309_v46 = vor.u32 %v2308_v19, %v2307_v31  ;;  %v10275_v59 = vshrl.u32 %v8490_v22, 16  ;;  %v10276_v61 = vshll.u32 %v8490_v22, 16  ;;  %v9211_v19 = vld [vmem:[%s9841_s3 + $0x200] sm:$0xff]   ;;  %v4717_v22 = vrot.slane %v8907_v5, 1  ;;  %6787 = vmatpush3.bf16.msra.mxu0 %v7390_v10 }
 0x12c   : > { %v9192_v25 = vsel %vm10274_vm7, %v2301_v48, %v2305_v51  ;;  %v2313_v42 = vor.u32 %v2312_v23, %v2311_v1  ;;  %v9202_v11 = vsel %vm4703_vm11, %v4711_v45, %v4713_v52  ;;  %v10277_v48 = vshrl.u32 %v8555_v0, 16  ;;  %6509 = vmatmul.mubr.bf16.gmra.mrb[32].mxu1 %v9006_v17  ;;  %6824 = vmatprep.subr.bf16.mxu0 %v9211_v19  ;;  %vm10285_vm7 = vmmov %vm10265_vm1 }
 0x12d   : > { %v2315_v44 = vrot.slane %v10275_v59, 3  ;;  %v9199_v4 = vsel %vm10265_vm1, %v2305_v51, %v2309_v46  ;;  %v2316_v31 = vrot.slane %v10276_v61, 4  ;;  %v9217_v47 = vsel %vm4703_vm11, %v4713_v52, %v4715_v54  ;;  %6528 = vmatprep.mubr.bf16.mxu1 %v9131_v58 }
 0x12e   : > { %v2319_v43 = vrot.slane %v10277_v48, 3  ;;  %v9214_v38 = vsel %vm10278_vm5, %v2309_v46, %v2313_v42  ;;  %v10279_v45 = vshll.u32 %v8555_v0, 16  ;;  %v4719_v1 = vrot.slane %v8938_v32, 1  ;;  %6753 = vmatmul.mubr.bf16.gmra.mrb[16].mxu0 %v9093_v62  ;;  %v10309_v32 = vld [vmem:[#allocation23_spill] sm:$0xff] }
 0x12f   : > { %v2317_v40 = vor.u32 %v2316_v31, %v2315_v44  ;;  %v10280_v30 = vshrl.u32 %v8596_v34, 16  ;;  %v10281_v59 = vshll.u32 %v8596_v34, 16  ;;  %v9228_v46 = vsel %vm4703_vm11, %v4715_v54, %v4717_v22  ;;  %v9243_v54 = vld [vmem:[#allocation2 + $0x90] sm:$0xff]   ;;  %6756 = vmatprep.mubr.bf16.mxu0 %v9096_v20 }
 0x130   : > { %v2320_v51 = vrot.slane %v10279_v45, 4  ;;  %v10282_v52 = vshrl.u32 %v8622_v33, 16  ;;  %v10283_v0 = vshll.u32 %v8622_v33, 16  ;;  %v9239_v31 = vsel %vm4703_vm11, %v4717_v22, %v4719_v1 }
 0x131   : > { %v2323_v23 = vrot.slane %v10280_v30, 3  ;;  %v2324_v61 = vrot.slane %v10281_v59, 4  ;;  %v9236_v44 = vsel %vm10284_vm9, %v2313_v42, %v2317_v40  ;;  %v4723_v10 = vrot.slane %v8955_v50, 1  ;;  %vm10289_vm9 = vmmov %vm10278_vm5 }
 0x132   : > { %v2321_v48 = vor.u32 %v2320_v51, %v2319_v43  ;;  %v2327_v29 = vrot.slane %v10282_v52, 3  ;;  %v2328_v45 = vrot.slane %v10283_v0, 4  ;;  %v4721_v43 = vrot.slane %v8953_v60, 1  ;;  %v10291_v52 = vld [vmem:[#allocation10_spill] sm:$0xff] }
 0x133   : > { %v2325_v34 = vor.u32 %v2324_v61, %v2323_v23  ;;  %v10286_v42 = vshrl.u32 %v8661_v55, 16  ;;  %vm10287_vm1 = vsmask.f32 7424  ;;  %v10288_v23 = vshll.u32 %v8661_v55, 16  ;;  %v10306_v60 = vld [vmem:[#allocation58_spill] sm:$0xff] }
 0x134   : > { %v9247_v33 = vsel %vm10285_vm7, %v2317_v40, %v2321_v48  ;;  %v2329_v17 = vor.u32 %v2328_v45, %v2327_v29  ;;  %v4362_v22 = vsel %vm10287_vm1, %v9114_v2, %v9135_v21  ;;  %v9259_v58 = vsel %vm4703_vm11, %v4719_v1, %v4721_v43  ;;  %vm10296_vm7 = vmmov %vm10278_vm5  ;;  %v10302_v45 = vld [vmem:[#allocation64_spill] sm:$0xff] }
 0x135   : > { %v2331_v51 = vrot.slane %v10286_v42, 3  ;;  %v9256_v30 = vsel %vm10278_vm5, %v2321_v48, %v2325_v34  ;;  %v2332_v40 = vrot.slane %v10288_v23, 4  ;;  %v9269_v61 = vsel %vm4703_vm11, %v4721_v43, %v4723_v10  ;;  %v10290_v48 = vld [vmem:[#allocation8_spill] sm:$0xff]  ;;  %v10292_v43 = vld [vmem:[#allocation13_spill] sm:$0xff]  ;;  %v10293_v42 = vld [vmem:[#allocation15_spill] sm:$0xff]  ;;  %6529 = vmatmul.mubr.bf16.vlgmr.msra.gmra.mrb[0].mxu1 %v10302_v45 }
 0x136   : > { %v9266_v59 = vsel %vm10289_vm9, %v2325_v34, %v2329_v17  ;;  %v4725_v2 = vrot.slane %v8983_v8, 1  ;;  %v9276_v1 = vor.u32 %v9946_v24, %v9135_v21  ;;  %v4727_v62 = vrot.slane %v9015_v36, 1  ;;  %v10294_v23 = vld [vmem:[#allocation18_spill] sm:$0xff]  ;;  %vm10298_vm1 = vmmov %vm10278_vm5  ;;  %6565 = vmatpush3.bf16.msra.mxu1 %v10306_v60  ;;  %6532 = vmatprep.mubr.bf16.mxu1 %v9074_v7 }
 0x137   : > { %v9278_v55 = vor.u32 %v2332_v40, %v2331_v51  ;;  %v2777_v0 = vor.u32 %v10291_v52, %v10290_v48  ;;  %v2785_v20 = vor.u32 %v10293_v42, %v10292_v43  ;;  %v2794_v29 = vor.u32 %v10295_v27, %v10294_v23  ;;  %v7381_v21 = vld [vmem:[%s9841_s3 + $0xc8] sm:$0xff]   ;;  %v9306_v27 = vld [vmem:[#allocation2 + $0x98] sm:$0xff]   ;;  %vm10299_vm5 = vmmov %vm10298_vm1  ;;  %6757 = vmatmul.mubr.bf16.gmra.mrb[20].mxu0 %v9101_v3 }
 0x138   : > { %v9285_v34 = vsel %vm4703_vm11, %v4723_v10, %v4725_v2  ;;  %v9299_v40 = vsel %vm4703_vm11, %v4725_v2, %v4727_v62  ;;  %v4729_v10 = vrot.slane %v9062_v16, 1  ;;  %v4731_v48 = vrot.slane %v9079_v15, 1  ;;  %v10304_v8 = vld [vmem:[#allocation22_spill] sm:$0xff]  ;;  %6566 = vmatprep.subr.bf16.mxu1 %v7381_v21  ;;  %6760 = vmatprep.mubr.bf16.mxu0 %v4362_v22  ;;  %vm10316_vm9 = vmmov %vm10298_vm1 }
 0x139   : > { %v9296_v51 = vsel %vm10296_vm7, %v2329_v17, %v9278_v55  ;;  %v10297_v52 = vshrl.u32 %v9079_v15, 16  ;;  %v9309_v42 = vsel %vm10298_vm1, %v2777_v0, %v2785_v20  ;;  %v9312_v23 = vsel %vm10299_vm5, %v2785_v20, %v2794_v29  ;;  %v10300_v17 = vld [vmem:[#allocation17_spill] sm:$0xff]  ;;  %v9340_v60 = vld [vmem:[#allocation2 + $0xa8] ss:$0 sps:$4 sm:$0x11]   ;;  %vm10317_vm7 = vmmov %vm10298_vm1 }
 0x13a   : > { %v10301_v24 = vshrl.u32 %v10300_v17, 16  ;;  %v9318_v16 = vsel %vm4703_vm11, %v4727_v62, %v4729_v10  ;;  %v9321_v36 = vsel %vm4703_vm11, %v4729_v10, %v4731_v48  ;;  %v10305_v0 = vshrl.u32 %v10304_v8, 16  ;;  %v7385_v62 = vld [vmem:[%s9841_s3 + $0xd0] sm:$0xff]   ;;  %v9334_v45 = vld [vmem:[#allocation2 + $0xa0] sm:$0xff]   ;;  %6567 = vmatpush3.bf16.msra.mxu1 %v7381_v21  ;;  %vm10323_vm5 = vmmov %vm10298_vm1 }
 0x13b   : > { %v4373_v43 = vor.u32 %v10297_v52, %v9148_v12  ;;  %v10303_v52 = vshll.u32 %v10300_v17, 16  ;;  %v10308_v10 = vshll.u32 %v10304_v8, 16  ;;  %v10310_v5 = vshrl.u32 %v10309_v32, 16  ;;  %6568 = vmatprep.subr.bf16.mxu1 %v7385_v62 }
 0x13c   : > { %v2799_v2 = vrot.slane %v10301_v24, 3  ;;  %v2808_v50 = vrot.slane %v10305_v0, 3  ;;  %v10307_v24 = vshll.u32 %v9243_v54, 16  ;;  %v4735_v0 = vrot.slane %v9306_v27, 1 }
 0x13d   : > { %v2802_v15 = vrot.slane %v10303_v52, 4  ;;  %v2811_v17 = vrot.slane %v10308_v10, 4  ;;  %v4733_v52 = vrot.slane %v9243_v54, 1  ;;  %v10311_v53 = vshll.u32 %v10309_v32, 16 }
 0x13e   : > { %v4377_v20 = vrot.slane %v10307_v24, 1  ;;  %v2817_v24 = vrot.slane %v10310_v5, 3  ;;  %v10313_v35 = vshrl.u32 %v10312_v9, 16  ;;  %v4737_v32 = vrot.slane %v9334_v45, 1  ;;  %6569 = vmatpush3.bf16.msra.mxu1 %v7385_v62 }
 0x13f   : > { %v2803_v7 = vor.u32 %v2802_v15, %v2799_v2  ;;  %v2820_v57 = vrot.slane %v10311_v53, 4  ;;  %v2812_v8 = vor.u32 %v2811_v17, %v2808_v50  ;;  %v9350_v10 = vsel %vm4703_vm11, %v4731_v48, %v4733_v52  ;;  %v10318_v48 = vld [vmem:[#allocation31_spill] sm:$0xff] }
 0x140   : > { %v2826_v13 = vrot.slane %v10313_v35, 3  ;;  %v9353_v26 = vsel %vm4703_vm11, %v4733_v52, %v4735_v0  ;;  %v10315_v15 = vshll.u32 %v10312_v9, 16  ;;  %v4739_v35 = vrot.slane %v9340_v60, 1 }
 0x141   : > { %10314 = vst [vmem:[#allocation8_spill] sm:$0xff] %v9353_v26  ;;  %v9358_v5 = vsel %vm10316_vm9, %v2794_v29, %v2803_v7  ;;  %v2821_v53 = vor.u32 %v2820_v57, %v2817_v24  ;;  %v9363_v50 = vsel %vm10317_vm7, %v2803_v7, %v2812_v8  ;;  %v10319_v17 = vshrl.u32 %v10318_v48, 16  ;;  %v7389_v57 = vld [vmem:[%s9841_s3 + $0xd8] sm:$0xff]   ;;  %vm10328_vm7 = vmmov %vm10298_vm1 }
 0x142   : > { %v2829_v2 = vrot.slane %v10315_v15, 4  ;;  %v10320_v9 = vshll.u32 %v10318_v48, 16  ;;  %v9376_v29 = vsel %vm4703_vm11, %v4735_v0, %v4737_v32  ;;  %v9379_v21 = vsel %vm4703_vm11, %v4737_v32, %v4739_v35  ;;  %6570 = vmatprep.subr.bf16.mxu1 %v7389_v57 }
 0x143   : > { %v2835_v52 = vrot.slane %v10319_v17, 3  ;;  %v9373_v22 = vsel %vm10298_vm1, %v2812_v8, %v2821_v53  ;;  %vm10325_vm9 = vsmask.f32 7424  ;;  %v10326_v8 = vld [vmem:[#allocation67_spill] sm:$0xff]  ;;  %v4379_v35 = vshrl.u32 %v9243_v54, 16  ;;  %6571 = vmatpush3.bf16.msra.mxu1 %v7389_v57 }
 0x144   : > { %v2830_v3 = vor.u32 %v2829_v2, %v2826_v13  ;;  %v2838_v15 = vrot.slane %v10320_v9, 4  ;;  %v10321_v13 = vld [vmem:[#allocation49_spill] sm:$0xff]  ;;  %v4383_v2 = vshll.u32 %v9306_v27, 16  ;;  %v4370_v0 = vsel %vm10325_vm9, %v9276_v1, %v9148_v12  ;;  %6533 = vmatmul.mubr.bf16.gmra.mrb[4].mxu1 %v10326_v8  ;;  %vm10327_vm11 = vmmov %vm10325_vm9 }
 0x145   : > { %v10322_v7 = vshrl.u32 %v10321_v13, 16  ;;  %v10324_v9 = vshll.u32 %v10321_v13, 16  ;;  %v4378_v32 = vsel %vm10327_vm11, %v4373_v43, %v4377_v20  ;;  %6536 = vmatprep.mubr.bf16.mxu1 %v9108_v63  ;;  %v7392_v12 = vld [vmem:[%s9841_s3 + $0xe0] sm:$0xff]   ;;  %6761 = vmatmul.mubr.bf16.gmra.mrb[24].mxu0 %v4370_v0  ;;  %v4381_v43 = vor.u32 %v4379_v35, %v4377_v20  ;;  %v7396_v20 = vld [vmem:[%s9841_s3 + $0xf0] sm:$0xff]  }
 0x146   : > { %v9385_v48 = vsel %vm10323_vm5, %v2821_v53, %v2830_v3  ;;  %v2839_v17 = vor.u32 %v2838_v15, %v2835_v52  ;;  %v4387_v53 = vshrl.u32 %v9306_v27, 16  ;;  %v4391_v52 = vshll.u32 %v9334_v45, 16  ;;  %6764 = vmatprep.mubr.bf16.mxu0 %v4378_v32  ;;  %6572 = vmatprep.subr.bf16.mxu1 %v7392_v12  ;;  %vm10329_vm5 = vmmov %vm10325_vm9 }
 0x147   : > { %v2844_v24 = vrot.slane %v10322_v7, 3  ;;  %v2847_v26 = vrot.slane %v10324_v9, 4  ;;  %v4385_v1 = vrot.slane %v4383_v2, 1  ;;  %vm10330_vm9 = vmmov %vm10329_vm5  ;;  %6573 = vmatpush3.bf16.msra.mxu1 %v7392_v12  ;;  %v7402_v12 = vld [vmem:[%s9841_s3 + $0x228] sm:$0xff]  }
 0x148   : > { %v9399_v15 = vsel %vm10328_vm7, %v2830_v3, %v2839_v17  ;;  %v7394_v3 = vld [vmem:[%s9841_s3 + $0xe8] sm:$0xff]   ;;  %vm10331_vm11 = vmmov %vm10329_vm5  ;;  %vm5041_vm7 = vsmask.f32 6400 }
 0x149   : > { %v9401_v13 = vor.u32 %v2847_v26, %v2844_v24  ;;  %v4389_v62 = vor.u32 %v4387_v53, %v4385_v1  ;;  %v4393_v26 = vrot.slane %v4391_v52, 1  ;;  %v4386_v7 = vsel %vm10329_vm5, %v4381_v43, %v4385_v1  ;;  %6574 = vmatprep.subr.bf16.mxu1 %v7394_v3  ;;  %vm10336_vm5 = vmmov %vm10298_vm1 }
 0x14a   : > { %v4395_v24 = vshrl.u32 %v9334_v45, 16 }
 0x14b   : > { %v9410_v63 = vsel %vm10298_vm1, %v2839_v17, %v9401_v13  ;;  %v4399_v17 = vshll.u32 %v9340_v60, 16  ;;  %v4394_v9 = vsel %vm10330_vm9, %v4389_v62, %v4393_v26  ;;  %6575 = vmatpush3.bf16.msra.mxu1 %v7394_v3  ;;  %v7399_v60 = vld [vmem:[#allocation2 + $0x94] ss:$0 sps:$4 sm:$0xff]   ;;  %vm10343_vm9 = vmmov %vm10298_vm1 }
 0x14c   : > { %6537 = vmatmul.mubr.bf16.gmra.mrb[8].mxu1 %v9118_v37  ;;  %v4397_v57 = vor.u32 %v4395_v24, %v4393_v26  ;;  %6576 = vmatprep.subr.bf16.mxu1 %v7396_v20  ;;  %v7398_v37 = vld [vmem:[%s9841_s3 + $0xf8] sm:$0xff]  }
 0x14d   : > { %6540 = vmatprep.mubr.bf16.mxu1 %v9151_v41  ;;  %6765 = vmatmul.mubr.bf16.gmra.mrb[28].mxu0 %v4386_v7  ;;  %v4401_v0 = vrot.slane %v4399_v17, 1  ;;  %v9436_v41 = vld [vmem:[%s9841_s3 + $0x100] sm:$0xff]  }
 0x14e   : > { %6768 = vmatprep.mubr.bf16.mxu0 %v4394_v9 }
 0x14f   : > { %v4402_v45 = vsel %vm10331_vm11, %v4397_v57, %v4401_v0  ;;  %6577 = vmatpush3.bf16.msra.mxu1 %v7396_v20  ;;  %vm10344_vm11 = vmmov %vm10298_vm1 }
 0x150   : > { %6578 = vmatprep.subr.bf16.mxu1 %v7398_v37 }
 0x153   : > { %6579 = vmatpush3.bf16.msra.mxu1 %v7398_v37 }
 0x154   : > { %6541 = vmatmul.mubr.bf16.gmra.mrb[12].mxu1 %v9159_v56  ;;  %6876 = vmatprep.subr.bf16.mxu1 %v9436_v41  ;;  %v7395_v56 = vld [vmem:[%s9841_s3 + $0x208] sm:$0xff]  }
 0x155   : > { %6544 = vmatprep.mubr.bf16.mxu1 %v9178_v39  ;;  %6769 = vmatmul.mubr.bf16.gmra.mrb[32].mxu0 %v4402_v45  ;;  %v7421_v39 = vld [vmem:[#allocation2 + $0xa8] ss:$0 sps:$4 sm:$0x33]  }
 0x156   : > { %6788 = vmatprep.mubr.bf16.mxu0 %v9154_v49  ;;  %v7397_v49 = vld [vmem:[%s9841_s3 + $0x210] sm:$0xff]   ;;  %v5122_v8 = vshll.u32 %v7421_v39, 16 }
 0x15c   : > { %6545 = vmatmul.mubr.bf16.gmra.mrb[16].mxu1 %v9192_v25  ;;  %v5110_v25 = vrot.slane %v4387_v53, 1 }
 0x15d   : > { %6548 = vmatprep.mubr.bf16.mxu1 %v9199_v4  ;;  %6789 = vmatmul.mubr.bf16.vlgmr.msra.gmra.mrb[0].mxu0 %v9162_v6  ;;  %v7400_v6 = vld [vmem:[%s9841_s3 + $0x218] sm:$0xff]   ;;  %v5114_v4 = vrot.slane %v4395_v24, 1 }
 0x15e   : > { %6792 = vmatprep.mubr.bf16.mxu0 %v9185_v14  ;;  %6825 = vmatpush3.bf16.msra.mxu0 %v9211_v19  ;;  %v5111_v14 = vrot.slane %v4383_v2, 2  ;;  %v5115_v19 = vrot.slane %v4391_v52, 2  ;;  %v5124_v2 = vrot.slane %v5122_v8, 2  ;;  %v2339_v52 = vshll.u32 %v7399_v60, 16 }
 0x15f   : > { %6826 = vmatprep.subr.bf16.mxu0 %v7395_v56 }
 0x160   : > { %v9462_v32 = vor.u32 %v5111_v14, %v5110_v25  ;;  %v5116_v53 = vor.u32 %v5115_v19, %v5114_v4  ;;  %v2341_v62 = vrot.slane %v2339_v52, 4  ;;  %v9542_v25 = vld [vmem:[#allocation2 + $0x70] sm:$0xf]  ;;  %v10335_v14 = vld [vmem:[#allocation8_spill] sm:$0xff]  ;;  %v10337_v52 = vld [vmem:[#allocation50_spill] sm:$0xff] }
 0x161   : > { %v9550_v4 = vld [vmem:[#allocation2 + $0x78] sm:$0xf] }
 0x162   : > { %6827 = vmatpush3.bf16.msra.mxu0 %v7395_v56 }
 0x163   : > { %6828 = vmatprep.subr.bf16.mxu0 %v7397_v49 }
 0x164   : > { %6549 = vmatmul.mubr.bf16.gmra.mrb[20].mxu1 %v9214_v38  ;;  %v5119_v38 = vshrl.u32 %v7421_v39, 16 }
 0x165   : > { %6552 = vmatprep.mubr.bf16.mxu1 %v9236_v44  ;;  %6793 = vmatmul.mubr.bf16.gmra.mrb[4].mxu0 %v9188_v28  ;;  %v7401_v44 = vld [vmem:[%s9841_s3 + $0x220] sm:$0xff]   ;;  %v9467_v28 = vsel %vm5041_vm7, %v9462_v32, %v5116_v53 }
 0x166   : > { %6796 = vmatprep.mubr.bf16.mxu0 %v9202_v11  ;;  %6829 = vmatpush3.bf16.msra.mxu0 %v7397_v49  ;;  %v5121_v27 = vrot.slane %v5119_v38, 1  ;;  %v2336_v11 = vshrl.u32 %v7399_v60, 16 }
 0x167   : > { %6830 = vmatprep.subr.bf16.mxu0 %v7400_v6 }
 0x168   : > { %v5125_v1 = vor.u32 %v5124_v2, %v5121_v27 }
 0x16a   : > { %6831 = vmatpush3.bf16.msra.mxu0 %v7400_v6  ;;  %v9475_v43 = vsel %vm5041_vm7, %v5116_v53, %v5125_v1  ;;  %v9540_v6 = vld [vmem:[#allocation2 + $0x6c] sm:$0xf] }
 0x16b   : > { %6832 = vmatprep.subr.bf16.mxu0 %v7401_v44  ;;  %v5835_v8 = vcombine.low %v9540_v6, %v9542_v25 }
 0x16c   : > { %6553 = vmatmul.mubr.bf16.gmra.mrb[24].mxu1 %v9247_v33  ;;  %v2338_v33 = vrot.slane %v2336_v11, 3 }
 0x16d   : > { %6556 = vmatprep.mubr.bf16.mxu1 %v9256_v30  ;;  %6797 = vmatmul.mubr.bf16.gmra.mrb[8].mxu0 %v9217_v47  ;;  %v7403_v30 = vld [vmem:[%s9841_s3 + $0x230] sm:$0xff]   ;;  %v7404_v47 = vld [vmem:[%s9841_s3 + $0x238] sm:$0xff]  }
 0x16e   : > { %6800 = vmatprep.mubr.bf16.mxu0 %v9228_v46  ;;  %6833 = vmatpush3.bf16.msra.mxu0 %v7401_v44  ;;  %v2342_v26 = vor.u32 %v2341_v62, %v2338_v33  ;;  %v10339_v33 = vshll.u32 %v10337_v52, 16 }
 0x16f   : > { %6834 = vmatprep.subr.bf16.mxu0 %v7402_v12 }
 0x170   : > { %v2343_v46 = vsel %vm10298_vm1, %v9278_v55, %v2342_v26  ;;  %v5055_v62 = vrot.slane %v10339_v33, 2  ;;  %v9604_v33 = vld [vmem:[#allocation2 + $0x94] sm:$0xf] }
 0x172   : > { %6835 = vmatpush3.bf16.msra.mxu0 %v7402_v12  ;;  %v10338_v12 = vshrl.u32 %v10337_v52, 16 }
 0x173   : > { %6836 = vmatprep.subr.bf16.mxu0 %v7403_v30 }
 0x174   : > { %6557 = vmatmul.mubr.bf16.gmra.mrb[28].mxu1 %v9266_v59  ;;  %v9502_v59 = vld [vmem:[#allocation2 + $0x58] sm:$0xf]  ;;  %v5054_v1 = vrot.slane %v10338_v12, 1  ;;  %v9600_v12 = vld [vmem:[#allocation2 + $0x8c] sm:$0xf] }
 0x175   : > { %6560 = vmatprep.mubr.bf16.mxu1 %v9296_v51  ;;  %6801 = vmatmul.mubr.bf16.gmra.mrb[12].mxu0 %v9239_v31  ;;  %v7445_v31 = vld [vmem:[%s9841_s3 + $0x108] sm:$0xff]  }
 0x176   : > { %6804 = vmatprep.mubr.bf16.mxu0 %v9259_v58  ;;  %6837 = vmatpush3.bf16.msra.mxu0 %v7403_v30  ;;  %v9500_v58 = vld [vmem:[#allocation2 + $0x54] sm:$0xf]  ;;  %v10340_v30 = vld [vmem:[#allocation53_spill] sm:$0xff] }
 0x177   : > { %6838 = vmatprep.subr.bf16.mxu0 %v7404_v47  ;;  %v5832_v55 = vcombine.low %v9500_v58, %v9502_v59 }
 0x179   : > { %v2854_v51 = vshll.u32 %v5832_v55, 16 }
 0x17a   : > { %6839 = vmatpush3.bf16.msra.mxu0 %v7404_v47  ;;  %v10342_v47 = vshll.u32 %v10340_v30, 16 }
 0x17b   : > { %v2856_v24 = vrot.slane %v2854_v51, 4 }
 0x17c   : > { %6561 = vmatmul.mubr.bf16.gmra.mrb[32].mxu1 %v2343_v46  ;;  %v5059_v46 = vrot.slane %v10342_v47, 2 }
 0x17d   : > { %6580 = vmatprep.mubr.bf16.mxu1 %v9309_v42  ;;  %6805 = vmatmul.mubr.bf16.gmra.mrb[16].mxu0 %v9269_v61  ;;  %v7446_v61 = vld [vmem:[%s9841_s3 + $0x110] sm:$0xff]   ;;  %v9517_v42 = vld [vmem:[#allocation2 + $0x60] sm:$0xf] }
 0x17e   : > { %6808 = vmatprep.mubr.bf16.mxu0 %v9285_v34  ;;  %v7447_v34 = vld [vmem:[%s9841_s3 + $0x118] sm:$0xff]  }
 0x184   : > { %6581 = vmatmul.mubr.bf16.vlgmr.msra.gmra.mrb[0].mxu1 %v9312_v23  ;;  %v9520_v23 = vld [vmem:[#allocation2 + $0x64] sm:$0xf] }
 0x185   : > { %6884 = vmatpush3.bf16.msra.mxu1 %v9436_v41  ;;  %6584 = vmatprep.mubr.bf16.mxu1 %v9358_v5  ;;  %v9522_v5 = vld [vmem:[#allocation2 + $0x68] sm:$0xf] }
 0x186   : > { %6877 = vmatprep.subr.bf16.mxu1 %v7445_v31  ;;  %6809 = vmatmul.mubr.bf16.gmra.mrb[20].mxu0 %v9299_v40  ;;  %v9515_v40 = vld [vmem:[#allocation2 + $0x5c] sm:$0xf]  ;;  %v5834_v17 = vcombine.low %v9520_v23, %v9522_v5 }
 0x187   : > { %6812 = vmatprep.mubr.bf16.mxu0 %v9318_v16  ;;  %v2851_v16 = vshrl.u32 %v5832_v55, 16  ;;  %v5833_v3 = vcombine.low %v9515_v40, %v9517_v42  ;;  %v2878_v55 = vshrl.u32 %v5835_v8, 16 }
 0x188   : > { %v2869_v49 = vshrl.u32 %v5834_v17, 16  ;;  %v2872_v39 = vshll.u32 %v5834_v17, 16 }
 0x189   : > { %6885 = vmatpush3.bf16.msra.mxu1 %v7445_v31  ;;  %v2853_v7 = vrot.slane %v2851_v16, 3  ;;  %v2860_v45 = vshrl.u32 %v5833_v3, 16  ;;  %v2863_v41 = vshll.u32 %v5833_v3, 16  ;;  %v9574_v3 = vld [vmem:[#allocation2 + $0x80] sm:$0xf] }
 0x18a   : > { %6878 = vmatprep.subr.bf16.mxu1 %v7446_v61  ;;  %v2871_v27 = vrot.slane %v2869_v49, 3  ;;  %v2874_v2 = vrot.slane %v2872_v39, 4 }
 0x18b   : > { %v2857_v56 = vor.u32 %v2856_v24, %v2853_v7  ;;  %v2862_v60 = vrot.slane %v2860_v45, 3  ;;  %v2865_v44 = vrot.slane %v2863_v41, 4  ;;  %v5056_v7 = vor.u32 %v5055_v62, %v5054_v1  ;;  %v9580_v24 = vld [vmem:[#allocation2 + $0x84] sm:$0xf]  ;;  %v9602_v1 = vld [vmem:[#allocation2 + $0x90] sm:$0xf] }
 0x18c   : > { %6585 = vmatmul.mubr.bf16.gmra.mrb[4].mxu1 %v9363_v50  ;;  %v5043_v50 = vshrl.u32 %v8843_v18, 16  ;;  %v2875_v16 = vor.u32 %v2874_v2, %v2871_v27  ;;  %v10345_v41 = vld [vmem:[#allocation54_spill] sm:$0xff]  ;;  %v9606_v62 = vld [vmem:[#allocation2 + $0x98] sm:$0xf] }
 0x18d   : > { %6588 = vmatprep.mubr.bf16.mxu1 %v9373_v22  ;;  %6886 = vmatpush3.bf16.msra.mxu1 %v7446_v61  ;;  %v5046_v22 = vshll.u32 %v8843_v18, 16  ;;  %v2858_v53 = vsel %vm10336_vm5, %v9401_v13, %v2857_v56  ;;  %v10341_v13 = vshrl.u32 %v10340_v30, 16  ;;  %v2866_v61 = vor.u32 %v2865_v44, %v2862_v60  ;;  %vm10351_vm5 = vmmov %vm10298_vm1 }
 0x18e   : > { %6879 = vmatprep.subr.bf16.mxu1 %v7447_v34  ;;  %6813 = vmatmul.mubr.bf16.gmra.mrb[24].mxu0 %v9321_v36  ;;  %v7448_v36 = vld [vmem:[%s9841_s3 + $0x120] sm:$0xff]   ;;  %v5045_v0 = vrot.slane %v5043_v50, 1  ;;  %v10346_v49 = vshrl.u32 %v10345_v41, 16 }
 0x18f   : > { %6816 = vmatprep.mubr.bf16.mxu0 %v9350_v10  ;;  %v10332_v10 = vld [vmem:[#allocation48_spill] sm:$0xff]  ;;  %v5048_v37 = vrot.slane %v5046_v22, 2  ;;  %v5058_v26 = vrot.slane %v10341_v13, 1  ;;  %v9572_v22 = vld [vmem:[#allocation2 + $0x7c] sm:$0xf] }
 0x190   : > { %v10333_v9 = vshrl.u32 %v10332_v10, 16  ;;  %v10334_v18 = vshll.u32 %v10332_v10, 16  ;;  %v2867_v10 = vsel %vm10343_vm9, %v2857_v56, %v2866_v61  ;;  %v5062_v39 = vrot.slane %v10346_v49, 1  ;;  %vm10358_vm9 = vmmov %vm10298_vm1 }
 0x191   : > { %6887 = vmatpush3.bf16.msra.mxu1 %v7447_v34  ;;  %v5049_v38 = vor.u32 %v5048_v37, %v5045_v0  ;;  %v2881_v34 = vshll.u32 %v5835_v8, 16  ;;  %v5060_v17 = vor.u32 %v5059_v46, %v5058_v26  ;;  %v10347_v56 = vshll.u32 %v10345_v41, 16 }
 0x192   : > { %6880 = vmatprep.subr.bf16.mxu1 %v7448_v36  ;;  %v5050_v20 = vrot.slane %v10333_v9, 1  ;;  %v5051_v57 = vrot.slane %v10334_v18, 2  ;;  %v2880_v9 = vrot.slane %v2878_v55, 3  ;;  %v5837_v18 = vcombine.low %v9572_v22, %v9574_v3 }
 0x194   : > { %6589 = vmatmul.mubr.bf16.gmra.mrb[8].mxu1 %v9385_v48  ;;  %v7449_v48 = vld [vmem:[%s9841_s3 + $0x128] sm:$0xff]   ;;  %v5052_v19 = vor.u32 %v5051_v57, %v5050_v20  ;;  %v2883_v20 = vrot.slane %v2881_v34, 4  ;;  %v2876_v57 = vsel %vm10344_vm11, %v2866_v61, %v2875_v16  ;;  %v2896_v2 = vshrl.u32 %v5837_v18, 16  ;;  %vm10359_vm11 = vmmov %vm10298_vm1 }
 0x195   : > { %6592 = vmatprep.mubr.bf16.mxu1 %v9399_v15  ;;  %6888 = vmatpush3.bf16.msra.mxu1 %v7448_v36  ;;  %v9548_v15 = vld [vmem:[#allocation2 + $0x74] sm:$0xf]  ;;  %v9582_v36 = vld [vmem:[#allocation2 + $0x88] sm:$0xf] }
 0x196   : > { %6881 = vmatprep.subr.bf16.mxu1 %v7449_v48  ;;  %6817 = vmatmul.mubr.bf16.gmra.mrb[28].mxu0 %v10335_v14  ;;  %v5836_v11 = vcombine.low %v9548_v15, %v9550_v4  ;;  %v5053_v31 = vsel %vm5041_vm7, %v5049_v38, %v5052_v19  ;;  %v5057_v45 = vsel %vm5041_vm7, %v5052_v19, %v5056_v7  ;;  %v10348_v14 = vld [vmem:[#allocation55_spill] sm:$0xff]  ;;  %v2898_v47 = vrot.slane %v2896_v2, 3 }
 0x197   : > { %6820 = vmatprep.mubr.bf16.mxu0 %v9376_v29  ;;  %v7450_v29 = vld [vmem:[%s9841_s3 + $0x130] sm:$0xff]   ;;  %v10349_v38 = vshrl.u32 %v10348_v14, 16  ;;  %v10350_v44 = vshll.u32 %v10348_v14, 16  ;;  %v2884_v27 = vor.u32 %v2883_v20, %v2880_v9  ;;  %v10355_v20 = vld [vmem:[#allocation57_spill] sm:$0xff] }
 0x198   : > { %v2887_v51 = vshrl.u32 %v5836_v11, 16  ;;  %v2890_v50 = vshll.u32 %v5836_v11, 16  ;;  %v2899_v11 = vshll.u32 %v5837_v18, 16  ;;  %v10356_v18 = vshrl.u32 %v10355_v20, 16  ;;  %v9624_v14 = vld [vmem:[#allocation2 + $0x9c] sm:$0xf] }
 0x199   : > { %6889 = vmatpush3.bf16.msra.mxu1 %v7449_v48  ;;  %v5063_v48 = vrot.slane %v10347_v56, 2  ;;  %v5066_v60 = vrot.slane %v10349_v38, 1  ;;  %v5067_v8 = vrot.slane %v10350_v44, 2  ;;  %v2885_v26 = vsel %vm10298_vm1, %v2875_v16, %v2884_v27 }
 0x19a   : > { %6882 = vmatprep.subr.bf16.mxu1 %v7450_v29  ;;  %v2889_v0 = vrot.slane %v2887_v51, 3  ;;  %v2892_v37 = vrot.slane %v2890_v50, 4  ;;  %v2901_v46 = vrot.slane %v2899_v11, 4  ;;  %v5840_v51 = vcombine.low %v9604_v33, %v9606_v62  ;;  %v10352_v50 = vld [vmem:[#allocation56_spill] sm:$0xff] }
 0x19b   : > { %v5064_v30 = vor.u32 %v5063_v48, %v5062_v39  ;;  %v5068_v13 = vor.u32 %v5067_v8, %v5066_v60 }
 0x19c   : > { %6593 = vmatmul.mubr.bf16.gmra.mrb[12].mxu1 %v9410_v63  ;;  %v7451_v63 = vld [vmem:[%s9841_s3 + $0x138] sm:$0xff]   ;;  %v2893_v19 = vor.u32 %v2892_v37, %v2889_v0  ;;  %v10357_v0 = vshll.u32 %v10355_v20, 16  ;;  %v2923_v56 = vshrl.u32 %v5840_v51, 16  ;;  %v2926_v48 = vshll.u32 %v5840_v51, 16 }
 0x19d   : > { %6596 = vmatprep.mubr.bf16.mxu1 %v2858_v53  ;;  %6890 = vmatpush3.bf16.msra.mxu1 %v7450_v29  ;;  %v5061_v53 = vsel %vm5041_vm7, %v5056_v7, %v5060_v17  ;;  %v5065_v16 = vsel %vm5041_vm7, %v5060_v17, %v5064_v30 }
 0x19e   : > { %6883 = vmatprep.subr.bf16.mxu1 %v7451_v63  ;;  %6821 = vmatmul.mubr.bf16.gmra.mrb[32].mxu0 %v9379_v21  ;;  %v5838_v21 = vcombine.low %v9580_v24, %v9582_v36  ;;  %v2894_v61 = vsel %vm10351_vm5, %v2884_v27, %v2893_v19  ;;  %v5075_v37 = vrot.slane %v10357_v0, 2  ;;  %v2925_v2 = vrot.slane %v2923_v56, 3  ;;  %vm10366_vm5 = vmmov %vm10298_vm1 }
 0x19f   : > { %6840 = vmatprep.mubr.bf16.mxu0 %v5053_v31  ;;  %v5839_v31 = vcombine.low %v9600_v12, %v9602_v1  ;;  %v2928_v11 = vrot.slane %v2926_v48, 4 }
 0x1a0   : > { %v2905_v29 = vshrl.u32 %v5838_v21, 16  ;;  %v2908_v52 = vshll.u32 %v5838_v21, 16  ;;  %v5069_v21 = vsel %vm5041_vm7, %v5064_v30, %v5068_v13  ;;  %v10360_v30 = vld [vmem:[#allocation59_spill] sm:$0xff] }
 0x1a1   : > { %6891 = vmatpush3.bf16.msra.mxu1 %v7451_v63  ;;  %v10353_v63 = vshrl.u32 %v10352_v50, 16  ;;  %v2914_v41 = vshrl.u32 %v5839_v31, 16  ;;  %v2917_v49 = vshll.u32 %v5839_v31, 16  ;;  %v10363_v31 = vld [vmem:[#allocation60_spill] sm:$0xff] }
 0x1a2   : > { %v2907_v55 = vrot.slane %v2905_v29, 3  ;;  %v2910_v34 = vrot.slane %v2908_v52, 4  ;;  %v10365_v51 = vshll.u32 %v10363_v31, 16 }
 0x1a3   : > { %v5070_v7 = vrot.slane %v10353_v63, 1  ;;  %v2916_v44 = vrot.slane %v2914_v41, 3  ;;  %v2919_v8 = vrot.slane %v2917_v49, 4 }
 0x1a4   : > { %6597 = vmatmul.mubr.bf16.gmra.mrb[16].mxu1 %v2867_v10  ;;  %v10354_v10 = vshll.u32 %v10352_v50, 16  ;;  %v2911_v39 = vor.u32 %v2910_v34, %v2907_v55  ;;  %v5083_v50 = vrot.slane %v10365_v51, 2 }
 0x1a5   : > { %6600 = vmatprep.mubr.bf16.mxu1 %v2876_v57  ;;  %v5074_v57 = vrot.slane %v10356_v18, 1  ;;  %v2920_v34 = vor.u32 %v2919_v8, %v2916_v44 }
 0x1a6   : > { %6841 = vmatmul.mubr.bf16.vlgmr.msra.gmra.mrb[0].mxu0 %v5057_v45  ;;  %v5071_v9 = vrot.slane %v10354_v10, 2  ;;  %v2902_v45 = vor.u32 %v2901_v46, %v2898_v47  ;;  %v10362_v46 = vshll.u32 %v10360_v30, 16 }
 0x1a7   : > { %6844 = vmatprep.mubr.bf16.mxu0 %v5061_v53  ;;  %v5076_v38 = vor.u32 %v5075_v37, %v5074_v57  ;;  %v5841_v53 = vcombine.low %v9624_v14, %v9624_v14  ;;  %v10367_v37 = vld [vmem:[#allocation61_spill] sm:$0xff] }
 0x1a8   : > { %v5072_v17 = vor.u32 %v5071_v9, %v5070_v7  ;;  %v2903_v60 = vsel %vm10358_vm9, %v2893_v19, %v2902_v45  ;;  %v2912_v27 = vsel %vm10359_vm11, %v2902_v45, %v2911_v39  ;;  %v5079_v19 = vrot.slane %v10362_v46, 2  ;;  %vm10373_vm9 = vmmov %vm10298_vm1 }
 0x1a9   : > { %v2932_v63 = vshrl.u32 %v5841_v53, 16  ;;  %v2935_v7 = vshll.u32 %v5841_v53, 16  ;;  %v2921_v9 = vsel %vm10298_vm1, %v2911_v39, %v2920_v34  ;;  %v10369_v41 = vshll.u32 %v10367_v37, 16 }
 0x1aa   : > { %v5073_v29 = vsel %vm5041_vm7, %v5068_v13, %v5072_v17  ;;  %v5077_v52 = vsel %vm5041_vm7, %v5072_v17, %v5076_v38  ;;  %v2929_v13 = vor.u32 %v2928_v11, %v2925_v2  ;;  %v10370_v17 = vld [vmem:[#allocation62_spill] sm:$0xff]  ;;  %v7452_v2 = vld [vmem:[#allocation2 + $0x50] sm:$0xf] }
 0x1ab   : > { %v2934_v20 = vrot.slane %v2932_v63, 3  ;;  %v2937_v18 = vrot.slane %v2935_v7, 4  ;;  %v5087_v49 = vrot.slane %v10369_v41, 2  ;;  %v10371_v39 = vshrl.u32 %v10370_v17, 16 }
 0x1ac   : > { %6601 = vmatmul.mubr.bf16.gmra.mrb[20].mxu1 %v2885_v26  ;;  %v10361_v26 = vshrl.u32 %v10360_v30, 16  ;;  %v2930_v57 = vsel %vm10366_vm5, %v2920_v34, %v2929_v13  ;;  %v10372_v44 = vshll.u32 %v10370_v17, 16  ;;  %v5874_v11 = vcombine.low %v7452_v2, %v9500_v58 }
 0x1ad   : > { %6604 = vmatprep.mubr.bf16.mxu1 %v2894_v61  ;;  %v10364_v61 = vshrl.u32 %v10363_v31, 16  ;;  %v2938_v48 = vor.u32 %v2937_v18, %v2934_v20  ;;  %v10377_v31 = vld [vmem:[#allocation65_spill] sm:$0xff]  ;;  %v5876_v7 = vcombine.low %v9517_v42, %v9520_v23  ;;  %v5877_v23 = vcombine.low %v9522_v5, %v9540_v6 }
 0x1ae   : > { %6845 = vmatmul.mubr.bf16.gmra.mrb[4].mxu0 %v5065_v16  ;;  %v5078_v47 = vrot.slane %v10361_v26, 1  ;;  %v5091_v8 = vrot.slane %v10372_v44, 2  ;;  %v10379_v34 = vshll.u32 %v10377_v31, 16  ;;  %v5881_v6 = vcombine.low %v9582_v36, %v9600_v12 }
 0x1af   : > { %6848 = vmatprep.mubr.bf16.mxu0 %v5069_v21  ;;  %v5082_v55 = vrot.slane %v10364_v61, 1  ;;  %v10368_v21 = vshrl.u32 %v10367_v37, 16  ;;  %v2939_v53 = vsel %vm10373_vm9, %v2929_v13, %v2938_v48  ;;  %v10378_v61 = vshrl.u32 %v10377_v31, 16 }
 0x1b0   : > { %v5080_v10 = vor.u32 %v5079_v19, %v5078_v47  ;;  %v5099_v51 = vrot.slane %v10379_v34, 2 }
 0x1b1   : > { %v5084_v16 = vor.u32 %v5083_v50, %v5082_v55  ;;  %v5086_v45 = vrot.slane %v10368_v21, 1  ;;  %v5098_v55 = vrot.slane %v10378_v61, 1  ;;  %v5875_v50 = vcombine.low %v9502_v59, %v9515_v40 }
 0x1b2   : > { %v5081_v0 = vsel %vm5041_vm7, %v5076_v38, %v5080_v10  ;;  %v10383_v59 = vshll.u32 %v9243_v54, 16  ;;  %v5878_v21 = vcombine.low %v9542_v25, %v9548_v15  ;;  %v5879_v54 = vcombine.low %v9550_v4, %v9572_v22 }
 0x1b3   : > { %v5085_v56 = vsel %vm5041_vm7, %v5080_v10, %v5084_v16  ;;  %v5088_v38 = vor.u32 %v5087_v49, %v5086_v45  ;;  %v5100_v63 = vor.u32 %v5099_v51, %v5098_v55  ;;  %v10380_v10 = vld [vmem:[#allocation66_spill] sm:$0xff]  ;;  %v5882_v25 = vcombine.low %v9602_v1, %v9604_v33 }
 0x1b4   : > { %6605 = vmatmul.mubr.bf16.gmra.mrb[24].mxu1 %v2903_v60  ;;  %v5090_v60 = vrot.slane %v10371_v39, 1  ;;  %v10382_v20 = vshll.u32 %v10380_v10, 16  ;;  %v5107_v40 = vrot.slane %v10383_v59, 2  ;;  %v5883_v15 = vcombine.low %v9606_v62, %v9624_v14 }
 0x1b5   : > { %6608 = vmatprep.mubr.bf16.mxu1 %v2912_v27 }
 0x1b6   : > { %6849 = vmatmul.mubr.bf16.gmra.mrb[8].mxu0 %v5073_v29  ;;  %v5092_v27 = vor.u32 %v5091_v8, %v5090_v60  ;;  %v5089_v29 = vsel %vm5041_vm7, %v5084_v16, %v5088_v38  ;;  %v5103_v18 = vrot.slane %v10382_v20, 2 }
 0x1b7   : > { %6852 = vmatprep.mubr.bf16.mxu0 %v5077_v52  ;;  %v10374_v52 = vld [vmem:[#allocation63_spill] sm:$0xff] }
 0x1b8   : > { %v10375_v30 = vshrl.u32 %v10374_v52, 16  ;;  %v10376_v47 = vshll.u32 %v10374_v52, 16  ;;  %v5093_v19 = vsel %vm5041_vm7, %v5088_v38, %v5092_v27 }
 0x1ba   : > { %v5094_v26 = vrot.slane %v10375_v30, 1  ;;  %v5095_v46 = vrot.slane %v10376_v47, 2 }
 0x1bc   : > { %6609 = vmatmul.mubr.bf16.gmra.mrb[28].mxu1 %v2921_v9  ;;  %v5096_v58 = vor.u32 %v5095_v46, %v5094_v26  ;;  %v10381_v9 = vshrl.u32 %v10380_v10, 16 }
 0x1bd   : > { %6612 = vmatprep.mubr.bf16.mxu1 %v2930_v57 }
 0x1be   : > { %6853 = vmatmul.mubr.bf16.gmra.mrb[12].mxu0 %v5081_v0  ;;  %v5097_v13 = vsel %vm5041_vm7, %v5092_v27, %v5096_v58  ;;  %v5102_v16 = vrot.slane %v10381_v9, 1  ;;  %v5101_v57 = vsel %vm5041_vm7, %v5096_v58, %v5100_v63  ;;  %v5106_v0 = vrot.slane %v4379_v35, 1 }
 0x1bf   : > { %6856 = vmatprep.mubr.bf16.mxu0 %v5085_v56  ;;  %v5880_v35 = vcombine.low %v9574_v3, %v9580_v24 }
 0x1c0   : > { %v5104_v42 = vor.u32 %v5103_v18, %v5102_v16  ;;  %v5108_v37 = vor.u32 %v5107_v40, %v5106_v0 }
 0x1c2   : > { %v5105_v45 = vsel %vm5041_vm7, %v5100_v63, %v5104_v42  ;;  %v5109_v41 = vsel %vm5041_vm7, %v5104_v42, %v5108_v37  ;;  %v5113_v5 = vsel %vm5041_vm7, %v5108_v37, %v9462_v32  ;;  %v10407_v37 = vld [vmem:[#allocation27_spill] sm:$0xff] }
 0x1c3   : > { %vm10408_vm11 = vnez %v10407_v37 }
 0x1c4   : > { %6613 = vmatmul.mubr.bf16.gmra.mrb[32].mxu1 %v2939_v53 }
 0x1c5   : > { %6648 = vmatprep.mubr.bf16.mxu1 %v5874_v11 }
 0x1c6   : > { %6857 = vmatmul.mubr.bf16.gmra.mrb[16].mxu0 %v5089_v29  ;;  %v10397_v29 = vld [vmem:[#allocation16_spill] sm:$0xff] }
 0x1c7   : > { %6860 = vmatprep.mubr.bf16.mxu0 %v5093_v19 }
 0x1cc   : > { %6649 = vmatmul.mubr.bf16.vlgmr.msra.gmra.mrb[16].mxu1 %v5875_v50 }
 0x1cd   : > { %6652 = vmatprep.mubr.bf16.mxu1 %v5876_v7 }
 0x1ce   : > { %6861 = vmatmul.mubr.bf16.gmra.mrb[20].mxu0 %v5097_v13 }
 0x1cf   : > { %6864 = vmatprep.mubr.bf16.mxu0 %v5101_v57 }
 0x1d4   : > { %6653 = vmatmul.mubr.bf16.gmra.mrb[20].mxu1 %v5877_v23 }
 0x1d5   : > { %6656 = vmatprep.mubr.bf16.mxu1 %v5878_v21 }
 0x1d6   : > { %6865 = vmatmul.mubr.bf16.gmra.mrb[24].mxu0 %v5105_v45 }
 0x1d7   : > { %6868 = vmatprep.mubr.bf16.mxu0 %v5109_v41 }
 0x1dc   : > { %6657 = vmatmul.mubr.bf16.gmra.mrb[24].mxu1 %v5879_v54 }
 0x1dd   : > { %6660 = vmatprep.mubr.bf16.mxu1 %v5880_v35 }
 0x1de   : > { %6869 = vmatmul.mubr.bf16.gmra.mrb[28].mxu0 %v5113_v5 }
 0x1df   : > { %6872 = vmatprep.mubr.bf16.mxu0 %v9467_v28 }
 0x1e4   : > { %6661 = vmatmul.mubr.bf16.gmra.mrb[28].mxu1 %v5881_v6  ;;  %v10391_v6 = vld [vmem:[#allocation12_spill] sm:$0xff] }
 0x1e5   : > { %6664 = vmatprep.mubr.bf16.mxu1 %v5882_v25 }
 0x1e6   : > { %6873 = vmatmul.mubr.bf16.gmra.mrb[32].mxu0 %v9475_v43 }
 0x1ec   : > { %6665 = vmatmul.mubr.bf16.gmra.mrb[32].mxu1 %v5883_v15 }
 0x257   : > { %v6582_v32 = vpop.f32.mrb[0].mxu1 }
 0x258   : > { %v3040_v4 = vpop.f32.mrb[1].mxu1 }
 0x259   : > { %v6583_v22 = vpop.f32.mrb[2].mxu1 }
 0x25a   : > { %v3043_v3 = vpop.f32.mrb[3].mxu1 }
 0x25f   : > { %v6586_v28 = vpop.f32.mrb[4].mxu1 }
 0x260   : > { %v3056_v24 = vpop.f32.mrb[5].mxu1 }
 0x261   : > { %v6587_v49 = vpop.f32.mrb[6].mxu1 }
 0x262   : > { %v3059_v36 = vpop.f32.mrb[7].mxu1 }
 0x267   : > { %v6590_v12 = vpop.f32.mrb[8].mxu1 }
 0x268   : > { %v3072_v56 = vpop.f32.mrb[9].mxu1 }
 0x269   : > { %v9698_v1 = vpop.f32.mrb[10].mxu1 }
 0x26a   : > { %v9700_v33 = vpop.f32.mrb[11].mxu1 }
 0x26f   : > { %v9702_v43 = vpop.f32.mrb[12].mxu1 }
 0x270   : > { %v9704_v48 = vpop.f32.mrb[13].mxu1 }
 0x271   : > { %v9706_v62 = vpop.f32.mrb[14].mxu1 }
 0x272   : > { %v9708_v14 = vpop.f32.mrb[15].mxu1 }
 0x279   : > { %v6842_v17 = vpop.f32.mrb[0].mxu0 }
 0x27a   : > { %v6892_v39 = vadd.f32 %v6842_v17, %v6582_v32  ;;  %v5227_v60 = vpop.f32.mrb[1].mxu0 }
 0x27b   : > { %v6893_v44 = vadd.f32 %v5227_v60, %v3040_v4  ;;  %v6843_v8 = vpop.f32.mrb[2].mxu0 }
 0x27c   : > { %5444 = vst [vmem:[%s9715_s29 + $0x10] sm:$0xff] %v6892_v39  ;;  %v6894_v38 = vadd.f32 %v6843_v8, %v6583_v22  ;;  %v5230_v53 = vpop.f32.mrb[3].mxu0  ;;  %v5408_v52 = vsel %vm7704_vm14, %v6892_v39, 0.0  ;;  %v10393_v8 = vld [vmem:[#allocation14_spill] sm:$0xff] }
 0x27d   : > { %v5406_v2 = vsel %vm7696_vm12, %v6893_v44, 0.0  ;;  %5442 = vst [vmem:[%s9715_s29] sm:$0xff] %v6893_v44  ;;  %v6895_v11 = vadd.f32 %v5230_v53, %v3043_v3  ;;  %v5522_v34 = vmul.f32 %v5408_v52, %v5408_v52  ;;  %vm10392_vm12 = vnez %v10391_v6 }
 0x27e   : > { %5445 = vst [vmem:[%s9715_s29 + $0x18] sm:$0xff] %v6894_v38  ;;  %v5520_v47 = vmul.f32 %v5406_v2, %v5406_v2  ;;  %v5409_v61 = vsel %vm7709_vm15, %v6894_v38, 0.0  ;;  %vm10398_vm15 = vnez %v10397_v29  ;;  %v10412_v29 = vld [vmem:[#allocation30_spill] sm:$0xff] }
 0x27f   : > { %v5407_v26 = vsel %vm7700_vm13, %v6895_v11, 0.0  ;;  %5443 = vst [vmem:[%s9715_s29 + $0x8] sm:$0xff] %v6895_v11  ;;  %v5523_v10 = vmul.f32 %v5409_v61, %v5409_v61  ;;  %vm10394_vm13 = vnez %v10393_v8  ;;  %vm10413_vm5 = vnez %v10412_v29  ;;  %v10428_v29 = vld [vmem:[#allocation39_spill] sm:$0xff] }
 0x280   : > { %v5478_v46 = vadd.f32 %v5407_v26, %v5406_v2  ;;  %v5521_v19 = vmul.f32 %v5407_v26, %v5407_v26 }
 0x281   : > { %v6846_v55 = vpop.f32.mrb[4].mxu0 }
 0x282   : > { %v5479_v51 = vadd.f32 %v5478_v46, %v5408_v52  ;;  %v5556_v58 = vadd.f32 %v5521_v19, %v5520_v47  ;;  %v6896_v50 = vadd.f32 %v6846_v55, %v6586_v28  ;;  %v5243_v63 = vpop.f32.mrb[5].mxu0  ;;  %v10399_v47 = vld [vmem:[#allocation21_spill] sm:$0xff] }
 0x283   : > { %v6897_v7 = vadd.f32 %v5243_v63, %v3056_v24  ;;  %v6847_v13 = vpop.f32.mrb[6].mxu0 }
 0x284   : > { %v5557_v9 = vadd.f32 %v5556_v58, %v5522_v34  ;;  %5448 = vst [vmem:[%s9715_s29 + $0x30] sm:$0xff] %v6896_v50  ;;  %v5480_v16 = vadd.f32 %v5479_v51, %v5409_v61  ;;  %v6898_v20 = vadd.f32 %v6847_v13, %v6587_v49  ;;  %v5246_v18 = vpop.f32.mrb[7].mxu0  ;;  %v5412_v21 = vsel %vm7863_vm3, %v6896_v50, 0.0 }
 0x285   : > { %v5410_v0 = vsel %vm7782_vm4, %v6897_v7, 0.0  ;;  %5446 = vst [vmem:[%s9715_s29 + $0x20] sm:$0xff] %v6897_v7  ;;  %v6899_v59 = vadd.f32 %v5246_v18, %v3059_v36  ;;  %v5526_v32 = vmul.f32 %v5412_v21, %v5412_v21  ;;  %vm10400_vm4 = vnez %v10399_v47  ;;  %v10414_v47 = vld [vmem:[#allocation33_spill] sm:$0xff] }
 0x286   : > { %v5481_v40 = vadd.f32 %v5480_v16, %v5410_v0  ;;  %v5524_v42 = vmul.f32 %v5410_v0, %v5410_v0  ;;  %v5558_v23 = vadd.f32 %v5557_v9, %v5523_v10  ;;  %5449 = vst [vmem:[%s9715_s29 + $0x38] sm:$0xff] %v6898_v20  ;;  %v5413_v25 = vsel %vm10392_vm12, %v6898_v20, 0.0  ;;  %v10401_v9 = vld [vmem:[#allocation24_spill] sm:$0xff] }
 0x287   : > { %v5411_v41 = vsel %vm7830_vm8, %v6899_v59, 0.0  ;;  %5447 = vst [vmem:[%s9715_s29 + $0x28] sm:$0xff] %v6899_v59  ;;  %v5527_v36 = vmul.f32 %v5413_v25, %v5413_v25  ;;  %vm10402_vm8 = vnez %v10401_v9  ;;  %v10405_v59 = vld [vmem:[#allocation25_spill] sm:$0xff]  ;;  %vm10415_vm9 = vnez %v10414_v47 }
 0x288   : > { %v5559_v54 = vadd.f32 %v5558_v23, %v5524_v42  ;;  %v5482_v35 = vadd.f32 %v5481_v40, %v5411_v41  ;;  %v5525_v5 = vmul.f32 %v5411_v41, %v5411_v41  ;;  %vm10406_vm7 = vnez %v10405_v59  ;;  %v10430_v47 = vld [vmem:[#allocation41_spill] sm:$0xff] }
 0x289   : > { %v6850_v15 = vpop.f32.mrb[8].mxu0 }
 0x28a   : > { %v5483_v4 = vadd.f32 %v5482_v35, %v5412_v21  ;;  %v5560_v22 = vadd.f32 %v5559_v54, %v5525_v5  ;;  %v6900_v3 = vadd.f32 %v6850_v15, %v6590_v12  ;;  %v5259_v28 = vpop.f32.mrb[9].mxu0 }
 0x28b   : > { %v6901_v24 = vadd.f32 %v5259_v28, %v3072_v56  ;;  %v6851_v49 = vpop.f32.mrb[10].mxu0  ;;  %v10395_v56 = vld [vmem:[#allocation20_spill] sm:$0xff] }
 0x28c   : > { %v5561_v17 = vadd.f32 %v5560_v22, %v5526_v32  ;;  %5452 = vst [vmem:[%s9715_s29 + $0x50] sm:$0xff] %v6900_v3  ;;  %v5484_v39 = vadd.f32 %v5483_v4, %v5413_v25  ;;  %v6902_v60 = vadd.f32 %v6851_v49, %v9698_v1  ;;  %v5262_v44 = vpop.f32.mrb[11].mxu0  ;;  %vm10396_vm14 = vnez %v10395_v56 }
 0x28d   : > { %v5414_v38 = vsel %vm10394_vm13, %v6901_v24, 0.0  ;;  %5450 = vst [vmem:[%s9715_s29 + $0x40] sm:$0xff] %v6901_v24  ;;  %v6903_v53 = vadd.f32 %v5262_v44, %v9700_v33  ;;  %v5416_v11 = vsel %vm10396_vm14, %v6900_v3, 0.0  ;;  %v10409_v44 = vld [vmem:[#allocation28_spill] sm:$0xff] }
 0x28e   : > { %v5485_v27 = vadd.f32 %v5484_v39, %v5414_v38  ;;  %v5528_v12 = vmul.f32 %v5414_v38, %v5414_v38  ;;  %v5562_v2 = vadd.f32 %v5561_v17, %v5527_v36  ;;  %5453 = vst [vmem:[%s9715_s29 + $0x58] sm:$0xff] %v6902_v60  ;;  %v5417_v46 = vsel %vm10400_vm4, %v6902_v60, 0.0 }
 0x28f   : > { %v5415_v52 = vsel %vm10398_vm15, %v6903_v53, 0.0  ;;  %5451 = vst [vmem:[%s9715_s29 + $0x48] sm:$0xff] %v6903_v53  ;;  %v5530_v19 = vmul.f32 %v5416_v11, %v5416_v11  ;;  %v5531_v50 = vmul.f32 %v5417_v46, %v5417_v46  ;;  %vm10410_vm1 = vnez %v10409_v44 }
 0x290   : > { %v5563_v1 = vadd.f32 %v5562_v2, %v5528_v12  ;;  %v5486_v30 = vadd.f32 %v5485_v27, %v5415_v52  ;;  %v5529_v26 = vmul.f32 %v5415_v52, %v5415_v52  ;;  %v10426_v2 = vld [vmem:[#allocation40_spill] sm:$0xff] }
 0x291   : > { %v6854_v33 = vpop.f32.mrb[12].mxu0  ;;  %vm10427_vm4 = vnez %v10426_v2 }
 0x292   : > { %v5487_v31 = vadd.f32 %v5486_v30, %v5416_v11  ;;  %v5564_v61 = vadd.f32 %v5563_v1, %v5529_v26  ;;  %v6904_v55 = vadd.f32 %v6854_v33, %v9702_v43  ;;  %v5275_v34 = vpop.f32.mrb[13].mxu0 }
 0x293   : > { %v6905_v51 = vadd.f32 %v5275_v34, %v9704_v48  ;;  %v6855_v58 = vpop.f32.mrb[14].mxu0  ;;  %v10403_v48 = vld [vmem:[#allocation26_spill] sm:$0xff] }
 0x294   : > { %v5565_v63 = vadd.f32 %v5564_v61, %v5530_v19  ;;  %5456 = vst [vmem:[%s9715_s29 + $0x70] sm:$0xff] %v6904_v55  ;;  %v5488_v7 = vadd.f32 %v5487_v31, %v5417_v46  ;;  %v6906_v13 = vadd.f32 %v6855_v58, %v9706_v62  ;;  %v5278_v10 = vpop.f32.mrb[15].mxu0  ;;  %vm10404_vm3 = vnez %v10403_v48 }
 0x295   : > { %v5418_v16 = vsel %vm10402_vm8, %v6905_v51, 0.0  ;;  %5454 = vst [vmem:[%s9715_s29 + $0x60] sm:$0xff] %v6905_v51  ;;  %v6907_v20 = vadd.f32 %v5278_v10, %v9708_v14  ;;  %v5420_v0 = vsel %vm10404_vm3, %v6904_v55, 0.0  ;;  %vm10429_vm8 = vnez %v10428_v29 }
 0x296   : > { %v5489_v43 = vadd.f32 %v5488_v7, %v5418_v16  ;;  %v5532_v18 = vmul.f32 %v5418_v16, %v5418_v16  ;;  %v5566_v57 = vadd.f32 %v5565_v63, %v5531_v50  ;;  %5457 = vst [vmem:[%s9715_s29 + $0x78] sm:$0xff] %v6906_v13  ;;  %v5421_v21 = vsel %vm10408_vm11, %v6906_v13, 0.0 }
 0x297   : > { %v5419_v40 = vsel %vm10406_vm7, %v6907_v20, 0.0  ;;  %5455 = vst [vmem:[%s9715_s29 + $0x68] sm:$0xff] %v6907_v20  ;;  %v5534_v41 = vmul.f32 %v5420_v0, %v5420_v0  ;;  %v5535_v6 = vmul.f32 %v5421_v21, %v5421_v21  ;;  %v10416_v20 = vld [vmem:[#allocation34_spill] sm:$0xff]  ;;  %vm10431_vm3 = vnez %v10430_v47 }
 0x298   : > { %v5567_v42 = vadd.f32 %v5566_v57, %v5532_v18  ;;  %v5490_v62 = vadd.f32 %v5489_v43, %v5419_v40  ;;  %v5533_v23 = vmul.f32 %v5419_v40, %v5419_v40  ;;  %v10418_v40 = vld [vmem:[#allocation36_spill] sm:$0xff] }
 0x299   : > { %v6858_v45 = vpop.f32.mrb[16].mxu0  ;;  %vm10419_vm12 = vnez %v10418_v40  ;;  %v10434_v40 = vld [vmem:[#allocation44_spill] sm:$0xff] }
 0x29a   : > { %v5491_v14 = vadd.f32 %v5490_v62, %v5420_v0  ;;  %v5568_v54 = vadd.f32 %v5567_v42, %v5533_v23  ;;  %v5291_v35 = vpop.f32.mrb[17].mxu0  ;;  %v10420_v23 = vld [vmem:[#allocation35_spill] sm:$0xff]  ;;  %vm10435_vm11 = vnez %v10434_v40 }
 0x29b   : > { %v6859_v5 = vpop.f32.mrb[18].mxu0  ;;  %vm10421_vm13 = vnez %v10420_v23  ;;  %v10436_v23 = vld [vmem:[#allocation43_spill] sm:$0xff] }
 0x29c   : > { %v5569_v25 = vadd.f32 %v5568_v54, %v5534_v41  ;;  %v5294_v15 = vpop.f32.mrb[19].mxu0  ;;  %v5492_v32 = vadd.f32 %v5491_v14, %v5421_v21  ;;  %v10422_v14 = vld [vmem:[#allocation37_spill] sm:$0xff] }
 0x29d   : > { %vm10423_vm14 = vnez %v10422_v14  ;;  %v10438_v14 = vld [vmem:[#allocation45_spill] sm:$0xff] }
 0x29e   : > { %v5570_v22 = vadd.f32 %v5569_v25, %v5535_v6 }
 0x29f   : > { %v6650_v4 = vpop.f32.mrb[16].mxu1 }
 0x2a0   : > { %v6908_v3 = vadd.f32 %v6858_v45, %v6650_v4  ;;  %v3418_v28 = vpop.f32.mrb[17].mxu1 }
 0x2a1   : > { %v6909_v24 = vadd.f32 %v5291_v35, %v3418_v28  ;;  %v6651_v49 = vpop.f32.mrb[18].mxu1  ;;  %v6862_v36 = vpop.f32.mrb[20].mxu0 }
 0x2a2   : > { %5460 = vst [vmem:[%s9715_s29 + $0x90] sm:$0xff] %v6908_v3  ;;  %v6910_v17 = vadd.f32 %v6859_v5, %v6651_v49  ;;  %v3421_v39 = vpop.f32.mrb[19].mxu1  ;;  %v5307_v60 = vpop.f32.mrb[21].mxu0  ;;  %v5424_v56 = vsel %vm8255_vm0, %v6908_v3, 0.0  ;;  %vm10417_vm0 = vnez %v10416_v20  ;;  %v10432_v20 = vld [vmem:[#allocation42_spill] sm:$0xff] }
 0x2a3   : > { %v5422_v8 = vsel %vm10410_vm1, %v6909_v24, 0.0  ;;  %5458 = vst [vmem:[%s9715_s29 + $0x80] sm:$0xff] %v6909_v24  ;;  %v6911_v38 = vadd.f32 %v5294_v15, %v3421_v39  ;;  %v6863_v53 = vpop.f32.mrb[22].mxu0  ;;  %v5538_v19 = vmul.f32 %v5424_v56, %v5424_v56  ;;  %vm10433_vm7 = vnez %v10432_v20 }
 0x2a4   : > { %v5493_v27 = vadd.f32 %v5492_v32, %v5422_v8  ;;  %v5536_v12 = vmul.f32 %v5422_v8, %v5422_v8  ;;  %5461 = vst [vmem:[%s9715_s29 + $0x98] sm:$0xff] %v6910_v17  ;;  %v5310_v11 = vpop.f32.mrb[23].mxu0  ;;  %v5425_v46 = vsel %vm10415_vm9, %v6910_v17, 0.0  ;;  %vm10437_vm1 = vnez %v10436_v23 }
 0x2a5   : > { %v5423_v52 = vsel %vm10413_vm5, %v6911_v38, 0.0  ;;  %5459 = vst [vmem:[%s9715_s29 + $0x88] sm:$0xff] %v6911_v38  ;;  %v5539_v50 = vmul.f32 %v5425_v46, %v5425_v46  ;;  %vm10439_vm5 = vnez %v10438_v14 }
 0x2a6   : > { %v5571_v1 = vadd.f32 %v5570_v22, %v5536_v12  ;;  %v5494_v30 = vadd.f32 %v5493_v27, %v5423_v52  ;;  %v5537_v26 = vmul.f32 %v5423_v52, %v5423_v52 }
 0x2a7   : > { %v6654_v33 = vpop.f32.mrb[20].mxu1 }
 0x2a8   : > { %v5495_v31 = vadd.f32 %v5494_v30, %v5424_v56  ;;  %v5572_v61 = vadd.f32 %v5571_v1, %v5537_v26  ;;  %v6912_v55 = vadd.f32 %v6862_v36, %v6654_v33  ;;  %v3434_v34 = vpop.f32.mrb[21].mxu1 }
 0x2a9   : > { %v6913_v51 = vadd.f32 %v5307_v60, %v3434_v34  ;;  %v6655_v58 = vpop.f32.mrb[22].mxu1  ;;  %v6866_v7 = vpop.f32.mrb[24].mxu0  ;;  %v10424_v60 = vld [vmem:[#allocation38_spill] sm:$0xff] }
 0x2aa   : > { %v5573_v63 = vadd.f32 %v5572_v61, %v5538_v19  ;;  %5464 = vst [vmem:[%s9715_s29 + $0xb0] sm:$0xff] %v6912_v55  ;;  %v5496_v13 = vadd.f32 %v5495_v31, %v5425_v46  ;;  %v6914_v10 = vadd.f32 %v6863_v53, %v6655_v58  ;;  %v3437_v9 = vpop.f32.mrb[23].mxu1  ;;  %v5323_v16 = vpop.f32.mrb[25].mxu0  ;;  %v5428_v42 = vsel %vm10419_vm12, %v6912_v55, 0.0 }
 0x2ab   : > { %v5426_v43 = vsel %vm10417_vm0, %v6913_v51, 0.0  ;;  %5462 = vst [vmem:[%s9715_s29 + $0xa0] sm:$0xff] %v6913_v51  ;;  %v6915_v18 = vadd.f32 %v5310_v11, %v3437_v9  ;;  %v6867_v57 = vpop.f32.mrb[26].mxu0  ;;  %v5542_v5 = vmul.f32 %v5428_v42, %v5428_v42  ;;  %vm10425_vm15 = vnez %v10424_v60 }
 0x2ac   : > { %v5497_v48 = vadd.f32 %v5496_v13, %v5426_v43  ;;  %v5540_v0 = vmul.f32 %v5426_v43, %v5426_v43  ;;  %v5574_v59 = vadd.f32 %v5573_v63, %v5539_v50  ;;  %5465 = vst [vmem:[%s9715_s29 + $0xb8] sm:$0xff] %v6914_v10  ;;  %v5326_v62 = vpop.f32.mrb[27].mxu0  ;;  %v5429_v54 = vsel %vm10423_vm14, %v6914_v10, 0.0 }
 0x2ad   : > { %v5427_v37 = vsel %vm10421_vm13, %v6915_v18, 0.0  ;;  %5463 = vst [vmem:[%s9715_s29 + $0xa8] sm:$0xff] %v6915_v18  ;;  %v5543_v3 = vmul.f32 %v5429_v54, %v5429_v54 }
 0x2ae   : > { %v5575_v21 = vadd.f32 %v5574_v59, %v5540_v0  ;;  %v5498_v45 = vadd.f32 %v5497_v48, %v5427_v37  ;;  %v5541_v41 = vmul.f32 %v5427_v37, %v5427_v37 }
 0x2af   : > { %v6658_v35 = vpop.f32.mrb[24].mxu1 }
 0x2b0   : > { %v5499_v6 = vadd.f32 %v5498_v45, %v5428_v42  ;;  %v5576_v25 = vadd.f32 %v5575_v21, %v5541_v41  ;;  %v6916_v15 = vadd.f32 %v6866_v7, %v6658_v35  ;;  %v3450_v32 = vpop.f32.mrb[25].mxu1 }
 0x2b1   : > { %v6917_v4 = vadd.f32 %v5323_v16, %v3450_v32  ;;  %v6659_v22 = vpop.f32.mrb[26].mxu1  ;;  %v6870_v24 = vpop.f32.mrb[28].mxu0 }
 0x2b2   : > { %v5577_v28 = vadd.f32 %v5576_v25, %v5542_v5  ;;  %5468 = vst [vmem:[%s9715_s29 + $0xd0] sm:$0xff] %v6916_v15  ;;  %v5500_v49 = vadd.f32 %v5499_v6, %v5429_v54  ;;  %v6918_v36 = vadd.f32 %v6867_v57, %v6659_v22  ;;  %v3453_v17 = vpop.f32.mrb[27].mxu1  ;;  %v5339_v39 = vpop.f32.mrb[29].mxu0  ;;  %v5432_v56 = vsel %vm10427_vm4, %v6916_v15, 0.0 }
 0x2b3   : > { %v5430_v44 = vsel %vm10425_vm15, %v6917_v4, 0.0  ;;  %5466 = vst [vmem:[%s9715_s29 + $0xc0] sm:$0xff] %v6917_v4  ;;  %v6919_v8 = vadd.f32 %v5326_v62, %v3453_v17  ;;  %v6871_v38 = vpop.f32.mrb[30].mxu0  ;;  %v5546_v19 = vmul.f32 %v5432_v56, %v5432_v56 }
 0x2b4   : > { %v5501_v53 = vadd.f32 %v5500_v49, %v5430_v44  ;;  %v5544_v27 = vmul.f32 %v5430_v44, %v5430_v44  ;;  %v5578_v12 = vadd.f32 %v5577_v28, %v5543_v3  ;;  %5469 = vst [vmem:[%s9715_s29 + $0xd8] sm:$0xff] %v6918_v36  ;;  %v5342_v11 = vpop.f32.mrb[31].mxu0  ;;  %v5433_v46 = vsel %vm10431_vm3, %v6918_v36, 0.0 }
 0x2b5   : > { %v5431_v52 = vsel %vm10429_vm8, %v6919_v8, 0.0  ;;  %5467 = vst [vmem:[%s9715_s29 + $0xc8] sm:$0xff] %v6919_v8  ;;  %v5547_v50 = vmul.f32 %v5433_v46, %v5433_v46 }
 0x2b6   : > { %v5579_v1 = vadd.f32 %v5578_v12, %v5544_v27  ;;  %v5502_v30 = vadd.f32 %v5501_v53, %v5431_v52  ;;  %v5545_v26 = vmul.f32 %v5431_v52, %v5431_v52  ;;  %v10443_v52 = vld [vmem:[#allocation52_spill] sm:$0xff] }
 0x2b7   : > { %v6662_v33 = vpop.f32.mrb[28].mxu1  ;;  %vm10444_vm9 = vnez %v10443_v52 }
 0x2b8   : > { %v5503_v31 = vadd.f32 %v5502_v30, %v5432_v56  ;;  %v5580_v61 = vadd.f32 %v5579_v1, %v5545_v26  ;;  %v6920_v55 = vadd.f32 %v6870_v24, %v6662_v33  ;;  %v3466_v34 = vpop.f32.mrb[29].mxu1 }
 0x2b9   : > { %v6921_v51 = vadd.f32 %v5339_v39, %v3466_v34  ;;  %v6663_v58 = vpop.f32.mrb[30].mxu1  ;;  %v6874_v7 = vpop.f32.mrb[32].mxu0 }
 0x2ba   : > { %v5581_v63 = vadd.f32 %v5580_v61, %v5546_v19  ;;  %5472 = vst [vmem:[%s9715_s29 + $0xf0] sm:$0xff] %v6920_v55  ;;  %v5504_v13 = vadd.f32 %v5503_v31, %v5433_v46  ;;  %v6922_v10 = vadd.f32 %v6871_v38, %v6663_v58  ;;  %v3469_v9 = vpop.f32.mrb[31].mxu1  ;;  %v5355_v16 = vpop.f32.mrb[33].mxu0  ;;  %v5436_v42 = vsel %vm10435_vm11, %v6920_v55, 0.0 }
 0x2bb   : > { %v5434_v43 = vsel %vm10433_vm7, %v6921_v51, 0.0  ;;  %5470 = vst [vmem:[%s9715_s29 + $0xe0] sm:$0xff] %v6921_v51  ;;  %v6923_v18 = vadd.f32 %v5342_v11, %v3469_v9  ;;  %v6875_v57 = vpop.f32.mrb[34].mxu0  ;;  %v5550_v5 = vmul.f32 %v5436_v42, %v5436_v42 }
 0x2bc   : > { %v5505_v48 = vadd.f32 %v5504_v13, %v5434_v43  ;;  %v5548_v0 = vmul.f32 %v5434_v43, %v5434_v43  ;;  %v5582_v59 = vadd.f32 %v5581_v63, %v5547_v50  ;;  %5473 = vst [vmem:[%s9715_s29 + $0xf8] sm:$0xff] %v6922_v10  ;;  %v5358_v62 = vpop.f32.mrb[35].mxu0  ;;  %v5437_v54 = vsel %vm10439_vm5, %v6922_v10, 0.0 }
 0x2bd   : > { %v5435_v37 = vsel %vm10437_vm1, %v6923_v18, 0.0  ;;  %5471 = vst [vmem:[%s9715_s29 + $0xe8] sm:$0xff] %v6923_v18  ;;  %v5551_v3 = vmul.f32 %v5437_v54, %v5437_v54 }
 0x2be   : > { %v5583_v21 = vadd.f32 %v5582_v59, %v5548_v0  ;;  %v5506_v45 = vadd.f32 %v5505_v48, %v5435_v37  ;;  %v5549_v41 = vmul.f32 %v5435_v37, %v5435_v37 }
 0x2bf   : > { %v6666_v35 = vpop.f32.mrb[32].mxu1 }
 0x2c0   : > { %v5507_v6 = vadd.f32 %v5506_v45, %v5436_v42  ;;  %v5584_v25 = vadd.f32 %v5583_v21, %v5549_v41  ;;  %v6924_v15 = vadd.f32 %v6874_v7, %v6666_v35  ;;  %v3482_v32 = vpop.f32.mrb[33].mxu1 }
 0x2c1   : > { %v6925_v4 = vadd.f32 %v5355_v16, %v3482_v32  ;;  %v6667_v22 = vpop.f32.mrb[34].mxu1 }
 0x2c2   : > { %v5585_v28 = vadd.f32 %v5584_v25, %v5550_v5  ;;  %5476 = vst [vmem:[%s9715_s29 + $0x110] sm:$0xff] %v6924_v15  ;;  %v5508_v24 = vadd.f32 %v5507_v6, %v5437_v54  ;;  %v6926_v49 = vadd.f32 %v6875_v57, %v6667_v22  ;;  %v3485_v36 = vpop.f32.mrb[35].mxu1  ;;  %v5440_v27 = vsel %vm8783_vm6, %v6924_v15, 0.0 }
 0x2c3   : > { %v5438_v39 = vsel %vm8612_vm10, %v6925_v4, 0.0  ;;  %5474 = vst [vmem:[%s9715_s29 + $0x100] sm:$0xff] %v6925_v4  ;;  %v6927_v60 = vadd.f32 %v5358_v62, %v3485_v36  ;;  %v5554_v30 = vmul.f32 %v5440_v27, %v5440_v27 }
 0x2c4   : > { %v5509_v44 = vadd.f32 %v5508_v24, %v5438_v39  ;;  %v5552_v8 = vmul.f32 %v5438_v39, %v5438_v39  ;;  %v5586_v38 = vadd.f32 %v5585_v28, %v5551_v3  ;;  %5477 = vst [vmem:[%s9715_s29 + $0x118] sm:$0xff] %v6926_v49  ;;  %v5441_v1 = vsel %vm10444_vm9, %v6926_v49, 0.0 }
 0x2c5   : > { %v5439_v2 = vsel %vm8616_vm2, %v6927_v60, 0.0  ;;  %5475 = vst [vmem:[%s9715_s29 + $0x108] sm:$0xff] %v6927_v60  ;;  %v5555_v46 = vmul.f32 %v5441_v1, %v5441_v1 }
 0x2c6   : > { %v5587_v56 = vadd.f32 %v5586_v38, %v5552_v8  ;;  %v5510_v11 = vadd.f32 %v5509_v44, %v5439_v2  ;;  %v5553_v29 = vmul.f32 %v5439_v2, %v5439_v2 }
 0x2c8   : > { %v5511_v26 = vadd.f32 %v5510_v11, %v5440_v27  ;;  %v5588_v47 = vadd.f32 %v5587_v56, %v5553_v29 }
 0x2ca   : > { %v5512_v33 = vadd.f32 %v5511_v26, %v5441_v1  ;;  %v5589_v19 = vadd.f32 %v5588_v47, %v5554_v30 }
 0x2cc   : > { %v5513_v31 = vrot.slane %v5512_v33, 4  ;;  %v5590_v61 = vadd.f32 %v5589_v19, %v5555_v46 }
 0x2ce   : > { %v5514_v55 = vadd.f32 %v5513_v31, %v5512_v33  ;;  %v5591_v34 = vrot.slane %v5590_v61, 4 }
 0x2d0   : > { %v5515_v51 = vrot.slane %v5514_v55, 2  ;;  %v5592_v58 = vadd.f32 %v5591_v34, %v5590_v61 }
 0x2d2   : > { %v5516_v50 = vadd.f32 %v5515_v51, %v5514_v55  ;;  %v5593_v63 = vrot.slane %v5592_v58, 2 }
 0x2d4   : > { %v5517_v7 = vrot.slane %v5516_v50, 1  ;;  %v5594_v13 = vadd.f32 %v5593_v63, %v5592_v58 }
 0x2d6   : > { %v5518_v10 = vadd.f32 %v5517_v7, %v5516_v50  ;;  %v5595_v9 = vrot.slane %v5594_v13, 1 }
 0x2d8   : > { %5519 = vst [vmem:[%s235_s21] sm:$0x1] %v5518_v10  ;;  %v5596_v16 = vadd.f32 %v5595_v9, %v5594_v13 }
 0x2da   : > { %5597 = vst [vmem:[%s235_s21 + $0x1] sm:$0x1] %v5596_v16 }
 0x2db PF: > { %s16_s18 = sadd.s32 1, %s7459_s18  }
 0x2dc   : > { %p13_p4 = scmp.ge.s32.totalorder %s16_s18, 4  }
 0x2de   :  { %15 = sbr.rel (!%p13_p4) target bundleno = 1 (0x1), region = 86 }

</bundles_post_ra>
